<compile_context>
chip_gen: v5e
topology: v5e:2x2
jax: 0.10.0
libtpu: 0.0.40
codegen_flags: <defaults>
</compile_context>

<pallas_src>
import jax
import jax.numpy as jnp
from jax import lax
from jax.experimental import pallas as pl
from jax.experimental.pallas import tpu as pltpu

BN_EPS = 1e-5
_LANES = 128
_SUBLANES = 8


def _round_up(x, m):
    return ((x + m - 1) // m) * m


# --------------------------------------------------------------------------
# Per-chip VMEM planning
# --------------------------------------------------------------------------
def _vmem_plan():
    """Returns (band_budget_bytes, vmem_limit_bytes) derived from the chip."""
    cap = 64 * 1024 * 1024            # conservative fallback (v7x per-TC VMEM)
    try:
        cap = int(pltpu.get_tpu_info().vmem_capacity_bytes)
    except Exception:
        cap = 64 * 1024 * 1024
    if cap < (32 << 20):
        cap = 64 << 20
    budget = int(cap * 0.55)          # working-set target (leaves headroom)
    limit = int(cap * 0.75)           # explicit scoped-VMEM limit
    return budget, limit


def _pick_band_rows(h, wp, cin_p, cout_p, y_bytes, budget):
    """Largest divisor of h whose per-step (double-buffered) footprint fits."""
    best = 1
    for th in range(1, h + 1):
        if h % th:
            continue
        in_blk = th * wp * cin_p * 2                 # bf16 main band block
        halo = 2 * wp * cin_p * 2                    # top+bottom halo rows
        wgt = 3 * cin_p * 3 * cout_p * 2             # packed bf16 weights
        out_blk = th * wp * cout_p * y_bytes         # raw conv output block
        stats = 2 * cout_p * 4
        accw = th * wp * 3 * cout_p * 4              # f32 wide accumulator
        temps = th * wp * cin_p * 4 + 3 * th * wp * cout_p * 4
        foot = 2 * (in_blk + halo + wgt + out_blk + stats) + accw + temps
        if foot <= budget:
            best = th
    return best


# --------------------------------------------------------------------------
# Conv3x3 kernel: 3 wide MXU matmuls (dx packed along the output dim),
# dy handled as free row offsets, optional fused input BN+ReLU, per-block
# BN statistics emitted for the decoupled BatchNorm of *this* stage's output.
# --------------------------------------------------------------------------
def _make_conv_kernel(th, wp, w_real, cin_p, cout_p, fuse_input_bn):
    cout3 = 3 * cout_p

    def kernel(*refs):
        if fuse_input_bn:
            (xm_ref, top_ref, bot_ref, w_ref, insc_ref, insh_ref,
             y_ref, stats_ref, accw_ref) = refs
        else:
            (xm_ref, top_ref, bot_ref, w_ref,
             y_ref, stats_ref, accw_ref) = refs

        # Column mask in stored coords: real data lives in columns [1, w_real+1).
        col = lax.broadcasted_iota(jnp.int32, (1, wp, 1), 1)
        colmask = ((col >= 1) & (col <= w_real)).astype(jnp.float32)

        xm = xm_ref[0]                                    # (th, wp, cin_p) bf16
        if fuse_input_bn:
            # Fused previous-stage BatchNorm + ReLU on the loaded band (f32 on
            # the VPU, cast to bf16 only at the matmul operand).
            sc = insc_ref[...].reshape(1, 1, cin_p)
            sh = insh_ref[...].reshape(1, 1, cin_p)
            v = xm.astype(jnp.float32) * sc + sh
            v = jnp.maximum(v, 0.0) * colmask             # halo cols stay zero
            xin = v.astype(jnp.bfloat16)
        else:
            xin = xm                                      # already bf16, zero halos
        xin2d = xin.reshape(th * wp, cin_p)               # tile-aligned reshape

        top = top_ref[0, 0]                               # (wp, cin_p) bf16
        bot = bot_ref[0, 0]

        # dy = 1 (center row tap): output row r uses input row r.
        r1 = jnp.dot(xin2d, w_ref[1], preferred_element_type=jnp.float32)
        accw_ref[...] = r1.reshape(th, wp, cout3)

        # dy = 0 (row above): output row r uses input row r-1.
        r0 = jnp.dot(xin2d, w_ref[0], preferred_element_type=jnp.float32)
        r0 = r0.reshape(th, wp, cout3)
        if th > 1:
            accw_ref[pl.ds(1, th - 1)] = accw_ref[pl.ds(1, th - 1)] + r0[:th - 1]
        accw_ref[0] = accw_ref[0] + jnp.dot(
            top, w_ref[0], preferred_element_type=jnp.float32)

        # dy = 2 (row below): output row r uses input row r+1.
        r2 = jnp.dot(xin2d, w_ref[2], preferred_element_type=jnp.float32)
        r2 = r2.reshape(th, wp, cout3)
        if th > 1:
            accw_ref[pl.ds(0, th - 1)] = accw_ref[pl.ds(0, th - 1)] + r2[1:]
        accw_ref[th - 1] = accw_ref[th - 1] + jnp.dot(
            bot, w_ref[2], preferred_element_type=jnp.float32)

        # dx combine in stored-column space:
        #   y[:, pc] = aw[:, pc-1, 0:C] + aw[:, pc, C:2C] + aw[:, pc+1, 2C:3C]
        aw = accw_ref[...]
        out = aw[:, :, cout_p:2 * cout_p]
        a0 = aw[:, :, 0:cout_p]
        out = out + jnp.concatenate(
            [jnp.zeros_like(a0[:, :1]), a0[:, :wp - 1]], axis=1)
        a2 = aw[:, :, 2 * cout_p:cout3]
        out = out + jnp.concatenate(
            [a2[:, 1:], jnp.zeros_like(a2[:, :1])], axis=1)
        out = out * colmask                               # zero the halo/pad cols

        y_ref[...] = out.astype(y_ref.dtype).reshape(1, th, wp, cout_p)

        # Per-block channel statistics (masked cols contribute exactly zero).
        of = out.reshape(th * wp, cout_p)
        s1 = jnp.sum(of, axis=0, keepdims=True)
        s2 = jnp.sum(of * of, axis=0, keepdims=True)
        stats_ref[0, 0] = jnp.concatenate([s1, s2], axis=0)

    return kernel


# --------------------------------------------------------------------------
# One conv stage: tiled over (image, row band), halo rows via tiny side arrays.
# If in_scale/in_shift are given, the previous stage's BN+ReLU is fused into
# the band load (and into the halo-row preparation done in XLA).
# --------------------------------------------------------------------------
def _conv_stage(x_st, w_packed, th, w_real, *, in_scale, in_shift,
                out_dtype, vmem_limit):
    n, h, wp, cin_p = x_st.shape
    cout3 = w_packed.shape[-1]
    cout_p = cout3 // 3
    nb = h // th
    fuse = in_scale is not None

    # ---- halo rows (tiny: 2 rows per band per image), prepared in XLA ----
    col = jnp.arange(wp)
    colmask_x = ((col >= 1) & (col <= w_real)).astype(jnp.float32
                                                      ).reshape(1, 1, wp, 1)

    def _halo_transform(rows):
        if not fuse:
            return rows
        v = rows.astype(jnp.float32) * in_scale.reshape(1, 1, 1, -1) \
            + in_shift.reshape(1, 1, 1, -1)
        v = jnp.maximum(v, 0.0) * colmask_x
        return v.astype(jnp.bfloat16)

    zrow = jnp.zeros((n, 1, wp, cin_p), jnp.bfloat16)
    if nb > 1:
        tops = _halo_transform(x_st[:, th - 1:h - 1:th])  # x[b*th - 1], b>=1
        bots = _halo_transform(x_st[:, th:h:th])          # x[(b+1)*th], b<nb-1
        top = jnp.concatenate([zrow, tops], axis=1)
        bot = jnp.concatenate([bots, zrow], axis=1)
    else:
        top = zrow
        bot = zrow

    kernel = _make_conv_kernel(th, wp, w_real, cin_p, cout_p, fuse)

    in_specs = [
        pl.BlockSpec((1, th, wp, cin_p), lambda i, j: (i, j, 0, 0)),
        pl.BlockSpec((1, 1, wp, cin_p), lambda i, j: (i, j, 0, 0)),
        pl.BlockSpec((1, 1, wp, cin_p), lambda i, j: (i, j, 0, 0)),
        pl.BlockSpec((3, cin_p, cout3), lambda i, j: (0, 0, 0)),
    ]
    args = [x_st, top, bot, w_packed]
    if fuse:
        in_specs += [pl.BlockSpec((1, cin_p), lambda i, j: (0, 0)),
                     pl.BlockSpec((1, cin_p), lambda i, j: (0, 0))]
        args += [in_scale.reshape(1, cin_p), in_shift.reshape(1, cin_p)]

    y_raw, stats = pl.pallas_call(
        kernel,
        out_shape=(jax.ShapeDtypeStruct((n, h, wp, cout_p), out_dtype),
                   jax.ShapeDtypeStruct((n, nb, 2, cout_p), jnp.float32)),
        grid_spec=pltpu.PrefetchScalarGridSpec(
            num_scalar_prefetch=0,
            grid=(n, nb),
            in_specs=in_specs,
            out_specs=[pl.BlockSpec((1, th, wp, cout_p), lambda i, j: (i, j, 0, 0)),
                       pl.BlockSpec((1, 1, 2, cout_p), lambda i, j: (i, j, 0, 0))],
            scratch_shapes=[pltpu.VMEM((th, wp, cout3), jnp.float32)]),
        # TODO(synk): on v7x, pltpu.CORE_PARALLEL / pl.core_map could force an
        # explicit 2-TC split; "parallel" is kept here for portability.
        compiler_params=pltpu.CompilerParams(
            dimension_semantics=("parallel", "parallel"),
            vmem_limit_bytes=vmem_limit),
    )(*args)
    return y_raw, stats


def _bn_constants(stats, gamma_p, beta_p, m):
    tot = jnp.sum(stats, axis=(0, 1))                 # (2, C)
    mean = tot[0] / m
    var = jnp.maximum(tot[1] / m - mean * mean, 0.0)  # biased (training BN)
    scale = gamma_p * lax.rsqrt(var + BN_EPS)
    shift = beta_p - mean * scale
    return scale, shift


# --------------------------------------------------------------------------
# Final BatchNorm + ReLU pass (only needed for the last stage's output),
# tiled over flattened N*H rows with as large a lane-dense block as fits.
# --------------------------------------------------------------------------
def _bn_relu_kernel(y_ref, sc_ref, sh_ref, o_ref):
    sc = sc_ref[...].reshape(1, 1, -1)
    sh = sh_ref[...].reshape(1, 1, -1)
    o_ref[...] = jnp.maximum(y_ref[...] * sc + sh, 0.0).astype(o_ref.dtype)


def _bn_relu(y_raw, scale, shift, budget, vmem_limit):
    n, h, wp, c = y_raw.shape
    rows = n * h
    yf = y_raw.reshape(rows, wp, c)
    tr = 1
    for cand in range(1, rows + 1):
        if rows % cand:
            continue
        foot = 2 * 2 * cand * wp * c * 4 * 2     # in+out f32, double-buffered
        if foot <= budget:
            tr = cand
    out = pl.pallas_call(
        _bn_relu_kernel,
        out_shape=jax.ShapeDtypeStruct((rows, wp, c), jnp.float32),
        grid_spec=pltpu.PrefetchScalarGridSpec(
            num_scalar_prefetch=0,
            grid=(rows // tr,),
            in_specs=[pl.BlockSpec((tr, wp, c), lambda i: (i, 0, 0)),
                      pl.BlockSpec((1, c), lambda i: (0, 0)),
                      pl.BlockSpec((1, c), lambda i: (0, 0))],
            out_specs=pl.BlockSpec((tr, wp, c), lambda i: (i, 0, 0))),
        compiler_params=pltpu.CompilerParams(
            dimension_semantics=("parallel",),
            vmem_limit_bytes=vmem_limit),
    )(yf, scale.reshape(1, c), shift.reshape(1, c))
    return out.reshape(n, h, wp, c)


# --------------------------------------------------------------------------
# Gather-free bilinear x2 upsample (align_corners=True) via interpolation mats
# --------------------------------------------------------------------------
def _interp_matrix(n_in, n_out):
    if n_in == 1:
        return jnp.ones((n_out, 1), jnp.float32)
    src = jnp.arange(n_out, dtype=jnp.float32) * (n_in - 1) / (n_out - 1)
    i0 = jnp.clip(jnp.floor(src), 0, n_in - 1).astype(jnp.int32)
    i1 = jnp.minimum(i0 + 1, n_in - 1)
    frac = src - i0.astype(jnp.float32)
    cols = jnp.arange(n_in, dtype=jnp.int32)[None, :]
    a0 = (cols == i0[:, None]).astype(jnp.float32) * (1.0 - frac)[:, None]
    a1 = (cols == i1[:, None]).astype(jnp.float32) * frac[:, None]
    return a0 + a1


def upsample_bilinear_x2_align_corners(x_nhwc):
    n, h, w, c = x_nhwc.shape
    ah = _interp_matrix(h, 2 * h)
    aw = _interp_matrix(w, 2 * w)
    y = jnp.einsum('oh,nhwc->nowc', ah, x_nhwc)
    y = jnp.einsum('pw,nowc->nopc', aw, y)
    return y


# --------------------------------------------------------------------------
# Parameter / input packing helpers
# --------------------------------------------------------------------------
def _pack_weight(w_hwio, cin_p, cout_p):
    """(3,3,Cin,Cout) HWIO -> (3, Cin_p, 3*Cout_p) bf16 (dx packed along N)."""
    kh, kw, cin, cout = w_hwio.shape
    wpad = jnp.pad(w_hwio, ((0, 0), (0, 0), (0, cin_p - cin), (0, cout_p - cout)))
    wt = jnp.transpose(wpad, (0, 2, 1, 3)).reshape(kh, cin_p, kw * cout_p)
    return wt.astype(jnp.bfloat16)


def _pad_vec(v, target):
    return jnp.pad(v.astype(jnp.float32), (0, target - v.shape[0]))


# --------------------------------------------------------------------------
# Up(in_channels, out_channels, bilinear=True) forward
# --------------------------------------------------------------------------
def up_forward(x1_nchw, x2_nchw, params):
    w1, g1, b1, w2, g2, b2 = params
    x1 = jnp.transpose(x1_nchw, (0, 2, 3, 1)).astype(jnp.float32)
    x2 = jnp.transpose(x2_nchw, (0, 2, 3, 1)).astype(jnp.float32)

    # TODO(synk): fuse upsample + pad + concat into conv1's band load (two
    # input streams, VPU lerp in-kernel) to drop this XLA-side materialization.
    x1 = upsample_bilinear_x2_align_corners(x1)
    dyy = x2.shape[1] - x1.shape[1]
    dxx = x2.shape[2] - x1.shape[2]
    if dyy < 0 or dxx < 0:
        raise ValueError("x2 spatial dims must be >= upsampled x1 dims")
    x1 = jnp.pad(x1, ((0, 0), (dyy // 2, dyy - dyy // 2),
                      (dxx // 2, dxx - dxx // 2), (0, 0)))
    x = jnp.concatenate([x2, x1], axis=-1)            # torch.cat([x2, x1])

    n, h, w, cin = x.shape
    cmid = w1.shape[3]
    cout = w2.shape[3]
    cin_p = _round_up(cin, _LANES)
    cmid_p = _round_up(cmid, _LANES)
    cout_p = _round_up(cout, _LANES)
    wp = _round_up(w + 2, _SUBLANES)                  # stored width: [1, w+1) real

    # Stored layout: (N, H, Wp, C_p), zero halo column left/right + lane pad.
    x_st = jnp.pad(x, ((0, 0), (0, 0), (1, wp - w - 1),
                       (0, cin_p - cin))).astype(jnp.bfloat16)
    w1p = _pack_weight(w1, cin_p, cmid_p)
    w2p = _pack_weight(w2, cmid_p, cout_p)
    g1p, b1p = _pad_vec(g1, cmid_p), _pad_vec(b1, cmid_p)
    g2p, b2p = _pad_vec(g2, cout_p), _pad_vec(b2, cout_p)

    budget, vmem_limit = _vmem_plan()
    m = float(n * h * w)

    # Stage 1: conv3x3 + stats (raw output kept in bf16, BN fused into stage 2)
    th1 = _pick_band_rows(h, wp, cin_p, cmid_p, 2, budget)
    y1_raw, stats1 = _conv_stage(x_st, w1p, th1, w, in_scale=None, in_shift=None,
                                 out_dtype=jnp.bfloat16, vmem_limit=vmem_limit)
    scale1, shift1 = _bn_constants(stats1, g1p, b1p, m)

    # Stage 2: BN1+ReLU fused into the band load, conv3x3 + stats
    th2 = _pick_band_rows(h, wp, cmid_p, cout_p, 4, budget)
    y2_raw, stats2 = _conv_stage(y1_raw, w2p, th2, w, in_scale=scale1,
                                 in_shift=shift1, out_dtype=jnp.float32,
                                 vmem_limit=vmem_limit)
    scale2, shift2 = _bn_constants(stats2, g2p, b2p, m)

    # Final BN + ReLU (large lane-dense tiles over flattened rows)
    y2 = _bn_relu(y2_raw, scale2, shift2, budget, vmem_limit)

    out = y2[:, :, 1:w + 1, :cout]                    # drop halo cols / pad chans
    return jnp.transpose(out, (0, 3, 1, 2))           # NHWC -> NCHW


# --------------------------------------------------------------------------
# Deterministic parameter init + example run
# --------------------------------------------------------------------------
def init_params(key, in_channels, out_channels):
    mid_channels = in_channels // 2
    k1, k2, k3, k4, k5, k6 = jax.random.split(key, 6)
    w1 = 0.1 * jax.random.normal(k1, (3, 3, in_channels, mid_channels), jnp.float32)
    g1 = 1.0 + 0.1 * jax.random.normal(k2, (mid_channels,), jnp.float32)
    b1 = 0.1 * jax.random.normal(k3, (mid_channels,), jnp.float32)
    w2 = 0.1 * jax.random.normal(k4, (3, 3, mid_channels, out_channels), jnp.float32)
    g2 = 1.0 + 0.1 * jax.random.normal(k5, (out_channels,), jnp.float32)
    b2 = 0.1 * jax.random.normal(k6, (out_channels,), jnp.float32)
    return (w1, g1, b1, w2, g2, b2)


if __name__ == "__main__":
    # Up(in_channels=8, out_channels=4, bilinear=True)
    # x1: decoder feature (N, 4, 8, 8)  -> upsampled to 16x16
    # x2: skip connection (N, 4, 16, 16); concat -> 8 channels = in_channels
    key = jax.random.PRNGKey(0)
    kx1, kx2, kp = jax.random.split(key, 3)
    x1 = jax.random.normal(kx1, (2, 4, 8, 8), jnp.float32)    # NCHW
    x2 = jax.random.normal(kx2, (2, 4, 16, 16), jnp.float32)  # NCHW
    params = init_params(kp, in_channels=8, out_channels=4)

    out = jax.jit(up_forward)(x1, x2, params)
    out = jax.block_until_ready(out)
    assert out.shape == (2, 4, 16, 16), out.shape
    assert bool(jnp.all(jnp.isfinite(out)))
    print("KERNEL_OK")
</pallas_src>

<mosaic_0001>
module attributes {stable_mosaic.version = 11 : i64} {
  func.func @kernel(%arg0: i32, %arg1: i32, %arg2: memref<1x16x24x128xbf16, #tpu.memory_space<vmem>>, %arg3: memref<1x1x24x128xbf16, #tpu.memory_space<vmem>>, %arg4: memref<1x1x24x128xbf16, #tpu.memory_space<vmem>>, %arg5: memref<3x128x384xbf16, #tpu.memory_space<vmem>>, %arg6: memref<1x16x24x128xbf16, #tpu.memory_space<vmem>>, %arg7: memref<1x1x2x128xf32, #tpu.memory_space<vmem>>, %arg8: memref<16x24x384xf32, #tpu.memory_space<vmem>>) attributes {dimension_semantics = [#tpu.dimension_semantics<parallel>, #tpu.dimension_semantics<parallel>], iteration_bounds = array<i64: 2, 1>, scalar_prefetch = 0 : i64, scratch_operands = 1 : i64, tpu.core_type = #tpu.core_type<tc>, window_params = [{transform_indices = @transform_0, window_bounds = array<i64: 1, 16, 24, 128>}, {transform_indices = @transform_1, window_bounds = array<i64: 1, 1, 24, 128>}, {transform_indices = @transform_2, window_bounds = array<i64: 1, 1, 24, 128>}, {pipeline_mode = #tpu.pipeline_mode<synchronous>, transform_indices = @transform_3, window_bounds = array<i64: 3, 128, 384>}, {transform_indices = @transform_4, window_bounds = array<i64: 1, 16, 24, 128>}, {transform_indices = @transform_5, window_bounds = array<i64: 1, 1, 2, 128>}]} {
    %0 = tpu.iota {dimensions = array<i32: 1>} : vector<1x24x1xi32>
    %c1_i32 = arith.constant 1 : i32
    %1 = vector.broadcast %c1_i32 : i32 to vector<1x24x1xi32>
    %2 = arith.cmpi sge, %0, %1 : vector<1x24x1xi32>
    %c16_i32 = arith.constant 16 : i32
    %3 = vector.broadcast %c16_i32 : i32 to vector<1x24x1xi32>
    %4 = arith.cmpi sle, %0, %3 : vector<1x24x1xi32>
    %5 = arith.andi %2, %4 : vector<1x24x1xi1>
    %6 = arith.extui %5 : vector<1x24x1xi1> to vector<1x24x1xi32>
    %7 = arith.sitofp %6 : vector<1x24x1xi32> to vector<1x24x1xf32>
    %c0 = arith.constant 0 : index
    %c0_0 = arith.constant 0 : index
    %c0_1 = arith.constant 0 : index
    %c0_2 = arith.constant 0 : index
    %8 = vector.load %arg2[%c0, %c0_0, %c0_1, %c0_2] : memref<1x16x24x128xbf16, #tpu.memory_space<vmem>>, vector<1x16x24x128xbf16>
    %9 = vector.shape_cast %8 : vector<1x16x24x128xbf16> to vector<16x24x128xbf16>
    %10 = vector.shape_cast %9 : vector<16x24x128xbf16> to vector<384x128xbf16>
    %c0_3 = arith.constant 0 : index
    %c0_4 = arith.constant 0 : index
    %c0_5 = arith.constant 0 : index
    %c0_6 = arith.constant 0 : index
    %11 = vector.load %arg3[%c0_3, %c0_4, %c0_5, %c0_6] : memref<1x1x24x128xbf16, #tpu.memory_space<vmem>>, vector<1x1x24x128xbf16>
    %12 = vector.shape_cast %11 : vector<1x1x24x128xbf16> to vector<24x128xbf16>
    %c0_7 = arith.constant 0 : index
    %c0_8 = arith.constant 0 : index
    %c0_9 = arith.constant 0 : index
    %c0_10 = arith.constant 0 : index
    %13 = vector.load %arg4[%c0_7, %c0_8, %c0_9, %c0_10] : memref<1x1x24x128xbf16, #tpu.memory_space<vmem>>, vector<1x1x24x128xbf16>
    %14 = vector.shape_cast %13 : vector<1x1x24x128xbf16> to vector<24x128xbf16>
    %c1 = arith.constant 1 : index
    %c0_11 = arith.constant 0 : index
    %c0_12 = arith.constant 0 : index
    %15 = vector.load %arg5[%c1, %c0_11, %c0_12] : memref<3x128x384xbf16, #tpu.memory_space<vmem>>, vector<1x128x384xbf16>
    %16 = vector.shape_cast %15 : vector<1x128x384xbf16> to vector<128x384xbf16>
    %cst = arith.constant dense<0.000000e+00> : vector<384x384xf32>
    %17 = tpu.matmul %10, %16, %cst {dimension_numbers = #tpu.dot_dimension_numbers<[1], [0], [0], [1], [0, 0, 1, 1], [], []>} : vector<384x128xbf16>, vector<128x384xbf16>, vector<384x384xf32> -> vector<384x384xf32>
    %18 = vector.shape_cast %17 : vector<384x384xf32> to vector<16x24x384xf32>
    %c0_13 = arith.constant 0 : index
    %c0_14 = arith.constant 0 : index
    %c0_15 = arith.constant 0 : index
    %19 = vector.load %arg8[%c0_13, %c0_14, %c0_15] : memref<16x24x384xf32, #tpu.memory_space<vmem>>, vector<16x24x384xf32>
    tpu.vector_store %arg8[%c0_13, %c0_14, %c0_15], %18 {strides = array<i32>} : memref<16x24x384xf32, #tpu.memory_space<vmem>>, vector<16x24x384xf32>,
    %c0_16 = arith.constant 0 : index
    %c0_17 = arith.constant 0 : index
    %c0_18 = arith.constant 0 : index
    %20 = vector.load %arg5[%c0_16, %c0_17, %c0_18] : memref<3x128x384xbf16, #tpu.memory_space<vmem>>, vector<1x128x384xbf16>
    %21 = vector.shape_cast %20 : vector<1x128x384xbf16> to vector<128x384xbf16>
    %cst_19 = arith.constant dense<0.000000e+00> : vector<384x384xf32>
    %22 = tpu.matmul %10, %21, %cst_19 {dimension_numbers = #tpu.dot_dimension_numbers<[1], [0], [0], [1], [0, 0, 1, 1], [], []>} : vector<384x128xbf16>, vector<128x384xbf16>, vector<384x384xf32> -> vector<384x384xf32>
    %23 = vector.shape_cast %22 : vector<384x384xf32> to vector<16x24x384xf32>
    %c1_20 = arith.constant 1 : index
    %c0_21 = arith.constant 0 : index
    %c0_22 = arith.constant 0 : index
    %24 = vector.load %arg8[%c1_20, %c0_21, %c0_22] : memref<16x24x384xf32, #tpu.memory_space<vmem>>, vector<15x24x384xf32>
    %25 = vector.extract_strided_slice %23 {offsets = [0, 0, 0], sizes = [15, 24, 384], strides = [1, 1, 1]} : vector<16x24x384xf32> to vector<15x24x384xf32>
    %26 = arith.addf %24, %25 : vector<15x24x384xf32>
    %c1_23 = arith.constant 1 : index
    %c0_24 = arith.constant 0 : index
    %c0_25 = arith.constant 0 : index
    %27 = vector.load %arg8[%c1_23, %c0_24, %c0_25] : memref<16x24x384xf32, #tpu.memory_space<vmem>>, vector<15x24x384xf32>
    tpu.vector_store %arg8[%c1_23, %c0_24, %c0_25], %26 {strides = array<i32>} : memref<16x24x384xf32, #tpu.memory_space<vmem>>, vector<15x24x384xf32>,
    %c0_26 = arith.constant 0 : index
    %c0_27 = arith.constant 0 : index
    %c0_28 = arith.constant 0 : index
    %28 = vector.load %arg8[%c0_26, %c0_27, %c0_28] : memref<16x24x384xf32, #tpu.memory_space<vmem>>, vector<1x24x384xf32>
    %29 = vector.shape_cast %28 : vector<1x24x384xf32> to vector<24x384xf32>
    %c0_29 = arith.constant 0 : index
    %c0_30 = arith.constant 0 : index
    %c0_31 = arith.constant 0 : index
    %30 = vector.load %arg5[%c0_29, %c0_30, %c0_31] : memref<3x128x384xbf16, #tpu.memory_space<vmem>>, vector<1x128x384xbf16>
    %31 = vector.shape_cast %30 : vector<1x128x384xbf16> to vector<128x384xbf16>
    %cst_32 = arith.constant dense<0.000000e+00> : vector<24x384xf32>
    %32 = tpu.matmul %12, %31, %cst_32 {dimension_numbers = #tpu.dot_dimension_numbers<[1], [0], [0], [1], [0, 0, 1, 1], [], []>} : vector<24x128xbf16>, vector<128x384xbf16>, vector<24x384xf32> -> vector<24x384xf32>
    %33 = arith.addf %29, %32 : vector<24x384xf32>
    %c0_33 = arith.constant 0 : index
    %c0_34 = arith.constant 0 : index
    %c0_35 = arith.constant 0 : index
    %34 = vector.load %arg8[%c0_33, %c0_34, %c0_35] : memref<16x24x384xf32, #tpu.memory_space<vmem>>, vector<1x24x384xf32>
    %35 = vector.shape_cast %34 : vector<1x24x384xf32> to vector<24x384xf32>
    %36 = vector.shape_cast %33 : vector<24x384xf32> to vector<1x24x384xf32>
    tpu.vector_store %arg8[%c0_33, %c0_34, %c0_35], %36 {strides = array<i32>} : memref<16x24x384xf32, #tpu.memory_space<vmem>>, vector<1x24x384xf32>,
    %c2 = arith.constant 2 : index
    %c0_36 = arith.constant 0 : index
    %c0_37 = arith.constant 0 : index
    %37 = vector.load %arg5[%c2, %c0_36, %c0_37] : memref<3x128x384xbf16, #tpu.memory_space<vmem>>, vector<1x128x384xbf16>
    %38 = vector.shape_cast %37 : vector<1x128x384xbf16> to vector<128x384xbf16>
    %cst_38 = arith.constant dense<0.000000e+00> : vector<384x384xf32>
    %39 = tpu.matmul %10, %38, %cst_38 {dimension_numbers = #tpu.dot_dimension_numbers<[1], [0], [0], [1], [0, 0, 1, 1], [], []>} : vector<384x128xbf16>, vector<128x384xbf16>, vector<384x384xf32> -> vector<384x384xf32>
    %40 = vector.shape_cast %39 : vector<384x384xf32> to vector<16x24x384xf32>
    %c0_39 = arith.constant 0 : index
    %c0_40 = arith.constant 0 : index
    %c0_41 = arith.constant 0 : index
    %41 = vector.load %arg8[%c0_39, %c0_40, %c0_41] : memref<16x24x384xf32, #tpu.memory_space<vmem>>, vector<15x24x384xf32>
    %42 = vector.extract_strided_slice %40 {offsets = [1, 0, 0], sizes = [15, 24, 384], strides = [1, 1, 1]} : vector<16x24x384xf32> to vector<15x24x384xf32>
    %43 = arith.addf %41, %42 : vector<15x24x384xf32>
    %c0_42 = arith.constant 0 : index
    %c0_43 = arith.constant 0 : index
    %c0_44 = arith.constant 0 : index
    %44 = vector.load %arg8[%c0_42, %c0_43, %c0_44] : memref<16x24x384xf32, #tpu.memory_space<vmem>>, vector<15x24x384xf32>
    tpu.vector_store %arg8[%c0_42, %c0_43, %c0_44], %43 {strides = array<i32>} : memref<16x24x384xf32, #tpu.memory_space<vmem>>, vector<15x24x384xf32>,
    %c15 = arith.constant 15 : index
    %c0_45 = arith.constant 0 : index
    %c0_46 = arith.constant 0 : index
    %45 = vector.load %arg8[%c15, %c0_45, %c0_46] : memref<16x24x384xf32, #tpu.memory_space<vmem>>, vector<1x24x384xf32>
    %46 = vector.shape_cast %45 : vector<1x24x384xf32> to vector<24x384xf32>
    %c2_47 = arith.constant 2 : index
    %c0_48 = arith.constant 0 : index
    %c0_49 = arith.constant 0 : index
    %47 = vector.load %arg5[%c2_47, %c0_48, %c0_49] : memref<3x128x384xbf16, #tpu.memory_space<vmem>>, vector<1x128x384xbf16>
    %48 = vector.shape_cast %47 : vector<1x128x384xbf16> to vector<128x384xbf16>
    %cst_50 = arith.constant dense<0.000000e+00> : vector<24x384xf32>
    %49 = tpu.matmul %14, %48, %cst_50 {dimension_numbers = #tpu.dot_dimension_numbers<[1], [0], [0], [1], [0, 0, 1, 1], [], []>} : vector<24x128xbf16>, vector<128x384xbf16>, vector<24x384xf32> -> vector<24x384xf32>
    %50 = arith.addf %46, %49 : vector<24x384xf32>
    %c15_51 = arith.constant 15 : index
    %c0_52 = arith.constant 0 : index
    %c0_53 = arith.constant 0 : index
    %51 = vector.load %arg8[%c15_51, %c0_52, %c0_53] : memref<16x24x384xf32, #tpu.memory_space<vmem>>, vector<1x24x384xf32>
    %52 = vector.shape_cast %51 : vector<1x24x384xf32> to vector<24x384xf32>
    %53 = vector.shape_cast %50 : vector<24x384xf32> to vector<1x24x384xf32>
    tpu.vector_store %arg8[%c15_51, %c0_52, %c0_53], %53 {strides = array<i32>} : memref<16x24x384xf32, #tpu.memory_space<vmem>>, vector<1x24x384xf32>,
    %c0_54 = arith.constant 0 : index
    %c0_55 = arith.constant 0 : index
    %c0_56 = arith.constant 0 : index
    %54 = vector.load %arg8[%c0_54, %c0_55, %c0_56] : memref<16x24x384xf32, #tpu.memory_space<vmem>>, vector<16x24x384xf32>
    %55 = vector.extract_strided_slice %54 {offsets = [0, 0, 128], sizes = [16, 24, 128], strides = [1, 1, 1]} : vector<16x24x384xf32> to vector<16x24x128xf32>
    %56 = vector.extract_strided_slice %54 {offsets = [0, 0, 0], sizes = [16, 24, 128], strides = [1, 1, 1]} : vector<16x24x384xf32> to vector<16x24x128xf32>
    %cst_57 = arith.constant 0.000000e+00 : f32
    %57 = vector.broadcast %cst_57 : f32 to vector<16x1x128xf32>
    %58 = vector.extract_strided_slice %56 {offsets = [0, 0, 0], sizes = [16, 23, 128], strides = [1, 1, 1]} : vector<16x24x128xf32> to vector<16x23x128xf32>
    %59 = tpu.concatenate %57, %58 in 1 : vector<16x1x128xf32>, vector<16x23x128xf32> -> vector<16x24x128xf32>
    %60 = arith.addf %55, %59 : vector<16x24x128xf32>
    %61 = vector.extract_strided_slice %54 {offsets = [0, 0, 256], sizes = [16, 24, 128], strides = [1, 1, 1]} : vector<16x24x384xf32> to vector<16x24x128xf32>
    %62 = vector.extract_strided_slice %61 {offsets = [0, 1, 0], sizes = [16, 23, 128], strides = [1, 1, 1]} : vector<16x24x128xf32> to vector<16x23x128xf32>
    %cst_58 = arith.constant 0.000000e+00 : f32
    %63 = vector.broadcast %cst_58 : f32 to vector<16x1x128xf32>
    %64 = tpu.concatenate %62, %63 in 1 : vector<16x23x128xf32>, vector<16x1x128xf32> -> vector<16x24x128xf32>
    %65 = arith.addf %60, %64 : vector<16x24x128xf32>
    %66 = vector.broadcast %7 : vector<1x24x1xf32> to vector<16x24x128xf32>
    %67 = arith.mulf %65, %66 : vector<16x24x128xf32>
    %68 = arith.truncf %67 : vector<16x24x128xf32> to vector<16x24x128xbf16>
    %69 = vector.shape_cast %68 : vector<16x24x128xbf16> to vector<1x16x24x128xbf16>
    %c0_59 = arith.constant 0 : index
    %c0_60 = arith.constant 0 : index
    %c0_61 = arith.constant 0 : index
    %c0_62 = arith.constant 0 : index
    %70 = vector.load %arg6[%c0_59, %c0_60, %c0_61, %c0_62] : memref<1x16x24x128xbf16, #tpu.memory_space<vmem>>, vector<1x16x24x128xbf16>
    tpu.vector_store %arg6[%c0_59, %c0_60, %c0_61, %c0_62], %69 {strides = array<i32>} : memref<1x16x24x128xbf16, #tpu.memory_space<vmem>>, vector<1x16x24x128xbf16>,
    %71 = vector.shape_cast %67 : vector<16x24x128xf32> to vector<384x128xf32>
    %cst_63 = arith.constant dense<0.000000e+00> : vector<128xf32>
    %72 = vector.multi_reduction <add>, %71, %cst_63 [0] : vector<384x128xf32> to vector<128xf32>
    %73 = vector.shape_cast %72 : vector<128xf32> to vector<1x128xf32>
    %74 = arith.mulf %71, %71 : vector<384x128xf32>
    %cst_64 = arith.constant dense<0.000000e+00> : vector<128xf32>
    %75 = vector.multi_reduction <add>, %74, %cst_64 [0] : vector<384x128xf32> to vector<128xf32>
    %76 = vector.shape_cast %75 : vector<128xf32> to vector<1x128xf32>
    %77 = tpu.concatenate %73, %76 in 0 : vector<1x128xf32>, vector<1x128xf32> -> vector<2x128xf32>
    %c0_65 = arith.constant 0 : index
    %c0_66 = arith.constant 0 : index
    %c0_67 = arith.constant 0 : index
    %c0_68 = arith.constant 0 : index
    %78 = vector.load %arg7[%c0_65, %c0_66, %c0_67, %c0_68] : memref<1x1x2x128xf32, #tpu.memory_space<vmem>>, vector<1x1x2x128xf32>
    %79 = vector.shape_cast %78 : vector<1x1x2x128xf32> to vector<2x128xf32>
    %80 = vector.shape_cast %77 : vector<2x128xf32> to vector<1x1x2x128xf32>
    tpu.vector_store %arg7[%c0_65, %c0_66, %c0_67, %c0_68], %80 {strides = array<i32>} : memref<1x1x2x128xf32, #tpu.memory_space<vmem>>, vector<1x1x2x128xf32>,
    return
  }
  func.func @transform_0(%arg0: i32, %arg1: i32) -> (i32, i32, i32, i32) {
    %c0_i32 = arith.constant 0 : i32
    %c0_i32_0 = arith.constant 0 : i32
    %c0_i32_1 = arith.constant 0 : i32
    return %arg0, %arg1, %c0_i32, %c0_i32_0 : i32, i32, i32, i32
  }
  func.func @transform_1(%arg0: i32, %arg1: i32) -> (i32, i32, i32, i32) {
    %c0_i32 = arith.constant 0 : i32
    %c0_i32_0 = arith.constant 0 : i32
    %c0_i32_1 = arith.constant 0 : i32
    return %arg0, %arg1, %c0_i32, %c0_i32_0 : i32, i32, i32, i32
  }
  func.func @transform_2(%arg0: i32, %arg1: i32) -> (i32, i32, i32, i32) {
    %c0_i32 = arith.constant 0 : i32
    %c0_i32_0 = arith.constant 0 : i32
    %c0_i32_1 = arith.constant 0 : i32
    return %arg0, %arg1, %c0_i32, %c0_i32_0 : i32, i32, i32, i32
  }
  func.func @transform_3(%arg0: i32, %arg1: i32) -> (i32, i32, i32) {
    %c0_i32 = arith.constant 0 : i32
    %c0_i32_0 = arith.constant 0 : i32
    %c0_i32_1 = arith.constant 0 : i32
    %c0_i32_2 = arith.constant 0 : i32
    return %c0_i32, %c0_i32_0, %c0_i32_1 : i32, i32, i32
  }
  func.func @transform_4(%arg0: i32, %arg1: i32) -> (i32, i32, i32, i32) {
    %c0_i32 = arith.constant 0 : i32
    %c0_i32_0 = arith.constant 0 : i32
    %c0_i32_1 = arith.constant 0 : i32
    return %arg0, %arg1, %c0_i32, %c0_i32_0 : i32, i32, i32, i32
  }
  func.func @transform_5(%arg0: i32, %arg1: i32) -> (i32, i32, i32, i32) {
    %c0_i32 = arith.constant 0 : i32
    %c0_i32_0 = arith.constant 0 : i32
    %c0_i32_1 = arith.constant 0 : i32
    return %arg0, %arg1, %c0_i32, %c0_i32_0 : i32, i32, i32, i32
  }
}

module attributes {stable_mosaic.version = 11 : i64} {
  func.func @kernel(%arg0: i32, %arg1: i32, %arg2: memref<1x16x24x128xbf16, #tpu.memory_space<vmem>>, %arg3: memref<1x1x24x128xbf16, #tpu.memory_space<vmem>>, %arg4: memref<1x1x24x128xbf16, #tpu.memory_space<vmem>>, %arg5: memref<3x128x384xbf16, #tpu.memory_space<vmem>>, %arg6: memref<1x128xf32, #tpu.memory_space<vmem>>, %arg7: memref<1x128xf32, #tpu.memory_space<vmem>>, %arg8: memref<1x16x24x128xf32, #tpu.memory_space<vmem>>, %arg9: memref<1x1x2x128xf32, #tpu.memory_space<vmem>>, %arg10: memref<16x24x384xf32, #tpu.memory_space<vmem>>) attributes {dimension_semantics = [#tpu.dimension_semantics<parallel>, #tpu.dimension_semantics<parallel>], iteration_bounds = array<i64: 2, 1>, scalar_prefetch = 0 : i64, scratch_operands = 1 : i64, tpu.core_type = #tpu.core_type<tc>, window_params = [{transform_indices = @transform_0, window_bounds = array<i64: 1, 16, 24, 128>}, {transform_indices = @transform_1, window_bounds = array<i64: 1, 1, 24, 128>}, {transform_indices = @transform_2, window_bounds = array<i64: 1, 1, 24, 128>}, {pipeline_mode = #tpu.pipeline_mode<synchronous>, transform_indices = @transform_3, window_bounds = array<i64: 3, 128, 384>}, {pipeline_mode = #tpu.pipeline_mode<synchronous>, transform_indices = @transform_4, window_bounds = array<i64: 1, 128>}, {pipeline_mode = #tpu.pipeline_mode<synchronous>, transform_indices = @transform_5, window_bounds = array<i64: 1, 128>}, {transform_indices = @transform_6, window_bounds = array<i64: 1, 16, 24, 128>}, {transform_indices = @transform_7, window_bounds = array<i64: 1, 1, 2, 128>}]} {
    %0 = tpu.iota {dimensions = array<i32: 1>} : vector<1x24x1xi32>
    %c1_i32 = arith.constant 1 : i32
    %1 = vector.broadcast %c1_i32 : i32 to vector<1x24x1xi32>
    %2 = arith.cmpi sge, %0, %1 : vector<1x24x1xi32>
    %c16_i32 = arith.constant 16 : i32
    %3 = vector.broadcast %c16_i32 : i32 to vector<1x24x1xi32>
    %4 = arith.cmpi sle, %0, %3 : vector<1x24x1xi32>
    %5 = arith.andi %2, %4 : vector<1x24x1xi1>
    %6 = arith.extui %5 : vector<1x24x1xi1> to vector<1x24x1xi32>
    %7 = arith.sitofp %6 : vector<1x24x1xi32> to vector<1x24x1xf32>
    %c0 = arith.constant 0 : index
    %c0_0 = arith.constant 0 : index
    %c0_1 = arith.constant 0 : index
    %c0_2 = arith.constant 0 : index
    %8 = vector.load %arg2[%c0, %c0_0, %c0_1, %c0_2] : memref<1x16x24x128xbf16, #tpu.memory_space<vmem>>, vector<1x16x24x128xbf16>
    %9 = vector.shape_cast %8 : vector<1x16x24x128xbf16> to vector<16x24x128xbf16>
    %c0_3 = arith.constant 0 : index
    %c0_4 = arith.constant 0 : index
    %10 = vector.load %arg6[%c0_3, %c0_4] : memref<1x128xf32, #tpu.memory_space<vmem>>, vector<1x128xf32>
    %11 = vector.shape_cast %10 : vector<1x128xf32> to vector<1x1x128xf32>
    %c0_5 = arith.constant 0 : index
    %c0_6 = arith.constant 0 : index
    %12 = vector.load %arg7[%c0_5, %c0_6] : memref<1x128xf32, #tpu.memory_space<vmem>>, vector<1x128xf32>
    %13 = vector.shape_cast %12 : vector<1x128xf32> to vector<1x1x128xf32>
    %14 = arith.extf %9 : vector<16x24x128xbf16> to vector<16x24x128xf32>
    %15 = vector.broadcast %11 : vector<1x1x128xf32> to vector<16x24x128xf32>
    %16 = arith.mulf %14, %15 : vector<16x24x128xf32>
    %17 = vector.broadcast %13 : vector<1x1x128xf32> to vector<16x24x128xf32>
    %18 = arith.addf %16, %17 : vector<16x24x128xf32>
    %cst = arith.constant 0.000000e+00 : f32
    %19 = vector.broadcast %cst : f32 to vector<16x24x128xf32>
    %20 = arith.maximumf %18, %19 : vector<16x24x128xf32>
    %21 = vector.broadcast %7 : vector<1x24x1xf32> to vector<16x24x128xf32>
    %22 = arith.mulf %20, %21 : vector<16x24x128xf32>
    %23 = arith.truncf %22 : vector<16x24x128xf32> to vector<16x24x128xbf16>
    %24 = vector.shape_cast %23 : vector<16x24x128xbf16> to vector<384x128xbf16>
    %c0_7 = arith.constant 0 : index
    %c0_8 = arith.constant 0 : index
    %c0_9 = arith.constant 0 : index
    %c0_10 = arith.constant 0 : index
    %25 = vector.load %arg3[%c0_7, %c0_8, %c0_9, %c0_10] : memref<1x1x24x128xbf16, #tpu.memory_space<vmem>>, vector<1x1x24x128xbf16>
    %26 = vector.shape_cast %25 : vector<1x1x24x128xbf16> to vector<24x128xbf16>
    %c0_11 = arith.constant 0 : index
    %c0_12 = arith.constant 0 : index
    %c0_13 = arith.constant 0 : index
    %c0_14 = arith.constant 0 : index
    %27 = vector.load %arg4[%c0_11, %c0_12, %c0_13, %c0_14] : memref<1x1x24x128xbf16, #tpu.memory_space<vmem>>, vector<1x1x24x128xbf16>
    %28 = vector.shape_cast %27 : vector<1x1x24x128xbf16> to vector<24x128xbf16>
    %c1 = arith.constant 1 : index
    %c0_15 = arith.constant 0 : index
    %c0_16 = arith.constant 0 : index
    %29 = vector.load %arg5[%c1, %c0_15, %c0_16] : memref<3x128x384xbf16, #tpu.memory_space<vmem>>, vector<1x128x384xbf16>
    %30 = vector.shape_cast %29 : vector<1x128x384xbf16> to vector<128x384xbf16>
    %cst_17 = arith.constant dense<0.000000e+00> : vector<384x384xf32>
    %31 = tpu.matmul %24, %30, %cst_17 {dimension_numbers = #tpu.dot_dimension_numbers<[1], [0], [0], [1], [0, 0, 1, 1], [], []>} : vector<384x128xbf16>, vector<128x384xbf16>, vector<384x384xf32> -> vector<384x384xf32>
    %32 = vector.shape_cast %31 : vector<384x384xf32> to vector<16x24x384xf32>
    %c0_18 = arith.constant 0 : index
    %c0_19 = arith.constant 0 : index
    %c0_20 = arith.constant 0 : index
    %33 = vector.load %arg10[%c0_18, %c0_19, %c0_20] : memref<16x24x384xf32, #tpu.memory_space<vmem>>, vector<16x24x384xf32>
    tpu.vector_store %arg10[%c0_18, %c0_19, %c0_20], %32 {strides = array<i32>} : memref<16x24x384xf32, #tpu.memory_space<vmem>>, vector<16x24x384xf32>,
    %c0_21 = arith.constant 0 : index
    %c0_22 = arith.constant 0 : index
    %c0_23 = arith.constant 0 : index
    %34 = vector.load %arg5[%c0_21, %c0_22, %c0_23] : memref<3x128x384xbf16, #tpu.memory_space<vmem>>, vector<1x128x384xbf16>
    %35 = vector.shape_cast %34 : vector<1x128x384xbf16> to vector<128x384xbf16>
    %cst_24 = arith.constant dense<0.000000e+00> : vector<384x384xf32>
    %36 = tpu.matmul %24, %35, %cst_24 {dimension_numbers = #tpu.dot_dimension_numbers<[1], [0], [0], [1], [0, 0, 1, 1], [], []>} : vector<384x128xbf16>, vector<128x384xbf16>, vector<384x384xf32> -> vector<384x384xf32>
    %37 = vector.shape_cast %36 : vector<384x384xf32> to vector<16x24x384xf32>
    %c1_25 = arith.constant 1 : index
    %c0_26 = arith.constant 0 : index
    %c0_27 = arith.constant 0 : index
    %38 = vector.load %arg10[%c1_25, %c0_26, %c0_27] : memref<16x24x384xf32, #tpu.memory_space<vmem>>, vector<15x24x384xf32>
    %39 = vector.extract_strided_slice %37 {offsets = [0, 0, 0], sizes = [15, 24, 384], strides = [1, 1, 1]} : vector<16x24x384xf32> to vector<15x24x384xf32>
    %40 = arith.addf %38, %39 : vector<15x24x384xf32>
    %c1_28 = arith.constant 1 : index
    %c0_29 = arith.constant 0 : index
    %c0_30 = arith.constant 0 : index
    %41 = vector.load %arg10[%c1_28, %c0_29, %c0_30] : memref<16x24x384xf32, #tpu.memory_space<vmem>>, vector<15x24x384xf32>
    tpu.vector_store %arg10[%c1_28, %c0_29, %c0_30], %40 {strides = array<i32>} : memref<16x24x384xf32, #tpu.memory_space<vmem>>, vector<15x24x384xf32>,
    %c0_31 = arith.constant 0 : index
    %c0_32 = arith.constant 0 : index
    %c0_33 = arith.constant 0 : index
    %42 = vector.load %arg10[%c0_31, %c0_32, %c0_33] : memref<16x24x384xf32, #tpu.memory_space<vmem>>, vector<1x24x384xf32>
    %43 = vector.shape_cast %42 : vector<1x24x384xf32> to vector<24x384xf32>
    %c0_34 = arith.constant 0 : index
    %c0_35 = arith.constant 0 : index
    %c0_36 = arith.constant 0 : index
    %44 = vector.load %arg5[%c0_34, %c0_35, %c0_36] : memref<3x128x384xbf16, #tpu.memory_space<vmem>>, vector<1x128x384xbf16>
    %45 = vector.shape_cast %44 : vector<1x128x384xbf16> to vector<128x384xbf16>
    %cst_37 = arith.constant dense<0.000000e+00> : vector<24x384xf32>
    %46 = tpu.matmul %26, %45, %cst_37 {dimension_numbers = #tpu.dot_dimension_numbers<[1], [0], [0], [1], [0, 0, 1, 1], [], []>} : vector<24x128xbf16>, vector<128x384xbf16>, vector<24x384xf32> -> vector<24x384xf32>
    %47 = arith.addf %43, %46 : vector<24x384xf32>
    %c0_38 = arith.constant 0 : index
    %c0_39 = arith.constant 0 : index
    %c0_40 = arith.constant 0 : index
    %48 = vector.load %arg10[%c0_38, %c0_39, %c0_40] : memref<16x24x384xf32, #tpu.memory_space<vmem>>, vector<1x24x384xf32>
    %49 = vector.shape_cast %48 : vector<1x24x384xf32> to vector<24x384xf32>
    %50 = vector.shape_cast %47 : vector<24x384xf32> to vector<1x24x384xf32>
    tpu.vector_store %arg10[%c0_38, %c0_39, %c0_40], %50 {strides = array<i32>} : memref<16x24x384xf32, #tpu.memory_space<vmem>>, vector<1x24x384xf32>,
    %c2 = arith.constant 2 : index
    %c0_41 = arith.constant 0 : index
    %c0_42 = arith.constant 0 : index
    %51 = vector.load %arg5[%c2, %c0_41, %c0_42] : memref<3x128x384xbf16, #tpu.memory_space<vmem>>, vector<1x128x384xbf16>
    %52 = vector.shape_cast %51 : vector<1x128x384xbf16> to vector<128x384xbf16>
    %cst_43 = arith.constant dense<0.000000e+00> : vector<384x384xf32>
    %53 = tpu.matmul %24, %52, %cst_43 {dimension_numbers = #tpu.dot_dimension_numbers<[1], [0], [0], [1], [0, 0, 1, 1], [], []>} : vector<384x128xbf16>, vector<128x384xbf16>, vector<384x384xf32> -> vector<384x384xf32>
    %54 = vector.shape_cast %53 : vector<384x384xf32> to vector<16x24x384xf32>
    %c0_44 = arith.constant 0 : index
    %c0_45 = arith.constant 0 : index
    %c0_46 = arith.constant 0 : index
    %55 = vector.load %arg10[%c0_44, %c0_45, %c0_46] : memref<16x24x384xf32, #tpu.memory_space<vmem>>, vector<15x24x384xf32>
    %56 = vector.extract_strided_slice %54 {offsets = [1, 0, 0], sizes = [15, 24, 384], strides = [1, 1, 1]} : vector<16x24x384xf32> to vector<15x24x384xf32>
    %57 = arith.addf %55, %56 : vector<15x24x384xf32>
    %c0_47 = arith.constant 0 : index
    %c0_48 = arith.constant 0 : index
    %c0_49 = arith.constant 0 : index
    %58 = vector.load %arg10[%c0_47, %c0_48, %c0_49] : memref<16x24x384xf32, #tpu.memory_space<vmem>>, vector<15x24x384xf32>
    tpu.vector_store %arg10[%c0_47, %c0_48, %c0_49], %57 {strides = array<i32>} : memref<16x24x384xf32, #tpu.memory_space<vmem>>, vector<15x24x384xf32>,
    %c15 = arith.constant 15 : index
    %c0_50 = arith.constant 0 : index
    %c0_51 = arith.constant 0 : index
    %59 = vector.load %arg10[%c15, %c0_50, %c0_51] : memref<16x24x384xf32, #tpu.memory_space<vmem>>, vector<1x24x384xf32>
    %60 = vector.shape_cast %59 : vector<1x24x384xf32> to vector<24x384xf32>
    %c2_52 = arith.constant 2 : index
    %c0_53 = arith.constant 0 : index
    %c0_54 = arith.constant 0 : index
    %61 = vector.load %arg5[%c2_52, %c0_53, %c0_54] : memref<3x128x384xbf16, #tpu.memory_space<vmem>>, vector<1x128x384xbf16>
    %62 = vector.shape_cast %61 : vector<1x128x384xbf16> to vector<128x384xbf16>
    %cst_55 = arith.constant dense<0.000000e+00> : vector<24x384xf32>
    %63 = tpu.matmul %28, %62, %cst_55 {dimension_numbers = #tpu.dot_dimension_numbers<[1], [0], [0], [1], [0, 0, 1, 1], [], []>} : vector<24x128xbf16>, vector<128x384xbf16>, vector<24x384xf32> -> vector<24x384xf32>
    %64 = arith.addf %60, %63 : vector<24x384xf32>
    %c15_56 = arith.constant 15 : index
    %c0_57 = arith.constant 0 : index
    %c0_58 = arith.constant 0 : index
    %65 = vector.load %arg10[%c15_56, %c0_57, %c0_58] : memref<16x24x384xf32, #tpu.memory_space<vmem>>, vector<1x24x384xf32>
    %66 = vector.shape_cast %65 : vector<1x24x384xf32> to vector<24x384xf32>
    %67 = vector.shape_cast %64 : vector<24x384xf32> to vector<1x24x384xf32>
    tpu.vector_store %arg10[%c15_56, %c0_57, %c0_58], %67 {strides = array<i32>} : memref<16x24x384xf32, #tpu.memory_space<vmem>>, vector<1x24x384xf32>,
    %c0_59 = arith.constant 0 : index
    %c0_60 = arith.constant 0 : index
    %c0_61 = arith.constant 0 : index
    %68 = vector.load %arg10[%c0_59, %c0_60, %c0_61] : memref<16x24x384xf32, #tpu.memory_space<vmem>>, vector<16x24x384xf32>
    %69 = vector.extract_strided_slice %68 {offsets = [0, 0, 128], sizes = [16, 24, 128], strides = [1, 1, 1]} : vector<16x24x384xf32> to vector<16x24x128xf32>
    %70 = vector.extract_strided_slice %68 {offsets = [0, 0, 0], sizes = [16, 24, 128], strides = [1, 1, 1]} : vector<16x24x384xf32> to vector<16x24x128xf32>
    %cst_62 = arith.constant 0.000000e+00 : f32
    %71 = vector.broadcast %cst_62 : f32 to vector<16x1x128xf32>
    %72 = vector.extract_strided_slice %70 {offsets = [0, 0, 0], sizes = [16, 23, 128], strides = [1, 1, 1]} : vector<16x24x128xf32> to vector<16x23x128xf32>
    %73 = tpu.concatenate %71, %72 in 1 : vector<16x1x128xf32>, vector<16x23x128xf32> -> vector<16x24x128xf32>
    %74 = arith.addf %69, %73 : vector<16x24x128xf32>
    %75 = vector.extract_strided_slice %68 {offsets = [0, 0, 256], sizes = [16, 24, 128], strides = [1, 1, 1]} : vector<16x24x384xf32> to vector<16x24x128xf32>
    %76 = vector.extract_strided_slice %75 {offsets = [0, 1, 0], sizes = [16, 23, 128], strides = [1, 1, 1]} : vector<16x24x128xf32> to vector<16x23x128xf32>
    %cst_63 = arith.constant 0.000000e+00 : f32
    %77 = vector.broadcast %cst_63 : f32 to vector<16x1x128xf32>
    %78 = tpu.concatenate %76, %77 in 1 : vector<16x23x128xf32>, vector<16x1x128xf32> -> vector<16x24x128xf32>
    %79 = arith.addf %74, %78 : vector<16x24x128xf32>
    %80 = vector.broadcast %7 : vector<1x24x1xf32> to vector<16x24x128xf32>
    %81 = arith.mulf %79, %80 : vector<16x24x128xf32>
    %82 = vector.shape_cast %81 : vector<16x24x128xf32> to vector<1x16x24x128xf32>
    %c0_64 = arith.constant 0 : index
    %c0_65 = arith.constant 0 : index
    %c0_66 = arith.constant 0 : index
    %c0_67 = arith.constant 0 : index
    %83 = vector.load %arg8[%c0_64, %c0_65, %c0_66, %c0_67] : memref<1x16x24x128xf32, #tpu.memory_space<vmem>>, vector<1x16x24x128xf32>
    tpu.vector_store %arg8[%c0_64, %c0_65, %c0_66, %c0_67], %82 {strides = array<i32>} : memref<1x16x24x128xf32, #tpu.memory_space<vmem>>, vector<1x16x24x128xf32>,
    %84 = vector.shape_cast %81 : vector<16x24x128xf32> to vector<384x128xf32>
    %cst_68 = arith.constant dense<0.000000e+00> : vector<128xf32>
    %85 = vector.multi_reduction <add>, %84, %cst_68 [0] : vector<384x128xf32> to vector<128xf32>
    %86 = vector.shape_cast %85 : vector<128xf32> to vector<1x128xf32>
    %87 = arith.mulf %84, %84 : vector<384x128xf32>
    %cst_69 = arith.constant dense<0.000000e+00> : vector<128xf32>
    %88 = vector.multi_reduction <add>, %87, %cst_69 [0] : vector<384x128xf32> to vector<128xf32>
    %89 = vector.shape_cast %88 : vector<128xf32> to vector<1x128xf32>
    %90 = tpu.concatenate %86, %89 in 0 : vector<1x128xf32>, vector<1x128xf32> -> vector<2x128xf32>
    %c0_70 = arith.constant 0 : index
    %c0_71 = arith.constant 0 : index
    %c0_72 = arith.constant 0 : index
    %c0_73 = arith.constant 0 : index
    %91 = vector.load %arg9[%c0_70, %c0_71, %c0_72, %c0_73] : memref<1x1x2x128xf32, #tpu.memory_space<vmem>>, vector<1x1x2x128xf32>
    %92 = vector.shape_cast %91 : vector<1x1x2x128xf32> to vector<2x128xf32>
    %93 = vector.shape_cast %90 : vector<2x128xf32> to vector<1x1x2x128xf32>
    tpu.vector_store %arg9[%c0_70, %c0_71, %c0_72, %c0_73], %93 {strides = array<i32>} : memref<1x1x2x128xf32, #tpu.memory_space<vmem>>, vector<1x1x2x128xf32>,
    return
  }
  func.func @transform_0(%arg0: i32, %arg1: i32) -> (i32, i32, i32, i32) {
    %c0_i32 = arith.constant 0 : i32
    %c0_i32_0 = arith.constant 0 : i32
    %c0_i32_1 = arith.constant 0 : i32
    return %arg0, %arg1, %c0_i32, %c0_i32_0 : i32, i32, i32, i32
  }
  func.func @transform_1(%arg0: i32, %arg1: i32) -> (i32, i32, i32, i32) {
    %c0_i32 = arith.constant 0 : i32
    %c0_i32_0 = arith.constant 0 : i32
    %c0_i32_1 = arith.constant 0 : i32
    return %arg0, %arg1, %c0_i32, %c0_i32_0 : i32, i32, i32, i32
  }
  func.func @transform_2(%arg0: i32, %arg1: i32) -> (i32, i32, i32, i32) {
    %c0_i32 = arith.constant 0 : i32
    %c0_i32_0 = arith.constant 0 : i32
    %c0_i32_1 = arith.constant 0 : i32
    return %arg0, %arg1, %c0_i32, %c0_i32_0 : i32, i32, i32, i32
  }
  func.func @transform_3(%arg0: i32, %arg1: i32) -> (i32, i32, i32) {
    %c0_i32 = arith.constant 0 : i32
    %c0_i32_0 = arith.constant 0 : i32
    %c0_i32_1 = arith.constant 0 : i32
    %c0_i32_2 = arith.constant 0 : i32
    return %c0_i32, %c0_i32_0, %c0_i32_1 : i32, i32, i32
  }
  func.func @transform_4(%arg0: i32, %arg1: i32) -> (i32, i32) {
    %c0_i32 = arith.constant 0 : i32
    %c0_i32_0 = arith.constant 0 : i32
    %c0_i32_1 = arith.constant 0 : i32
    return %c0_i32, %c0_i32_0 : i32, i32
  }
  func.func @transform_5(%arg0: i32, %arg1: i32) -> (i32, i32) {
    %c0_i32 = arith.constant 0 : i32
    %c0_i32_0 = arith.constant 0 : i32
    %c0_i32_1 = arith.constant 0 : i32
    return %c0_i32, %c0_i32_0 : i32, i32
  }
  func.func @transform_6(%arg0: i32, %arg1: i32) -> (i32, i32, i32, i32) {
    %c0_i32 = arith.constant 0 : i32
    %c0_i32_0 = arith.constant 0 : i32
    %c0_i32_1 = arith.constant 0 : i32
    return %arg0, %arg1, %c0_i32, %c0_i32_0 : i32, i32, i32, i32
  }
  func.func @transform_7(%arg0: i32, %arg1: i32) -> (i32, i32, i32, i32) {
    %c0_i32 = arith.constant 0 : i32
    %c0_i32_0 = arith.constant 0 : i32
    %c0_i32_1 = arith.constant 0 : i32
    return %arg0, %arg1, %c0_i32, %c0_i32_0 : i32, i32, i32, i32
  }
}

module attributes {stable_mosaic.version = 11 : i64} {
  func.func @_bn_relu_kernel(%arg0: i32, %arg1: memref<32x24x128xf32, #tpu.memory_space<vmem>>, %arg2: memref<1x128xf32, #tpu.memory_space<vmem>>, %arg3: memref<1x128xf32, #tpu.memory_space<vmem>>, %arg4: memref<32x24x128xf32, #tpu.memory_space<vmem>>) attributes {dimension_semantics = [#tpu.dimension_semantics<parallel>], iteration_bounds = array<i64: 1>, scalar_prefetch = 0 : i64, scratch_operands = 0 : i64, tpu.core_type = #tpu.core_type<tc>, window_params = [{transform_indices = @transform_0, window_bounds = array<i64: 32, 24, 128>}, {pipeline_mode = #tpu.pipeline_mode<synchronous>, transform_indices = @transform_1, window_bounds = array<i64: 1, 128>}, {pipeline_mode = #tpu.pipeline_mode<synchronous>, transform_indices = @transform_2, window_bounds = array<i64: 1, 128>}, {transform_indices = @transform_3, window_bounds = array<i64: 32, 24, 128>}]} {
    %c0 = arith.constant 0 : index
    %c0_0 = arith.constant 0 : index
    %0 = vector.load %arg2[%c0, %c0_0] : memref<1x128xf32, #tpu.memory_space<vmem>>, vector<1x128xf32>
    %1 = vector.shape_cast %0 : vector<1x128xf32> to vector<1x1x128xf32>
    %c0_1 = arith.constant 0 : index
    %c0_2 = arith.constant 0 : index
    %2 = vector.load %arg3[%c0_1, %c0_2] : memref<1x128xf32, #tpu.memory_space<vmem>>, vector<1x128xf32>
    %3 = vector.shape_cast %2 : vector<1x128xf32> to vector<1x1x128xf32>
    %c0_3 = arith.constant 0 : index
    %c0_4 = arith.constant 0 : index
    %c0_5 = arith.constant 0 : index
    %4 = vector.load %arg1[%c0_3, %c0_4, %c0_5] : memref<32x24x128xf32, #tpu.memory_space<vmem>>, vector<32x24x128xf32>
    %5 = vector.broadcast %1 : vector<1x1x128xf32> to vector<32x24x128xf32>
    %6 = arith.mulf %4, %5 : vector<32x24x128xf32>
    %7 = vector.broadcast %3 : vector<1x1x128xf32> to vector<32x24x128xf32>
    %8 = arith.addf %6, %7 : vector<32x24x128xf32>
    %cst = arith.constant 0.000000e+00 : f32
    %9 = vector.broadcast %cst : f32 to vector<32x24x128xf32>
    %10 = arith.maximumf %8, %9 : vector<32x24x128xf32>
    %c0_6 = arith.constant 0 : index
    %c0_7 = arith.constant 0 : index
    %c0_8 = arith.constant 0 : index
    %11 = vector.load %arg4[%c0_6, %c0_7, %c0_8] : memref<32x24x128xf32, #tpu.memory_space<vmem>>, vector<32x24x128xf32>
    tpu.vector_store %arg4[%c0_6, %c0_7, %c0_8], %10 {strides = array<i32>} : memref<32x24x128xf32, #tpu.memory_space<vmem>>, vector<32x24x128xf32>,
    return
  }
  func.func @transform_0(%arg0: i32) -> (i32, i32, i32) {
    %c0_i32 = arith.constant 0 : i32
    %c0_i32_0 = arith.constant 0 : i32
    %c0_i32_1 = arith.constant 0 : i32
    return %arg0, %c0_i32, %c0_i32_0 : i32, i32, i32
  }
  func.func @transform_1(%arg0: i32) -> (i32, i32) {
    %c0_i32 = arith.constant 0 : i32
    %c0_i32_0 = arith.constant 0 : i32
    %c0_i32_1 = arith.constant 0 : i32
    return %c0_i32, %c0_i32_0 : i32, i32
  }
  func.func @transform_2(%arg0: i32) -> (i32, i32) {
    %c0_i32 = arith.constant 0 : i32
    %c0_i32_0 = arith.constant 0 : i32
    %c0_i32_1 = arith.constant 0 : i32
    return %c0_i32, %c0_i32_0 : i32, i32
  }
  func.func @transform_3(%arg0: i32) -> (i32, i32, i32) {
    %c0_i32 = arith.constant 0 : i32
    %c0_i32_0 = arith.constant 0 : i32
    %c0_i32_1 = arith.constant 0 : i32
    return %arg0, %c0_i32, %c0_i32_0 : i32, i32, i32
  }
}

</mosaic_0001>

<bundles_post_ra>
// kernel: up_forward.5
= control target key start
LH: loop header
LB: loop body
LE: loop exit
PB: predicated region body
PF: predicated region fallthrough
CT: control target
= control target key end

     0   :  { %s1306_s0 = inlined_call_operand.vmem [shape: f32[32,24,128], index: 0, kind: input, shape index: {}]   ;;  %s1307_s1 = inlined_call_operand.vmem [shape: f32[1,128], index: 1, kind: input, shape index: {}]   ;;  %s1308_s2 = inlined_call_operand.vmem [shape: f32[1,128], index: 2, kind: input, shape index: {}]   ;;  %s1309_s3 = inlined_call_operand.vmem [shape: f32[32,24,128], index: 3, kind: output, shape index: {}]  }
   0x1   :  { %v16_v0 = vld [vmem:[%s1306_s0] sm:$0xff]  ;;  %v17_v3 = vld [vmem:[%s1306_s0 + $0x8] sm:$0xff]  ;;  %v18_v4 = vld [vmem:[%s1306_s0 + $0x10] sm:$0xff] }
   0x2   :  { %v534_v1 = vld [vmem:[%s1307_s1] ss:$0 sm:$0xff]  ;;  %v19_v5 = vld [vmem:[%s1306_s0 + $0x18] sm:$0xff]  ;;  %v21_v11 = vld [vmem:[%s1306_s0 + $0x28] sm:$0xff] }
   0x3   :  { %v539_v2 = vld [vmem:[%s1308_s2] ss:$0 sm:$0xff]  ;;  %v115_v7 = vmul.f32 %v534_v1, %v16_v0  ;;  %v116_v8 = vmul.f32 %v534_v1, %v17_v3  ;;  %v117_v9 = vmul.f32 %v534_v1, %v18_v4  ;;  %v118_v10 = vmul.f32 %v534_v1, %v19_v5  ;;  %v22_v12 = vld [vmem:[%s1306_s0 + $0x30] sm:$0xff]  ;;  %v23_v13 = vld [vmem:[%s1306_s0 + $0x38] sm:$0xff] }
   0x4   :  { %v20_v6 = vld [vmem:[%s1306_s0 + $0x20] sm:$0xff]  ;;  %v120_v15 = vmul.f32 %v534_v1, %v21_v11  ;;  %v121_v16 = vmul.f32 %v534_v1, %v22_v12  ;;  %v122_v17 = vmul.f32 %v534_v1, %v23_v13  ;;  %v25_v25 = vld [vmem:[%s1306_s0 + $0x48] sm:$0xff]  ;;  %v26_v26 = vld [vmem:[%s1306_s0 + $0x50] sm:$0xff] }
   0x5   :  { %v119_v14 = vmul.f32 %v534_v1, %v20_v6  ;;  %v214_v18 = vadd.f32 %v539_v2, %v115_v7  ;;  %v215_v19 = vadd.f32 %v539_v2, %v116_v8  ;;  %v216_v20 = vadd.f32 %v539_v2, %v117_v9  ;;  %v24_v22 = vld [vmem:[%s1306_s0 + $0x40] sm:$0xff]  ;;  %v27_v27 = vld [vmem:[%s1306_s0 + $0x58] sm:$0xff]  ;;  %v29_v33 = vld [vmem:[%s1306_s0 + $0x68] sm:$0xff] }
   0x6   :  { %v217_v21 = vadd.f32 %v539_v2, %v118_v10  ;;  %v219_v24 = vadd.f32 %v539_v2, %v120_v15  ;;  %v220_v31 = vadd.f32 %v539_v2, %v121_v16  ;;  %v28_v32 = vld [vmem:[%s1306_s0 + $0x60] sm:$0xff]  ;;  %v30_v34 = vld [vmem:[%s1306_s0 + $0x70] sm:$0xff]  ;;  %v221_v37 = vadd.f32 %v539_v2, %v122_v17  ;;  %v31_v42 = vld [vmem:[%s1306_s0 + $0x78] sm:$0xff] }
   0x7   :  { %v218_v23 = vadd.f32 %v539_v2, %v119_v14  ;;  %v310_v28 = vmax.f32 %v214_v18, 0.0  ;;  %v311_v29 = vmax.f32 %v215_v19, 0.0  ;;  %v312_v30 = vmax.f32 %v216_v20, 0.0  ;;  %v32_v54 = vld [vmem:[%s1306_s0 + $0x80] sm:$0xff]  ;;  %v33_v55 = vld [vmem:[%s1306_s0 + $0x88] sm:$0xff]  ;;  %v34_v56 = vld [vmem:[%s1306_s0 + $0x90] sm:$0xff] }
   0x8   :  { %v313_v35 = vmax.f32 %v217_v21, 0.0  ;;  %v123_v38 = vmul.f32 %v534_v1, %v24_v22  ;;  %v124_v39 = vmul.f32 %v534_v1, %v25_v25  ;;  %v125_v40 = vmul.f32 %v534_v1, %v26_v26  ;;  %v35_v59 = vld [vmem:[%s1306_s0 + $0x98] sm:$0xff]  ;;  %v36_v63 = vld [vmem:[%s1306_s0 + $0xa0] sm:$0xff]  ;;  %v37_v6 = vld [vmem:[%s1306_s0 + $0xa8] sm:$0xff] }
   0x9   :  { %v314_v36 = vmax.f32 %v218_v23, 0.0  ;;  %406 = vst [vmem:[%s1309_s3] sm:$0xff] %v310_v28  ;;  %v126_v41 = vmul.f32 %v534_v1, %v27_v27  ;;  %v315_v43 = vmax.f32 %v219_v24, 0.0  ;;  %v127_v44 = vmul.f32 %v534_v1, %v28_v32  ;;  %v38_v10 = vld [vmem:[%s1306_s0 + $0xb0] sm:$0xff]  ;;  %v39_v14 = vld [vmem:[%s1306_s0 + $0xb8] sm:$0xff]  ;;  %v40_v18 = vld [vmem:[%s1306_s0 + $0xc0] sm:$0xff] }
   0xa   :  { %407 = vst [vmem:[%s1309_s3 + $0x8] sm:$0xff] %v311_v29  ;;  %v128_v45 = vmul.f32 %v534_v1, %v29_v33  ;;  %v129_v46 = vmul.f32 %v534_v1, %v30_v34  ;;  %v316_v47 = vmax.f32 %v220_v31, 0.0  ;;  %v222_v48 = vadd.f32 %v539_v2, %v123_v38  ;;  %v41_v22 = vld [vmem:[%s1306_s0 + $0xc8] sm:$0xff]  ;;  %v42_v26 = vld [vmem:[%s1306_s0 + $0xd0] sm:$0xff]  ;;  %v44_v34 = vld [vmem:[%s1306_s0 + $0xe0] sm:$0xff] }
   0xb   :  { %408 = vst [vmem:[%s1309_s3 + $0x10] sm:$0xff] %v312_v30  ;;  %v223_v49 = vadd.f32 %v539_v2, %v124_v39  ;;  %v224_v50 = vadd.f32 %v539_v2, %v125_v40  ;;  %v317_v51 = vmax.f32 %v221_v37, 0.0  ;;  %v225_v52 = vadd.f32 %v539_v2, %v126_v41  ;;  %v43_v30 = vld [vmem:[%s1306_s0 + $0xd8] sm:$0xff]  ;;  %v45_v38 = vld [vmem:[%s1306_s0 + $0xe8] sm:$0xff] }
   0xc   :  { %409 = vst [vmem:[%s1309_s3 + $0x18] sm:$0xff] %v313_v35  ;;  %v130_v53 = vmul.f32 %v534_v1, %v31_v42  ;;  %v318_v57 = vmax.f32 %v222_v48, 0.0  ;;  %v226_v58 = vadd.f32 %v539_v2, %v127_v44  ;;  %v227_v61 = vadd.f32 %v539_v2, %v128_v45  ;;  %v46_v42 = vld [vmem:[%s1306_s0 + $0xf0] sm:$0xff] }
   0xd   :  { %410 = vst [vmem:[%s1309_s3 + $0x20] sm:$0xff] %v314_v36  ;;  %v319_v60 = vmax.f32 %v223_v49, 0.0  ;;  %v228_v62 = vadd.f32 %v539_v2, %v129_v46  ;;  %v320_v0 = vmax.f32 %v224_v50, 0.0  ;;  %v131_v3 = vmul.f32 %v534_v1, %v32_v54  ;;  %v47_v46 = vld [vmem:[%s1306_s0 + $0xf8] sm:$0xff]  ;;  %v48_v50 = vld [vmem:[%s1306_s0 + $0x100] sm:$0xff]  ;;  %v49_v54 = vld [vmem:[%s1306_s0 + $0x108] sm:$0xff] }
   0xe   :  { %411 = vst [vmem:[%s1309_s3 + $0x28] sm:$0xff] %v315_v43  ;;  %v132_v4 = vmul.f32 %v534_v1, %v33_v55  ;;  %v133_v5 = vmul.f32 %v534_v1, %v34_v56  ;;  %v321_v7 = vmax.f32 %v225_v52, 0.0  ;;  %v229_v8 = vadd.f32 %v539_v2, %v130_v53 }
   0xf   :  { %412 = vst [vmem:[%s1309_s3 + $0x30] sm:$0xff] %v316_v47  ;;  %v134_v9 = vmul.f32 %v534_v1, %v35_v59  ;;  %v322_v11 = vmax.f32 %v226_v58, 0.0  ;;  %v230_v12 = vadd.f32 %v539_v2, %v131_v3  ;;  %v135_v13 = vmul.f32 %v534_v1, %v36_v63  ;;  %v50_v58 = vld [vmem:[%s1306_s0 + $0x110] sm:$0xff] }
  0x10   :  { %413 = vst [vmem:[%s1309_s3 + $0x38] sm:$0xff] %v317_v51  ;;  %v323_v15 = vmax.f32 %v227_v61, 0.0  ;;  %v231_v16 = vadd.f32 %v539_v2, %v132_v4  ;;  %v136_v17 = vmul.f32 %v534_v1, %v37_v6  ;;  %v324_v19 = vmax.f32 %v228_v62, 0.0  ;;  %v51_v62 = vld [vmem:[%s1306_s0 + $0x118] sm:$0xff]  ;;  %v52_v4 = vld [vmem:[%s1306_s0 + $0x120] sm:$0xff] }
  0x11   :  { %414 = vst [vmem:[%s1309_s3 + $0x40] sm:$0xff] %v318_v57  ;;  %v232_v20 = vadd.f32 %v539_v2, %v133_v5  ;;  %v137_v21 = vmul.f32 %v534_v1, %v38_v10  ;;  %v325_v23 = vmax.f32 %v229_v8, 0.0  ;;  %v233_v24 = vadd.f32 %v539_v2, %v134_v9  ;;  %v53_v8 = vld [vmem:[%s1306_s0 + $0x128] sm:$0xff] }
  0x12   :  { %415 = vst [vmem:[%s1309_s3 + $0x48] sm:$0xff] %v319_v60  ;;  %v138_v25 = vmul.f32 %v534_v1, %v39_v14  ;;  %v326_v27 = vmax.f32 %v230_v12, 0.0  ;;  %v234_v28 = vadd.f32 %v539_v2, %v135_v13  ;;  %v139_v29 = vmul.f32 %v534_v1, %v40_v18  ;;  %v54_v12 = vld [vmem:[%s1306_s0 + $0x130] sm:$0xff] }
  0x13   :  { %416 = vst [vmem:[%s1309_s3 + $0x50] sm:$0xff] %v320_v0  ;;  %v327_v31 = vmax.f32 %v231_v16, 0.0  ;;  %v235_v32 = vadd.f32 %v539_v2, %v136_v17  ;;  %v140_v33 = vmul.f32 %v534_v1, %v41_v22  ;;  %v328_v35 = vmax.f32 %v232_v20, 0.0  ;;  %v55_v16 = vld [vmem:[%s1306_s0 + $0x138] sm:$0xff]  ;;  %v56_v20 = vld [vmem:[%s1306_s0 + $0x140] sm:$0xff] }
  0x14   :  { %417 = vst [vmem:[%s1309_s3 + $0x58] sm:$0xff] %v321_v7  ;;  %v236_v36 = vadd.f32 %v539_v2, %v137_v21  ;;  %v141_v37 = vmul.f32 %v534_v1, %v42_v26  ;;  %v329_v39 = vmax.f32 %v233_v24, 0.0  ;;  %v237_v40 = vadd.f32 %v539_v2, %v138_v25  ;;  %v57_v24 = vld [vmem:[%s1306_s0 + $0x148] sm:$0xff] }
  0x15   :  { %418 = vst [vmem:[%s1309_s3 + $0x60] sm:$0xff] %v322_v11  ;;  %v142_v41 = vmul.f32 %v534_v1, %v43_v30  ;;  %v330_v43 = vmax.f32 %v234_v28, 0.0  ;;  %v238_v44 = vadd.f32 %v539_v2, %v139_v29  ;;  %v143_v45 = vmul.f32 %v534_v1, %v44_v34  ;;  %v58_v28 = vld [vmem:[%s1306_s0 + $0x150] sm:$0xff] }
  0x16   :  { %419 = vst [vmem:[%s1309_s3 + $0x68] sm:$0xff] %v323_v15  ;;  %v331_v47 = vmax.f32 %v235_v32, 0.0  ;;  %v239_v48 = vadd.f32 %v539_v2, %v140_v33  ;;  %v144_v49 = vmul.f32 %v534_v1, %v45_v38  ;;  %v332_v51 = vmax.f32 %v236_v36, 0.0  ;;  %v59_v32 = vld [vmem:[%s1306_s0 + $0x158] sm:$0xff]  ;;  %v60_v36 = vld [vmem:[%s1306_s0 + $0x160] sm:$0xff] }
  0x17   :  { %420 = vst [vmem:[%s1309_s3 + $0x70] sm:$0xff] %v324_v19  ;;  %v240_v52 = vadd.f32 %v539_v2, %v141_v37  ;;  %v145_v53 = vmul.f32 %v534_v1, %v46_v42  ;;  %v333_v55 = vmax.f32 %v237_v40, 0.0  ;;  %v241_v56 = vadd.f32 %v539_v2, %v142_v41  ;;  %v61_v40 = vld [vmem:[%s1306_s0 + $0x168] sm:$0xff] }
  0x18   :  { %421 = vst [vmem:[%s1309_s3 + $0x78] sm:$0xff] %v325_v23  ;;  %v146_v57 = vmul.f32 %v534_v1, %v47_v46  ;;  %v334_v59 = vmax.f32 %v238_v44, 0.0  ;;  %v242_v60 = vadd.f32 %v539_v2, %v143_v45  ;;  %v147_v61 = vmul.f32 %v534_v1, %v48_v50  ;;  %v62_v44 = vld [vmem:[%s1306_s0 + $0x170] sm:$0xff] }
  0x19   :  { %422 = vst [vmem:[%s1309_s3 + $0x80] sm:$0xff] %v326_v27  ;;  %v335_v63 = vmax.f32 %v239_v48, 0.0  ;;  %v243_v0 = vadd.f32 %v539_v2, %v144_v49  ;;  %v148_v3 = vmul.f32 %v534_v1, %v49_v54  ;;  %v336_v5 = vmax.f32 %v240_v52, 0.0  ;;  %v63_v48 = vld [vmem:[%s1306_s0 + $0x178] sm:$0xff]  ;;  %v64_v52 = vld [vmem:[%s1306_s0 + $0x180] sm:$0xff] }
  0x1a   :  { %423 = vst [vmem:[%s1309_s3 + $0x88] sm:$0xff] %v327_v31  ;;  %v244_v6 = vadd.f32 %v539_v2, %v145_v53  ;;  %v149_v7 = vmul.f32 %v534_v1, %v50_v58  ;;  %v337_v9 = vmax.f32 %v241_v56, 0.0  ;;  %v245_v10 = vadd.f32 %v539_v2, %v146_v57  ;;  %v65_v56 = vld [vmem:[%s1306_s0 + $0x188] sm:$0xff] }
  0x1b   :  { %424 = vst [vmem:[%s1309_s3 + $0x90] sm:$0xff] %v328_v35  ;;  %v150_v11 = vmul.f32 %v534_v1, %v51_v62  ;;  %v338_v13 = vmax.f32 %v242_v60, 0.0  ;;  %v246_v14 = vadd.f32 %v539_v2, %v147_v61  ;;  %v151_v15 = vmul.f32 %v534_v1, %v52_v4  ;;  %v66_v60 = vld [vmem:[%s1306_s0 + $0x190] sm:$0xff] }
  0x1c   :  { %425 = vst [vmem:[%s1309_s3 + $0x98] sm:$0xff] %v329_v39  ;;  %v339_v17 = vmax.f32 %v243_v0, 0.0  ;;  %v247_v18 = vadd.f32 %v539_v2, %v148_v3  ;;  %v152_v19 = vmul.f32 %v534_v1, %v53_v8  ;;  %v340_v21 = vmax.f32 %v244_v6, 0.0  ;;  %v67_v0 = vld [vmem:[%s1306_s0 + $0x198] sm:$0xff]  ;;  %v68_v6 = vld [vmem:[%s1306_s0 + $0x1a0] sm:$0xff] }
  0x1d   :  { %426 = vst [vmem:[%s1309_s3 + $0xa0] sm:$0xff] %v330_v43  ;;  %v248_v22 = vadd.f32 %v539_v2, %v149_v7  ;;  %v153_v23 = vmul.f32 %v534_v1, %v54_v12  ;;  %v341_v25 = vmax.f32 %v245_v10, 0.0  ;;  %v249_v26 = vadd.f32 %v539_v2, %v150_v11  ;;  %v69_v10 = vld [vmem:[%s1306_s0 + $0x1a8] sm:$0xff] }
  0x1e   :  { %427 = vst [vmem:[%s1309_s3 + $0xa8] sm:$0xff] %v331_v47  ;;  %v154_v27 = vmul.f32 %v534_v1, %v55_v16  ;;  %v342_v29 = vmax.f32 %v246_v14, 0.0  ;;  %v250_v30 = vadd.f32 %v539_v2, %v151_v15  ;;  %v155_v31 = vmul.f32 %v534_v1, %v56_v20  ;;  %v70_v14 = vld [vmem:[%s1306_s0 + $0x1b0] sm:$0xff] }
  0x1f   :  { %428 = vst [vmem:[%s1309_s3 + $0xb0] sm:$0xff] %v332_v51  ;;  %v343_v33 = vmax.f32 %v247_v18, 0.0  ;;  %v251_v34 = vadd.f32 %v539_v2, %v152_v19  ;;  %v156_v35 = vmul.f32 %v534_v1, %v57_v24  ;;  %v344_v37 = vmax.f32 %v248_v22, 0.0  ;;  %v71_v18 = vld [vmem:[%s1306_s0 + $0x1b8] sm:$0xff]  ;;  %v72_v22 = vld [vmem:[%s1306_s0 + $0x1c0] sm:$0xff] }
  0x20   :  { %429 = vst [vmem:[%s1309_s3 + $0xb8] sm:$0xff] %v333_v55  ;;  %v252_v38 = vadd.f32 %v539_v2, %v153_v23  ;;  %v157_v39 = vmul.f32 %v534_v1, %v58_v28  ;;  %v345_v41 = vmax.f32 %v249_v26, 0.0  ;;  %v253_v42 = vadd.f32 %v539_v2, %v154_v27  ;;  %v73_v26 = vld [vmem:[%s1306_s0 + $0x1c8] sm:$0xff] }
  0x21   :  { %430 = vst [vmem:[%s1309_s3 + $0xc0] sm:$0xff] %v334_v59  ;;  %v158_v43 = vmul.f32 %v534_v1, %v59_v32  ;;  %v346_v45 = vmax.f32 %v250_v30, 0.0  ;;  %v254_v46 = vadd.f32 %v539_v2, %v155_v31  ;;  %v159_v47 = vmul.f32 %v534_v1, %v60_v36  ;;  %v74_v30 = vld [vmem:[%s1306_s0 + $0x1d0] sm:$0xff] }
  0x22   :  { %431 = vst [vmem:[%s1309_s3 + $0xc8] sm:$0xff] %v335_v63  ;;  %v347_v49 = vmax.f32 %v251_v34, 0.0  ;;  %v255_v50 = vadd.f32 %v539_v2, %v156_v35  ;;  %v160_v51 = vmul.f32 %v534_v1, %v61_v40  ;;  %v348_v53 = vmax.f32 %v252_v38, 0.0  ;;  %v75_v34 = vld [vmem:[%s1306_s0 + $0x1d8] sm:$0xff]  ;;  %v76_v38 = vld [vmem:[%s1306_s0 + $0x1e0] sm:$0xff] }
  0x23   :  { %432 = vst [vmem:[%s1309_s3 + $0xd0] sm:$0xff] %v336_v5  ;;  %v256_v54 = vadd.f32 %v539_v2, %v157_v39  ;;  %v161_v55 = vmul.f32 %v534_v1, %v62_v44  ;;  %v349_v57 = vmax.f32 %v253_v42, 0.0  ;;  %v257_v58 = vadd.f32 %v539_v2, %v158_v43  ;;  %v77_v42 = vld [vmem:[%s1306_s0 + $0x1e8] sm:$0xff] }
  0x24   :  { %433 = vst [vmem:[%s1309_s3 + $0xd8] sm:$0xff] %v337_v9  ;;  %v162_v59 = vmul.f32 %v534_v1, %v63_v48  ;;  %v350_v61 = vmax.f32 %v254_v46, 0.0  ;;  %v258_v62 = vadd.f32 %v539_v2, %v159_v47  ;;  %v163_v63 = vmul.f32 %v534_v1, %v64_v52  ;;  %v78_v46 = vld [vmem:[%s1306_s0 + $0x1f0] sm:$0xff] }
  0x25   :  { %434 = vst [vmem:[%s1309_s3 + $0xe0] sm:$0xff] %v338_v13  ;;  %v351_v3 = vmax.f32 %v255_v50, 0.0  ;;  %v259_v4 = vadd.f32 %v539_v2, %v160_v51  ;;  %v164_v5 = vmul.f32 %v534_v1, %v65_v56  ;;  %v352_v7 = vmax.f32 %v256_v54, 0.0  ;;  %v79_v50 = vld [vmem:[%s1306_s0 + $0x1f8] sm:$0xff]  ;;  %v80_v54 = vld [vmem:[%s1306_s0 + $0x200] sm:$0xff] }
  0x26   :  { %435 = vst [vmem:[%s1309_s3 + $0xe8] sm:$0xff] %v339_v17  ;;  %v260_v8 = vadd.f32 %v539_v2, %v161_v55  ;;  %v165_v9 = vmul.f32 %v534_v1, %v66_v60  ;;  %v353_v11 = vmax.f32 %v257_v58, 0.0  ;;  %v261_v12 = vadd.f32 %v539_v2, %v162_v59  ;;  %v81_v58 = vld [vmem:[%s1306_s0 + $0x208] sm:$0xff] }
  0x27   :  { %436 = vst [vmem:[%s1309_s3 + $0xf0] sm:$0xff] %v340_v21  ;;  %v166_v13 = vmul.f32 %v534_v1, %v67_v0  ;;  %v354_v15 = vmax.f32 %v258_v62, 0.0  ;;  %v262_v16 = vadd.f32 %v539_v2, %v163_v63  ;;  %v167_v17 = vmul.f32 %v534_v1, %v68_v6  ;;  %v82_v62 = vld [vmem:[%s1306_s0 + $0x210] sm:$0xff] }
  0x28   :  { %437 = vst [vmem:[%s1309_s3 + $0xf8] sm:$0xff] %v341_v25  ;;  %v355_v19 = vmax.f32 %v259_v4, 0.0  ;;  %v263_v20 = vadd.f32 %v539_v2, %v164_v5  ;;  %v168_v21 = vmul.f32 %v534_v1, %v69_v10  ;;  %v356_v23 = vmax.f32 %v260_v8, 0.0  ;;  %v83_v4 = vld [vmem:[%s1306_s0 + $0x218] sm:$0xff]  ;;  %v84_v8 = vld [vmem:[%s1306_s0 + $0x220] sm:$0xff] }
  0x29   :  { %438 = vst [vmem:[%s1309_s3 + $0x100] sm:$0xff] %v342_v29  ;;  %v264_v24 = vadd.f32 %v539_v2, %v165_v9  ;;  %v169_v25 = vmul.f32 %v534_v1, %v70_v14  ;;  %v357_v27 = vmax.f32 %v261_v12, 0.0  ;;  %v265_v28 = vadd.f32 %v539_v2, %v166_v13  ;;  %v85_v12 = vld [vmem:[%s1306_s0 + $0x228] sm:$0xff] }
  0x2a   :  { %439 = vst [vmem:[%s1309_s3 + $0x108] sm:$0xff] %v343_v33  ;;  %v170_v29 = vmul.f32 %v534_v1, %v71_v18  ;;  %v358_v31 = vmax.f32 %v262_v16, 0.0  ;;  %v266_v32 = vadd.f32 %v539_v2, %v167_v17  ;;  %v171_v33 = vmul.f32 %v534_v1, %v72_v22  ;;  %v86_v16 = vld [vmem:[%s1306_s0 + $0x230] sm:$0xff] }
  0x2b   :  { %440 = vst [vmem:[%s1309_s3 + $0x110] sm:$0xff] %v344_v37  ;;  %v359_v35 = vmax.f32 %v263_v20, 0.0  ;;  %v267_v36 = vadd.f32 %v539_v2, %v168_v21  ;;  %v172_v37 = vmul.f32 %v534_v1, %v73_v26  ;;  %v360_v39 = vmax.f32 %v264_v24, 0.0  ;;  %v87_v20 = vld [vmem:[%s1306_s0 + $0x238] sm:$0xff]  ;;  %v88_v24 = vld [vmem:[%s1306_s0 + $0x240] sm:$0xff] }
  0x2c   :  { %441 = vst [vmem:[%s1309_s3 + $0x118] sm:$0xff] %v345_v41  ;;  %v268_v40 = vadd.f32 %v539_v2, %v169_v25  ;;  %v173_v41 = vmul.f32 %v534_v1, %v74_v30  ;;  %v361_v43 = vmax.f32 %v265_v28, 0.0  ;;  %v269_v44 = vadd.f32 %v539_v2, %v170_v29  ;;  %v89_v28 = vld [vmem:[%s1306_s0 + $0x248] sm:$0xff] }
  0x2d   :  { %442 = vst [vmem:[%s1309_s3 + $0x120] sm:$0xff] %v346_v45  ;;  %v174_v45 = vmul.f32 %v534_v1, %v75_v34  ;;  %v362_v47 = vmax.f32 %v266_v32, 0.0  ;;  %v270_v48 = vadd.f32 %v539_v2, %v171_v33  ;;  %v363_v51 = vmax.f32 %v267_v36, 0.0  ;;  %v90_v32 = vld [vmem:[%s1306_s0 + $0x250] sm:$0xff]  ;;  %v91_v36 = vld [vmem:[%s1306_s0 + $0x258] sm:$0xff] }
  0x2e   :  { %443 = vst [vmem:[%s1309_s3 + $0x128] sm:$0xff] %v347_v49  ;;  %v175_v49 = vmul.f32 %v534_v1, %v76_v38  ;;  %v271_v52 = vadd.f32 %v539_v2, %v172_v37  ;;  %v364_v55 = vmax.f32 %v268_v40, 0.0  ;;  %v272_v56 = vadd.f32 %v539_v2, %v173_v41  ;;  %v92_v40 = vld [vmem:[%s1306_s0 + $0x260] sm:$0xff] }
  0x2f   :  { %444 = vst [vmem:[%s1309_s3 + $0x130] sm:$0xff] %v348_v53  ;;  %v176_v53 = vmul.f32 %v534_v1, %v77_v42  ;;  %v365_v59 = vmax.f32 %v269_v44, 0.0  ;;  %v273_v60 = vadd.f32 %v539_v2, %v174_v45  ;;  %v366_v63 = vmax.f32 %v270_v48, 0.0  ;;  %v93_v44 = vld [vmem:[%s1306_s0 + $0x268] sm:$0xff]  ;;  %v94_v48 = vld [vmem:[%s1306_s0 + $0x270] sm:$0xff] }
  0x30   :  { %445 = vst [vmem:[%s1309_s3 + $0x138] sm:$0xff] %v349_v57  ;;  %v177_v57 = vmul.f32 %v534_v1, %v78_v46  ;;  %v274_v0 = vadd.f32 %v539_v2, %v175_v49  ;;  %v367_v5 = vmax.f32 %v271_v52, 0.0  ;;  %v368_v9 = vmax.f32 %v272_v56, 0.0  ;;  %v95_v52 = vld [vmem:[%s1306_s0 + $0x278] sm:$0xff]  ;;  %v96_v56 = vld [vmem:[%s1306_s0 + $0x280] sm:$0xff] }
  0x31   :  { %446 = vst [vmem:[%s1309_s3 + $0x140] sm:$0xff] %v350_v61  ;;  %v178_v61 = vmul.f32 %v534_v1, %v79_v50  ;;  %v275_v6 = vadd.f32 %v539_v2, %v176_v53  ;;  %v369_v13 = vmax.f32 %v273_v60, 0.0  ;;  %v97_v60 = vld [vmem:[%s1306_s0 + $0x288] sm:$0xff] }
  0x32   :  { %447 = vst [vmem:[%s1309_s3 + $0x148] sm:$0xff] %v351_v3  ;;  %v179_v3 = vmul.f32 %v534_v1, %v80_v54  ;;  %v276_v10 = vadd.f32 %v539_v2, %v177_v57  ;;  %v370_v17 = vmax.f32 %v274_v0, 0.0  ;;  %v98_v0 = vld [vmem:[%s1306_s0 + $0x290] sm:$0xff] }
  0x33   :  { %448 = vst [vmem:[%s1309_s3 + $0x150] sm:$0xff] %v352_v7  ;;  %v180_v7 = vmul.f32 %v534_v1, %v81_v58  ;;  %v277_v14 = vadd.f32 %v539_v2, %v178_v61  ;;  %v371_v21 = vmax.f32 %v275_v6, 0.0  ;;  %v99_v6 = vld [vmem:[%s1306_s0 + $0x298] sm:$0xff] }
  0x34   :  { %449 = vst [vmem:[%s1309_s3 + $0x158] sm:$0xff] %v353_v11  ;;  %v181_v11 = vmul.f32 %v534_v1, %v82_v62  ;;  %v278_v18 = vadd.f32 %v539_v2, %v179_v3  ;;  %v372_v25 = vmax.f32 %v276_v10, 0.0  ;;  %v100_v10 = vld [vmem:[%s1306_s0 + $0x2a0] sm:$0xff] }
  0x35   :  { %450 = vst [vmem:[%s1309_s3 + $0x160] sm:$0xff] %v354_v15  ;;  %v182_v15 = vmul.f32 %v534_v1, %v83_v4  ;;  %v279_v22 = vadd.f32 %v539_v2, %v180_v7  ;;  %v373_v29 = vmax.f32 %v277_v14, 0.0  ;;  %v101_v14 = vld [vmem:[%s1306_s0 + $0x2a8] sm:$0xff] }
  0x36   :  { %451 = vst [vmem:[%s1309_s3 + $0x168] sm:$0xff] %v355_v19  ;;  %v183_v19 = vmul.f32 %v534_v1, %v84_v8  ;;  %v280_v26 = vadd.f32 %v539_v2, %v181_v11  ;;  %v374_v33 = vmax.f32 %v278_v18, 0.0  ;;  %v102_v18 = vld [vmem:[%s1306_s0 + $0x2b0] sm:$0xff] }
  0x37   :  { %452 = vst [vmem:[%s1309_s3 + $0x170] sm:$0xff] %v356_v23  ;;  %v184_v23 = vmul.f32 %v534_v1, %v85_v12  ;;  %v281_v30 = vadd.f32 %v539_v2, %v182_v15  ;;  %v375_v37 = vmax.f32 %v279_v22, 0.0  ;;  %v103_v22 = vld [vmem:[%s1306_s0 + $0x2b8] sm:$0xff] }
  0x38   :  { %453 = vst [vmem:[%s1309_s3 + $0x178] sm:$0xff] %v357_v27  ;;  %v185_v27 = vmul.f32 %v534_v1, %v86_v16  ;;  %v282_v34 = vadd.f32 %v539_v2, %v183_v19  ;;  %v376_v41 = vmax.f32 %v280_v26, 0.0  ;;  %v104_v26 = vld [vmem:[%s1306_s0 + $0x2c0] sm:$0xff] }
  0x39   :  { %454 = vst [vmem:[%s1309_s3 + $0x180] sm:$0xff] %v358_v31  ;;  %v186_v31 = vmul.f32 %v534_v1, %v87_v20  ;;  %v283_v38 = vadd.f32 %v539_v2, %v184_v23  ;;  %v377_v45 = vmax.f32 %v281_v30, 0.0  ;;  %v105_v30 = vld [vmem:[%s1306_s0 + $0x2c8] sm:$0xff] }
  0x3a   :  { %455 = vst [vmem:[%s1309_s3 + $0x188] sm:$0xff] %v359_v35  ;;  %v187_v35 = vmul.f32 %v534_v1, %v88_v24  ;;  %v284_v42 = vadd.f32 %v539_v2, %v185_v27  ;;  %v378_v49 = vmax.f32 %v282_v34, 0.0  ;;  %v106_v34 = vld [vmem:[%s1306_s0 + $0x2d0] sm:$0xff] }
  0x3b   :  { %456 = vst [vmem:[%s1309_s3 + $0x190] sm:$0xff] %v360_v39  ;;  %v188_v39 = vmul.f32 %v534_v1, %v89_v28  ;;  %v285_v46 = vadd.f32 %v539_v2, %v186_v31  ;;  %v379_v53 = vmax.f32 %v283_v38, 0.0  ;;  %v107_v38 = vld [vmem:[%s1306_s0 + $0x2d8] sm:$0xff] }
  0x3c   :  { %457 = vst [vmem:[%s1309_s3 + $0x198] sm:$0xff] %v361_v43  ;;  %v189_v43 = vmul.f32 %v534_v1, %v90_v32  ;;  %v286_v50 = vadd.f32 %v539_v2, %v187_v35  ;;  %v380_v57 = vmax.f32 %v284_v42, 0.0  ;;  %v108_v42 = vld [vmem:[%s1306_s0 + $0x2e0] sm:$0xff] }
  0x3d   :  { %458 = vst [vmem:[%s1309_s3 + $0x1a0] sm:$0xff] %v362_v47  ;;  %v190_v47 = vmul.f32 %v534_v1, %v91_v36  ;;  %v287_v54 = vadd.f32 %v539_v2, %v188_v39  ;;  %v381_v61 = vmax.f32 %v285_v46, 0.0  ;;  %v109_v46 = vld [vmem:[%s1306_s0 + $0x2e8] sm:$0xff] }
  0x3e   :  { %459 = vst [vmem:[%s1309_s3 + $0x1a8] sm:$0xff] %v363_v51  ;;  %v191_v51 = vmul.f32 %v534_v1, %v92_v40  ;;  %v288_v58 = vadd.f32 %v539_v2, %v189_v43  ;;  %v382_v3 = vmax.f32 %v286_v50, 0.0  ;;  %v110_v50 = vld [vmem:[%s1306_s0 + $0x2f0] sm:$0xff] }
  0x3f   :  { %460 = vst [vmem:[%s1309_s3 + $0x1b0] sm:$0xff] %v364_v55  ;;  %v192_v55 = vmul.f32 %v534_v1, %v93_v44  ;;  %v289_v62 = vadd.f32 %v539_v2, %v190_v47  ;;  %v383_v7 = vmax.f32 %v287_v54, 0.0  ;;  %v111_v54 = vld [vmem:[%s1306_s0 + $0x2f8] sm:$0xff] }
  0x40   :  { %461 = vst [vmem:[%s1309_s3 + $0x1b8] sm:$0xff] %v365_v59  ;;  %v193_v59 = vmul.f32 %v534_v1, %v94_v48  ;;  %v290_v4 = vadd.f32 %v539_v2, %v191_v51  ;;  %v384_v11 = vmax.f32 %v288_v58, 0.0 }
  0x41   :  { %462 = vst [vmem:[%s1309_s3 + $0x1c0] sm:$0xff] %v366_v63  ;;  %v194_v63 = vmul.f32 %v534_v1, %v95_v52  ;;  %v291_v8 = vadd.f32 %v539_v2, %v192_v55  ;;  %v385_v15 = vmax.f32 %v289_v62, 0.0 }
  0x42   :  { %463 = vst [vmem:[%s1309_s3 + $0x1c8] sm:$0xff] %v367_v5  ;;  %v195_v5 = vmul.f32 %v534_v1, %v96_v56  ;;  %v292_v12 = vadd.f32 %v539_v2, %v193_v59  ;;  %v386_v19 = vmax.f32 %v290_v4, 0.0 }
  0x43   :  { %464 = vst [vmem:[%s1309_s3 + $0x1d0] sm:$0xff] %v368_v9  ;;  %v196_v9 = vmul.f32 %v534_v1, %v97_v60  ;;  %v293_v16 = vadd.f32 %v539_v2, %v194_v63  ;;  %v387_v23 = vmax.f32 %v291_v8, 0.0  ;;  %v209_v60 = vmul.f32 %v534_v1, %v110_v50 }
  0x44   :  { %465 = vst [vmem:[%s1309_s3 + $0x1d8] sm:$0xff] %v369_v13  ;;  %v197_v13 = vmul.f32 %v534_v1, %v98_v0  ;;  %v294_v20 = vadd.f32 %v539_v2, %v195_v5  ;;  %v388_v27 = vmax.f32 %v292_v12, 0.0  ;;  %v210_v63 = vmul.f32 %v534_v1, %v111_v54 }
  0x45   :  { %466 = vst [vmem:[%s1309_s3 + $0x1e0] sm:$0xff] %v370_v17  ;;  %v198_v17 = vmul.f32 %v534_v1, %v99_v6  ;;  %v295_v24 = vadd.f32 %v539_v2, %v196_v9  ;;  %v389_v31 = vmax.f32 %v293_v16, 0.0 }
  0x46   :  { %467 = vst [vmem:[%s1309_s3 + $0x1e8] sm:$0xff] %v371_v21  ;;  %v199_v21 = vmul.f32 %v534_v1, %v100_v10  ;;  %v296_v28 = vadd.f32 %v539_v2, %v197_v13  ;;  %v390_v35 = vmax.f32 %v294_v20, 0.0  ;;  %v309_v8 = vadd.f32 %v539_v2, %v210_v63 }
  0x47   :  { %468 = vst [vmem:[%s1309_s3 + $0x1f0] sm:$0xff] %v372_v25  ;;  %v200_v25 = vmul.f32 %v534_v1, %v101_v14  ;;  %v297_v32 = vadd.f32 %v539_v2, %v198_v17  ;;  %v391_v39 = vmax.f32 %v295_v24, 0.0 }
  0x48   :  { %469 = vst [vmem:[%s1309_s3 + $0x1f8] sm:$0xff] %v373_v29  ;;  %v201_v29 = vmul.f32 %v534_v1, %v102_v18  ;;  %v298_v36 = vadd.f32 %v539_v2, %v199_v21  ;;  %v392_v43 = vmax.f32 %v296_v28, 0.0 }
  0x49   :  { %470 = vst [vmem:[%s1309_s3 + $0x200] sm:$0xff] %v374_v33  ;;  %v202_v33 = vmul.f32 %v534_v1, %v103_v22  ;;  %v299_v40 = vadd.f32 %v539_v2, %v200_v25  ;;  %v393_v47 = vmax.f32 %v297_v32, 0.0 }
  0x4a   :  { %471 = vst [vmem:[%s1309_s3 + $0x208] sm:$0xff] %v375_v37  ;;  %v203_v37 = vmul.f32 %v534_v1, %v104_v26  ;;  %v300_v44 = vadd.f32 %v539_v2, %v201_v29  ;;  %v394_v51 = vmax.f32 %v298_v36, 0.0 }
  0x4b   :  { %472 = vst [vmem:[%s1309_s3 + $0x210] sm:$0xff] %v376_v41  ;;  %v204_v41 = vmul.f32 %v534_v1, %v105_v30  ;;  %v301_v48 = vadd.f32 %v539_v2, %v202_v33  ;;  %v395_v55 = vmax.f32 %v299_v40, 0.0 }
  0x4c   :  { %473 = vst [vmem:[%s1309_s3 + $0x218] sm:$0xff] %v377_v45  ;;  %v205_v45 = vmul.f32 %v534_v1, %v106_v34  ;;  %v302_v52 = vadd.f32 %v539_v2, %v203_v37  ;;  %v396_v58 = vmax.f32 %v300_v44, 0.0 }
  0x4d   :  { %474 = vst [vmem:[%s1309_s3 + $0x220] sm:$0xff] %v378_v49  ;;  %v206_v49 = vmul.f32 %v534_v1, %v107_v38  ;;  %v303_v56 = vadd.f32 %v539_v2, %v204_v41 }
  0x4e   :  { %475 = vst [vmem:[%s1309_s3 + $0x228] sm:$0xff] %v379_v53  ;;  %v207_v53 = vmul.f32 %v534_v1, %v108_v42  ;;  %v304_v59 = vadd.f32 %v539_v2, %v205_v45  ;;  %v398_v0 = vmax.f32 %v302_v52, 0.0 }
  0x4f   :  { %476 = vst [vmem:[%s1309_s3 + $0x230] sm:$0xff] %v380_v57  ;;  %v208_v57 = vmul.f32 %v534_v1, %v109_v46  ;;  %v305_v62 = vadd.f32 %v539_v2, %v206_v49  ;;  %v399_v4 = vmax.f32 %v303_v56, 0.0  ;;  %v308_v1 = vadd.f32 %v539_v2, %v209_v60 }
  0x50   :  { %477 = vst [vmem:[%s1309_s3 + $0x238] sm:$0xff] %v381_v61  ;;  %v397_v61 = vmax.f32 %v301_v48, 0.0  ;;  %v400_v6 = vmax.f32 %v304_v59, 0.0 }
  0x51   :  { %478 = vst [vmem:[%s1309_s3 + $0x240] sm:$0xff] %v382_v3  ;;  %v306_v3 = vadd.f32 %v539_v2, %v207_v53  ;;  %v307_v5 = vadd.f32 %v539_v2, %v208_v57  ;;  %v405_v2 = vmax.f32 %v309_v8, 0.0 }
  0x52   :  { %479 = vst [vmem:[%s1309_s3 + $0x248] sm:$0xff] %v383_v7  ;;  %v401_v7 = vmax.f32 %v305_v62, 0.0 }
  0x53   :  { %480 = vst [vmem:[%s1309_s3 + $0x250] sm:$0xff] %v384_v11  ;;  %v402_v9 = vmax.f32 %v306_v3, 0.0  ;;  %v403_v10 = vmax.f32 %v307_v5, 0.0  ;;  %v404_v11 = vmax.f32 %v308_v1, 0.0 }
  0x54   :  { %481 = vst [vmem:[%s1309_s3 + $0x258] sm:$0xff] %v385_v15 }
  0x55   :  { %482 = vst [vmem:[%s1309_s3 + $0x260] sm:$0xff] %v386_v19 }
  0x56   :  { %483 = vst [vmem:[%s1309_s3 + $0x268] sm:$0xff] %v387_v23 }
  0x57   :  { %484 = vst [vmem:[%s1309_s3 + $0x270] sm:$0xff] %v388_v27 }
  0x58   :  { %485 = vst [vmem:[%s1309_s3 + $0x278] sm:$0xff] %v389_v31 }
  0x59   :  { %486 = vst [vmem:[%s1309_s3 + $0x280] sm:$0xff] %v390_v35 }
  0x5a   :  { %487 = vst [vmem:[%s1309_s3 + $0x288] sm:$0xff] %v391_v39 }
  0x5b   :  { %488 = vst [vmem:[%s1309_s3 + $0x290] sm:$0xff] %v392_v43 }
  0x5c   :  { %489 = vst [vmem:[%s1309_s3 + $0x298] sm:$0xff] %v393_v47 }
  0x5d   :  { %490 = vst [vmem:[%s1309_s3 + $0x2a0] sm:$0xff] %v394_v51 }
  0x5e   :  { %491 = vst [vmem:[%s1309_s3 + $0x2a8] sm:$0xff] %v395_v55 }
  0x5f   :  { %492 = vst [vmem:[%s1309_s3 + $0x2b0] sm:$0xff] %v396_v58 }
  0x60   :  { %493 = vst [vmem:[%s1309_s3 + $0x2b8] sm:$0xff] %v397_v61 }
  0x61   :  { %494 = vst [vmem:[%s1309_s3 + $0x2c0] sm:$0xff] %v398_v0 }
  0x62   :  { %495 = vst [vmem:[%s1309_s3 + $0x2c8] sm:$0xff] %v399_v4 }
  0x63   :  { %496 = vst [vmem:[%s1309_s3 + $0x2d0] sm:$0xff] %v400_v6 }
  0x64   :  { %497 = vst [vmem:[%s1309_s3 + $0x2d8] sm:$0xff] %v401_v7 }
  0x65   :  { %498 = vst [vmem:[%s1309_s3 + $0x2e0] sm:$0xff] %v402_v9 }
  0x66   :  { %499 = vst [vmem:[%s1309_s3 + $0x2e8] sm:$0xff] %v403_v10 }
  0x67   :  { %500 = vst [vmem:[%s1309_s3 + $0x2f0] sm:$0xff] %v404_v11 }
  0x68   :  { %501 = vst [vmem:[%s1309_s3 + $0x2f8] sm:$0xff] %v405_v2 }

// kernel: up_forward.3
= control target key start
LH: loop header
LB: loop body
LE: loop exit
PB: predicated region body
PF: predicated region fallthrough
CT: control target
= control target key end

     0   :  { %s5879_s18 = smov 0   ;;  %s5881_s19 = smov 0   ;;  %s8139_s0 = inlined_call_operand.vmem [shape: bf16[2,16,24,128], index: 0, kind: input, shape index: {}]   ;;  %s8140_s1 = inlined_call_operand.vmem [shape: bf16[2,1,24,128], index: 1, kind: input, shape index: {}, may-alias: {1,2}]   ;;  %s8141_s2 = inlined_call_operand.vmem [shape: bf16[2,1,24,128], index: 2, kind: input, shape index: {}, may-alias: {1,2}]   ;;  %s8142_s3 = inlined_call_operand.vmem [shape: bf16[3,128,384], index: 3, kind: input, shape index: {}]   ;;  %s8143_s4 = inlined_call_operand.vmem [shape: bf16[2,16,24,128], index: 4, kind: output, shape index: {0}]   ;;  %s8144_s5 = inlined_call_operand.vmem [shape: f32[2,1,2,128], index: 5, kind: output, shape index: {1}]  }
   0x1   :  { %s5883_s20 = smov 0  }
   0x2 LB: > { %s28_s21 = sadd.s32 1, %s5842_s19  ;;  %p4765_p0 = scmp.ge.s32.totalorder %s5846_s20, 1  ;;  %s5846_s20 = sphi %s5883_s20, %s16_s20   ;;  %s5842_s19 = sphi %s5881_s19, %s8438_s19   ;;  %s5838_s18 = sphi %s5879_s18, %s8437_s18  }
   0x3   : > { %p30_p1 = scmp.ge.s32.totalorder %s28_s21, 2  ;;  %p246_p2 = scmp.lt.s32.totalorder %s5846_s20, 3 }
   0x5   : > { %s8440_s21 = smov (%p30_p1, %s28_s21), 0  ;;  %p247_p3 = pnand %p4765_p0, %p246_p2 }
   0x7   : > { %250 = sbr.rel (%p247_p3) target bundleno = 1116 (0x45c), region = 36 }
   0xc   : > { %v4987_v0 = vld [vmem:[%s8142_s3 + $0x168] sm:$0xf]  ;;  %v5503_v1 = vld [vmem:[%s8142_s3 + $0x170] sm:$0xf0]  ;;  %v4975_v2 = vld [vmem:[%s8142_s3 + $0x150] sm:$0xf] }
   0xd   : > { %v4988_v3 = vor.u32 %v5503_v1, %v4987_v0  ;;  %v5500_v4 = vld [vmem:[%s8142_s3 + $0x158] sm:$0xf0]  ;;  %v4963_v6 = vld [vmem:[%s8142_s3 + $0x138] sm:$0xf]  ;;  %v5497_v7 = vld [vmem:[%s8142_s3 + $0x140] sm:$0xf0] }
   0xe   : > { %v4976_v5 = vor.u32 %v5500_v4, %v4975_v2  ;;  %v4964_v8 = vor.u32 %v5497_v7, %v4963_v6  ;;  %v4951_v9 = vld [vmem:[%s8142_s3 + $0x120] sm:$0xf]  ;;  %v5494_v10 = vld [vmem:[%s8142_s3 + $0x128] sm:$0xf0]  ;;  %v4939_v12 = vld [vmem:[%s8142_s3 + $0x108] sm:$0xf] }
   0xf   : > { %734 = vmatpush.bf16.msra.mxu0 %v4988_v3  ;;  %5744 = vmatpush.bf16.msra.mxu1 %v4988_v3  ;;  %v4952_v11 = vor.u32 %v5494_v10, %v4951_v9  ;;  %v5491_v13 = vld [vmem:[%s8142_s3 + $0x110] sm:$0xf0]  ;;  %p310_p4 = scmp.lt.s32.totalorder %s5838_s18, 1  ;;  %v4927_v15 = vld [vmem:[%s8142_s3 + $0xf0] sm:$0xf]  ;;  %vm3848_vm0 = vcmask 1040384  }
  0x10   : > { %5745 = vmatpush.bf16.msra.mxu2 %v4988_v3  ;;  %5746 = vmatpush.bf16.msra.mxu3 %v4988_v3  ;;  %v4940_v14 = vor.u32 %v5491_v13, %v4939_v12  ;;  %v5488_v16 = vld [vmem:[%s8142_s3 + $0xf8] sm:$0xf0]  ;;  %v4915_v18 = vld [vmem:[%s8142_s3 + $0xd8] sm:$0xf]  ;;  %v5485_v19 = vld [vmem:[%s8142_s3 + $0xe0] sm:$0xf0] }
  0x11   : > { %s8442_s18 = smov (!%p310_p4, %s5838_s18), 1  ;;  %v4928_v17 = vor.u32 %v5488_v16, %v4927_v15  ;;  %v4916_v20 = vor.u32 %v5485_v19, %v4915_v18  ;;  %v4903_v21 = vld [vmem:[%s8142_s3 + $0xc0] sm:$0xf]  ;;  %v5482_v22 = vld [vmem:[%s8142_s3 + $0xc8] sm:$0xf0]  ;;  %vm4089_vm1 = vcmask 1046528  }
  0x12   : > { %s5768_s29 = smul.u32 192, %s8442_s18  ;;  %v4995_v23 = vld [vmem:[%s8142_s3 + $0x170] sm:$0xf]  ;;  %v5504_v24 = vld [vmem:[%s8142_s3 + $0x178] sm:$0xf0]  ;;  %v4904_v27 = vor.u32 %v5482_v22, %v4903_v21 }
  0x13   : > { %735 = vmatpush.bf16.msra.mxu0 %v4976_v5  ;;  %5747 = vmatpush.bf16.msra.mxu1 %v4976_v5  ;;  %v5526_v25 = vld [vmem:[%s8142_s3 + $0xac] sm:$0xf]  ;;  %v5085_v26 = vld [vmem:[%s8142_s3 + $0xb4] sm:$0xf0]  ;;  %v5501_v29 = vld [vmem:[%s8142_s3 + $0x160] sm:$0xf0]  ;;  %v4996_v33 = vor.u32 %v5504_v24, %v4995_v23 }
  0x14   : > { %5748 = vmatpush.bf16.msra.mxu2 %v4976_v5  ;;  %5749 = vmatpush.bf16.msra.mxu3 %v4976_v5  ;;  %s5960_s13 = scalar_lea.vmem %s8139_s0, %s5768_s29  ;;  %v4983_v28 = vld [vmem:[%s8142_s3 + $0x158] sm:$0xf]  ;;  %v5083_v30 = vld [vmem:[%s8142_s3 + $0xa8] sm:$0xf]  ;;  %v5527_v31 = vld [vmem:[%s8142_s3 + $0xb0] sm:$0xf0]  ;;  %v5088_v34 = vor.u32 %v5526_v25, %v5085_v26 }
  0x15   : > { %v5984_v32 = vld [vmem:[%s5960_s13] sm:$0xff]  ;;  %v5502_v35 = vld [vmem:[%s8142_s3 + $0x16c] sm:$0xf]  ;;  %v4989_v36 = vld [vmem:[%s8142_s3 + $0x174] sm:$0xf0]  ;;  %v5084_v42 = vor.u32 %v5527_v31, %v5083_v30  ;;  %v4984_v45 = vor.u32 %v5501_v29, %v4983_v28  ;;  %s5769_s7 = smul.u32 12, %s8442_s18 }
  0x16   : > { %v5993_v37 = vld [vmem:[%s5960_s13 + $0x48] sm:$0xff]  ;;  %v5523_v38 = vld [vmem:[%s8142_s3 + $0x94] sm:$0xf]  ;;  %v5073_v39 = vld [vmem:[%s8142_s3 + $0x9c] sm:$0xf0]  ;;  %v4992_v43 = vor.u32 %v5502_v35, %v4989_v36 }
  0x17   : > { %736 = vmatpush.bf16.msra.mxu0 %v4964_v8  ;;  %5750 = vmatpush.bf16.msra.mxu1 %v4964_v8  ;;  %v6002_v40 = vld [vmem:[%s5960_s13 + $0x70] sm:$0xff]  ;;  %v6005_v41 = vld [vmem:[%s5960_s13 + $0x98] sm:$0xff]  ;;  %v5076_v47 = vor.u32 %v5523_v38, %v5073_v39  ;;  %v4977_v49 = vld [vmem:[%s8142_s3 + $0x15c] sm:$0xf0]  ;;  %s6935_s8 = scalar_lea.vmem %s8140_s1, %s5769_s7  ;;  %s7759_s16 = scalar_lea.vmem %s8141_s2, %s5769_s7 }
  0x18   : > { %5751 = vmatpush.bf16.msra.mxu2 %v4964_v8  ;;  %5752 = vmatpush.bf16.msra.mxu3 %v4964_v8  ;;  %v5071_v44 = vld [vmem:[%s8142_s3 + $0x90] sm:$0xf]  ;;  %v5524_v46 = vld [vmem:[%s8142_s3 + $0x98] sm:$0xf0]  ;;  %v5499_v48 = vld [vmem:[%s8142_s3 + $0x154] sm:$0xf] }
  0x19   : > { %v4971_v50 = vld [vmem:[%s8142_s3 + $0x140] sm:$0xf]  ;;  %v5498_v51 = vld [vmem:[%s8142_s3 + $0x148] sm:$0xf0]  ;;  %v5072_v52 = vor.u32 %v5524_v46, %v5071_v44  ;;  %v4980_v53 = vor.u32 %v5499_v48, %v4977_v49  ;;  %v5059_v54 = vld [vmem:[%s8142_s3 + $0x78] sm:$0xf] }
  0x1a   : > { %v5521_v55 = vld [vmem:[%s8142_s3 + $0x80] sm:$0xf0]  ;;  %v5496_v56 = vld [vmem:[%s8142_s3 + $0x13c] sm:$0xf]  ;;  %v4972_v57 = vor.u32 %v5498_v51, %v4971_v50  ;;  %v4965_v58 = vld [vmem:[%s8142_s3 + $0x144] sm:$0xf0] }
  0x1b   : > { %737 = vmatpush.bf16.msra.mxu0 %v4952_v11  ;;  %5753 = vmatpush.bf16.msra.mxu1 %v4952_v11  ;;  %v5520_v59 = vld [vmem:[%s8142_s3 + $0x7c] sm:$0xf]  ;;  %v5061_v60 = vld [vmem:[%s8142_s3 + $0x84] sm:$0xf0]  ;;  %v5495_v62 = vld [vmem:[%s8142_s3 + $0x130] sm:$0xf0]  ;;  %v5060_v0 = vor.u32 %v5521_v55, %v5059_v54  ;;  %v4968_v1 = vor.u32 %v5496_v56, %v4965_v58 }
  0x1c   : > { %5754 = vmatpush.bf16.msra.mxu2 %v4952_v11  ;;  %5755 = vmatpush.bf16.msra.mxu3 %v4952_v11  ;;  %v4959_v61 = vld [vmem:[%s8142_s3 + $0x128] sm:$0xf]  ;;  %v5064_v63 = vor.u32 %v5520_v59, %v5061_v60  ;;  %v5047_v3 = vld [vmem:[%s8142_s3 + $0x60] sm:$0xf]  ;;  %v5518_v4 = vld [vmem:[%s8142_s3 + $0x68] sm:$0xf0] }
  0x1d   : > { %v4960_v2 = vor.u32 %v5495_v62, %v4959_v61  ;;  %v4947_v5 = vld [vmem:[%s8142_s3 + $0x110] sm:$0xf]  ;;  %v5492_v6 = vld [vmem:[%s8142_s3 + $0x118] sm:$0xf0]  ;;  %v5048_v7 = vor.u32 %v5518_v4, %v5047_v3  ;;  %v6066_v9 = vld [vmem:[%s5960_s13 + $0x8] sm:$0xff] }
  0x1e   : > { %v4948_v8 = vor.u32 %v5492_v6, %v4947_v5  ;;  %v6069_v10 = vld [vmem:[%s5960_s13 + $0x50] sm:$0xff]  ;;  %v6072_v11 = vld [vmem:[%s5960_s13 + $0x78] sm:$0xff]  ;;  %v6075_v12 = vld [vmem:[%s5960_s13 + $0xa0] sm:$0xff] }
  0x1f   : > { %738 = vmatpush.bf16.msra.mxu0 %v4940_v14  ;;  %5756 = vmatpush.bf16.msra.mxu1 %v4940_v14  ;;  %v5493_v13 = vld [vmem:[%s8142_s3 + $0x124] sm:$0xf]  ;;  %v4935_v15 = vld [vmem:[%s8142_s3 + $0xf8] sm:$0xf]  ;;  %v5035_v18 = vld [vmem:[%s8142_s3 + $0x48] sm:$0xf] }
  0x20   : > { %5757 = vmatpush.bf16.msra.mxu2 %v4940_v14  ;;  %5758 = vmatpush.bf16.msra.mxu3 %v4940_v14  ;;  %v4953_v14 = vld [vmem:[%s8142_s3 + $0x12c] sm:$0xf0]  ;;  %v5515_v19 = vld [vmem:[%s8142_s3 + $0x50] sm:$0xf0]  ;;  %v5517_v22 = vld [vmem:[%s8142_s3 + $0x64] sm:$0xf] }
  0x21   : > { %v4956_v16 = vor.u32 %v5493_v13, %v4953_v14  ;;  %v5036_v21 = vor.u32 %v5515_v19, %v5035_v18  ;;  %v5049_v23 = vld [vmem:[%s8142_s3 + $0x6c] sm:$0xf0]  ;;  %v5490_v24 = vld [vmem:[%s8142_s3 + $0x10c] sm:$0xf]  ;;  %v4941_v26 = vld [vmem:[%s8142_s3 + $0x114] sm:$0xf0] }
  0x22   : > { %v5052_v25 = vor.u32 %v5517_v22, %v5049_v23  ;;  %v5486_v28 = vld [vmem:[%s8142_s3 + $0xe8] sm:$0xf0]  ;;  %v4944_v29 = vor.u32 %v5490_v24, %v4941_v26  ;;  %v5023_v31 = vld [vmem:[%s8142_s3 + $0x30] sm:$0xf]  ;;  %v6127_v36 = vld [vmem:[%s5960_s13 + $0x58] sm:$0xff] }
  0x23   : > { %739 = vmatpush.bf16.msra.mxu0 %v4928_v17  ;;  %5759 = vmatpush.bf16.msra.mxu1 %v4928_v17  ;;  %v6124_v35 = vld [vmem:[%s5960_s13 + $0x10] sm:$0xff]  ;;  %v6130_v38 = vld [vmem:[%s5960_s13 + $0x80] sm:$0xff]  ;;  %v6133_v39 = vld [vmem:[%s5960_s13 + $0xa8] sm:$0xff] }
  0x24   : > { %5760 = vmatpush.bf16.msra.mxu2 %v4928_v17  ;;  %5761 = vmatpush.bf16.msra.mxu3 %v4928_v17  ;;  %v5489_v17 = vld [vmem:[%s8142_s3 + $0x100] sm:$0xf0]  ;;  %v4911_v44 = vld [vmem:[%s8142_s3 + $0xc8] sm:$0xf]  ;;  %v5483_v46 = vld [vmem:[%s8142_s3 + $0xd0] sm:$0xf0] }
  0x25   : > { %v4917_v48 = vld [vmem:[%s8142_s3 + $0xe4] sm:$0xf0]  ;;  %v4912_v49 = vor.u32 %v5483_v46, %v4911_v44  ;;  %v5011_v50 = vld [vmem:[%s8142_s3 + $0x18] sm:$0xf]  ;;  %v5509_v51 = vld [vmem:[%s8142_s3 + $0x20] sm:$0xf0] }
  0x26   : > { %v5481_v54 = vld [vmem:[%s8142_s3 + $0xc4] sm:$0xf]  ;;  %v4999_v55 = vld [vmem:[%s8142_s3] sm:$0xf]  ;;  %v5506_v56 = vld [vmem:[%s8142_s3 + $0x8] sm:$0xf0] }
  0x27   : > { %740 = vmatpush.bf16.msra.mxu0 %v4916_v20  ;;  %5762 = vmatpush.bf16.msra.mxu1 %v4916_v20  ;;  %v5514_v58 = vld [vmem:[%s8142_s3 + $0x4c] sm:$0xf]  ;;  %v5037_v59 = vld [vmem:[%s8142_s3 + $0x54] sm:$0xf0]  ;;  %v5000_v60 = vor.u32 %v5506_v56, %v4999_v55  ;;  %v5183_v3 = vld [vmem:[%s8142_s3 + $0xa8] sm:$0xf] }
  0x28   : > { %5763 = vmatpush.bf16.msra.mxu2 %v4916_v20  ;;  %5764 = vmatpush.bf16.msra.mxu3 %v4916_v20  ;;  %v4936_v20 = vor.u32 %v5489_v17, %v4935_v15  ;;  %v5040_v61 = vor.u32 %v5514_v58, %v5037_v59  ;;  %v5551_v4 = vld [vmem:[%s8142_s3 + $0xb0] sm:$0xf0]  ;;  %v5550_v5 = vld [vmem:[%s8142_s3 + $0xac] sm:$0xf]  ;;  %v5025_v13 = vld [vmem:[%s8142_s3 + $0x3c] sm:$0xf0] }
  0x29   : > { %v5184_v6 = vor.u32 %v5551_v4, %v5183_v3  ;;  %v6219_v17 = vld [vmem:[%s5960_s13 + $0x68] sm:$0xff]  ;;  %v6222_v18 = vld [vmem:[%s5960_s13 + $0x90] sm:$0xff]  ;;  %v6225_v19 = vld [vmem:[%s5960_s13 + $0xb8] sm:$0xff] }
  0x2a   : > { %v6238_v23 = vld [vmem:[%s5960_s13 + $0x28] sm:$0xff]  ;;  %v5508_v24 = vld [vmem:[%s8142_s3 + $0x1c] sm:$0xf]  ;;  %v5173_v44 = vld [vmem:[%s8142_s3 + $0x9c] sm:$0xf0] }
  0x2b   : > { %741 = vmatpush.bf16.msra.mxu0 %v4904_v27  ;;  %5765 = vmatpush.bf16.msra.mxu1 %v4904_v27  ;;  %v5079_v46 = vld [vmem:[%s8142_s3 + $0x98] sm:$0xf]  ;;  %v5545_v4 = vld [vmem:[%s8142_s3 + $0x80] sm:$0xf0] }
  0x2c   : > { %5766 = vmatpush.bf16.msra.mxu2 %v4904_v27  ;;  %5767 = vmatpush.bf16.msra.mxu3 %v4904_v27  ;;  %v4923_v27 = vld [vmem:[%s8142_s3 + $0xe0] sm:$0xf]  ;;  %v5159_v3 = vld [vmem:[%s8142_s3 + $0x78] sm:$0xf] }
  0x2d   : > { %v4924_v30 = vor.u32 %v5486_v28, %v4923_v27  ;;  %v6251_v27 = vld [vmem:[%s5960_s13 + $0x30] sm:$0xff] }
  0x2e   : > { %742 = vmatmul.bf16.vlgmr.msra.gmra.mxu0 %v5984_v32  ;;  %787 = vmatmul.bf16.vlgmr.msra.gmra.mxu1 %v5993_v37  ;;  %v5171_v28 = vld [vmem:[%s8142_s3 + $0x90] sm:$0xf] }
  0x2f   : > { %1551 = vmatpush.bf16.msrb.mxu0 %v5088_v34  ;;  %812 = vmatmul.bf16.vlgmr.msra.gmra.mxu2 %v6002_v40 }
  0x30   : > { %992 = vmatpush.bf16.msrb.mxu2 %v4996_v33  ;;  %837 = vmatmul.bf16.vlgmr.msra.gmra.mxu3 %v6005_v41  ;;  %v5512_v33 = vld [vmem:[%s8142_s3 + $0x38] sm:$0xf0] }
  0x31   : > { %1425 = vmatpush.bf16.msrb.mxu3 %v5084_v42  ;;  %863 = vmatpush.bf16.msrb.mxu1 %v4992_v43  ;;  %v5024_v34 = vor.u32 %v5512_v33, %v5023_v31  ;;  %v5487_v42 = vld [vmem:[%s8142_s3 + $0xf4] sm:$0xf]  ;;  %v4929_v43 = vld [vmem:[%s8142_s3 + $0xfc] sm:$0xf0]  ;;  %v5505_v31 = vld [vmem:[%s8142_s3 + $0x4] sm:$0xf] }
  0x32   : > { %v5001_v33 = vld [vmem:[%s8142_s3 + $0xc] sm:$0xf0] }
  0x33   : > { %1552 = vmatpush.bf16.msrb.mxu0 %v5076_v47  ;;  %v5484_v47 = vld [vmem:[%s8142_s3 + $0xdc] sm:$0xf] }
  0x34   : > { %993 = vmatpush.bf16.msrb.mxu2 %v4984_v45  ;;  %v4932_v45 = vor.u32 %v5487_v42, %v4929_v43  ;;  %v6270_v42 = vld [vmem:[%s5960_s13 + $0x38] sm:$0xff]  ;;  %v5547_v43 = vld [vmem:[%s8142_s3 + $0x94] sm:$0xf] }
  0x35   : > { %1426 = vmatpush.bf16.msrb.mxu3 %v5072_v52  ;;  %864 = vmatpush.bf16.msrb.mxu1 %v4980_v53  ;;  %v4920_v52 = vor.u32 %v5484_v47, %v4917_v48  ;;  %v5012_v53 = vor.u32 %v5509_v51, %v5011_v50  ;;  %v5525_v47 = vld [vmem:[%s8142_s3 + $0xa0] sm:$0xf0]  ;;  %v5576_v50 = vld [vmem:[%s8142_s3 + $0x238] sm:$0xf0] }
  0x36   : > { %v5080_v48 = vor.u32 %v5525_v47, %v5079_v46 }
  0x37   : > { %1553 = vmatpush.bf16.msrb.mxu0 %v5064_v63  ;;  %v6182_v63 = vld [vmem:[%s5960_s13 + $0x18] sm:$0xff] }
  0x38   : > { %994 = vmatpush.bf16.msrb.mxu2 %v4972_v57  ;;  %v4905_v57 = vld [vmem:[%s8142_s3 + $0xcc] sm:$0xf0] }
  0x39   : > { %1427 = vmatpush.bf16.msrb.mxu3 %v5060_v0  ;;  %865 = vmatpush.bf16.msrb.mxu1 %v4968_v1  ;;  %v4908_v62 = vor.u32 %v5481_v54, %v4905_v57  ;;  %v6185_v0 = vld [vmem:[%s5960_s13 + $0x60] sm:$0xff]  ;;  %v6188_v1 = vld [vmem:[%s5960_s13 + $0x88] sm:$0xff] }
  0x3b   : > { %1554 = vmatpush.bf16.msrb.mxu0 %v5052_v25  ;;  %v5013_v25 = vld [vmem:[%s8142_s3 + $0x24] sm:$0xf0] }
  0x3c   : > { %995 = vmatpush.bf16.msrb.mxu2 %v4960_v2  ;;  %v6191_v2 = vld [vmem:[%s5960_s13 + $0xb0] sm:$0xff]  ;;  %v5016_v26 = vor.u32 %v5508_v24, %v5013_v25 }
  0x3d   : > { %1428 = vmatpush.bf16.msrb.mxu3 %v5048_v7  ;;  %866 = vmatpush.bf16.msrb.mxu1 %v4956_v16  ;;  %v5185_v7 = vld [vmem:[%s8142_s3 + $0xb4] sm:$0xf0]  ;;  %v6216_v16 = vld [vmem:[%s5960_s13 + $0x20] sm:$0xff] }
  0x3e   : > { %747 = vmatmul.bf16.gmra.mxu0 %v6066_v9  ;;  %792 = vmatmul.bf16.gmra.mxu1 %v6069_v10  ;;  %v5188_v14 = vor.u32 %v5550_v5, %v5185_v7  ;;  %v5160_v5 = vor.u32 %v5545_v4, %v5159_v3 }
  0x3f   : > { %817 = vmatmul.bf16.gmra.mxu2 %v6072_v11  ;;  %1555 = vmatpush.bf16.msrb.mxu0 %v5040_v61 }
  0x40   : > { %996 = vmatpush.bf16.msrb.mxu2 %v4948_v8  ;;  %842 = vmatmul.bf16.gmra.mxu3 %v6075_v12  ;;  %v5511_v8 = vld [vmem:[%s8142_s3 + $0x34] sm:$0xf] }
  0x41   : > { %1429 = vmatpush.bf16.msrb.mxu3 %v5036_v21  ;;  %867 = vmatpush.bf16.msrb.mxu1 %v4944_v29  ;;  %v5028_v15 = vor.u32 %v5511_v8, %v5025_v13  ;;  %v5528_v21 = vld [vmem:[%s8142_s3 + $0xb8] sm:$0xf0] }
  0x42   : > { %v5548_v29 = vld [vmem:[%s8142_s3 + $0x98] sm:$0xf0] }
  0x43   : > { %1556 = vmatpush.bf16.msrb.mxu0 %v5028_v15 }
  0x44   : > { %997 = vmatpush.bf16.msrb.mxu2 %v4936_v20  ;;  %v5091_v20 = vld [vmem:[%s8142_s3 + $0xb0] sm:$0xf] }
  0x45   : > { %1430 = vmatpush.bf16.msrb.mxu3 %v5024_v34  ;;  %868 = vmatpush.bf16.msrb.mxu1 %v4932_v45  ;;  %v5092_v22 = vor.u32 %v5528_v21, %v5091_v20  ;;  %v5004_v34 = vor.u32 %v5505_v31, %v5001_v33  ;;  %v5176_v45 = vor.u32 %v5547_v43, %v5173_v44  ;;  %v5544_v21 = vld [vmem:[%s8142_s3 + $0x7c] sm:$0xf]  ;;  %v5307_v33 = vld [vmem:[%s8142_s3 + $0x218] sm:$0xf] }
  0x47   : > { %1557 = vmatpush.bf16.msrb.mxu0 %v5016_v26 }
  0x48   : > { %998 = vmatpush.bf16.msrb.mxu2 %v4924_v30  ;;  %v5172_v30 = vor.u32 %v5548_v29, %v5171_v28  ;;  %v5067_v28 = vld [vmem:[%s8142_s3 + $0x80] sm:$0xf]  ;;  %v5522_v29 = vld [vmem:[%s8142_s3 + $0x88] sm:$0xf0] }
  0x49   : > { %1431 = vmatpush.bf16.msrb.mxu3 %v5012_v53  ;;  %869 = vmatpush.bf16.msrb.mxu1 %v4920_v52  ;;  %v6295_v52 = vld [vmem:[%s5960_s13 + $0x40] sm:$0xff]  ;;  %v5068_v31 = vor.u32 %v5522_v29, %v5067_v28 }
  0x4b   : > { %1558 = vmatpush.bf16.msrb.mxu0 %v5004_v34  ;;  %v5573_v34 = vld [vmem:[%s8142_s3 + $0x220] sm:$0xf0] }
  0x4c   : > { %999 = vmatpush.bf16.msrb.mxu2 %v4912_v49  ;;  %v5319_v49 = vld [vmem:[%s8142_s3 + $0x230] sm:$0xf]  ;;  %v5308_v43 = vor.u32 %v5573_v34, %v5307_v33 }
  0x4d   : > { %1432 = vmatpush.bf16.msrb.mxu3 %v5000_v60  ;;  %870 = vmatpush.bf16.msrb.mxu1 %v4908_v62  ;;  %v5320_v51 = vor.u32 %v5576_v50, %v5319_v49 }
  0x4e   : > { %752 = vmatmul.bf16.gmra.mxu0 %v6124_v35  ;;  %797 = vmatmul.bf16.gmra.mxu1 %v6127_v36 }
  0x4f   : > { %822 = vmatmul.bf16.gmra.mxu2 %v6130_v38  ;;  %2873 = vmatpush.bf16.msra.mxu0 %v5320_v51 }
  0x50   : > { %847 = vmatmul.bf16.gmra.mxu3 %v6133_v39  ;;  %2388 = vmatpush.bf16.msra.mxu2 %v5184_v6 }
  0x51   : > { %2406 = vmatpush.bf16.msra.mxu3 %v5188_v14  ;;  %1677 = vmatpush.bf16.msra.mxu1 %v5092_v22  ;;  %v5161_v22 = vld [vmem:[%s8142_s3 + $0x84] sm:$0xf0] }
  0x52   : > { %v5164_v24 = vor.u32 %v5544_v21, %v5161_v22  ;;  %v5542_v22 = vld [vmem:[%s8142_s3 + $0x68] sm:$0xf0] }
  0x53   : > { %2874 = vmatpush.bf16.msra.mxu0 %v5308_v43 }
  0x54   : > { %2389 = vmatpush.bf16.msra.mxu2 %v5172_v30 }
  0x55   : > { %2407 = vmatpush.bf16.msra.mxu3 %v5176_v45  ;;  %1678 = vmatpush.bf16.msra.mxu1 %v5080_v48 }
  0x58   : > { %2390 = vmatpush.bf16.msra.mxu2 %v5160_v5 }
  0x59   : > { %2408 = vmatpush.bf16.msra.mxu3 %v5164_v24  ;;  %1679 = vmatpush.bf16.msra.mxu1 %v5068_v31 }
  0x5e   : > { %757 = vmatmul.bf16.gmra.mxu0 %v6182_v63  ;;  %802 = vmatmul.bf16.gmra.mxu1 %v6185_v0 }
  0x5f   : > { %827 = vmatmul.bf16.gmra.mxu2 %v6188_v1 }
  0x60   : > { %852 = vmatmul.bf16.gmra.mxu3 %v6191_v2 }
  0x6e   : > { %762 = vmatmul.bf16.gmra.mxu0 %v6216_v16  ;;  %807 = vmatmul.bf16.gmra.mxu1 %v6219_v17 }
  0x6f   : > { %832 = vmatmul.bf16.gmra.mxu2 %v6222_v18 }
  0x70   : > { %857 = vmatmul.bf16.gmra.mxu3 %v6225_v19 }
  0x7e   : > { %767 = vmatmul.bf16.gmra.mxu0 %v6238_v23  ;;  %871 = vmatmul.bf16.vlgmr.msrb.gmra.mxu1 %v5984_v32 }
  0x7f   : > { %1000 = vmatmul.bf16.vlgmr.msrb.gmra.mxu2 %v5984_v32 }
  0x80   : > { %1433 = vmatmul.bf16.vlgmr.msrb.gmra.mxu3 %v5984_v32 }
  0x8e   : > { %772 = vmatmul.bf16.gmra.mxu0 %v6251_v27  ;;  %876 = vmatmul.bf16.gmra.mxu1 %v6066_v9 }
  0x8f   : > { %1005 = vmatmul.bf16.gmra.mxu2 %v6066_v9 }
  0x90   : > { %1438 = vmatmul.bf16.gmra.mxu3 %v6066_v9 }
  0x9e   : > { %777 = vmatmul.bf16.gmra.mxu0 %v6270_v42  ;;  %881 = vmatmul.bf16.gmra.mxu1 %v6124_v35 }
  0x9f   : > { %1010 = vmatmul.bf16.gmra.mxu2 %v6124_v35 }
  0xa0   : > { %1443 = vmatmul.bf16.gmra.mxu3 %v6124_v35 }
  0xab   : > { %v6297_v53 = vpop.f32.mrf.mxu0  ;;  %v6299_v54 = vpop.f32.mrf.mxu1 }
  0xac   : > { %8145 = vst [vmem:[#allocation3_spill] sm:$0xff] %v6299_v54 }
  0xae   : > { %782 = vmatmul.bf16.gmra.mxu0 %v6295_v52  ;;  %886 = vmatmul.bf16.gmra.mxu1 %v6182_v63 }
  0xaf   : > { %1015 = vmatmul.bf16.gmra.mxu2 %v6182_v63 }
  0xb0   : > { %1448 = vmatmul.bf16.gmra.mxu3 %v6182_v63 }
  0xb2   : > { %v6305_v55 = vpop.f32.mrf.mxu2 }
  0xb3   : > { %8146 = vst [vmem:[#allocation4_spill] sm:$0xff] %v6305_v55  ;;  %v6307_v56 = vpop.f32.mrf.mxu3  ;;  %v6309_v57 = vpop.f32.mrf.mxu0 }
  0xb4   : > { %8147 = vst [vmem:[#allocation5_spill] sm:$0xff] %v6307_v56  ;;  %v6311_v58 = vpop.f32.mrf.mxu1 }
  0xb5   : > { %8148 = vst [vmem:[#allocation6_spill] sm:$0xff] %v6311_v58 }
  0xba   : > { %v6313_v59 = vpop.f32.mrf.mxu2 }
  0xbb   : > { %8149 = vst [vmem:[#allocation7_spill] sm:$0xff] %v6313_v59  ;;  %v6315_v60 = vpop.f32.mrf.mxu3  ;;  %v6317_v61 = vpop.f32.mrf.mxu0 }
  0xbc   : > { %8150 = vst [vmem:[#allocation8_spill] sm:$0xff] %v6315_v60  ;;  %v6319_v62 = vpop.f32.mrf.mxu1 }
  0xbd   : > { %8151 = vst [vmem:[#allocation9_spill] sm:$0xff] %v6319_v62 }
  0xbe   : > { %891 = vmatmul.bf16.gmra.mxu1 %v6216_v16  ;;  %1559 = vmatmul.bf16.vlgmr.msrb.gmra.mxu0 %v5984_v32 }
  0xbf   : > { %1020 = vmatmul.bf16.gmra.mxu2 %v6216_v16 }
  0xc0   : > { %1453 = vmatmul.bf16.gmra.mxu3 %v6216_v16 }
  0xc2   : > { %v6331_v6 = vpop.f32.mrf.mxu2 }
  0xc3   : > { %8152 = vst [vmem:[#allocation10_spill] sm:$0xff] %v6331_v6  ;;  %v6333_v7 = vpop.f32.mrf.mxu3  ;;  %v6335_v8 = vpop.f32.mrf.mxu0 }
  0xc4   : > { %8153 = vst [vmem:[#allocation11_spill] sm:$0xff] %v6333_v7  ;;  %v6337_v32 = vpop.f32.mrf.mxu1 }
  0xc5   : > { %8154 = vst [vmem:[#allocation12_spill] sm:$0xff] %v6337_v32 }
  0xca   : > { %v6339_v13 = vpop.f32.mrf.mxu2 }
  0xcb   : > { %8155 = vst [vmem:[#allocation13_spill] sm:$0xff] %v6339_v13  ;;  %v6341_v14 = vpop.f32.mrf.mxu3  ;;  %v6343_v15 = vpop.f32.mrf.mxu0 }
  0xcc   : > { %8156 = vst [vmem:[#allocation14_spill] sm:$0xff] %v6341_v14  ;;  %v6345_v20 = vpop.f32.mrf.mxu1 }
  0xcd   : > { %8157 = vst [vmem:[#allocation15_spill] sm:$0xff] %v6345_v20 }
  0xce   : > { %896 = vmatmul.bf16.gmra.mxu1 %v6238_v23  ;;  %1564 = vmatmul.bf16.gmra.mxu0 %v6066_v9 }
  0xcf   : > { %1025 = vmatmul.bf16.gmra.mxu2 %v6238_v23 }
  0xd0   : > { %1458 = vmatmul.bf16.gmra.mxu3 %v6238_v23 }
  0xd2   : > { %v6357_v25 = vpop.f32.mrf.mxu2 }
  0xd3   : > { %8158 = vst [vmem:[#allocation16_spill] sm:$0xff] %v6357_v25  ;;  %v6359_v26 = vpop.f32.mrf.mxu3  ;;  %v6367_v30 = vpop.f32.mrf.mxu0 }
  0xd4   : > { %8159 = vst [vmem:[#allocation17_spill] sm:$0xff] %v6359_v26  ;;  %v6369_v9 = vpop.f32.mrf.mxu1 }
  0xd5   : > { %8160 = vst [vmem:[#allocation18_spill] sm:$0xff] %v6369_v9 }
  0xda   : > { %v6377_v44 = vpop.f32.mrf.mxu2 }
  0xdb   : > { %8161 = vst [vmem:[#allocation19_spill] sm:$0xff] %v6377_v44  ;;  %v6379_v45 = vpop.f32.mrf.mxu3  ;;  %v6381_v46 = vpop.f32.mrf.mxu0 }
  0xdc   : > { %8162 = vst [vmem:[#allocation20_spill] sm:$0xff] %v6379_v45  ;;  %v6383_v47 = vpop.f32.mrf.mxu1 }
  0xdd   : > { %8163 = vst [vmem:[#allocation21_spill] sm:$0xff] %v6383_v47 }
  0xde   : > { %901 = vmatmul.bf16.gmra.mxu1 %v6251_v27  ;;  %1569 = vmatmul.bf16.gmra.mxu0 %v6124_v35  ;;  %v5147_v35 = vld [vmem:[%s8142_s3 + $0x60] sm:$0xf] }
  0xdf   : > { %1030 = vmatmul.bf16.gmra.mxu2 %v6251_v27  ;;  %v5148_v24 = vor.u32 %v5542_v22, %v5147_v35  ;;  %v5541_v35 = vld [vmem:[%s8142_s3 + $0x64] sm:$0xf]  ;;  %v5149_v22 = vld [vmem:[%s8142_s3 + $0x6c] sm:$0xf0] }
  0xe0   : > { %1463 = vmatmul.bf16.gmra.mxu3 %v6251_v27 }
  0xe1   : > { %2391 = vmatpush.bf16.msra.mxu2 %v5148_v24  ;;  %v5152_v24 = vor.u32 %v5541_v35, %v5149_v22  ;;  %v5055_v35 = vld [vmem:[%s8142_s3 + $0x68] sm:$0xf]  ;;  %v5295_v22 = vld [vmem:[%s8142_s3 + $0x200] sm:$0xf] }
  0xe2   : > { %v6389_v48 = vpop.f32.mrf.mxu2 }
  0xe3   : > { %8164 = vst [vmem:[#allocation22_spill] sm:$0xff] %v6389_v48  ;;  %v6391_v49 = vpop.f32.mrf.mxu3  ;;  %v6393_v50 = vpop.f32.mrf.mxu0  ;;  %2409 = vmatpush.bf16.msra.mxu3 %v5152_v24 }
  0xe4   : > { %8165 = vst [vmem:[#allocation23_spill] sm:$0xff] %v6391_v49  ;;  %v6395_v51 = vpop.f32.mrf.mxu1 }
  0xe5   : > { %8166 = vst [vmem:[#allocation24_spill] sm:$0xff] %v6395_v51 }
  0xea   : > { %v6397_v3 = vpop.f32.mrf.mxu2 }
  0xeb   : > { %8167 = vst [vmem:[#allocation25_spill] sm:$0xff] %v6397_v3  ;;  %v6399_v4 = vpop.f32.mrf.mxu3  ;;  %v6401_v5 = vpop.f32.mrf.mxu0 }
  0xec   : > { %8168 = vst [vmem:[#allocation26_spill] sm:$0xff] %v6399_v4  ;;  %v6403_v21 = vpop.f32.mrf.mxu1 }
  0xed   : > { %8169 = vst [vmem:[#allocation27_spill] sm:$0xff] %v6403_v21 }
  0xee   : > { %906 = vmatmul.bf16.gmra.mxu1 %v6270_v42  ;;  %1574 = vmatmul.bf16.gmra.mxu0 %v6182_v63 }
  0xef   : > { %1035 = vmatmul.bf16.gmra.mxu2 %v6270_v42 }
  0xf0   : > { %1468 = vmatmul.bf16.gmra.mxu3 %v6270_v42 }
  0xf2   : > { %v6415_v28 = vpop.f32.mrf.mxu2 }
  0xf3   : > { %8170 = vst [vmem:[#allocation28_spill] sm:$0xff] %v6415_v28  ;;  %v6417_v29 = vpop.f32.mrf.mxu3  ;;  %v6419_v31 = vpop.f32.mrf.mxu0 }
  0xf4   : > { %8171 = vst [vmem:[#allocation29_spill] sm:$0xff] %v6417_v29  ;;  %v6421_v63 = vpop.f32.mrf.mxu1 }
  0xf5   : > { %8172 = vst [vmem:[#allocation30_spill] sm:$0xff] %v6421_v63 }
  0xfa   : > { %v6423_v33 = vpop.f32.mrf.mxu2 }
  0xfb   : > { %8173 = vst [vmem:[#allocation31_spill] sm:$0xff] %v6423_v33  ;;  %v6425_v34 = vpop.f32.mrf.mxu3  ;;  %v6427_v43 = vpop.f32.mrf.mxu0 }
  0xfc   : > { %8174 = vst [vmem:[#allocation32_spill] sm:$0xff] %v6425_v34  ;;  %v6429_v49 = vpop.f32.mrf.mxu1 }
  0xfe   : > { %911 = vmatmul.bf16.gmra.mxu1 %v6295_v52  ;;  %1579 = vmatmul.bf16.gmra.mxu0 %v6216_v16  ;;  %v5519_v16 = vld [vmem:[%s8142_s3 + $0x70] sm:$0xf0] }
  0xff   : > { %1040 = vmatmul.bf16.gmra.mxu2 %v6295_v52  ;;  %v5056_v24 = vor.u32 %v5519_v16, %v5055_v35 }
 0x100   : > { %1473 = vmatmul.bf16.gmra.mxu3 %v6295_v52 }
 0x101   : > { %1680 = vmatpush.bf16.msra.mxu1 %v5056_v24 }
 0x102   : > { %v6441_v45 = vpop.f32.mrf.mxu2 }
 0x103   : > { %v1434_v26 = vpop.f32.mrf.mxu3  ;;  %v6446_v29 = vpop.f32.mrf.mxu0 }
 0x104   : > { %v6444_v34 = vadd.f32 %v1434_v26, %v6335_v8  ;;  %v6448_v14 = vpop.f32.mrf.mxu1  ;;  %v5570_v8 = vld [vmem:[%s8142_s3 + $0x208] sm:$0xf0] }
 0x105   : > { %v5296_v26 = vor.u32 %v5570_v8, %v5295_v22 }
 0x107   : > { %2875 = vmatpush.bf16.msra.mxu0 %v5296_v26 }
 0x10a   : > { %v6462_v4 = vpop.f32.mrf.mxu2 }
 0x10b   : > { %v1436_v7 = vpop.f32.mrf.mxu3  ;;  %v6467_v56 = vpop.f32.mrf.mxu0 }
 0x10c   : > { %v6465_v60 = vadd.f32 %v1436_v7, %v6343_v15  ;;  %v6469_v33 = vpop.f32.mrf.mxu1 }
 0x10e   : > { %916 = vmatmul.bf16.gmra.mxu1 %v5993_v37  ;;  %1584 = vmatmul.bf16.gmra.mxu0 %v6238_v23 }
 0x10f   : > { %1045 = vmatmul.bf16.gmra.mxu2 %v5993_v37 }
 0x110   : > { %1478 = vmatmul.bf16.gmra.mxu3 %v5993_v37 }
 0x112   : > { %v6475_v35 = vpop.f32.mrf.mxu2 }
 0x113   : > { %v1439_v16 = vpop.f32.mrf.mxu3  ;;  %v6480_v7 = vpop.f32.mrf.mxu0 }
 0x114   : > { %v6478_v22 = vadd.f32 %v1439_v16, %v6367_v30  ;;  %v879_v15 = vpop.f32.mrf.mxu1  ;;  %v5135_v30 = vld [vmem:[%s8142_s3 + $0x48] sm:$0xf] }
 0x11a   : > { %v6482_v24 = vpop.f32.mrf.mxu2 }
 0x11b   : > { %v1441_v8 = vpop.f32.mrf.mxu3  ;;  %v6487_v23 = vpop.f32.mrf.mxu0 }
 0x11c   : > { %v6485_v26 = vadd.f32 %v1441_v8, %v6381_v46  ;;  %v882_v28 = vpop.f32.mrf.mxu1  ;;  %v5539_v46 = vld [vmem:[%s8142_s3 + $0x50] sm:$0xf0] }
 0x11d   : > { %v5136_v16 = vor.u32 %v5539_v46, %v5135_v30  ;;  %v5538_v30 = vld [vmem:[%s8142_s3 + $0x4c] sm:$0xf] }
 0x11e   : > { %921 = vmatmul.bf16.gmra.mxu1 %v6069_v10  ;;  %1589 = vmatmul.bf16.gmra.mxu0 %v6251_v27 }
 0x11f   : > { %1050 = vmatmul.bf16.gmra.mxu2 %v6069_v10 }
 0x120   : > { %1483 = vmatmul.bf16.gmra.mxu3 %v6069_v10  ;;  %2392 = vmatpush.bf16.msra.mxu2 %v5136_v16 }
 0x122   : > { %v6499_v8 = vpop.f32.mrf.mxu2 }
 0x123   : > { %v1444_v3 = vpop.f32.mrf.mxu3  ;;  %v6504_v27 = vpop.f32.mrf.mxu0 }
 0x124   : > { %v6502_v48 = vadd.f32 %v1444_v3, %v6393_v50  ;;  %v884_v44 = vpop.f32.mrf.mxu1  ;;  %v5137_v50 = vld [vmem:[%s8142_s3 + $0x54] sm:$0xf0] }
 0x125   : > { %v5140_v3 = vor.u32 %v5538_v30, %v5137_v50  ;;  %v5043_v30 = vld [vmem:[%s8142_s3 + $0x50] sm:$0xf] }
 0x127   : > { %2410 = vmatpush.bf16.msra.mxu3 %v5140_v3  ;;  %v5283_v3 = vld [vmem:[%s8142_s3 + $0x1e8] sm:$0xf] }
 0x12a   : > { %v6506_v25 = vpop.f32.mrf.mxu2 }
 0x12b   : > { %v1446_v13 = vpop.f32.mrf.mxu3  ;;  %v6511_v59 = vpop.f32.mrf.mxu0 }
 0x12c   : > { %v6509_v6 = vadd.f32 %v1446_v13, %v6401_v5  ;;  %v887_v55 = vpop.f32.mrf.mxu1 }
 0x12e   : > { %926 = vmatmul.bf16.gmra.mxu1 %v6127_v36  ;;  %1594 = vmatmul.bf16.gmra.mxu0 %v6270_v42  ;;  %v5516_v42 = vld [vmem:[%s8142_s3 + $0x58] sm:$0xf0] }
 0x12f   : > { %1055 = vmatmul.bf16.gmra.mxu2 %v6127_v36  ;;  %v5044_v50 = vor.u32 %v5516_v42, %v5043_v30 }
 0x130   : > { %1488 = vmatmul.bf16.gmra.mxu3 %v6127_v36 }
 0x131   : > { %1681 = vmatpush.bf16.msra.mxu1 %v5044_v50 }
 0x132   : > { %v6523_v13 = vpop.f32.mrf.mxu2 }
 0x133   : > { %v1449_v5 = vpop.f32.mrf.mxu3  ;;  %v6528_v16 = vpop.f32.mrf.mxu0 }
 0x134   : > { %v6526_v46 = vadd.f32 %v1449_v5, %v6419_v31  ;;  %v889_v63 = vpop.f32.mrf.mxu1  ;;  %v5567_v31 = vld [vmem:[%s8142_s3 + $0x1f0] sm:$0xf0] }
 0x135   : > { %v5284_v5 = vor.u32 %v5567_v31, %v5283_v3 }
 0x137   : > { %2876 = vmatpush.bf16.msra.mxu0 %v5284_v5 }
 0x13a   : > { %v6542_v21 = vpop.f32.mrf.mxu2 }
 0x13b   : > { %v1451_v51 = vpop.f32.mrf.mxu3  ;;  %v1560_v20 = vpop.f32.mrf.mxu0 }
 0x13c   : > { %v6545_v47 = vadd.f32 %v1451_v51, %v6427_v43  ;;  %v892_v9 = vpop.f32.mrf.mxu1  ;;  %v6547_v30 = vadd.f32 %v1560_v20, %v879_v15 }
 0x13e   : > { %931 = vmatmul.bf16.gmra.mxu1 %v6185_v0  ;;  %1599 = vmatmul.bf16.gmra.mxu0 %v6295_v52 }
 0x13f   : > { %1060 = vmatmul.bf16.gmra.mxu2 %v6185_v0 }
 0x140   : > { %1493 = vmatmul.bf16.gmra.mxu3 %v6185_v0 }
 0x142   : > { %v6553_v42 = vpop.f32.mrf.mxu2 }
 0x143   : > { %v1454_v50 = vpop.f32.mrf.mxu3  ;;  %v1562_v43 = vpop.f32.mrf.mxu0 }
 0x144   : > { %v6556_v3 = vadd.f32 %v1454_v50, %v6446_v29  ;;  %v894_v51 = vpop.f32.mrf.mxu1  ;;  %v6558_v31 = vadd.f32 %v1562_v43, %v882_v28  ;;  %v5123_v28 = vld [vmem:[%s8142_s3 + $0x30] sm:$0xf] }
 0x146   : > { %8175 = vst [vmem:[#allocation33_spill] sm:$0xff] %v6556_v3 }
 0x14a   : > { %v6560_v20 = vpop.f32.mrf.mxu2 }
 0x14b   : > { %8176 = vst [vmem:[#allocation34_spill] sm:$0xff] %v6560_v20  ;;  %v1456_v15 = vpop.f32.mrf.mxu3  ;;  %v1565_v32 = vpop.f32.mrf.mxu0 }
 0x14c   : > { %v6563_v5 = vadd.f32 %v1456_v15, %v6467_v56  ;;  %v897_v52 = vpop.f32.mrf.mxu1  ;;  %v6565_v62 = vadd.f32 %v1565_v32, %v884_v44  ;;  %v5536_v56 = vld [vmem:[%s8142_s3 + $0x38] sm:$0xf0] }
 0x14d   : > { %v5124_v29 = vor.u32 %v5536_v56, %v5123_v28  ;;  %v5535_v56 = vld [vmem:[%s8142_s3 + $0x34] sm:$0xf] }
 0x14e   : > { %8177 = vst [vmem:[#allocation35_spill] sm:$0xff] %v6563_v5  ;;  %936 = vmatmul.bf16.gmra.mxu1 %v6219_v17  ;;  %1604 = vmatmul.bf16.gmra.mxu0 %v5993_v37 }
 0x14f   : > { %1065 = vmatmul.bf16.gmra.mxu2 %v6219_v17 }
 0x150   : > { %1498 = vmatmul.bf16.gmra.mxu3 %v6219_v17  ;;  %2393 = vmatpush.bf16.msra.mxu2 %v5124_v29 }
 0x152   : > { %v6577_v50 = vpop.f32.mrf.mxu2 }
 0x153   : > { %v1459_v32 = vpop.f32.mrf.mxu3  ;;  %v1567_v43 = vpop.f32.mrf.mxu0 }
 0x154   : > { %v6580_v44 = vadd.f32 %v1459_v32, %v6480_v7  ;;  %v899_v37 = vpop.f32.mrf.mxu1  ;;  %v6582_v15 = vadd.f32 %v1567_v43, %v887_v55  ;;  %v5125_v7 = vld [vmem:[%s8142_s3 + $0x3c] sm:$0xf0]  ;;  %v5031_v32 = vld [vmem:[%s8142_s3 + $0x38] sm:$0xf] }
 0x155   : > { %v5128_v55 = vor.u32 %v5535_v56, %v5125_v7  ;;  %v5271_v7 = vld [vmem:[%s8142_s3 + $0x1d0] sm:$0xf] }
 0x156   : > { %8178 = vst [vmem:[#allocation36_spill] sm:$0xff] %v6580_v44 }
 0x157   : > { %2411 = vmatpush.bf16.msra.mxu3 %v5128_v55 }
 0x15a   : > { %v6584_v58 = vpop.f32.mrf.mxu2 }
 0x15b   : > { %8179 = vst [vmem:[#allocation37_spill] sm:$0xff] %v6584_v58  ;;  %v1461_v54 = vpop.f32.mrf.mxu3  ;;  %v1570_v3 = vpop.f32.mrf.mxu0 }
 0x15c   : > { %v6587_v5 = vadd.f32 %v1461_v54, %v6487_v23  ;;  %v902_v20 = vpop.f32.mrf.mxu1  ;;  %v6589_v28 = vadd.f32 %v1570_v3, %v889_v63 }
 0x15e   : > { %8180 = vst [vmem:[#allocation38_spill] sm:$0xff] %v6587_v5  ;;  %941 = vmatmul.bf16.gmra.mxu1 %v6002_v40  ;;  %1609 = vmatmul.bf16.gmra.mxu0 %v6069_v10  ;;  %v5513_v10 = vld [vmem:[%s8142_s3 + $0x40] sm:$0xf0] }
 0x15f   : > { %1070 = vmatmul.bf16.gmra.mxu2 %v6002_v40  ;;  %v5032_v56 = vor.u32 %v5513_v10, %v5031_v32  ;;  %v7281_v5 = vld [vmem:[%s5960_s13 + $0x60] sm:$0xff] }
 0x160   : > { %1503 = vmatmul.bf16.gmra.mxu3 %v6002_v40 }
 0x161   : > { %1682 = vmatpush.bf16.msra.mxu1 %v5032_v56 }
 0x162   : > { %v6601_v54 = vpop.f32.mrf.mxu2 }
 0x163   : > { %8181 = vst [vmem:[#allocation39_spill] sm:$0xff] %v6601_v54  ;;  %v1464_v63 = vpop.f32.mrf.mxu3  ;;  %v1572_v29 = vpop.f32.mrf.mxu0 }
 0x164   : > { %v6604_v23 = vadd.f32 %v1464_v63, %v6504_v27  ;;  %v904_v3 = vpop.f32.mrf.mxu1  ;;  %v6612_v43 = vadd.f32 %v1572_v29, %v892_v9  ;;  %v5564_v27 = vld [vmem:[%s8142_s3 + $0x1d8] sm:$0xf0] }
 0x165   : > { %v5272_v55 = vor.u32 %v5564_v27, %v5271_v7 }
 0x166   : > { %8182 = vst [vmem:[#allocation40_spill] sm:$0xff] %v6604_v23 }
 0x167   : > { %2877 = vmatpush.bf16.msra.mxu0 %v5272_v55 }
 0x16a   : > { %v6620_v63 = vpop.f32.mrf.mxu2 }
 0x16b   : > { %8183 = vst [vmem:[#allocation41_spill] sm:$0xff] %v6620_v63  ;;  %v1466_v23 = vpop.f32.mrf.mxu3  ;;  %v1575_v29 = vpop.f32.mrf.mxu0 }
 0x16c   : > { %v6623_v54 = vadd.f32 %v1466_v23, %v6511_v59  ;;  %v907_v9 = vpop.f32.mrf.mxu1  ;;  %v6625_v32 = vadd.f32 %v1575_v29, %v894_v51 }
 0x16e   : > { %8184 = vst [vmem:[#allocation42_spill] sm:$0xff] %v6623_v54  ;;  %946 = vmatmul.bf16.gmra.mxu1 %v6072_v11  ;;  %1614 = vmatmul.bf16.gmra.mxu0 %v6127_v36 }
 0x16f   : > { %8185 = vst [vmem:[#allocation43_spill] sm:$0xff] %v6625_v32  ;;  %1075 = vmatmul.bf16.gmra.mxu2 %v6072_v11 }
 0x170   : > { %1508 = vmatmul.bf16.gmra.mxu3 %v6072_v11 }
 0x172   : > { %v6631_v10 = vpop.f32.mrf.mxu2 }
 0x173   : > { %8186 = vst [vmem:[#allocation44_spill] sm:$0xff] %v6631_v10  ;;  %v1469_v56 = vpop.f32.mrf.mxu3  ;;  %v1577_v23 = vpop.f32.mrf.mxu0 }
 0x174   : > { %v6634_v7 = vadd.f32 %v1469_v56, %v6528_v16  ;;  %v909_v59 = vpop.f32.mrf.mxu1  ;;  %v6636_v27 = vadd.f32 %v1577_v23, %v897_v52  ;;  %v5111_v16 = vld [vmem:[%s8142_s3 + $0x18] sm:$0xf]  ;;  %v5533_v52 = vld [vmem:[%s8142_s3 + $0x20] sm:$0xf0] }
 0x175   : > { %v5112_v56 = vor.u32 %v5533_v52, %v5111_v16  ;;  %v5532_v16 = vld [vmem:[%s8142_s3 + $0x1c] sm:$0xf]  ;;  %v5113_v52 = vld [vmem:[%s8142_s3 + $0x24] sm:$0xf0] }
 0x176   : > { %8187 = vst [vmem:[#allocation45_spill] sm:$0xff] %v6634_v7 }
 0x177   : > { %8188 = vst [vmem:[#allocation46_spill] sm:$0xff] %v6636_v27  ;;  %2394 = vmatpush.bf16.msra.mxu2 %v5112_v56  ;;  %v5116_v56 = vor.u32 %v5532_v16, %v5113_v52  ;;  %v5510_v16 = vld [vmem:[%s8142_s3 + $0x28] sm:$0xf0] }
 0x179   : > { %2412 = vmatpush.bf16.msra.mxu3 %v5116_v56  ;;  %v5259_v56 = vld [vmem:[%s8142_s3 + $0x1b8] sm:$0xf] }
 0x17a   : > { %v6638_v51 = vpop.f32.mrf.mxu2 }
 0x17b   : > { %8189 = vst [vmem:[#allocation47_spill] sm:$0xff] %v6638_v51  ;;  %v6640_v55 = vpop.f32.mrf.mxu3  ;;  %v1580_v36 = vpop.f32.mrf.mxu0 }
 0x17c   : > { %8190 = vst [vmem:[#allocation48_spill] sm:$0xff] %v6640_v55  ;;  %v912_v29 = vpop.f32.mrf.mxu1  ;;  %v6642_v54 = vadd.f32 %v1580_v36, %v899_v37 }
 0x17e   : > { %8191 = vst [vmem:[#allocation49_spill] sm:$0xff] %v6642_v54  ;;  %951 = vmatmul.bf16.gmra.mxu1 %v6130_v38  ;;  %1619 = vmatmul.bf16.gmra.mxu0 %v6185_v0 }
 0x17f   : > { %1080 = vmatmul.bf16.gmra.mxu2 %v6130_v38 }
 0x180   : > { %1513 = vmatmul.bf16.gmra.mxu3 %v6130_v38 }
 0x182   : > { %v6654_v23 = vpop.f32.mrf.mxu2 }
 0x183   : > { %8192 = vst [vmem:[#allocation50_spill] sm:$0xff] %v6654_v23  ;;  %v6656_v37 = vpop.f32.mrf.mxu3  ;;  %v1582_v0 = vpop.f32.mrf.mxu0 }
 0x184   : > { %8193 = vst [vmem:[#allocation51_spill] sm:$0xff] %v6656_v37  ;;  %v914_v36 = vpop.f32.mrf.mxu1  ;;  %v6658_v51 = vadd.f32 %v1582_v0, %v902_v20 }
 0x186   : > { %8194 = vst [vmem:[#allocation52_spill] sm:$0xff] %v6658_v51 }
 0x18a   : > { %v6660_v55 = vpop.f32.mrf.mxu2 }
 0x18b   : > { %8195 = vst [vmem:[#allocation53_spill] sm:$0xff] %v6660_v55  ;;  %v6662_v7 = vpop.f32.mrf.mxu3  ;;  %v1585_v63 = vpop.f32.mrf.mxu0  ;;  %v5019_v55 = vld [vmem:[%s8142_s3 + $0x20] sm:$0xf] }
 0x18c   : > { %8196 = vst [vmem:[#allocation54_spill] sm:$0xff] %v6662_v7  ;;  %v917_v10 = vpop.f32.mrf.mxu1  ;;  %v6664_v54 = vadd.f32 %v1585_v63, %v904_v3  ;;  %v5020_v52 = vor.u32 %v5510_v16, %v5019_v55 }
 0x18e   : > { %8197 = vst [vmem:[#allocation55_spill] sm:$0xff] %v6664_v54  ;;  %956 = vmatmul.bf16.gmra.mxu1 %v6188_v1  ;;  %1624 = vmatmul.bf16.gmra.mxu0 %v6219_v17 }
 0x18f   : > { %1085 = vmatmul.bf16.gmra.mxu2 %v6188_v1  ;;  %1683 = vmatpush.bf16.msra.mxu1 %v5020_v52 }
 0x190   : > { %1518 = vmatmul.bf16.gmra.mxu3 %v6188_v1 }
 0x192   : > { %v6676_v20 = vpop.f32.mrf.mxu2 }
 0x193   : > { %8198 = vst [vmem:[#allocation56_spill] sm:$0xff] %v6676_v20  ;;  %v6678_v3 = vpop.f32.mrf.mxu3  ;;  %v1587_v0 = vpop.f32.mrf.mxu0  ;;  %v5561_v20 = vld [vmem:[%s8142_s3 + $0x1c0] sm:$0xf0] }
 0x194   : > { %8199 = vst [vmem:[#allocation57_spill] sm:$0xff] %v6678_v3  ;;  %v919_v63 = vpop.f32.mrf.mxu1  ;;  %v6686_v17 = vadd.f32 %v1587_v0, %v907_v9  ;;  %v5260_v3 = vor.u32 %v5561_v20, %v5259_v56 }
 0x196   : > { %8200 = vst [vmem:[#allocation58_spill] sm:$0xff] %v6686_v17  ;;  %2878 = vmatpush.bf16.msra.mxu0 %v5260_v3 }
 0x19a   : > { %v6694_v7 = vpop.f32.mrf.mxu2 }
 0x19b   : > { %8201 = vst [vmem:[#allocation59_spill] sm:$0xff] %v6694_v7  ;;  %v6696_v23 = vpop.f32.mrf.mxu3  ;;  %v1590_v54 = vpop.f32.mrf.mxu0 }
 0x19c   : > { %8202 = vst [vmem:[#allocation60_spill] sm:$0xff] %v6696_v23  ;;  %v922_v37 = vpop.f32.mrf.mxu1  ;;  %v6698_v9 = vadd.f32 %v1590_v54, %v909_v59 }
 0x19e   : > { %8203 = vst [vmem:[#allocation61_spill] sm:$0xff] %v6698_v9  ;;  %961 = vmatmul.bf16.gmra.mxu1 %v6222_v18  ;;  %1629 = vmatmul.bf16.gmra.mxu0 %v6002_v40  ;;  %v5099_v40 = vld [vmem:[%s8142_s3] sm:$0xf]  ;;  %v7262_v9 = vld [vmem:[%s5960_s13 + $0x58] sm:$0xff] }
 0x19f   : > { %1090 = vmatmul.bf16.gmra.mxu2 %v6222_v18 }
 0x1a0   : > { %1523 = vmatmul.bf16.gmra.mxu3 %v6222_v18 }
 0x1a2   : > { %v6704_v55 = vpop.f32.mrf.mxu2 }
 0x1a3   : > { %8204 = vst [vmem:[#allocation62_spill] sm:$0xff] %v6704_v55  ;;  %v6706_v20 = vpop.f32.mrf.mxu3  ;;  %v1592_v0 = vpop.f32.mrf.mxu0 }
 0x1a4   : > { %8205 = vst [vmem:[#allocation63_spill] sm:$0xff] %v6706_v20  ;;  %v924_v3 = vpop.f32.mrf.mxu1  ;;  %v6708_v16 = vadd.f32 %v1592_v0, %v912_v29  ;;  %v5530_v29 = vld [vmem:[%s8142_s3 + $0x8] sm:$0xf0] }
 0x1a5   : > { %v5100_v0 = vor.u32 %v5530_v29, %v5099_v40  ;;  %v5529_v40 = vld [vmem:[%s8142_s3 + $0x4] sm:$0xf]  ;;  %v5101_v29 = vld [vmem:[%s8142_s3 + $0xc] sm:$0xf0] }
 0x1a6   : > { %8206 = vst [vmem:[#allocation64_spill] sm:$0xff] %v6708_v16 }
 0x1a7   : > { %2395 = vmatpush.bf16.msra.mxu2 %v5100_v0  ;;  %v5104_v0 = vor.u32 %v5529_v40, %v5101_v29  ;;  %v5007_v40 = vld [vmem:[%s8142_s3 + $0x8] sm:$0xf] }
 0x1a9   : > { %2413 = vmatpush.bf16.msra.mxu3 %v5104_v0  ;;  %v5558_v0 = vld [vmem:[%s8142_s3 + $0x1a8] sm:$0xf0] }
 0x1aa   : > { %v6710_v52 = vpop.f32.mrf.mxu2 }
 0x1ab   : > { %8207 = vst [vmem:[#allocation65_spill] sm:$0xff] %v6710_v52  ;;  %v6712_v54 = vpop.f32.mrf.mxu3  ;;  %v1595_v56 = vpop.f32.mrf.mxu0 }
 0x1ac   : > { %8208 = vst [vmem:[#allocation66_spill] sm:$0xff] %v6712_v54  ;;  %v927_v59 = vpop.f32.mrf.mxu1  ;;  %v6714_v7 = vadd.f32 %v1595_v56, %v914_v36 }
 0x1ae   : > { %8209 = vst [vmem:[#allocation67_spill] sm:$0xff] %v6714_v7  ;;  %966 = vmatmul.bf16.gmra.mxu1 %v6005_v41  ;;  %1634 = vmatmul.bf16.gmra.mxu0 %v6072_v11 }
 0x1af   : > { %1095 = vmatmul.bf16.gmra.mxu2 %v6005_v41 }
 0x1b0   : > { %1528 = vmatmul.bf16.gmra.mxu3 %v6005_v41 }
 0x1b2   : > { %v6726_v52 = vpop.f32.mrf.mxu2 }
 0x1b3   : > { %8210 = vst [vmem:[#allocation68_spill] sm:$0xff] %v6726_v52  ;;  %v6728_v36 = vpop.f32.mrf.mxu3  ;;  %v1597_v11 = vpop.f32.mrf.mxu0 }
 0x1b4   : > { %8211 = vst [vmem:[#allocation69_spill] sm:$0xff] %v6728_v36  ;;  %v929_v56 = vpop.f32.mrf.mxu1  ;;  %v6730_v54 = vadd.f32 %v1597_v11, %v917_v10  ;;  %v7089_v36 = vld [vmem:[%s5960_s13 + $0x18] sm:$0xff] }
 0x1b6   : > { %8212 = vst [vmem:[#allocation70_spill] sm:$0xff] %v6730_v54  ;;  %v7241_v54 = vld [vmem:[%s5960_s13 + $0x50] sm:$0xff] }
 0x1ba   : > { %v6732_v55 = vpop.f32.mrf.mxu2 }
 0x1bb   : > { %8213 = vst [vmem:[#allocation71_spill] sm:$0xff] %v6732_v55  ;;  %v6734_v41 = vpop.f32.mrf.mxu3  ;;  %v1600_v23 = vpop.f32.mrf.mxu0 }
 0x1bc   : > { %8214 = vst [vmem:[#allocation72_spill] sm:$0xff] %v6734_v41  ;;  %v6736_v20 = vpop.f32.mrf.mxu1  ;;  %v6738_v7 = vadd.f32 %v1600_v23, %v919_v63 }
 0x1be   : > { %8215 = vst [vmem:[#allocation73_spill] sm:$0xff] %v6738_v7  ;;  %971 = vmatmul.bf16.gmra.mxu1 %v6075_v12  ;;  %1639 = vmatmul.bf16.gmra.mxu0 %v6130_v38  ;;  %v5507_v38 = vld [vmem:[%s8142_s3 + $0x10] sm:$0xf0] }
 0x1bf   : > { %1100 = vmatmul.bf16.gmra.mxu2 %v6075_v12  ;;  %v5008_v55 = vor.u32 %v5507_v38, %v5007_v40 }
 0x1c0   : > { %1533 = vmatmul.bf16.gmra.mxu3 %v6075_v12  ;;  %v5247_v12 = vld [vmem:[%s8142_s3 + $0x1a0] sm:$0xf] }
 0x1c1   : > { %1684 = vmatpush.bf16.msra.mxu1 %v5008_v55 }
 0x1c2   : > { %v6750_v10 = vpop.f32.mrf.mxu2 }
 0x1c3   : > { %8216 = vst [vmem:[#allocation74_spill] sm:$0xff] %v6750_v10  ;;  %v6752_v23 = vpop.f32.mrf.mxu3  ;;  %v1602_v11 = vpop.f32.mrf.mxu0  ;;  %v5248_v10 = vor.u32 %v5558_v0, %v5247_v12 }
 0x1c4   : > { %8217 = vst [vmem:[#allocation75_spill] sm:$0xff] %v6752_v23  ;;  %v6754_v63 = vpop.f32.mrf.mxu1  ;;  %v6762_v29 = vadd.f32 %v1602_v11, %v922_v37 }
 0x1c5   : > { %2879 = vmatpush.bf16.msra.mxu0 %v5248_v10 }
 0x1c6   : > { %8218 = vst [vmem:[#allocation76_spill] sm:$0xff] %v6762_v29  ;;  %v7224_v29 = vld [vmem:[%s5960_s13 + $0x48] sm:$0xff] }
 0x1ca   : > { %v6770_v23 = vpop.f32.mrf.mxu2 }
 0x1cb   : > { %8219 = vst [vmem:[#allocation77_spill] sm:$0xff] %v6770_v23  ;;  %v6772_v41 = vpop.f32.mrf.mxu3  ;;  %v1605_v37 = vpop.f32.mrf.mxu0 }
 0x1cc   : > { %8220 = vst [vmem:[#allocation78_spill] sm:$0xff] %v6772_v41  ;;  %v6774_v52 = vpop.f32.mrf.mxu1  ;;  %v6776_v11 = vadd.f32 %v1605_v37, %v924_v3  ;;  %v5167_v41 = vld [vmem:[%s8142_s3 + $0x80] sm:$0xf] }
 0x1ce   : > { %8221 = vst [vmem:[#allocation79_spill] sm:$0xff] %v6776_v11  ;;  %976 = vmatmul.bf16.gmra.mxu1 %v6133_v39  ;;  %1644 = vmatmul.bf16.gmra.mxu0 %v6188_v1  ;;  %v5802_v11 = vld [vmem:[%s5960_s13 + $0xb8] sm:$0xff] }
 0x1cf   : > { %1105 = vmatmul.bf16.gmra.mxu2 %v6133_v39 }
 0x1d0   : > { %1538 = vmatmul.bf16.gmra.mxu3 %v6133_v39  ;;  %v5191_v39 = vld [vmem:[%s8142_s3 + $0xb0] sm:$0xf] }
 0x1d2   : > { %v6782_v40 = vpop.f32.mrf.mxu2 }
 0x1d3   : > { %8222 = vst [vmem:[#allocation80_spill] sm:$0xff] %v6782_v40  ;;  %v6784_v55 = vpop.f32.mrf.mxu3  ;;  %v1607_v38 = vpop.f32.mrf.mxu0  ;;  %v5552_v40 = vld [vmem:[%s8142_s3 + $0xb8] sm:$0xf0] }
 0x1d4   : > { %8223 = vst [vmem:[#allocation81_spill] sm:$0xff] %v6784_v55  ;;  %v6786_v10 = vpop.f32.mrf.mxu1  ;;  %v6788_v12 = vadd.f32 %v1607_v38, %v927_v59  ;;  %v5192_v59 = vor.u32 %v5552_v40, %v5191_v39  ;;  %v5311_v38 = vld [vmem:[%s8142_s3 + $0x228] sm:$0xf]  ;;  %v5549_v40 = vld [vmem:[%s8142_s3 + $0xa0] sm:$0xf0] }
 0x1d5   : > { %v5299_v39 = vld [vmem:[%s8142_s3 + $0x210] sm:$0xf] }
 0x1d6   : > { %8224 = vst [vmem:[#allocation82_spill] sm:$0xff] %v6788_v12  ;;  %2424 = vmatpush.bf16.msrb.mxu2 %v5192_v59  ;;  %v5572_v59 = vld [vmem:[%s8142_s3 + $0x218] sm:$0xf0] }
 0x1da   : > { %v6790_v0 = vpop.f32.mrf.mxu2 }
 0x1db   : > { %8225 = vst [vmem:[#allocation83_spill] sm:$0xff] %v6790_v0  ;;  %v6792_v3 = vpop.f32.mrf.mxu3  ;;  %v1610_v1 = vpop.f32.mrf.mxu0 }
 0x1dc   : > { %8226 = vst [vmem:[#allocation84_spill] sm:$0xff] %v6792_v3  ;;  %v6794_v37 = vpop.f32.mrf.mxu1  ;;  %v6796_v23 = vadd.f32 %v1610_v1, %v929_v56  ;;  %v5575_v56 = vld [vmem:[%s8142_s3 + $0x230] sm:$0xf0] }
 0x1dd   : > { %v5312_v1 = vor.u32 %v5575_v56, %v5311_v38 }
 0x1de   : > { %8227 = vst [vmem:[#allocation85_spill] sm:$0xff] %v6796_v23  ;;  %981 = vmatmul.bf16.gmra.mxu1 %v6191_v2  ;;  %1649 = vmatmul.bf16.gmra.mxu0 %v6222_v18  ;;  %v5179_v18 = vld [vmem:[%s8142_s3 + $0x98] sm:$0xf] }
 0x1df   : > { %1110 = vmatmul.bf16.gmra.mxu2 %v6191_v2  ;;  %2621 = vmatpush.bf16.msrb.mxu3 %v5312_v1  ;;  %v5300_v1 = vor.u32 %v5572_v59, %v5299_v39  ;;  %v5543_v59 = vld [vmem:[%s8142_s3 + $0x70] sm:$0xf0] }
 0x1e0   : > { %1543 = vmatmul.bf16.gmra.mxu3 %v6191_v2  ;;  %v5180_v2 = vor.u32 %v5549_v40, %v5179_v18  ;;  %v5546_v18 = vld [vmem:[%s8142_s3 + $0x88] sm:$0xf0]  ;;  %v5287_v40 = vld [vmem:[%s8142_s3 + $0x1f8] sm:$0xf] }
 0x1e2   : > { %v6823_v0 = vpop.f32.mrf.mxu2  ;;  %2425 = vmatpush.bf16.msrb.mxu2 %v5180_v2  ;;  %v5155_v2 = vld [vmem:[%s8142_s3 + $0x68] sm:$0xf] }
 0x1e3   : > { %8228 = vst [vmem:[#allocation86_spill] sm:$0xff] %v6823_v0  ;;  %v6825_v3 = vpop.f32.mrf.mxu3  ;;  %v1612_v56 = vpop.f32.mrf.mxu0  ;;  %2622 = vmatpush.bf16.msrb.mxu3 %v5300_v1  ;;  %v5168_v0 = vor.u32 %v5546_v18, %v5167_v41  ;;  %v5275_v41 = vld [vmem:[%s8142_s3 + $0x1e0] sm:$0xf]  ;;  %v5156_v18 = vor.u32 %v5543_v59, %v5155_v2  ;;  %v5540_v2 = vld [vmem:[%s8142_s3 + $0x58] sm:$0xf0] }
 0x1e4   : > { %8229 = vst [vmem:[#allocation87_spill] sm:$0xff] %v6825_v3  ;;  %v6830_v38 = vpop.f32.mrf.mxu1  ;;  %v6833_v55 = vadd.f32 %v1612_v56, %v6736_v20  ;;  %v5569_v20 = vld [vmem:[%s8142_s3 + $0x200] sm:$0xf0]  ;;  %v5263_v59 = vld [vmem:[%s8142_s3 + $0x1c8] sm:$0xf] }
 0x1e5   : > { %v5288_v39 = vor.u32 %v5569_v20, %v5287_v40 }
 0x1e6   : > { %8230 = vst [vmem:[#allocation88_spill] sm:$0xff] %v6833_v55  ;;  %2426 = vmatpush.bf16.msrb.mxu2 %v5168_v0  ;;  %v5566_v0 = vld [vmem:[%s8142_s3 + $0x1e8] sm:$0xf0]  ;;  %v5119_v55 = vld [vmem:[%s8142_s3 + $0x20] sm:$0xf] }
 0x1e7   : > { %2623 = vmatpush.bf16.msrb.mxu3 %v5288_v39  ;;  %v5276_v39 = vor.u32 %v5566_v0, %v5275_v41  ;;  %v5795_v41 = vld [vmem:[%s5960_s13 + $0x98] sm:$0xff] }
 0x1ea   : > { %v6856_v56 = vpop.f32.mrf.mxu2  ;;  %2427 = vmatpush.bf16.msrb.mxu2 %v5156_v18  ;;  %v5563_v18 = vld [vmem:[%s8142_s3 + $0x1d0] sm:$0xf0] }
 0x1eb   : > { %8231 = vst [vmem:[#allocation89_spill] sm:$0xff] %v6856_v56  ;;  %v6858_v1 = vpop.f32.mrf.mxu3  ;;  %v1615_v20 = vpop.f32.mrf.mxu0  ;;  %2624 = vmatpush.bf16.msrb.mxu3 %v5276_v39  ;;  %v5143_v56 = vld [vmem:[%s8142_s3 + $0x50] sm:$0xf]  ;;  %v5264_v0 = vor.u32 %v5563_v18, %v5263_v59  ;;  %v5560_v59 = vld [vmem:[%s8142_s3 + $0x1b8] sm:$0xf0] }
 0x1ec   : > { %8232 = vst [vmem:[#allocation90_spill] sm:$0xff] %v6858_v1  ;;  %v6863_v40 = vpop.f32.mrf.mxu1  ;;  %v6866_v3 = vadd.f32 %v1615_v20, %v6754_v63  ;;  %v5144_v63 = vor.u32 %v5540_v2, %v5143_v56  ;;  %v5131_v20 = vld [vmem:[%s8142_s3 + $0x38] sm:$0xf]  ;;  %v5537_v56 = vld [vmem:[%s8142_s3 + $0x40] sm:$0xf0] }
 0x1ed   : > { %v5251_v39 = vld [vmem:[%s8142_s3 + $0x1b0] sm:$0xf]  ;;  %v5599_v1 = vld [vmem:[%s8142_s3 + $0x230] sm:$0xf0] }
 0x1ee   : > { %8233 = vst [vmem:[#allocation91_spill] sm:$0xff] %v6866_v3  ;;  %986 = vmatmul.bf16.gmra.mxu1 %v6225_v19  ;;  %1654 = vmatmul.bf16.gmra.mxu0 %v5795_v41  ;;  %v5555_v3 = vld [vmem:[%s8142_s3 + $0x190] sm:$0xf0] }
 0x1ef   : > { %1115 = vmatmul.bf16.gmra.mxu2 %v6225_v19  ;;  %2625 = vmatpush.bf16.msrb.mxu3 %v5264_v0  ;;  %v5443_v0 = vld [vmem:[%s8142_s3 + $0x228] sm:$0xf] }
 0x1f0   : > { %1547 = vmatmul.bf16.gmra.mxu3 %v6225_v19  ;;  %2428 = vmatpush.bf16.msrb.mxu2 %v5144_v63  ;;  %v5132_v19 = vor.u32 %v5537_v56, %v5131_v20  ;;  %v5444_v56 = vor.u32 %v5599_v1, %v5443_v0  ;;  %v5239_v1 = vld [vmem:[%s8142_s3 + $0x198] sm:$0xf] }
 0x1f2   : > { %v6893_v2 = vpop.f32.mrf.mxu2  ;;  %3584 = vmatpush.bf16.msrb.mxu1 %v5444_v56 }
 0x1f3   : > { %8234 = vst [vmem:[#allocation92_spill] sm:$0xff] %v6893_v2  ;;  %v6895_v41 = vpop.f32.mrf.mxu3  ;;  %v1617_v18 = vpop.f32.mrf.mxu0  ;;  %v5252_v2 = vor.u32 %v5560_v59, %v5251_v39 }
 0x1f4   : > { %8235 = vst [vmem:[#allocation93_spill] sm:$0xff] %v6895_v41  ;;  %v6900_v63 = vpop.f32.mrf.mxu1  ;;  %v6910_v20 = vadd.f32 %v1617_v18, %v6774_v52  ;;  %2429 = vmatpush.bf16.msrb.mxu2 %v5132_v19  ;;  %v5235_v41 = vld [vmem:[%s8142_s3 + $0x188] sm:$0xf]  ;;  %v5534_v52 = vld [vmem:[%s8142_s3 + $0x28] sm:$0xf0] }
 0x1f5   : > { %2626 = vmatpush.bf16.msrb.mxu3 %v5252_v2  ;;  %v5236_v39 = vor.u32 %v5555_v3, %v5235_v41  ;;  %v5557_v19 = vld [vmem:[%s8142_s3 + $0x1a0] sm:$0xf0]  ;;  %v5120_v59 = vor.u32 %v5534_v52, %v5119_v55  ;;  %v5107_v3 = vld [vmem:[%s8142_s3 + $0x8] sm:$0xf]  ;;  %v5531_v55 = vld [vmem:[%s8142_s3 + $0x10] sm:$0xf0] }
 0x1f6   : > { %8236 = vst [vmem:[#allocation94_spill] sm:$0xff] %v6910_v20  ;;  %v5240_v18 = vor.u32 %v5557_v19, %v5239_v1  ;;  %v5227_v2 = vld [vmem:[%s8142_s3 + $0x180] sm:$0xf]  ;;  %v5108_v56 = vor.u32 %v5531_v55, %v5107_v3  ;;  %v5313_v3 = vld [vmem:[%s8142_s3 + $0x234] sm:$0xf0] }
 0x1f7   : > { %2880 = vmatpush.bf16.msra.mxu0 %v5236_v39  ;;  %v5554_v39 = vld [vmem:[%s8142_s3 + $0x188] sm:$0xf0]  ;;  %v6956_v19 = vld [vmem:[%s6935_s8] sm:$0xff]  ;;  %v5289_v20 = vld [vmem:[%s8142_s3 + $0x204] sm:$0xf0] }
 0x1f8   : > { %2430 = vmatpush.bf16.msrb.mxu2 %v5120_v59  ;;  %v5228_v59 = vor.u32 %v5554_v39, %v5227_v2  ;;  %v5796_v55 = vld [vmem:[%s5960_s13 + $0xa0] sm:$0xff] }
 0x1f9   : > { %2627 = vmatpush.bf16.msrb.mxu3 %v5240_v18 }
 0x1fa   : > { %v6946_v41 = vpop.f32.mrf.mxu2 }
 0x1fb   : > { %8237 = vst [vmem:[#allocation95_spill] sm:$0xff] %v6946_v41  ;;  %v6948_v0 = vpop.f32.mrf.mxu3  ;;  %v1620_v1 = vpop.f32.mrf.mxu0  ;;  %v5574_v41 = vld [vmem:[%s8142_s3 + $0x22c] sm:$0xf] }
 0x1fc   : > { %8238 = vst [vmem:[#allocation96_spill] sm:$0xff] %v6948_v0  ;;  %v6953_v52 = vpop.f32.mrf.mxu1  ;;  %v6959_v18 = vadd.f32 %v1620_v1, %v6786_v10  ;;  %2431 = vmatpush.bf16.msrb.mxu2 %v5108_v56  ;;  %v6969_v0 = vld [vmem:[%s5960_s13] sm:$0xff]  ;;  %v5316_v2 = vor.u32 %v5574_v41, %v5313_v3  ;;  %v5571_v10 = vld [vmem:[%s8142_s3 + $0x214] sm:$0xf] }
 0x1fd   : > { %2628 = vmatpush.bf16.msrb.mxu3 %v5228_v59  ;;  %v5301_v56 = vld [vmem:[%s8142_s3 + $0x21c] sm:$0xf0] }
 0x1fe   : > { %8239 = vst [vmem:[#allocation97_spill] sm:$0xff] %v6959_v18  ;;  %1659 = vmatmul.bf16.gmra.mxu0 %v5796_v55  ;;  %1685 = vmatmul.bf16.vlgmr.msra.gmra.mxu1 %v6969_v0  ;;  %v5304_v59 = vor.u32 %v5571_v10, %v5301_v56  ;;  %v5568_v18 = vld [vmem:[%s8142_s3 + $0x1fc] sm:$0xf]  ;;  %v5565_v10 = vld [vmem:[%s8142_s3 + $0x1e4] sm:$0xf] }
 0x1ff   : > { %2396 = vmatmul.bf16.vlgmr.msra.gmra.mxu2 %v6956_v19 }
 0x200   : > { %2414 = vmatmul.bf16.vlgmr.msra.gmra.mxu3 %v6956_v19  ;;  %2747 = vmatpush.bf16.msra.mxu2 %v5316_v2  ;;  %v425_v2 = vld [vmem:[%s6935_s8 + $0x8] sm:$0xf]  ;;  %s7365_s8 = scalar_lea.vmem %s8143_s4, %s5768_s29 }
 0x201   : > { %v2255_v23 = vunpack.c.l.b16 %v425_v2  ;;  %v5451_v2 = vld [vmem:[%s8142_s3 + $0x230] sm:$0xf] }
 0x202   : > { %v6980_v39 = vpop.f32.mrf.mxu2 }
 0x203   : > { %8240 = vst [vmem:[#allocation98_spill] sm:$0xff] %v6980_v39  ;;  %v6982_v1 = vpop.f32.mrf.mxu3  ;;  %v1622_v41 = vpop.f32.mrf.mxu0  ;;  %v5292_v39 = vor.u32 %v5568_v18, %v5289_v20  ;;  %v2257_v18 = vpack.c.b16 %v2255_v23, %v2255_v23  ;;  %v5265_v23 = vld [vmem:[%s8142_s3 + $0x1d4] sm:$0xf0] }
 0x204   : > { %8241 = vst [vmem:[#allocation99_spill] sm:$0xff] %v6982_v1  ;;  %v6984_v55 = vpop.f32.mrf.mxu1  ;;  %v6987_v3 = vadd.f32 %v1622_v41, %v6794_v37  ;;  %2748 = vmatpush.bf16.msra.mxu2 %v5304_v59  ;;  %v5277_v37 = vld [vmem:[%s8142_s3 + $0x1ec] sm:$0xf0] }
 0x205   : > { %v5280_v41 = vor.u32 %v5565_v10, %v5277_v37  ;;  %v5562_v10 = vld [vmem:[%s8142_s3 + $0x1cc] sm:$0xf] }
 0x206   : > { %8242 = vst [vmem:[#allocation100_spill] sm:$0xff] %v6987_v3  ;;  %v5600_v3 = vld [vmem:[%s8142_s3 + $0x238] sm:$0xf0]  ;;  %v7025_v37 = vld [vmem:[%s5960_s13 + $0x8] sm:$0xff] }
 0x208   : > { %2749 = vmatpush.bf16.msra.mxu2 %v5292_v39 }
 0x20a   : > { %v7002_v56 = vpop.f32.mrf.mxu2 }
 0x20b   : > { %8243 = vst [vmem:[#allocation101_spill] sm:$0xff] %v7002_v56  ;;  %v7004_v59 = vpop.f32.mrf.mxu3  ;;  %v1625_v20 = vpop.f32.mrf.mxu0  ;;  %v5452_v56 = vor.u32 %v5600_v3, %v5451_v2  ;;  %v5559_v3 = vld [vmem:[%s8142_s3 + $0x1b4] sm:$0xf] }
 0x20c   : > { %8244 = vst [vmem:[#allocation102_spill] sm:$0xff] %v7004_v59  ;;  %v7006_v1 = vpop.f32.mrf.mxu1  ;;  %v7009_v39 = vadd.f32 %v1625_v20, %v6830_v38  ;;  %2750 = vmatpush.bf16.msra.mxu2 %v5280_v41  ;;  %v5798_v38 = vld [vmem:[%s5960_s13 + $0xa8] sm:$0xff]  ;;  %v5268_v41 = vor.u32 %v5562_v10, %v5265_v23  ;;  %v5253_v20 = vld [vmem:[%s8142_s3 + $0x1bc] sm:$0xf0] }
 0x20d   : > { %3620 = vmatpush.bf16.msra.mxu3 %v5452_v56  ;;  %v5256_v59 = vor.u32 %v5559_v3, %v5253_v20  ;;  %v5556_v56 = vld [vmem:[%s8142_s3 + $0x19c] sm:$0xf]  ;;  %v5241_v23 = vld [vmem:[%s8142_s3 + $0x1a4] sm:$0xf0]  ;;  %v5553_v3 = vld [vmem:[%s8142_s3 + $0x184] sm:$0xf] }
 0x20e   : > { %8245 = vst [vmem:[#allocation103_spill] sm:$0xff] %v7009_v39  ;;  %1664 = vmatmul.bf16.gmra.mxu0 %v5798_v38  ;;  %1690 = vmatmul.bf16.gmra.mxu1 %v7025_v37 }
 0x20f   : > { %2401 = vmatmul.bf16.gmra.mxu2 %v2257_v18 }
 0x210   : > { %2419 = vmatmul.bf16.gmra.mxu3 %v2257_v18  ;;  %2751 = vmatpush.bf16.msra.mxu2 %v5268_v41  ;;  %v5244_v41 = vor.u32 %v5556_v56, %v5241_v23  ;;  %v5800_v56 = vld [vmem:[%s5960_s13 + $0xb0] sm:$0xff] }
 0x211   : > { %v7062_v23 = vld [vmem:[%s5960_s13 + $0x10] sm:$0xff] }
 0x212   : > { %v7034_v2 = vpop.f32.mrf.mxu2 }
 0x213   : > { %8246 = vst [vmem:[#allocation104_spill] sm:$0xff] %v7034_v2  ;;  %v7036_v38 = vpop.f32.mrf.mxu3  ;;  %v1627_v12 = vpop.f32.mrf.mxu0 }
 0x214   : > { %8247 = vst [vmem:[#allocation105_spill] sm:$0xff] %v7036_v38  ;;  %v959_v39 = vpop.f32.mrf.mxu1  ;;  %v7039_v10 = vadd.f32 %v1627_v12, %v6863_v40  ;;  %2752 = vmatpush.bf16.msra.mxu2 %v5256_v59  ;;  %v5229_v12 = vld [vmem:[%s8142_s3 + $0x18c] sm:$0xf0] }
 0x215   : > { %v5232_v20 = vor.u32 %v5553_v3, %v5229_v12 }
 0x216   : > { %8248 = vst [vmem:[#allocation106_spill] sm:$0xff] %v7039_v10 }
 0x218   : > { %2753 = vmatpush.bf16.msra.mxu2 %v5244_v41 }
 0x21a   : > { %v7053_v40 = vpop.f32.mrf.mxu2 }
 0x21b   : > { %8249 = vst [vmem:[#allocation107_spill] sm:$0xff] %v7053_v40  ;;  %v7055_v59 = vpop.f32.mrf.mxu3  ;;  %v1630_v38 = vpop.f32.mrf.mxu0 }
 0x21c   : > { %8250 = vst [vmem:[#allocation108_spill] sm:$0xff] %v7055_v59  ;;  %v962_v2 = vpop.f32.mrf.mxu1  ;;  %v7058_v10 = vadd.f32 %v1630_v38, %v6900_v63  ;;  %2754 = vmatpush.bf16.msra.mxu2 %v5232_v20  ;;  %v5431_v38 = vld [vmem:[%s8142_s3 + $0x210] sm:$0xf]  ;;  %v5596_v20 = vld [vmem:[%s8142_s3 + $0x218] sm:$0xf0] }
 0x21e   : > { %8251 = vst [vmem:[#allocation109_spill] sm:$0xff] %v7058_v10  ;;  %1669 = vmatmul.bf16.gmra.mxu0 %v5800_v56  ;;  %1695 = vmatmul.bf16.gmra.mxu1 %v7062_v23  ;;  %v5432_v56 = vor.u32 %v5596_v20, %v5431_v38 }
 0x21f   : > { %2432 = vmatmul.bf16.vlgmr.msrb.gmra.mxu2 %v6956_v19 }
 0x220   : > { %2629 = vmatmul.bf16.vlgmr.msrb.gmra.mxu3 %v6969_v0  ;;  %3585 = vmatpush.bf16.msrb.mxu1 %v5432_v56 }
 0x222   : > { %v7067_v41 = vpop.f32.mrf.mxu2 }
 0x223   : > { %8252 = vst [vmem:[#allocation110_spill] sm:$0xff] %v7067_v41  ;;  %v7069_v3 = vpop.f32.mrf.mxu3  ;;  %v1632_v63 = vpop.f32.mrf.mxu0 }
 0x224   : > { %8253 = vst [vmem:[#allocation111_spill] sm:$0xff] %v7069_v3  ;;  %v964_v12 = vpop.f32.mrf.mxu1  ;;  %v7078_v19 = vadd.f32 %v1632_v63, %v6953_v52 }
 0x226   : > { %8254 = vst [vmem:[#allocation112_spill] sm:$0xff] %v7078_v19  ;;  %v7132_v19 = vld [vmem:[%s5960_s13 + $0x28] sm:$0xff] }
 0x22a   : > { %v7080_v40 = vpop.f32.mrf.mxu2 }
 0x22b   : > { %8255 = vst [vmem:[#allocation113_spill] sm:$0xff] %v7080_v40  ;;  %v7082_v41 = vpop.f32.mrf.mxu3  ;;  %v1635_v59 = vpop.f32.mrf.mxu0 }
 0x22c   : > { %8256 = vst [vmem:[#allocation114_spill] sm:$0xff] %v7082_v41  ;;  %v967_v3 = vpop.f32.mrf.mxu1  ;;  %v7085_v10 = vadd.f32 %v1635_v59, %v6984_v55 }
 0x22e   : > { %8257 = vst [vmem:[#allocation115_spill] sm:$0xff] %v7085_v10  ;;  %1673 = vmatmul.bf16.gmra.mxu0 %v5802_v11  ;;  %1700 = vmatmul.bf16.gmra.mxu1 %v7089_v36  ;;  %v7113_v10 = vld [vmem:[%s5960_s13 + $0x20] sm:$0xff] }
 0x22f   : > { %2437 = vmatmul.bf16.gmra.mxu2 %v2257_v18  ;;  %v5439_v18 = vld [vmem:[%s8142_s3 + $0x218] sm:$0xf] }
 0x230   : > { %2632 = vmatmul.bf16.gmra.mxu3 %v7025_v37 }
 0x232   : > { %v7093_v52 = vpop.f32.mrf.mxu2 }
 0x233   : > { %8258 = vst [vmem:[#allocation116_spill] sm:$0xff] %v7093_v52  ;;  %v7095_v63 = vpop.f32.mrf.mxu3  ;;  %v1637_v20 = vpop.f32.mrf.mxu0  ;;  %v5597_v52 = vld [vmem:[%s8142_s3 + $0x220] sm:$0xf0] }
 0x234   : > { %8259 = vst [vmem:[#allocation117_spill] sm:$0xff] %v7095_v63  ;;  %v969_v38 = vpop.f32.mrf.mxu1  ;;  %v7098_v56 = vadd.f32 %v1637_v20, %v7006_v1  ;;  %v5440_v63 = vor.u32 %v5597_v52, %v5439_v18 }
 0x236   : > { %8260 = vst [vmem:[#allocation118_spill] sm:$0xff] %v7098_v56  ;;  %3621 = vmatpush.bf16.msra.mxu3 %v5440_v63 }
 0x23a   : > { %v7100_v55 = vpop.f32.mrf.mxu2 }
 0x23b   : > { %8261 = vst [vmem:[#allocation119_spill] sm:$0xff] %v7100_v55  ;;  %v7102_v11 = vpop.f32.mrf.mxu3  ;;  %v1640_v40 = vpop.f32.mrf.mxu0 }
 0x23c   : > { %8262 = vst [vmem:[#allocation120_spill] sm:$0xff] %v7102_v11  ;;  %v972_v59 = vpop.f32.mrf.mxu1  ;;  %v7104_v41 = vadd.f32 %v1640_v40, %v959_v39 }
 0x23e   : > { %8263 = vst [vmem:[#allocation121_spill] sm:$0xff] %v7104_v41  ;;  %1705 = vmatmul.bf16.gmra.mxu1 %v7113_v10  ;;  %2881 = vmatmul.bf16.vlgmr.msra.gmra.mxu0 %v6969_v0 }
 0x23f   : > { %2755 = vmatmul.bf16.vlgmr.msra.gmra.mxu2 %v6969_v0 }
 0x240   : > { %2636 = vmatmul.bf16.gmra.mxu3 %v7062_v23 }
 0x242   : > { %v7119_v1 = vpop.f32.mrf.mxu2 }
 0x243   : > { %8264 = vst [vmem:[#allocation122_spill] sm:$0xff] %v7119_v1  ;;  %v7121_v39 = vpop.f32.mrf.mxu3  ;;  %v1642_v20 = vpop.f32.mrf.mxu0 }
 0x244   : > { %8265 = vst [vmem:[#allocation123_spill] sm:$0xff] %v7121_v39  ;;  %v974_v40 = vpop.f32.mrf.mxu1  ;;  %v7123_v55 = vadd.f32 %v1642_v20, %v962_v2 }
 0x246   : > { %8266 = vst [vmem:[#allocation124_spill] sm:$0xff] %v7123_v55  ;;  %v7197_v55 = vld [vmem:[%s5960_s13 + $0x40] sm:$0xff] }
 0x24a   : > { %v7125_v52 = vpop.f32.mrf.mxu2 }
 0x24b   : > { %8267 = vst [vmem:[#allocation125_spill] sm:$0xff] %v7125_v52  ;;  %v7127_v18 = vpop.f32.mrf.mxu3  ;;  %v1645_v41 = vpop.f32.mrf.mxu0 }
 0x24c   : > { %8268 = vst [vmem:[#allocation126_spill] sm:$0xff] %v7127_v18  ;;  %v977_v11 = vpop.f32.mrf.mxu1  ;;  %v7129_v56 = vadd.f32 %v1645_v41, %v964_v12  ;;  %v5419_v41 = vld [vmem:[%s8142_s3 + $0x1f8] sm:$0xf]  ;;  %v5593_v12 = vld [vmem:[%s8142_s3 + $0x200] sm:$0xf0] }
 0x24d   : > { %v5420_v52 = vor.u32 %v5593_v12, %v5419_v41 }
 0x24e   : > { %8269 = vst [vmem:[#allocation127_spill] sm:$0xff] %v7129_v56  ;;  %1710 = vmatmul.bf16.gmra.mxu1 %v7132_v19  ;;  %2884 = vmatmul.bf16.gmra.mxu0 %v7025_v37 }
 0x24f   : > { %2758 = vmatmul.bf16.gmra.mxu2 %v7025_v37  ;;  %3586 = vmatpush.bf16.msrb.mxu1 %v5420_v52 }
 0x250   : > { %2641 = vmatmul.bf16.gmra.mxu3 %v7089_v36 }
 0x252   : > { %v7138_v0 = vpop.f32.mrf.mxu2 }
 0x253   : > { %8270 = vst [vmem:[#allocation128_spill] sm:$0xff] %v7138_v0  ;;  %v7140_v2 = vpop.f32.mrf.mxu3  ;;  %v1647_v20 = vpop.f32.mrf.mxu0 }
 0x254   : > { %8271 = vst [vmem:[#allocation129_spill] sm:$0xff] %v7140_v2  ;;  %v979_v63 = vpop.f32.mrf.mxu1  ;;  %v7148_v18 = vadd.f32 %v1647_v20, %v967_v3  ;;  %v7157_v2 = vld [vmem:[%s5960_s13 + $0x30] sm:$0xff] }
 0x256   : > { %8272 = vst [vmem:[#allocation130_spill] sm:$0xff] %v7148_v18 }
 0x25a   : > { %v7150_v1 = vpop.f32.mrf.mxu2 }
 0x25b   : > { %8273 = vst [vmem:[#allocation131_spill] sm:$0xff] %v7150_v1  ;;  %v7152_v37 = vpop.f32.mrf.mxu3  ;;  %v1650_v39 = vpop.f32.mrf.mxu0 }
 0x25c   : > { %8274 = vst [vmem:[#allocation132_spill] sm:$0xff] %v7152_v37  ;;  %v982_v0 = vpop.f32.mrf.mxu1  ;;  %v7154_v56 = vadd.f32 %v1650_v39, %v969_v38  ;;  %v5427_v37 = vld [vmem:[%s8142_s3 + $0x200] sm:$0xf] }
 0x25e   : > { %8275 = vst [vmem:[#allocation133_spill] sm:$0xff] %v7154_v56  ;;  %1715 = vmatmul.bf16.gmra.mxu1 %v7157_v2  ;;  %2888 = vmatmul.bf16.gmra.mxu0 %v7062_v23 }
 0x25f   : > { %2762 = vmatmul.bf16.gmra.mxu2 %v7062_v23  ;;  %v5594_v23 = vld [vmem:[%s8142_s3 + $0x208] sm:$0xf0] }
 0x260   : > { %2646 = vmatmul.bf16.gmra.mxu3 %v7113_v10 }
 0x262   : > { %v7163_v3 = vpop.f32.mrf.mxu2 }
 0x263   : > { %8276 = vst [vmem:[#allocation134_spill] sm:$0xff] %v7163_v3  ;;  %v7165_v52 = vpop.f32.mrf.mxu3  ;;  %v1652_v12 = vpop.f32.mrf.mxu0  ;;  %v5428_v3 = vor.u32 %v5594_v23, %v5427_v37 }
 0x264   : > { %8277 = vst [vmem:[#allocation135_spill] sm:$0xff] %v7165_v52  ;;  %v984_v41 = vpop.f32.mrf.mxu1  ;;  %v7167_v20 = vadd.f32 %v1652_v12, %v972_v59  ;;  %v7180_v52 = vld [vmem:[%s5960_s13 + $0x38] sm:$0xff] }
 0x265   : > { %3622 = vmatpush.bf16.msra.mxu3 %v5428_v3 }
 0x266   : > { %8278 = vst [vmem:[#allocation136_spill] sm:$0xff] %v7167_v20 }
 0x26a   : > { %v7169_v38 = vpop.f32.mrf.mxu2 }
 0x26b   : > { %8279 = vst [vmem:[#allocation137_spill] sm:$0xff] %v7169_v38  ;;  %v1546_v39 = vpop.f32.mrf.mxu3  ;;  %v1655_v56 = vpop.f32.mrf.mxu0 }
 0x26c   : > { %v987_v1 = vpop.f32.mrf.mxu1  ;;  %v7171_v18 = vadd.f32 %v1655_v56, %v974_v40 }
 0x26e   : > { %8280 = vst [vmem:[#allocation138_spill] sm:$0xff] %v7171_v18  ;;  %1720 = vmatmul.bf16.gmra.mxu1 %v7180_v52  ;;  %2893 = vmatmul.bf16.gmra.mxu0 %v7089_v36 }
 0x26f   : > { %2767 = vmatmul.bf16.gmra.mxu2 %v7089_v36 }
 0x270   : > { %2651 = vmatmul.bf16.gmra.mxu3 %v7132_v19 }
 0x272   : > { %v7186_v56 = vpop.f32.mrf.mxu2 }
 0x273   : > { %8281 = vst [vmem:[#allocation139_spill] sm:$0xff] %v7186_v56  ;;  %v1548_v59 = vpop.f32.mrf.mxu3  ;;  %v1657_v12 = vpop.f32.mrf.mxu0 }
 0x274   : > { %v989_v40 = vpop.f32.mrf.mxu1  ;;  %v7188_v39 = vadd.f32 %v1657_v12, %v977_v11 }
 0x276   : > { %8282 = vst [vmem:[#allocation140_spill] sm:$0xff] %v7188_v39 }
 0x27a   : > { %v7190_v37 = vpop.f32.mrf.mxu2 }
 0x27b   : > { %8283 = vst [vmem:[#allocation141_spill] sm:$0xff] %v7190_v37  ;;  %v1549_v23 = vpop.f32.mrf.mxu3  ;;  %v1660_v38 = vpop.f32.mrf.mxu0 }
 0x27c   : > { %v7192_v18 = vpop.f32.mrf.mxu1  ;;  %v7194_v20 = vadd.f32 %v1660_v38, %v979_v63  ;;  %v5407_v63 = vld [vmem:[%s8142_s3 + $0x1e0] sm:$0xf]  ;;  %v5590_v38 = vld [vmem:[%s8142_s3 + $0x1e8] sm:$0xf0] }
 0x27d   : > { %v5408_v23 = vor.u32 %v5590_v38, %v5407_v63 }
 0x27e   : > { %8284 = vst [vmem:[#allocation142_spill] sm:$0xff] %v7194_v20  ;;  %1725 = vmatmul.bf16.gmra.mxu1 %v7197_v55  ;;  %2898 = vmatmul.bf16.gmra.mxu0 %v7113_v10 }
 0x27f   : > { %2772 = vmatmul.bf16.gmra.mxu2 %v7113_v10  ;;  %3587 = vmatpush.bf16.msrb.mxu1 %v5408_v23 }
 0x280   : > { %2656 = vmatmul.bf16.gmra.mxu3 %v7157_v2 }
 0x282   : > { %v7203_v36 = vpop.f32.mrf.mxu2 }
 0x283   : > { %v7205_v11 = vpop.f32.mrf.mxu3  ;;  %v1662_v3 = vpop.f32.mrf.mxu0 }
 0x284   : > { %v7207_v59 = vpop.f32.mrf.mxu1  ;;  %v7215_v12 = vadd.f32 %v1662_v3, %v982_v0 }
 0x286   : > { %8285 = vst [vmem:[#allocation143_spill] sm:$0xff] %v7215_v12 }
 0x28a   : > { %v2399_v10 = vpop.f32.mrf.mxu2 }
 0x28b   : > { %v7217_v20 = vpop.f32.mrf.mxu3  ;;  %v1665_v37 = vpop.f32.mrf.mxu0 }
 0x28c   : > { %v7219_v39 = vpop.f32.mrf.mxu1  ;;  %v7221_v56 = vadd.f32 %v1665_v37, %v984_v41 }
 0x28e   : > { %8286 = vst [vmem:[#allocation144_spill] sm:$0xff] %v7221_v56  ;;  %1730 = vmatmul.bf16.gmra.mxu1 %v7224_v29  ;;  %2903 = vmatmul.bf16.gmra.mxu0 %v7132_v19 }
 0x28f   : > { %2777 = vmatmul.bf16.gmra.mxu2 %v7132_v19  ;;  %v5415_v19 = vld [vmem:[%s8142_s3 + $0x1e8] sm:$0xf] }
 0x290   : > { %2661 = vmatmul.bf16.gmra.mxu3 %v7180_v52 }
 0x292   : > { %v2402_v0 = vpop.f32.mrf.mxu2 }
 0x293   : > { %v7230_v3 = vpop.f32.mrf.mxu3  ;;  %v1667_v63 = vpop.f32.mrf.mxu0 }
 0x294   : > { %v7232_v38 = vpop.f32.mrf.mxu1  ;;  %v7234_v23 = vadd.f32 %v1667_v63, %v987_v1  ;;  %v5591_v1 = vld [vmem:[%s8142_s3 + $0x1f0] sm:$0xf0] }
 0x296   : > { %8287 = vst [vmem:[#allocation145_spill] sm:$0xff] %v7234_v23 }
 0x29a   : > { %v2404_v41 = vpop.f32.mrf.mxu2 }
 0x29b   : > { %v2422_v37 = vpop.f32.mrf.mxu3  ;;  %v1670_v12 = vpop.f32.mrf.mxu0 }
 0x29c   : > { %v7236_v56 = vpop.f32.mrf.mxu1  ;;  %v7238_v7 = vadd.f32 %v1670_v12, %v989_v40  ;;  %v5416_v40 = vor.u32 %v5591_v1, %v5415_v19 }
 0x29e   : > { %8288 = vst [vmem:[#allocation146_spill] sm:$0xff] %v7238_v7  ;;  %1735 = vmatmul.bf16.gmra.mxu1 %v7241_v54  ;;  %2908 = vmatmul.bf16.gmra.mxu0 %v7157_v2 }
 0x29f   : > { %2782 = vmatmul.bf16.gmra.mxu2 %v7157_v2  ;;  %3623 = vmatpush.bf16.msra.mxu3 %v5416_v40 }
 0x2a0   : > { %2666 = vmatmul.bf16.gmra.mxu3 %v7197_v55 }
 0x2a2   : > { %v7253_v12 = vpop.f32.mrf.mxu2 }
 0x2a3   : > { %v2630_v63 = vpop.f32.mrf.mxu3  ;;  %v1672_v41 = vpop.f32.mrf.mxu0 }
 0x2a4   : > { %v7255_v37 = vpop.f32.mrf.mxu1  ;;  %v5587_v41 = vld [vmem:[%s8142_s3 + $0x1d0] sm:$0xf0] }
 0x2aa   : > { %v7257_v7 = vpop.f32.mrf.mxu2 }
 0x2ab   : > { %v2631_v23 = vpop.f32.mrf.mxu3  ;;  %v1674_v2 = vpop.f32.mrf.mxu0 }
 0x2ac   : > { %v7259_v16 = vpop.f32.mrf.mxu1  ;;  %v5395_v23 = vld [vmem:[%s8142_s3 + $0x1c8] sm:$0xf] }
 0x2ad   : > { %v5396_v2 = vor.u32 %v5587_v41, %v5395_v23 }
 0x2ae   : > { %1740 = vmatmul.bf16.gmra.mxu1 %v7262_v9  ;;  %2913 = vmatmul.bf16.gmra.mxu0 %v7180_v52 }
 0x2af   : > { %2787 = vmatmul.bf16.gmra.mxu2 %v7180_v52  ;;  %3588 = vmatpush.bf16.msrb.mxu1 %v5396_v2 }
 0x2b0   : > { %2671 = vmatmul.bf16.gmra.mxu3 %v7224_v29 }
 0x2b2   : > { %v7268_v19 = vpop.f32.mrf.mxu2 }
 0x2b3   : > { %v2633_v1 = vpop.f32.mrf.mxu3  ;;  %v1675_v40 = vpop.f32.mrf.mxu0 }
 0x2b4   : > { %v7270_v63 = vpop.f32.mrf.mxu1  ;;  %v2442_v1 = vadd.f32 %v7203_v36, %v6297_v53  ;;  %v2448_v53 = vadd.f32 %v2402_v0, %v6317_v61 }
 0x2b5   : > { %8289 = vst [vmem:[#allocation147_spill] sm:$0xff] %v7270_v63 }
 0x2ba   : > { %v2440_v17 = vpop.f32.mrf.mxu2 }
 0x2bb   : > { %v2634_v51 = vpop.f32.mrf.mxu3  ;;  %v2882_v52 = vpop.f32.mrf.mxu0  ;;  %v2445_v17 = vadd.f32 %v2399_v10, %v6309_v57 }
 0x2bc   : > { %v7278_v27 = vpop.f32.mrf.mxu1  ;;  %v3134_v40 = vadd.f32 %v2634_v51, %v2442_v1  ;;  %v7299_v1 = vld [vmem:[%s5960_s13 + $0x68] sm:$0xff] }
 0x2bd   : > { %8290 = vst [vmem:[#allocation148_spill] sm:$0xff] %v7278_v27 }
 0x2be   : > { %1745 = vmatmul.bf16.gmra.mxu1 %v7281_v5  ;;  %2918 = vmatmul.bf16.gmra.mxu0 %v7197_v55  ;;  %v3849_v58 = vrot.slane %v3134_v40, 7 }
 0x2bf   : > { %2792 = vmatmul.bf16.gmra.mxu2 %v7197_v55 }
 0x2c0   : > { %2676 = vmatmul.bf16.gmra.mxu3 %v7241_v54 }
 0x2c2   : > { %v2756_v41 = vpop.f32.mrf.mxu2 }
 0x2c3   : > { %v2637_v23 = vpop.f32.mrf.mxu3  ;;  %v2883_v27 = vpop.f32.mrf.mxu0 }
 0x2c4   : > { %v3137_v2 = vadd.f32 %v2637_v23, %v2445_v17  ;;  %v7290_v52 = vpop.f32.mrf.mxu1  ;;  %v5588_v23 = vld [vmem:[%s8142_s3 + $0x1d8] sm:$0xf0] }
 0x2c6   : > { %v3850_v32 = vrot.slane %v3137_v2, 7 }
 0x2c8   : > { %v7293_v44 = vsel %vm3848_vm0, %v3849_v58, %v3850_v32 }
 0x2ca   : > { %v2757_v55 = vpop.f32.mrf.mxu2 }
 0x2cb   : > { %v2639_v36 = vpop.f32.mrf.mxu3  ;;  %v2885_v51 = vpop.f32.mrf.mxu0 }
 0x2cc   : > { %v3140_v63 = vadd.f32 %v2639_v36, %v2448_v53  ;;  %v7296_v57 = vpop.f32.mrf.mxu1  ;;  %v356_v53 = vlaneseq  ;;  %v2447_v36 = vadd.f32 %v7257_v7, %v6462_v4 }
 0x2ce   : > { %v3852_v10 = vrot.slane %v3140_v63, 7  ;;  %1750 = vmatmul.bf16.gmra.mxu1 %v7299_v1  ;;  %2923 = vmatmul.bf16.gmra.mxu0 %v7224_v29  ;;  %v5403_v63 = vld [vmem:[%s8142_s3 + $0x1d0] sm:$0xf] }
 0x2cf   : > { %2797 = vmatmul.bf16.gmra.mxu2 %v7224_v29  ;;  %v5404_v41 = vor.u32 %v5588_v23, %v5403_v63  ;;  %v2444_v29 = vadd.f32 %v7253_v12, %v6441_v45 }
 0x2d0   : > { %2681 = vmatmul.bf16.gmra.mxu3 %v7262_v9  ;;  %v7306_v27 = vsel %vm3848_vm0, %v3850_v32, %v3852_v10  ;;  %v2443_v32 = vadd.f32 %v7205_v11, %v6429_v49  ;;  %v3977_v49 = vsel %vm3848_vm0, 0.0, %v3849_v58 }
 0x2d1   : > { %3624 = vmatpush.bf16.msra.mxu3 %v5404_v41  ;;  %v357_v41 = vshrl.u32 %v356_v53, 7 }
 0x2d2   : > { %v2759_v0 = vpop.f32.mrf.mxu2 }
 0x2d3   : > { %v2642_v61 = vpop.f32.mrf.mxu3  ;;  %v2886_v40 = vpop.f32.mrf.mxu0  ;;  %vm360_vm2 = vcmp.ge.s32.totalorder %v357_v41, 1 }
 0x2d4   : > { %v7308_v17 = vpop.f32.mrf.mxu1  ;;  %v7321_v2 = vadd.f32 %v2642_v61, %v6444_v34  ;;  %v3136_v55 = vadd.f32 %v2886_v40, %v2444_v29  ;;  %v7331_v40 = vld [vmem:[%s5960_s13 + $0x70] sm:$0xff]  ;;  %v2446_v29 = vadd.f32 %v7217_v20, %v6448_v14 }
 0x2d6   : > { %v3854_v34 = vrot.slane %v7321_v2, 7  ;;  %v4090_v4 = vrot.slane %v3136_v55, 1 }
 0x2da   : > { %v2760_v10 = vpop.f32.mrf.mxu2 }
 0x2db   : > { %v2644_v51 = vpop.f32.mrf.mxu3  ;;  %v3135_v63 = vadd.f32 %v2760_v10, %v2443_v32  ;;  %v2889_v45 = vpop.f32.mrf.mxu0  ;;  %v2450_v32 = vadd.f32 %v7268_v19, %v6475_v35 }
 0x2dc   : > { %v3146_v0 = vadd.f32 %v2644_v51, %v6465_v60  ;;  %v7326_v23 = vpop.f32.mrf.mxu1  ;;  %v3139_v11 = vadd.f32 %v2889_v45, %v2447_v36 }
 0x2dd   : > { %v3993_v61 = vadd.f32 %v3977_v49, %v3135_v63  ;;  %v5848_v63 = vmov 0.0  }
 0x2de   : > { %v3855_v12 = vrot.slane %v3146_v0, 7  ;;  %v4091_v7 = vrot.slane %v3139_v11, 1  ;;  %1755 = vmatmul.bf16.gmra.mxu1 %v7331_v40  ;;  %2928 = vmatmul.bf16.gmra.mxu0 %v7241_v54  ;;  %v7350_v45 = vsel %vm360_vm2, 1.0, %v5848_v63 }
 0x2df   : > { %2802 = vmatmul.bf16.gmra.mxu2 %v7241_v54 }
 0x2e0   : > { %2686 = vmatmul.bf16.gmra.mxu3 %v7281_v5  ;;  %v7340_v58 = vsel %vm3848_vm0, %v3854_v34, %v3855_v12  ;;  %v4092_v60 = vsel %vm4089_vm1, %v4090_v4, %v4091_v7 }
 0x2e1   : > { %v4234_v55 = vadd.f32 %v4092_v60, %v3993_v61  ;;  %v359_v61 = vadd.s32 16, %v357_v41  ;;  %v2449_v60 = vadd.f32 %v7230_v3, %v6469_v33  ;;  %v5383_v3 = vld [vmem:[%s8142_s3 + $0x1b0] sm:$0xf] }
 0x2e2   : > { %v2763_v36 = vpop.f32.mrf.mxu2 }
 0x2e3   : > { %v2647_v53 = vpop.f32.mrf.mxu3  ;;  %v3138_v54 = vadd.f32 %v2763_v36, %v2446_v29  ;;  %v2891_v0 = vpop.f32.mrf.mxu0  ;;  %v4282_v35 = vmul.f32 %v7350_v45, %v4234_v55  ;;  %vm365_vm3 = vcmp.le.s32.totalorder %v359_v61, 16  ;;  %v1944_v61 = vadd.f32 %v7207_v59, %v6499_v8 }
 0x2e4   : > { %v3149_v51 = vadd.f32 %v2647_v53, %v6478_v22  ;;  %v7348_v10 = vpop.f32.mrf.mxu1  ;;  %v3142_v49 = vadd.f32 %v2891_v0, %v2450_v32  ;;  %v7378_v0 = vld [vmem:[%s5960_s13 + $0x78] sm:$0xff] }
 0x2e5   : > { %v3994_v14 = vadd.f32 %v7293_v44, %v3138_v54  ;;  %v4479_v32 = vmul.f32 %v4282_v35, %v4282_v35 }
 0x2e6   : > { %v3857_v11 = vrot.slane %v3149_v51, 7  ;;  %v4093_v20 = vrot.slane %v3142_v49, 1  ;;  %v5584_v51 = vld [vmem:[%s8142_s3 + $0x1b8] sm:$0xf0] }
 0x2e7   : > { %v5384_v49 = vor.u32 %v5584_v51, %v5383_v3 }
 0x2e8   : > { %v7355_v19 = vsel %vm3848_vm0, %v3855_v12, %v3857_v11  ;;  %v4094_v22 = vsel %vm4089_vm1, %v4091_v7, %v4093_v20  ;;  %v4218_v11 = vsel %vm4089_vm1, %v4093_v20, 0.0 }
 0x2e9   : > { %v4235_v4 = vadd.f32 %v4094_v22, %v3994_v14  ;;  %v7383_v14 = vsel %vm365_vm3, 1.0, %v5848_v63  ;;  %3589 = vmatpush.bf16.msrb.mxu1 %v5384_v49 }
 0x2ea   : > { %v2765_v29 = vpop.f32.mrf.mxu2 }
 0x2eb   : > { %v2649_v44 = vpop.f32.mrf.mxu3  ;;  %v5604_v12 = vpack.c.bf16 %v4235_v4, %v4282_v35  ;;  %v4426_v53 = vadd.f32 %v4282_v35, %v4235_v4  ;;  %v4480_v36 = vmul.f32 %v4235_v4, %v4235_v4  ;;  %v2894_v41 = vpop.f32.mrf.mxu0  ;;  %v3141_v55 = vadd.f32 %v2765_v29, %v2449_v60 }
 0x2ec   : > { %v7367_v7 = vpop.f32.mrf.mxu1  ;;  %v1941_v35 = vadd.f32 %v7192_v18, %v6482_v24 }
 0x2ed   : > { %5605 = vst [vmem:[%s7365_s8] sm:$0xff] %v5604_v12   ;;  %v4527_v33 = vadd.f32 %v4480_v36, %v4479_v32  ;;  %v3995_v54 = vadd.f32 %v7306_v27, %v3141_v55  ;;  %v7390_v27 = vadd.f32 %v2649_v44, %v6485_v26  ;;  %v3978_v26 = vsel %vm3848_vm0, 0.0, %v3854_v34 }
 0x2ee   : > { %1760 = vmatmul.bf16.gmra.mxu1 %v7378_v0  ;;  %2933 = vmatmul.bf16.gmra.mxu0 %v7262_v9  ;;  %v3145_v20 = vadd.f32 %v2894_v41, %v1941_v35  ;;  %v1947_v34 = vadd.f32 %v7219_v39, %v6506_v25  ;;  %v7418_v39 = vld [vmem:[%s5960_s13 + $0x80] sm:$0xff] }
 0x2ef   : > { %2807 = vmatmul.bf16.gmra.mxu2 %v7262_v9  ;;  %v4236_v22 = vadd.f32 %v4218_v11, %v3995_v54  ;;  %v3859_v8 = vrot.slane %v7390_v27, 7 }
 0x2f0   : > { %2691 = vmatmul.bf16.gmra.mxu3 %v7299_v1  ;;  %v4095_v55 = vrot.slane %v3145_v20, 1 }
 0x2f1   : > { %v4284_v4 = vmul.f32 %v7383_v14, %v4236_v22 }
 0x2f2   : > { %v2768_v60 = vpop.f32.mrf.mxu2 }
 0x2f3   : > { %v2652_v63 = vpop.f32.mrf.mxu3  ;;  %v3144_v9 = vadd.f32 %v2768_v60, %v6547_v30  ;;  %v2896_v24 = vpop.f32.mrf.mxu0  ;;  %v4427_v18 = vadd.f32 %v4426_v53, %v4284_v4  ;;  %v4481_v44 = vmul.f32 %v4284_v4, %v4284_v4 }
 0x2f4   : > { %v3155_v29 = vadd.f32 %v2652_v63, %v6502_v48  ;;  %v7397_v32 = vpop.f32.mrf.mxu1  ;;  %v3148_v12 = vadd.f32 %v2896_v24, %v1944_v61 }
 0x2f5   : > { %v3996_v36 = vadd.f32 %v3978_v26, %v3144_v9  ;;  %v4528_v41 = vadd.f32 %v4527_v33, %v4481_v44 }
 0x2f6   : > { %v3860_v59 = vrot.slane %v3155_v29, 7  ;;  %v4096_v3 = vrot.slane %v3148_v12, 1 }
 0x2f8   : > { %v7406_v48 = vsel %vm3848_vm0, %v3859_v8, %v3860_v59  ;;  %v4097_v30 = vsel %vm4089_vm1, %v4095_v55, %v4096_v3 }
 0x2f9   : > { %v4237_v2 = vadd.f32 %v4097_v30, %v3996_v36 }
 0x2fa   : > { %v2770_v51 = vpop.f32.mrf.mxu2 }
 0x2fb   : > { %v2654_v53 = vpop.f32.mrf.mxu3  ;;  %v4285_v54 = vmul.f32 %v7350_v45, %v4237_v2  ;;  %v3147_v49 = vadd.f32 %v2770_v51, %v6558_v31  ;;  %v2899_v35 = vpop.f32.mrf.mxu0 }
 0x2fc   : > { %v3158_v33 = vadd.f32 %v2654_v53, %v6509_v6  ;;  %v7414_v11 = vpop.f32.mrf.mxu1  ;;  %v3151_v22 = vadd.f32 %v2899_v35, %v1947_v34  ;;  %v1953_v53 = vadd.f32 %v7236_v56, %v6542_v21 }
 0x2fd   : > { %v5609_v61 = vpack.c.bf16 %v4285_v54, %v4284_v4  ;;  %v4482_v20 = vmul.f32 %v4285_v54, %v4285_v54  ;;  %v3997_v60 = vadd.f32 %v7340_v58, %v3147_v49  ;;  %v4428_v25 = vadd.f32 %v4427_v18, %v4285_v54 }
 0x2fe   : > { %v3862_v63 = vrot.slane %v3158_v33, 7  ;;  %v4098_v29 = vrot.slane %v3151_v22, 1  ;;  %1765 = vmatmul.bf16.gmra.mxu1 %v7418_v39  ;;  %2938 = vmatmul.bf16.gmra.mxu0 %v7281_v5 }
 0x2ff   : > { %5721 = vst [vmem:[%s7365_s8 + $0x8] sm:$0xff] %v5609_v61   ;;  %v4529_v6 = vadd.f32 %v4528_v41, %v4482_v20  ;;  %2812 = vmatmul.bf16.gmra.mxu2 %v7281_v5 }
 0x300   : > { %2696 = vmatmul.bf16.gmra.mxu3 %v7331_v40  ;;  %v7426_v31 = vsel %vm3848_vm0, %v3860_v59, %v3862_v63  ;;  %v4099_v4 = vsel %vm4089_vm1, %v4096_v3, %v4098_v29  ;;  %v4219_v5 = vsel %vm4089_vm1, %v4098_v29, 0.0  ;;  %v5391_v59 = vld [vmem:[%s8142_s3 + $0x1b8] sm:$0xf]  ;;  %v5585_v3 = vld [vmem:[%s8142_s3 + $0x1c0] sm:$0xf0]  ;;  %v3979_v63 = vsel %vm3848_vm0, 0.0, %v3859_v8 }
 0x301   : > { %v4238_v58 = vadd.f32 %v4099_v4, %v3997_v60  ;;  %v5392_v2 = vor.u32 %v5585_v3, %v5391_v59  ;;  %v7458_v4 = vld [vmem:[%s5960_s13 + $0x88] sm:$0xff]  ;;  %v1956_v8 = vadd.f32 %v7255_v37, %v6553_v42 }
 0x302   : > { %v2773_v24 = vpop.f32.mrf.mxu2 }
 0x303   : > { %v2657_v9 = vpop.f32.mrf.mxu3  ;;  %v4429_v26 = vadd.f32 %v4428_v25, %v4238_v58  ;;  %v4483_v18 = vmul.f32 %v4238_v58, %v4238_v58  ;;  %v3150_v44 = vadd.f32 %v2773_v24, %v6565_v62  ;;  %v2901_v36 = vpop.f32.mrf.mxu0  ;;  %v1950_v62 = vadd.f32 %v7232_v38, %v6523_v13  ;;  %3625 = vmatpush.bf16.msra.mxu3 %v5392_v2 }
 0x304   : > { %v7430_v12 = vpop.f32.mrf.mxu1  ;;  %v7443_v34 = vadd.f32 %v2657_v9, %v6526_v46 }
 0x305   : > { %v4530_v41 = vadd.f32 %v4529_v6, %v4483_v18  ;;  %v3998_v55 = vadd.f32 %v7355_v19, %v3150_v44  ;;  %v3154_v51 = vadd.f32 %v2901_v36, %v1950_v62 }
 0x306   : > { %v3864_v21 = vrot.slane %v7443_v34, 7 }
 0x307   : > { %v4239_v30 = vadd.f32 %v4219_v5, %v3998_v55  ;;  %v4100_v29 = vrot.slane %v3154_v51, 1 }
 0x309   : > { %v4287_v19 = vmul.f32 %v7383_v14, %v4239_v30 }
 0x30a   : > { %v2775_v33 = vpop.f32.mrf.mxu2 }
 0x30b   : > { %v2659_v54 = vpop.f32.mrf.mxu3  ;;  %v5614_v49 = vpack.c.bf16 %v4287_v19, %v4238_v58  ;;  %v4430_v35 = vadd.f32 %v4429_v26, %v4287_v19  ;;  %v4484_v22 = vmul.f32 %v4287_v19, %v4287_v19  ;;  %v2904_v46 = vpop.f32.mrf.mxu0  ;;  %v3153_v38 = vadd.f32 %v2775_v33, %v6582_v15  ;;  %v8291_v26 = vld [vmem:[#allocation33_spill] sm:$0xff] }
 0x30c   : > { %v3164_v61 = vadd.f32 %v2659_v54, %v6545_v47  ;;  %v7449_v13 = vpop.f32.mrf.mxu1  ;;  %v3157_v20 = vadd.f32 %v2904_v46, %v1953_v53 }
 0x30d   : > { %5722 = vst [vmem:[%s7365_s8 + $0x10] sm:$0xff] %v5614_v49   ;;  %v4531_v56 = vadd.f32 %v4530_v41, %v4484_v22  ;;  %v3999_v25 = vadd.f32 %v3979_v63, %v3153_v38  ;;  %v5371_v22 = vld [vmem:[%s8142_s3 + $0x198] sm:$0xf]  ;;  %v7494_v38 = vld [vmem:[%s5960_s13 + $0x90] sm:$0xff] }
 0x30e   : > { %v3865_v60 = vrot.slane %v3164_v61, 7  ;;  %v4101_v6 = vrot.slane %v3157_v20, 1  ;;  %1770 = vmatmul.bf16.gmra.mxu1 %v7458_v4  ;;  %2943 = vmatmul.bf16.gmra.mxu0 %v7299_v1  ;;  %v5581_v61 = vld [vmem:[%s8142_s3 + $0x1a0] sm:$0xf0]  ;;  %v8292_v63 = vld [vmem:[#allocation34_spill] sm:$0xff] }
 0x30f   : > { %2817 = vmatmul.bf16.gmra.mxu2 %v7299_v1  ;;  %v5372_v20 = vor.u32 %v5581_v61, %v5371_v22 }
 0x310   : > { %2701 = vmatmul.bf16.gmra.mxu3 %v7378_v0  ;;  %v7467_v47 = vsel %vm3848_vm0, %v3864_v21, %v3865_v60  ;;  %v4102_v15 = vsel %vm4089_vm1, %v4100_v29, %v4101_v6  ;;  %v8293_v29 = vld [vmem:[#allocation35_spill] sm:$0xff] }
 0x311   : > { %v4240_v27 = vadd.f32 %v4102_v15, %v3999_v25  ;;  %3590 = vmatpush.bf16.msrb.mxu1 %v5372_v20  ;;  %v8294_v25 = vld [vmem:[#allocation147_spill] sm:$0xff] }
 0x312   : > { %v2778_v9 = vpop.f32.mrf.mxu2 }
 0x313   : > { %v2662_v58 = vpop.f32.mrf.mxu3  ;;  %v4288_v24 = vmul.f32 %v7350_v45, %v4240_v27  ;;  %v3156_v44 = vadd.f32 %v2778_v9, %v6589_v28  ;;  %v2906_v36 = vpop.f32.mrf.mxu0  ;;  %v8295_v9 = vld [vmem:[#allocation36_spill] sm:$0xff] }
 0x314   : > { %v3167_v18 = vadd.f32 %v2662_v58, %v8291_v26  ;;  %v7475_v1 = vpop.f32.mrf.mxu1  ;;  %v3160_v41 = vadd.f32 %v2906_v36, %v1956_v8  ;;  %v8296_v26 = vld [vmem:[#allocation43_spill] sm:$0xff] }
 0x315   : > { %v4431_v55 = vadd.f32 %v4430_v35, %v4288_v24  ;;  %v4485_v5 = vmul.f32 %v4288_v24, %v4288_v24  ;;  %v4000_v3 = vadd.f32 %v7406_v48, %v3156_v44  ;;  %v3980_v44 = vsel %vm3848_vm0, 0.0, %v3864_v21  ;;  %v8298_v21 = vld [vmem:[#allocation148_spill] sm:$0xff] }
 0x316   : > { %v3867_v59 = vrot.slane %v3167_v18, 7  ;;  %v4103_v30 = vrot.slane %v3160_v41, 1 }
 0x317   : > { %v4532_v42 = vadd.f32 %v4531_v56, %v4485_v5  ;;  %v1959_v56 = vadd.f32 %v7259_v16, %v8292_v63 }
 0x318   : > { %v7479_v37 = vsel %vm3848_vm0, %v3865_v60, %v3867_v59  ;;  %v4104_v2 = vsel %vm4089_vm1, %v4101_v6, %v4103_v30  ;;  %v1962_v6 = vadd.f32 %v8294_v25, %v6577_v50 }
 0x319   : > { %v4241_v62 = vadd.f32 %v4104_v2, %v4000_v3 }
 0x31a   : > { %v2780_v19 = vpop.f32.mrf.mxu2 }
 0x31b   : > { %v2664_v28 = vpop.f32.mrf.mxu3  ;;  %v5619_v53 = vpack.c.bf16 %v4241_v62, %v4288_v24  ;;  %v4432_v51 = vadd.f32 %v4431_v55, %v4241_v62  ;;  %v4486_v54 = vmul.f32 %v4241_v62, %v4241_v62  ;;  %v2909_v49 = vpop.f32.mrf.mxu0  ;;  %v3159_v35 = vadd.f32 %v2780_v19, %v6612_v43 }
 0x31c   : > { %v7482_v33 = vpop.f32.mrf.mxu1  ;;  %v4220_v43 = vsel %vm4089_vm1, %v4103_v30, 0.0  ;;  %v3163_v27 = vadd.f32 %v2909_v49, %v1959_v56  ;;  %v8299_v49 = vld [vmem:[#allocation38_spill] sm:$0xff] }
 0x31d   : > { %5723 = vst [vmem:[%s7365_s8 + $0x18] sm:$0xff] %v5619_v53   ;;  %v4533_v48 = vadd.f32 %v4532_v42, %v4486_v54  ;;  %v4001_v46 = vadd.f32 %v7426_v31, %v3159_v35  ;;  %v7504_v31 = vadd.f32 %v2664_v28, %v8293_v29  ;;  %v8297_v28 = vld [vmem:[#allocation37_spill] sm:$0xff] }
 0x31e   : > { %1775 = vmatmul.bf16.gmra.mxu1 %v7494_v38  ;;  %2948 = vmatmul.bf16.gmra.mxu0 %v7331_v40  ;;  %v4105_v30 = vrot.slane %v3163_v27, 1  ;;  %v1965_v19 = vadd.f32 %v8298_v21, %v8297_v28  ;;  %v8304_v21 = vld [vmem:[#allocation41_spill] sm:$0xff] }
 0x31f   : > { %2822 = vmatmul.bf16.gmra.mxu2 %v7331_v40  ;;  %v4242_v60 = vadd.f32 %v4220_v43, %v4001_v46  ;;  %v3869_v50 = vrot.slane %v7504_v31, 7 }
 0x320   : > { %2706 = vmatmul.bf16.gmra.mxu3 %v7418_v39 }
 0x321   : > { %v4290_v15 = vmul.f32 %v7383_v14, %v4242_v60 }
 0x322   : > { %v2783_v58 = vpop.f32.mrf.mxu2 }
 0x323   : > { %v2667_v8 = vpop.f32.mrf.mxu3  ;;  %v3162_v40 = vadd.f32 %v2783_v58, %v8296_v26  ;;  %v2911_v16 = vpop.f32.mrf.mxu0  ;;  %v4433_v36 = vadd.f32 %v4432_v51, %v4290_v15  ;;  %v4487_v41 = vmul.f32 %v4290_v15, %v4290_v15 }
 0x324   : > { %v3173_v24 = vadd.f32 %v2667_v8, %v8295_v9  ;;  %v7511_v18 = vpop.f32.mrf.mxu1  ;;  %v3166_v55 = vadd.f32 %v2911_v16, %v1962_v6  ;;  %v7532_v6 = vld [vmem:[%s5960_s13 + $0x98] sm:$0xff] }
 0x325   : > { %v4002_v59 = vadd.f32 %v3980_v44, %v3162_v40  ;;  %v4534_v3 = vadd.f32 %v4533_v48, %v4487_v41  ;;  %v8300_v48 = vld [vmem:[#allocation46_spill] sm:$0xff]  ;;  %v8301_v40 = vld [vmem:[#allocation49_spill] sm:$0xff] }
 0x326   : > { %v3870_v5 = vrot.slane %v3173_v24, 7  ;;  %v4106_v42 = vrot.slane %v3166_v55, 1 }
 0x328   : > { %v7520_v2 = vsel %vm3848_vm0, %v3869_v50, %v3870_v5  ;;  %v4107_v62 = vsel %vm4089_vm1, %v4105_v30, %v4106_v42 }
 0x329   : > { %v4243_v34 = vadd.f32 %v4107_v62, %v4002_v59  ;;  %v5582_v59 = vld [vmem:[%s8142_s3 + $0x1a8] sm:$0xf0] }
 0x32a   : > { %v2785_v51 = vpop.f32.mrf.mxu2 }
 0x32b   : > { %v2669_v53 = vpop.f32.mrf.mxu3  ;;  %v4291_v54 = vmul.f32 %v7350_v45, %v4243_v34  ;;  %v3165_v22 = vadd.f32 %v2785_v51, %v8300_v48  ;;  %v2914_v46 = vpop.f32.mrf.mxu0  ;;  %v8303_v34 = vld [vmem:[#allocation40_spill] sm:$0xff] }
 0x32c   : > { %v3176_v35 = vadd.f32 %v2669_v53, %v8299_v49  ;;  %v7528_v61 = vpop.f32.mrf.mxu1  ;;  %v3169_v20 = vadd.f32 %v2914_v46, %v1965_v19  ;;  %v1971_v19 = vadd.f32 %v7296_v57, %v8304_v21 }
 0x32d   : > { %v5624_v43 = vpack.c.bf16 %v4291_v54, %v4290_v15  ;;  %v4488_v63 = vmul.f32 %v4291_v54, %v4291_v54  ;;  %v4003_v60 = vadd.f32 %v7467_v47, %v3165_v22  ;;  %v4434_v25 = vadd.f32 %v4433_v36, %v4291_v54  ;;  %v8305_v22 = vld [vmem:[#allocation42_spill] sm:$0xff] }
 0x32e   : > { %v3872_v56 = vrot.slane %v3176_v35, 7  ;;  %v4108_v29 = vrot.slane %v3169_v20, 1  ;;  %1780 = vmatmul.bf16.gmra.mxu1 %v7532_v6  ;;  %2953 = vmatmul.bf16.gmra.mxu0 %v7378_v0 }
 0x32f   : > { %5724 = vst [vmem:[%s7365_s8 + $0x20] sm:$0xff] %v5624_v43   ;;  %v4535_v27 = vadd.f32 %v4534_v3, %v4488_v63  ;;  %2827 = vmatmul.bf16.gmra.mxu2 %v7378_v0  ;;  %v8306_v43 = vld [vmem:[#allocation52_spill] sm:$0xff] }
 0x330   : > { %2711 = vmatmul.bf16.gmra.mxu3 %v7458_v4  ;;  %v7540_v15 = vsel %vm3848_vm0, %v3870_v5, %v3872_v56  ;;  %v4109_v8 = vsel %vm4089_vm1, %v4106_v42, %v4108_v29  ;;  %v4221_v0 = vsel %vm4089_vm1, %v4108_v29, 0.0  ;;  %v5379_v5 = vld [vmem:[%s8142_s3 + $0x1a0] sm:$0xf] }
 0x331   : > { %v4244_v47 = vadd.f32 %v4109_v8, %v4003_v60  ;;  %v5380_v30 = vor.u32 %v5582_v59, %v5379_v5  ;;  %v8302_v42 = vld [vmem:[#allocation39_spill] sm:$0xff]  ;;  %v3981_v60 = vsel %vm3848_vm0, 0.0, %v3869_v50 }
 0x332   : > { %v2788_v9 = vpop.f32.mrf.mxu2  ;;  %v1968_v62 = vadd.f32 %v7290_v52, %v8302_v42 }
 0x333   : > { %v2672_v58 = vpop.f32.mrf.mxu3  ;;  %v4435_v24 = vadd.f32 %v4434_v25, %v4244_v47  ;;  %v4489_v26 = vmul.f32 %v4244_v47, %v4244_v47  ;;  %v3168_v16 = vadd.f32 %v2788_v9, %v8301_v40  ;;  %v2916_v36 = vpop.f32.mrf.mxu0  ;;  %3626 = vmatpush.bf16.msra.mxu3 %v5380_v30 }
 0x334   : > { %v7544_v44 = vpop.f32.mrf.mxu1  ;;  %v7557_v28 = vadd.f32 %v2672_v58, %v8303_v34  ;;  %v3172_v53 = vadd.f32 %v2916_v36, %v1968_v62  ;;  %v7572_v58 = vld [vmem:[%s5960_s13 + $0xa0] sm:$0xff] }
 0x335   : > { %v4536_v41 = vadd.f32 %v4535_v27, %v4489_v26  ;;  %v4004_v55 = vadd.f32 %v7479_v37, %v3168_v16 }
 0x336   : > { %v3874_v57 = vrot.slane %v7557_v28, 7  ;;  %v4110_v27 = vrot.slane %v3172_v53, 1  ;;  %v8318_v28 = vld [vmem:[#allocation9_spill] sm:$0xff] }
 0x337   : > { %v4245_v3 = vadd.f32 %v4221_v0, %v4004_v55  ;;  %v8309_v0 = vld [vmem:[#allocation55_spill] sm:$0xff] }
 0x339   : > { %v4293_v37 = vmul.f32 %v7383_v14, %v4245_v3 }
 0x33a   : > { %v2790_v54 = vpop.f32.mrf.mxu2 }
 0x33b   : > { %v2674_v51 = vpop.f32.mrf.mxu3  ;;  %v5629_v49 = vpack.c.bf16 %v4293_v37, %v4244_v47  ;;  %v4436_v35 = vadd.f32 %v4435_v24, %v4293_v37  ;;  %v4490_v48 = vmul.f32 %v4293_v37, %v4293_v37  ;;  %v2919_v20 = vpop.f32.mrf.mxu0  ;;  %v3171_v63 = vadd.f32 %v2790_v54, %v8306_v43  ;;  %v8307_v24 = vld [vmem:[#allocation44_spill] sm:$0xff] }
 0x33c   : > { %v3182_v46 = vadd.f32 %v2674_v51, %v8305_v22  ;;  %v7563_v52 = vpop.f32.mrf.mxu1  ;;  %v3175_v56 = vadd.f32 %v2919_v20, %v1971_v19  ;;  %v1974_v26 = vadd.f32 %v7308_v17, %v8307_v24  ;;  %v8310_v20 = vld [vmem:[#allocation58_spill] sm:$0xff] }
 0x33d   : > { %5725 = vst [vmem:[%s7365_s8 + $0x28] sm:$0xff] %v5629_v49   ;;  %v4537_v29 = vadd.f32 %v4536_v41, %v4490_v48  ;;  %v4005_v8 = vadd.f32 %v3981_v60, %v3171_v63  ;;  %v8308_v41 = vld [vmem:[#allocation45_spill] sm:$0xff]  ;;  %v5359_v63 = vld [vmem:[%s8142_s3 + $0x180] sm:$0xf] }
 0x33e   : > { %v3875_v25 = vrot.slane %v3182_v46, 7  ;;  %v4111_v47 = vrot.slane %v3175_v56, 1  ;;  %1785 = vmatmul.bf16.gmra.mxu1 %v7572_v58  ;;  %2958 = vmatmul.bf16.gmra.mxu0 %v7418_v39  ;;  %v5578_v56 = vld [vmem:[%s8142_s3 + $0x188] sm:$0xf0] }
 0x33f   : > { %2832 = vmatmul.bf16.gmra.mxu2 %v7418_v39 }
 0x340   : > { %2716 = vmatmul.bf16.gmra.mxu3 %v7494_v38  ;;  %v7581_v31 = vsel %vm3848_vm0, %v3874_v57, %v3875_v25  ;;  %v4112_v50 = vsel %vm4089_vm1, %v4110_v27, %v4111_v47  ;;  %v8311_v27 = vld [vmem:[#allocation3_spill] sm:$0xff] }
 0x341   : > { %v4246_v9 = vadd.f32 %v4112_v50, %v4005_v8  ;;  %v8312_v8 = vld [vmem:[#allocation48_spill] sm:$0xff] }
 0x342   : > { %v2793_v16 = vpop.f32.mrf.mxu2 }
 0x343   : > { %v2677_v40 = vpop.f32.mrf.mxu3  ;;  %v4294_v36 = vmul.f32 %v7350_v45, %v4246_v9  ;;  %v3174_v5 = vadd.f32 %v2793_v16, %v8309_v0  ;;  %v2921_v59 = vpop.f32.mrf.mxu0  ;;  %v8313_v9 = vld [vmem:[#allocation47_spill] sm:$0xff] }
 0x344   : > { %v3185_v55 = vadd.f32 %v2677_v40, %v8308_v41  ;;  %v7589_v39 = vpop.f32.mrf.mxu1  ;;  %v3178_v3 = vadd.f32 %v2921_v59, %v1974_v26  ;;  %v1977_v24 = vadd.f32 %v7326_v23, %v8313_v9  ;;  %v8314_v26 = vld [vmem:[#allocation6_spill] sm:$0xff]  ;;  %v8315_v40 = vld [vmem:[#allocation51_spill] sm:$0xff] }
 0x345   : > { %v4437_v30 = vadd.f32 %v4436_v35, %v4294_v36  ;;  %v4491_v42 = vmul.f32 %v4294_v36, %v4294_v36  ;;  %v4006_v34 = vadd.f32 %v7520_v2, %v3174_v5  ;;  %v1987_v16 = vadd.f32 %v8315_v40, %v8314_v26  ;;  %v8316_v41 = vld [vmem:[#allocation50_spill] sm:$0xff] }
 0x346   : > { %v3877_v62 = vrot.slane %v3185_v55, 7  ;;  %v4113_v37 = vrot.slane %v3178_v3, 1  ;;  %v1980_v55 = vadd.f32 %v7348_v10, %v8316_v41 }
 0x347   : > { %v4538_v17 = vadd.f32 %v4537_v29, %v4491_v42  ;;  %v7608_v29 = vld [vmem:[%s5960_s13 + $0xa8] sm:$0xff] }
 0x348   : > { %v7593_v21 = vsel %vm3848_vm0, %v3875_v25, %v3877_v62  ;;  %v4114_v19 = vsel %vm4089_vm1, %v4111_v47, %v4113_v37  ;;  %v5360_v25 = vor.u32 %v5578_v56, %v5359_v63  ;;  %v1984_v47 = vadd.f32 %v8312_v8, %v8311_v27  ;;  %v8320_v63 = vld [vmem:[#allocation53_spill] sm:$0xff]  ;;  %v8321_v8 = vld [vmem:[#allocation64_spill] sm:$0xff] }
 0x349   : > { %v4247_v53 = vadd.f32 %v4114_v19, %v4006_v34  ;;  %v4222_v50 = vsel %vm4089_vm1, %v4113_v37, 0.0  ;;  %v3982_v34 = vsel %vm3848_vm0, 0.0, %v3874_v57  ;;  %v1983_v56 = vadd.f32 %v7367_v7, %v8320_v63  ;;  %v7649_v7 = vld [vmem:[%s5960_s13 + $0xb0] sm:$0xff] }
 0x34a   : > { %v2795_v54 = vpop.f32.mrf.mxu2  ;;  %3591 = vmatpush.bf16.msrb.mxu1 %v5360_v25  ;;  %v8324_v63 = vld [vmem:[#allocation57_spill] sm:$0xff] }
 0x34b   : > { %v2679_v51 = vpop.f32.mrf.mxu3  ;;  %v5634_v49 = vpack.c.bf16 %v4247_v53, %v4294_v36  ;;  %v4438_v48 = vadd.f32 %v4437_v30, %v4247_v53  ;;  %v4492_v22 = vmul.f32 %v4247_v53, %v4247_v53  ;;  %v2924_v46 = vpop.f32.mrf.mxu0  ;;  %v3177_v43 = vadd.f32 %v2795_v54, %v8310_v20 }
 0x34c   : > { %v7596_v35 = vpop.f32.mrf.mxu1  ;;  %v7621_v36 = vadd.f32 %v2679_v51, %v1984_v47  ;;  %v3181_v5 = vadd.f32 %v2924_v46, %v1977_v24 }
 0x34d   : > { %5726 = vst [vmem:[%s7365_s8 + $0x30] sm:$0xff] %v5634_v49   ;;  %v4539_v2 = vadd.f32 %v4538_v17, %v4492_v22  ;;  %v4007_v60 = vadd.f32 %v7540_v15, %v3177_v43  ;;  %v8319_v43 = vld [vmem:[#allocation54_spill] sm:$0xff] }
 0x34e   : > { %1790 = vmatmul.bf16.gmra.mxu1 %v7608_v29  ;;  %2963 = vmatmul.bf16.gmra.mxu0 %v7458_v4  ;;  %v3879_v10 = vrot.slane %v7621_v36, 7  ;;  %v4115_v49 = vrot.slane %v3181_v5, 1  ;;  %v1990_v57 = vadd.f32 %v8319_v43, %v8318_v28  ;;  %v5598_v5 = vld [vmem:[%s8142_s3 + $0x22c] sm:$0xf]  ;;  %v5367_v43 = vld [vmem:[%s8142_s3 + $0x188] sm:$0xf] }
 0x34f   : > { %2837 = vmatmul.bf16.gmra.mxu2 %v7458_v4  ;;  %v4248_v15 = vadd.f32 %v4222_v50, %v4007_v60  ;;  %v8317_v4 = vld [vmem:[#allocation61_spill] sm:$0xff]  ;;  %v5586_v36 = vld [vmem:[%s8142_s3 + $0x1cc] sm:$0xf] }
 0x350   : > { %2721 = vmatmul.bf16.gmra.mxu3 %v7532_v6 }
 0x351   : > { %v4296_v0 = vmul.f32 %v7383_v14, %v4248_v15 }
 0x352   : > { %v2798_v3 = vpop.f32.mrf.mxu2 }
 0x353   : > { %v2682_v59 = vpop.f32.mrf.mxu3  ;;  %v3180_v42 = vadd.f32 %v2798_v3, %v8317_v4  ;;  %v2926_v23 = vpop.f32.mrf.mxu0  ;;  %v4439_v37 = vadd.f32 %v4438_v48, %v4296_v0  ;;  %v4493_v17 = vmul.f32 %v4296_v0, %v4296_v0 }
 0x354   : > { %v3191_v30 = vadd.f32 %v2682_v59, %v1987_v16  ;;  %v7627_v62 = vpop.f32.mrf.mxu1  ;;  %v3184_v19 = vadd.f32 %v2926_v23, %v1980_v55 }
 0x355   : > { %v4008_v51 = vadd.f32 %v3982_v34, %v3180_v42  ;;  %v4540_v54 = vadd.f32 %v4539_v2, %v4493_v17  ;;  %v5595_v34 = vld [vmem:[%s8142_s3 + $0x214] sm:$0xf] }
 0x356   : > { %v3880_v53 = vrot.slane %v3191_v30, 7  ;;  %v4116_v22 = vrot.slane %v3184_v19, 1  ;;  %v8322_v19 = vld [vmem:[#allocation67_spill] sm:$0xff] }
 0x358   : > { %v7636_v46 = vsel %vm3848_vm0, %v3879_v10, %v3880_v53  ;;  %v4117_v20 = vsel %vm4089_vm1, %v4115_v49, %v4116_v22 }
 0x359   : > { %v4249_v48 = vadd.f32 %v4117_v20, %v4008_v51 }
 0x35a   : > { %v2800_v25 = vpop.f32.mrf.mxu2 }
 0x35b   : > { %v2684_v60 = vpop.f32.mrf.mxu3  ;;  %v4297_v2 = vmul.f32 %v7350_v45, %v4249_v48  ;;  %v3183_v47 = vadd.f32 %v2800_v25, %v8321_v8  ;;  %v2929_v9 = vpop.f32.mrf.mxu0  ;;  %v8323_v48 = vld [vmem:[#allocation12_spill] sm:$0xff] }
 0x35c   : > { %v3194_v27 = vadd.f32 %v2684_v60, %v1990_v57  ;;  %v7645_v50 = vpop.f32.mrf.mxu1  ;;  %v3187_v24 = vadd.f32 %v2929_v9, %v1983_v56  ;;  %v5579_v57 = vld [vmem:[%s8142_s3 + $0x190] sm:$0xf0]  ;;  %v1993_v56 = vadd.f32 %v8324_v63, %v8323_v48  ;;  %v8326_v9 = vld [vmem:[#allocation15_spill] sm:$0xff] }
 0x35d   : > { %v5639_v15 = vpack.c.bf16 %v4297_v2, %v4296_v0  ;;  %v4494_v26 = vmul.f32 %v4297_v2, %v4297_v2  ;;  %v4009_v16 = vadd.f32 %v7581_v31, %v3183_v47  ;;  %v4440_v55 = vadd.f32 %v4439_v37, %v4297_v2  ;;  %v5445_v0 = vld [vmem:[%s8142_s3 + $0x234] sm:$0xf0]  ;;  %v5433_v37 = vld [vmem:[%s8142_s3 + $0x21c] sm:$0xf0]  ;;  %v5421_v2 = vld [vmem:[%s8142_s3 + $0x204] sm:$0xf0] }
 0x35e   : > { %v3882_v40 = vrot.slane %v3194_v27, 7  ;;  %v4118_v41 = vrot.slane %v3187_v24, 1  ;;  %1795 = vmatmul.bf16.gmra.mxu1 %v7649_v7  ;;  %2968 = vmatmul.bf16.gmra.mxu0 %v7494_v38  ;;  %v5448_v3 = vor.u32 %v5598_v5, %v5445_v0  ;;  %v5436_v49 = vor.u32 %v5595_v34, %v5433_v37  ;;  %v8325_v27 = vld [vmem:[#allocation56_spill] sm:$0xff]  ;;  %v8329_v37 = vld [vmem:[#allocation70_spill] sm:$0xff] }
 0x35f   : > { %5727 = vst [vmem:[%s7365_s8 + $0x38] sm:$0xff] %v5639_v15   ;;  %v4541_v59 = vadd.f32 %v4540_v54, %v4494_v26  ;;  %2842 = vmatmul.bf16.gmra.mxu2 %v7494_v38  ;;  %v5368_v25 = vor.u32 %v5579_v57, %v5367_v43  ;;  %v1986_v8 = vadd.f32 %v7397_v32, %v8325_v27  ;;  %v8327_v24 = vld [vmem:[#allocation60_spill] sm:$0xff]  ;;  %v5589_v32 = vld [vmem:[%s8142_s3 + $0x1e4] sm:$0xf]  ;;  %v7715_v57 = vld [vmem:[%s5960_s13 + $0xb8] sm:$0xff] }
 0x360   : > { %2726 = vmatmul.bf16.gmra.mxu3 %v7572_v58  ;;  %v7663_v31 = vsel %vm3848_vm0, %v3880_v53, %v3882_v40  ;;  %v4119_v30 = vsel %vm4089_vm1, %v4116_v22, %v4118_v41  ;;  %3602 = vmatpush.bf16.msra.mxu1 %v5448_v3  ;;  %v4223_v28 = vsel %vm4089_vm1, %v4118_v41, 0.0  ;;  %v1996_v15 = vadd.f32 %v8327_v24, %v8326_v9  ;;  %v5385_v9 = vld [vmem:[%s8142_s3 + $0x1bc] sm:$0xf0] }
 0x361   : > { %v4250_v4 = vadd.f32 %v4119_v30, %v4009_v16  ;;  %3627 = vmatpush.bf16.msra.mxu3 %v5368_v25  ;;  %v8328_v16 = vld [vmem:[#allocation59_spill] sm:$0xff] }
 0x362   : > { %v2803_v23 = vpop.f32.mrf.mxu2  ;;  %v1989_v41 = vadd.f32 %v7414_v11, %v8328_v16 }
 0x363   : > { %v2687_v42 = vpop.f32.mrf.mxu3  ;;  %v4441_v17 = vadd.f32 %v4440_v55, %v4250_v4  ;;  %v4495_v38 = vmul.f32 %v4250_v4, %v4250_v4  ;;  %v3186_v53 = vadd.f32 %v2803_v23, %v8322_v19  ;;  %v2931_v54 = vpop.f32.mrf.mxu0 }
 0x364   : > { %v7673_v51 = vpop.f32.mrf.mxu1  ;;  %3603 = vmatpush.bf16.msra.mxu1 %v5436_v49  ;;  %v7695_v26 = vadd.f32 %v2687_v42, %v1993_v56  ;;  %v3190_v55 = vadd.f32 %v2931_v54, %v1986_v8  ;;  %v3983_v54 = vsel %vm3848_vm0, 0.0, %v3879_v10  ;;  %v5397_v10 = vld [vmem:[%s8142_s3 + $0x1d4] sm:$0xf0] }
 0x365   : > { %v4542_v22 = vadd.f32 %v4541_v59, %v4495_v38  ;;  %v4010_v20 = vadd.f32 %v7593_v21, %v3186_v53  ;;  %v5592_v21 = vld [vmem:[%s8142_s3 + $0x1fc] sm:$0xf]  ;;  %v5409_v59 = vld [vmem:[%s8142_s3 + $0x1ec] sm:$0xf0]  ;;  %v5400_v63 = vor.u32 %v5586_v36, %v5397_v10 }
 0x366   : > { %v5424_v47 = vor.u32 %v5592_v21, %v5421_v2  ;;  %v5412_v53 = vor.u32 %v5589_v32, %v5409_v59  ;;  %v3884_v49 = vrot.slane %v7695_v26, 7  ;;  %v8330_v56 = vld [vmem:[#allocation18_spill] sm:$0xff] }
 0x367   : > { %v4251_v60 = vadd.f32 %v4223_v28, %v4010_v20  ;;  %v8332_v2 = vld [vmem:[#allocation62_spill] sm:$0xff] }
 0x368   : > { %3604 = vmatpush.bf16.msra.mxu1 %v5424_v47  ;;  %v1992_v27 = vadd.f32 %v7430_v12, %v8332_v2  ;;  %v8335_v2 = vld [vmem:[#allocation21_spill] sm:$0xff] }
 0x369   : > { %v4299_v40 = vmul.f32 %v7383_v14, %v4251_v60  ;;  %v8331_v60 = vld [vmem:[#allocation63_spill] sm:$0xff] }
 0x36a   : > { %v2805_v0 = vpop.f32.mrf.mxu2  ;;  %v1999_v25 = vadd.f32 %v8331_v60, %v8330_v56 }
 0x36b   : > { %v2689_v5 = vpop.f32.mrf.mxu3  ;;  %v5644_v3 = vpack.c.bf16 %v4299_v40, %v4250_v4  ;;  %v4442_v30 = vadd.f32 %v4441_v17, %v4299_v40  ;;  %v4496_v42 = vmul.f32 %v4299_v40, %v4299_v40  ;;  %v2934_v11 = vpop.f32.mrf.mxu0  ;;  %v3189_v38 = vadd.f32 %v2805_v0, %v8329_v37  ;;  %v8333_v40 = vld [vmem:[#allocation73_spill] sm:$0xff] }
 0x36c   : > { %v3200_v23 = vadd.f32 %v2689_v5, %v1996_v15  ;;  %v7706_v34 = vpop.f32.mrf.mxu1  ;;  %v3193_v19 = vadd.f32 %v2934_v11, %v1989_v41  ;;  %v4120_v17 = vrot.slane %v3190_v55, 1  ;;  %3605 = vmatpush.bf16.msra.mxu1 %v5412_v53  ;;  %v5373_v11 = vld [vmem:[%s8142_s3 + $0x1a4] sm:$0xf0] }
 0x36d   : > { %5728 = vst [vmem:[%s7365_s8 + $0x40] sm:$0xff] %v5644_v3   ;;  %v4543_v20 = vadd.f32 %v4542_v22, %v4496_v42  ;;  %v4011_v28 = vadd.f32 %v3983_v54, %v3189_v38 }
 0x36e   : > { %v3885_v4 = vrot.slane %v3200_v23, 7  ;;  %v4121_v43 = vrot.slane %v3193_v19, 1  ;;  %1799 = vmatmul.bf16.gmra.mxu1 %v7715_v57  ;;  %2973 = vmatmul.bf16.gmra.mxu0 %v7532_v6  ;;  %v5580_v23 = vld [vmem:[%s8142_s3 + $0x19c] sm:$0xf] }
 0x36f   : > { %2847 = vmatmul.bf16.gmra.mxu2 %v7532_v6  ;;  %v5583_v6 = vld [vmem:[%s8142_s3 + $0x1b4] sm:$0xf]  ;;  %v5376_v38 = vor.u32 %v5580_v23, %v5373_v11  ;;  %v428_v11 = vld [vmem:[%s7759_s16 + $0x8] sm:$0xf] }
 0x370   : > { %2731 = vmatmul.bf16.gmra.mxu3 %v7608_v29  ;;  %v7730_v22 = vsel %vm3848_vm0, %v3884_v49, %v3885_v4  ;;  %v4122_v48 = vsel %vm4089_vm1, %v4120_v17, %v4121_v43  ;;  %3606 = vmatpush.bf16.msra.mxu1 %v5400_v63  ;;  %v5388_v5 = vor.u32 %v5583_v6, %v5385_v9  ;;  %v7766_v17 = vld [vmem:[%s7759_s16] sm:$0xff]  ;;  %v8334_v63 = vld [vmem:[#allocation76_spill] sm:$0xff]  ;;  %v8337_v6 = vld [vmem:[#allocation65_spill] sm:$0xff] }
 0x371   : > { %v4252_v21 = vadd.f32 %v4122_v48, %v4011_v28  ;;  %v5361_v28 = vld [vmem:[%s8142_s3 + $0x18c] sm:$0xf0]  ;;  %v1995_v9 = vadd.f32 %v7449_v13, %v8337_v6  ;;  %v8345_v6 = vld [vmem:[#allocation82_spill] sm:$0xff] }
 0x372   : > { %v2808_v47 = vpop.f32.mrf.mxu2 }
 0x373   : > { %v2692_v8 = vpop.f32.mrf.mxu3  ;;  %v4300_v24 = vmul.f32 %v7350_v45, %v4252_v21  ;;  %v3192_v16 = vadd.f32 %v2808_v47, %v8333_v40  ;;  %v2936_v55 = vpop.f32.mrf.mxu0 }
 0x374   : > { %v3203_v15 = vadd.f32 %v2692_v8, %v1999_v25  ;;  %v7745_v41 = vpop.f32.mrf.mxu1  ;;  %v3196_v12 = vadd.f32 %v2936_v55, %v1992_v27  ;;  %3607 = vmatpush.bf16.msra.mxu1 %v5388_v5  ;;  %v8336_v27 = vld [vmem:[#allocation66_spill] sm:$0xff]  ;;  %v8340_v55 = vld [vmem:[#allocation68_spill] sm:$0xff] }
 0x375   : > { %v4443_v0 = vadd.f32 %v4442_v30, %v4300_v24  ;;  %v4497_v32 = vmul.f32 %v4300_v24, %v4300_v24  ;;  %v4012_v3 = vadd.f32 %v7636_v46, %v3192_v16  ;;  %v2002_v8 = vadd.f32 %v8336_v27, %v8335_v2 }
 0x376   : > { %v3887_v59 = vrot.slane %v3203_v15, 7  ;;  %v4123_v42 = vrot.slane %v3196_v12, 1  ;;  %v8339_v15 = vld [vmem:[#allocation69_spill] sm:$0xff]  ;;  %v1998_v12 = vadd.f32 %v7475_v1, %v8340_v55 }
 0x377   : > { %v4544_v37 = vadd.f32 %v4543_v20, %v4497_v32  ;;  %v5577_v20 = vld [vmem:[%s8142_s3 + $0x184] sm:$0xf] }
 0x378   : > { %v7762_v30 = vsel %vm3848_vm0, %v3885_v4, %v3887_v59  ;;  %v4124_v46 = vsel %vm4089_vm1, %v4121_v43, %v4123_v42  ;;  %3608 = vmatpush.bf16.msra.mxu1 %v5376_v38  ;;  %v5364_v60 = vor.u32 %v5577_v20, %v5361_v28  ;;  %v4224_v47 = vsel %vm4089_vm1, %v4123_v42, 0.0 }
 0x379   : > { %v4253_v19 = vadd.f32 %v4124_v46, %v4012_v3 }
 0x37a   : > { %v2810_v54 = vpop.f32.mrf.mxu2 }
 0x37b   : > { %v2694_v53 = vpop.f32.mrf.mxu3  ;;  %v5649_v4 = vpack.c.bf16 %v4253_v19, %v4300_v24  ;;  %v4444_v36 = vadd.f32 %v4443_v0, %v4253_v19  ;;  %v4498_v10 = vmul.f32 %v4253_v19, %v4253_v19  ;;  %v2939_v48 = vpop.f32.mrf.mxu0  ;;  %v3195_v56 = vadd.f32 %v2810_v54, %v8334_v63  ;;  %v8342_v63 = vld [vmem:[#allocation27_spill] sm:$0xff] }
 0x37c   : > { %v7774_v43 = vpop.f32.mrf.mxu1  ;;  %3609 = vmatpush.bf16.msra.mxu1 %v5364_v60  ;;  %v7790_v16 = vadd.f32 %v2694_v53, %v2002_v8  ;;  %v3199_v0 = vadd.f32 %v2939_v48, %v1995_v9  ;;  %v8344_v60 = vld [vmem:[#allocation71_spill] sm:$0xff] }
 0x37d   : > { %5729 = vst [vmem:[%s7365_s8 + $0x48] sm:$0xff] %v5649_v4   ;;  %v4545_v25 = vadd.f32 %v4544_v37, %v4498_v10  ;;  %v4013_v21 = vadd.f32 %v7663_v31, %v3195_v56  ;;  %v8338_v31 = vld [vmem:[#allocation24_spill] sm:$0xff]  ;;  %v3984_v37 = vsel %vm3848_vm0, 0.0, %v3884_v49  ;;  %v3451_v10 = vunpack.c.l.b16 %v428_v11 }
 0x37e   : > { %2978 = vmatmul.bf16.gmra.mxu0 %v7572_v58  ;;  %3592 = vmatmul.bf16.vlgmr.msrb.gmra.mxu1 %v7766_v17  ;;  %v2005_v40 = vadd.f32 %v8339_v15, %v8338_v31  ;;  %v3889_v1 = vrot.slane %v7790_v16, 7  ;;  %v4125_v28 = vrot.slane %v3199_v0, 1  ;;  %v8343_v49 = vld [vmem:[#allocation72_spill] sm:$0xff] }
 0x37f   : > { %2852 = vmatmul.bf16.gmra.mxu2 %v7572_v58  ;;  %v4254_v24 = vadd.f32 %v4224_v47, %v4013_v21  ;;  %v8341_v58 = vld [vmem:[#allocation79_spill] sm:$0xff]  ;;  %v2001_v21 = vadd.f32 %v7482_v33, %v8344_v60 }
 0x380   : > { %2736 = vmatmul.bf16.gmra.mxu3 %v7649_v7 }
 0x381   : > { %v4302_v5 = vmul.f32 %v7383_v14, %v4254_v24 }
 0x382   : > { %v2813_v59 = vpop.f32.mrf.mxu2 }
 0x383   : > { %v2697_v32 = vpop.f32.mrf.mxu3  ;;  %v3198_v42 = vadd.f32 %v2813_v59, %v8341_v58  ;;  %v2941_v13 = vpop.f32.mrf.mxu0  ;;  %v4445_v46 = vadd.f32 %v4444_v36, %v4302_v5  ;;  %v4499_v38 = vmul.f32 %v4302_v5, %v4302_v5  ;;  %v2008_v36 = vadd.f32 %v8343_v49, %v8342_v63  ;;  %v8350_v49 = vld [vmem:[#allocation4_spill] sm:$0xff] }
 0x384   : > { %v3209_v3 = vadd.f32 %v2697_v32, %v2005_v40  ;;  %v7796_v23 = vpop.f32.mrf.mxu1  ;;  %v3202_v19 = vadd.f32 %v2941_v13, %v1998_v12 }
 0x385   : > { %v4014_v54 = vadd.f32 %v3984_v37, %v3198_v42  ;;  %v4546_v20 = vadd.f32 %v4545_v25, %v4499_v38  ;;  %v7813_v25 = vpack.c.b16 %v3451_v10, %v3451_v10  ;;  %v8346_v37 = vld [vmem:[#allocation85_spill] sm:$0xff] }
 0x386   : > { %v3890_v53 = vrot.slane %v3209_v3, 7  ;;  %v4126_v4 = vrot.slane %v3202_v19, 1 }
 0x388   : > { %v7806_v48 = vsel %vm3848_vm0, %v3889_v1, %v3890_v53  ;;  %v4127_v26 = vsel %vm4089_vm1, %v4125_v28, %v4126_v4  ;;  %v8347_v28 = vld [vmem:[#allocation30_spill] sm:$0xff] }
 0x389   : > { %v4255_v56 = vadd.f32 %v4127_v26, %v4014_v54 }
 0x38a   : > { %v2815_v27 = vpop.f32.mrf.mxu2 }
 0x38b   : > { %v2699_v2 = vpop.f32.mrf.mxu3  ;;  %v4303_v8 = vmul.f32 %v7350_v45, %v4255_v56  ;;  %v3201_v9 = vadd.f32 %v2815_v27, %v8345_v6  ;;  %v2944_v31 = vpop.f32.mrf.mxu0 }
 0x38c   : > { %v3212_v47 = vadd.f32 %v2699_v2, %v2008_v36  ;;  %v7817_v24 = vpop.f32.mrf.mxu1  ;;  %v3205_v15 = vadd.f32 %v2944_v31, %v2001_v21  ;;  %v8351_v36 = vld [vmem:[#allocation78_spill] sm:$0xff]  ;;  %v8352_v2 = vld [vmem:[#allocation77_spill] sm:$0xff] }
 0x38d   : > { %v5654_v40 = vpack.c.bf16 %v4303_v8, %v4302_v5  ;;  %v4500_v55 = vmul.f32 %v4303_v8, %v4303_v8  ;;  %v4015_v0 = vadd.f32 %v7730_v22, %v3201_v9  ;;  %v4446_v32 = vadd.f32 %v4445_v46, %v4303_v8 }
 0x38e   : > { %v3892_v12 = vrot.slane %v3212_v47, 7  ;;  %v4128_v33 = vrot.slane %v3205_v15, 1  ;;  %2983 = vmatmul.bf16.gmra.mxu0 %v7608_v29  ;;  %3597 = vmatmul.bf16.gmra.mxu1 %v7813_v25  ;;  %v2014_v56 = vadd.f32 %v8351_v36, %v8350_v49 }
 0x38f   : > { %5730 = vst [vmem:[%s7365_s8 + $0x50] sm:$0xff] %v5654_v40   ;;  %v4547_v59 = vadd.f32 %v4546_v20, %v4500_v55  ;;  %2857 = vmatmul.bf16.gmra.mxu2 %v7608_v29  ;;  %v8353_v55 = vld [vmem:[#allocation88_spill] sm:$0xff] }
 0x390   : > { %2741 = vmatmul.bf16.gmra.mxu3 %v7715_v57  ;;  %v7826_v3 = vsel %vm3848_vm0, %v3890_v53, %v3892_v12  ;;  %v4129_v5 = vsel %vm4089_vm1, %v4126_v4, %v4128_v33  ;;  %v4225_v29 = vsel %vm4089_vm1, %v4128_v33, 0.0  ;;  %v8348_v53 = vld [vmem:[#allocation75_spill] sm:$0xff]  ;;  %v8349_v4 = vld [vmem:[#allocation74_spill] sm:$0xff] }
 0x391   : > { %v4256_v58 = vadd.f32 %v4129_v5, %v4015_v0  ;;  %v2011_v10 = vadd.f32 %v8348_v53, %v8347_v28  ;;  %v2004_v63 = vadd.f32 %v7511_v18, %v8349_v4 }
 0x392   : > { %v2818_v22 = vpop.f32.mrf.mxu2 }
 0x393   : > { %v2702_v42 = vpop.f32.mrf.mxu3  ;;  %v4447_v13 = vadd.f32 %v4446_v32, %v4256_v58  ;;  %v4501_v11 = vmul.f32 %v4256_v58, %v4256_v58  ;;  %v3204_v46 = vadd.f32 %v2818_v22, %v8346_v37  ;;  %v2946_v19 = vpop.f32.mrf.mxu0 }
 0x394   : > { %v7830_v38 = vpop.f32.mrf.mxu1  ;;  %v7840_v60 = vadd.f32 %v2702_v42, %v2011_v10  ;;  %v3208_v27 = vadd.f32 %v2946_v19, %v2004_v63 }
 0x395   : > { %v4548_v54 = vadd.f32 %v4547_v59, %v4501_v11  ;;  %v4016_v20 = vadd.f32 %v7762_v30, %v3204_v46  ;;  %v2007_v30 = vadd.f32 %v7528_v61, %v8352_v2  ;;  %v3985_v61 = vsel %vm3848_vm0, 0.0, %v3889_v1  ;;  %v8355_v1 = vld [vmem:[#allocation81_spill] sm:$0xff]  ;;  %v8356_v46 = vld [vmem:[#allocation80_spill] sm:$0xff] }
 0x396   : > { %v3894_v33 = vrot.slane %v7840_v60, 7  ;;  %v4130_v5 = vrot.slane %v3208_v27, 1  ;;  %v2010_v19 = vadd.f32 %v7544_v44, %v8356_v46 }
 0x397   : > { %v4257_v26 = vadd.f32 %v4225_v29, %v4016_v20 }
 0x399   : > { %v4305_v21 = vmul.f32 %v7383_v14, %v4257_v26 }
 0x39a   : > { %v2820_v47 = vpop.f32.mrf.mxu2 }
 0x39b   : > { %v2704_v8 = vpop.f32.mrf.mxu3  ;;  %v5659_v6 = vpack.c.bf16 %v4305_v21, %v4256_v58  ;;  %v4448_v9 = vadd.f32 %v4447_v13, %v4305_v21  ;;  %v4502_v31 = vmul.f32 %v4305_v21, %v4305_v21  ;;  %v2949_v18 = vpop.f32.mrf.mxu0  ;;  %v3207_v12 = vadd.f32 %v2820_v47, %v8353_v55  ;;  %v8354_v13 = vld [vmem:[#allocation7_spill] sm:$0xff]  ;;  %v8358_v55 = vld [vmem:[#allocation94_spill] sm:$0xff] }
 0x39c   : > { %v3218_v15 = vadd.f32 %v2704_v8, %v2014_v56  ;;  %v7845_v40 = vpop.f32.mrf.mxu1  ;;  %v3211_v0 = vadd.f32 %v2949_v18, %v2007_v30  ;;  %v2017_v11 = vadd.f32 %v8355_v1, %v8354_v13  ;;  %v8363_v13 = vld [vmem:[#allocation87_spill] sm:$0xff] }
 0x39d   : > { %5731 = vst [vmem:[%s7365_s8 + $0x58] sm:$0xff] %v5659_v6   ;;  %v4549_v32 = vadd.f32 %v4548_v54, %v4502_v31  ;;  %v4017_v58 = vadd.f32 %v3985_v61, %v3207_v12 }
 0x39e   : > { %v3895_v59 = vrot.slane %v3218_v15, 7  ;;  %v4131_v42 = vrot.slane %v3211_v0, 1  ;;  %2988 = vmatmul.bf16.gmra.mxu0 %v7649_v7  ;;  %3610 = vmatmul.bf16.vlgmr.msra.gmra.mxu1 %v7766_v17  ;;  %v8359_v0 = vld [vmem:[#allocation10_spill] sm:$0xff] }
 0x39f   : > { %2862 = vmatmul.bf16.gmra.mxu2 %v7649_v7 }
 0x3a0   : > { %3628 = vmatmul.bf16.vlgmr.msra.gmra.mxu3 %v7766_v17  ;;  %v7860_v22 = vsel %vm3848_vm0, %v3894_v33, %v3895_v59  ;;  %v4132_v16 = vsel %vm4089_vm1, %v4130_v5, %v4131_v42  ;;  %v8357_v17 = vld [vmem:[#allocation91_spill] sm:$0xff] }
 0x3a1   : > { %v4258_v37 = vadd.f32 %v4132_v16, %v4017_v58  ;;  %v8361_v5 = vld [vmem:[#allocation83_spill] sm:$0xff]  ;;  %v8362_v16 = vld [vmem:[#allocation13_spill] sm:$0xff] }
 0x3a2   : > { %v2823_v20 = vpop.f32.mrf.mxu2  ;;  %v2013_v58 = vadd.f32 %v7563_v52, %v8361_v5 }
 0x3a3   : > { %v2707_v54 = vpop.f32.mrf.mxu3  ;;  %v4306_v7 = vmul.f32 %v7350_v45, %v4258_v37  ;;  %v3210_v28 = vadd.f32 %v2823_v20, %v8357_v17  ;;  %v2951_v10 = vpop.f32.mrf.mxu0  ;;  %v3986_v17 = vsel %vm3848_vm0, 0.0, %v3894_v33  ;;  %v8368_v33 = vld [vmem:[#allocation89_spill] sm:$0xff] }
 0x3a4   : > { %v3221_v29 = vadd.f32 %v2707_v54, %v2017_v11  ;;  %v7869_v53 = vpop.f32.mrf.mxu1  ;;  %v3214_v26 = vadd.f32 %v2951_v10, %v2010_v19  ;;  %v8364_v11 = vld [vmem:[#allocation86_spill] sm:$0xff] }
 0x3a5   : > { %v4503_v4 = vmul.f32 %v4306_v7, %v4306_v7  ;;  %v4018_v49 = vadd.f32 %v7806_v48, %v3210_v28  ;;  %v4449_v36 = vadd.f32 %v4448_v9, %v4306_v7  ;;  %v2016_v37 = vadd.f32 %v7589_v39, %v8364_v11 }
 0x3a6   : > { %v3897_v63 = vrot.slane %v3221_v29, 7  ;;  %v4133_v56 = vrot.slane %v3214_v26, 1 }
 0x3a7   : > { %v4550_v21 = vadd.f32 %v4549_v32, %v4503_v4  ;;  %v8360_v32 = vld [vmem:[#allocation84_spill] sm:$0xff] }
 0x3a8   : > { %v7873_v44 = vsel %vm3848_vm0, %v3895_v59, %v3897_v63  ;;  %v4134_v2 = vsel %vm4089_vm1, %v4131_v42, %v4133_v56  ;;  %v2020_v59 = vadd.f32 %v8360_v32, %v8359_v0  ;;  %v4226_v61 = vsel %vm4089_vm1, %v4133_v56, 0.0 }
 0x3a9   : > { %v4259_v30 = vadd.f32 %v4134_v2, %v4018_v49 }
 0x3aa   : > { %v2825_v8 = vpop.f32.mrf.mxu2 }
 0x3ab   : > { %v2709_v27 = vpop.f32.mrf.mxu3  ;;  %v5664_v47 = vpack.c.bf16 %v4259_v30, %v4306_v7  ;;  %v4450_v6 = vadd.f32 %v4449_v36, %v4259_v30  ;;  %v4504_v31 = vmul.f32 %v4259_v30, %v4259_v30  ;;  %v2954_v18 = vpop.f32.mrf.mxu0  ;;  %v3213_v12 = vadd.f32 %v2825_v8, %v8358_v55  ;;  %v8365_v7 = vld [vmem:[#allocation97_spill] sm:$0xff]  ;;  %v8366_v30 = vld [vmem:[#allocation16_spill] sm:$0xff] }
 0x3ac   : > { %v7876_v15 = vpop.f32.mrf.mxu1  ;;  %v7892_v1 = vadd.f32 %v2709_v27, %v2020_v59  ;;  %v3217_v19 = vadd.f32 %v2954_v18, %v2013_v58  ;;  %v8367_v27 = vld [vmem:[#allocation90_spill] sm:$0xff] }
 0x3ad   : > { %5732 = vst [vmem:[%s7365_s8 + $0x60] sm:$0xff] %v5664_v47   ;;  %v4551_v48 = vadd.f32 %v4550_v21, %v4504_v31  ;;  %v4019_v9 = vadd.f32 %v7826_v3, %v3213_v12  ;;  %v2023_v3 = vadd.f32 %v8363_v13, %v8362_v16  ;;  %v2026_v60 = vadd.f32 %v8367_v27, %v8366_v30  ;;  %v8369_v12 = vld [vmem:[#allocation100_spill] sm:$0xff]  ;;  %v8376_v27 = vld [vmem:[#allocation95_spill] sm:$0xff] }
 0x3ae   : > { %2993 = vmatmul.bf16.gmra.mxu0 %v7715_v57  ;;  %3615 = vmatmul.bf16.gmra.mxu1 %v7813_v25  ;;  %v3899_v39 = vrot.slane %v7892_v1, 7  ;;  %v4135_v36 = vrot.slane %v3217_v19, 1  ;;  %v2019_v47 = vadd.f32 %v7596_v35, %v8368_v33 }
 0x3af   : > { %2867 = vmatmul.bf16.gmra.mxu2 %v7715_v57  ;;  %v4260_v42 = vadd.f32 %v4226_v61, %v4019_v9 }
 0x3b0   : > { %3633 = vmatmul.bf16.gmra.mxu3 %v7813_v25 }
 0x3b1   : > { %v4308_v46 = vmul.f32 %v7383_v14, %v4260_v42 }
 0x3b2   : > { %v2828_v20 = vpop.f32.mrf.mxu2 }
 0x3b3   : > { %v2712_v54 = vpop.f32.mrf.mxu3  ;;  %v3216_v25 = vadd.f32 %v2828_v20, %v8365_v7  ;;  %v2956_v52 = vpop.f32.mrf.mxu0  ;;  %v4451_v28 = vadd.f32 %v4450_v6, %v4308_v46  ;;  %v4505_v10 = vmul.f32 %v4308_v46, %v4308_v46  ;;  %v8370_v20 = vld [vmem:[#allocation103_spill] sm:$0xff] }
 0x3b4   : > { %v3227_v57 = vadd.f32 %v2712_v54, %v2023_v3  ;;  %v7898_v29 = vpop.f32.mrf.mxu1  ;;  %v3220_v26 = vadd.f32 %v2956_v52, %v2016_v37 }
 0x3b5   : > { %v4020_v63 = vadd.f32 %v3986_v17, %v3216_v25  ;;  %v4552_v49 = vadd.f32 %v4551_v48, %v4505_v10  ;;  %v8371_v17 = vld [vmem:[#allocation19_spill] sm:$0xff] }
 0x3b6   : > { %v3900_v4 = vrot.slane %v3227_v57, 7  ;;  %v4136_v56 = vrot.slane %v3220_v26, 1 }
 0x3b8   : > { %v7905_v21 = vsel %vm3848_vm0, %v3899_v39, %v3900_v4  ;;  %v4137_v2 = vsel %vm4089_vm1, %v4135_v36, %v4136_v56  ;;  %v8375_v36 = vld [vmem:[#allocation96_spill] sm:$0xff] }
 0x3b9   : > { %v4261_v8 = vadd.f32 %v4137_v2, %v4020_v63 }
 0x3ba   : > { %v2830_v31 = vpop.f32.mrf.mxu2 }
 0x3bb   : > { %v2714_v6 = vpop.f32.mrf.mxu3  ;;  %v4309_v18 = vmul.f32 %v7350_v45, %v4261_v8  ;;  %v3219_v48 = vadd.f32 %v2830_v31, %v8369_v12  ;;  %v2959_v0 = vpop.f32.mrf.mxu0  ;;  %v8377_v12 = vld [vmem:[#allocation106_spill] sm:$0xff] }
 0x3bc   : > { %v3230_v55 = vadd.f32 %v2714_v6, %v2026_v60  ;;  %v7914_v9 = vpop.f32.mrf.mxu1  ;;  %v3223_v32 = vadd.f32 %v2959_v0, %v2019_v47 }
 0x3bd   : > { %v5669_v59 = vpack.c.bf16 %v4309_v18, %v4308_v46  ;;  %v4506_v61 = vmul.f32 %v4309_v18, %v4309_v18  ;;  %v4021_v58 = vadd.f32 %v7860_v22, %v3219_v48  ;;  %v4452_v16 = vadd.f32 %v4451_v28, %v4309_v18  ;;  %v8372_v28 = vld [vmem:[#allocation93_spill] sm:$0xff] }
 0x3be   : > { %v3902_v5 = vrot.slane %v3230_v55, 7  ;;  %v4138_v42 = vrot.slane %v3223_v32, 1  ;;  %v2029_v10 = vadd.f32 %v8372_v28, %v8371_v17  ;;  %v3987_v32 = vsel %vm3848_vm0, 0.0, %v3899_v39 }
 0x3bf   : > { %5733 = vst [vmem:[%s7365_s8 + $0x68] sm:$0xff] %v5669_v59   ;;  %v4553_v35 = vadd.f32 %v4552_v49, %v4506_v61  ;;  %v8374_v49 = vld [vmem:[#allocation22_spill] sm:$0xff] }
 0x3c0   : > { %v7919_v13 = vsel %vm3848_vm0, %v3900_v4, %v3902_v5  ;;  %v4139_v3 = vsel %vm4089_vm1, %v4136_v56, %v4138_v42  ;;  %v4227_v52 = vsel %vm4089_vm1, %v4138_v42, 0.0  ;;  %v8373_v4 = vld [vmem:[#allocation92_spill] sm:$0xff]  ;;  %v2032_v56 = vadd.f32 %v8375_v36, %v8374_v49 }
 0x3c1   : > { %v4262_v1 = vadd.f32 %v4139_v3, %v4021_v58  ;;  %v2022_v63 = vadd.f32 %v7627_v62, %v8373_v4  ;;  %v8378_v3 = vld [vmem:[#allocation25_spill] sm:$0xff] }
 0x3c2   : > { %v2833_v37 = vpop.f32.mrf.mxu2 }
 0x3c3   : > { %v2717_v11 = vpop.f32.mrf.mxu3  ;;  %v4453_v19 = vadd.f32 %v4452_v16, %v4262_v1  ;;  %v4507_v54 = vmul.f32 %v4262_v1, %v4262_v1  ;;  %v3222_v46 = vadd.f32 %v2833_v37, %v8370_v20  ;;  %v2961_v7 = vpop.f32.mrf.mxu0 }
 0x3c4   : > { %v7923_v57 = vpop.f32.mrf.mxu1  ;;  %v7933_v2 = vadd.f32 %v2717_v11, %v2029_v10  ;;  %v3226_v60 = vadd.f32 %v2961_v7, %v2022_v63 }
 0x3c5   : > { %v4554_v22 = vadd.f32 %v4553_v35, %v4507_v54  ;;  %v4022_v25 = vadd.f32 %v7873_v44, %v3222_v46  ;;  %v2025_v44 = vadd.f32 %v7645_v50, %v8376_v27 }
 0x3c6   : > { %v3904_v59 = vrot.slane %v7933_v2, 7  ;;  %v4140_v5 = vrot.slane %v3226_v60, 1 }
 0x3c7   : > { %v4263_v26 = vadd.f32 %v4227_v52, %v4022_v25 }
 0x3c9   : > { %v4311_v30 = vmul.f32 %v7383_v14, %v4263_v26 }
 0x3ca   : > { %v2835_v33 = vpop.f32.mrf.mxu2 }
 0x3cb   : > { %v2719_v8 = vpop.f32.mrf.mxu3  ;;  %v5674_v47 = vpack.c.bf16 %v4311_v30, %v4262_v1  ;;  %v4454_v6 = vadd.f32 %v4453_v19, %v4311_v30  ;;  %v4508_v31 = vmul.f32 %v4311_v30, %v4311_v30  ;;  %v2964_v62 = vpop.f32.mrf.mxu0  ;;  %v3225_v48 = vadd.f32 %v2835_v33, %v8377_v12  ;;  %v8379_v1 = vld [vmem:[#allocation99_spill] sm:$0xff]  ;;  %v8380_v19 = vld [vmem:[#allocation98_spill] sm:$0xff] }
 0x3cc   : > { %v3236_v18 = vadd.f32 %v2719_v8, %v2032_v56  ;;  %v7938_v55 = vpop.f32.mrf.mxu1  ;;  %v3229_v0 = vadd.f32 %v2964_v62, %v2025_v44  ;;  %v2035_v11 = vadd.f32 %v8379_v1, %v8378_v3  ;;  %v2028_v39 = vadd.f32 %v7673_v51, %v8380_v19  ;;  %v8383_v62 = vld [vmem:[#allocation28_spill] sm:$0xff]  ;;  %v8384_v12 = vld [vmem:[#allocation102_spill] sm:$0xff] }
 0x3cd   : > { %5734 = vst [vmem:[%s7365_s8 + $0x70] sm:$0xff] %v5674_v47   ;;  %v4555_v61 = vadd.f32 %v4554_v22, %v4508_v31  ;;  %v4023_v58 = vadd.f32 %v3987_v32, %v3225_v48  ;;  %v8381_v22 = vld [vmem:[#allocation109_spill] sm:$0xff]  ;;  %v8382_v31 = vld [vmem:[#allocation112_spill] sm:$0xff]  ;;  %v2038_v48 = vadd.f32 %v8384_v12, %v8383_v62 }
 0x3ce   : > { %v3905_v50 = vrot.slane %v3236_v18, 7  ;;  %v4141_v42 = vrot.slane %v3229_v0, 1  ;;  %v8385_v32 = vld [vmem:[#allocation101_spill] sm:$0xff]  ;;  %v8388_v3 = vld [vmem:[#allocation104_spill] sm:$0xff] }
 0x3cf   : > { %v2034_v1 = vadd.f32 %v7745_v41, %v8388_v3 }
 0x3d0   : > { %v7945_v16 = vsel %vm3848_vm0, %v3904_v59, %v3905_v50  ;;  %v4142_v35 = vsel %vm4089_vm1, %v4140_v5, %v4141_v42  ;;  %v8386_v5 = vld [vmem:[#allocation31_spill] sm:$0xff] }
 0x3d1   : > { %v4264_v37 = vadd.f32 %v4142_v35, %v4023_v58  ;;  %v8387_v58 = vld [vmem:[#allocation105_spill] sm:$0xff] }
 0x3d2   : > { %v2838_v20 = vpop.f32.mrf.mxu2 }
 0x3d3   : > { %v2722_v54 = vpop.f32.mrf.mxu3  ;;  %v4312_v46 = vmul.f32 %v7350_v45, %v4264_v37  ;;  %v3228_v25 = vadd.f32 %v2838_v20, %v8381_v22  ;;  %v2966_v17 = vpop.f32.mrf.mxu0 }
 0x3d4   : > { %v3239_v7 = vadd.f32 %v2722_v54, %v2035_v11  ;;  %v7954_v52 = vpop.f32.mrf.mxu1  ;;  %v3232_v28 = vadd.f32 %v2966_v17, %v2028_v39  ;;  %v8389_v54 = vld [vmem:[#allocation115_spill] sm:$0xff] }
 0x3d5   : > { %v4509_v10 = vmul.f32 %v4312_v46, %v4312_v46  ;;  %v4024_v4 = vadd.f32 %v7905_v21, %v3228_v25  ;;  %v4455_v63 = vadd.f32 %v4454_v6, %v4312_v46 }
 0x3d6   : > { %v3907_v26 = vrot.slane %v3239_v7, 7  ;;  %v4143_v49 = vrot.slane %v3232_v28, 1 }
 0x3d7   : > { %v4556_v36 = vadd.f32 %v4555_v61, %v4509_v10  ;;  %v2031_v61 = vadd.f32 %v7706_v34, %v8385_v32  ;;  %v3988_v34 = vsel %vm3848_vm0, 0.0, %v3904_v59  ;;  %v8392_v59 = vld [vmem:[#allocation107_spill] sm:$0xff] }
 0x3d8   : > { %v7958_v51 = vsel %vm3848_vm0, %v3905_v50, %v3907_v26  ;;  %v4144_v56 = vsel %vm4089_vm1, %v4141_v42, %v4143_v49  ;;  %v4228_v0 = vsel %vm4089_vm1, %v4143_v49, 0.0  ;;  %v2041_v42 = vadd.f32 %v8387_v58, %v8386_v5 }
 0x3d9   : > { %v4265_v2 = vadd.f32 %v4144_v56, %v4024_v4  ;;  %v8390_v56 = vld [vmem:[#allocation5_spill] sm:$0xff] }
 0x3da   : > { %v2840_v27 = vpop.f32.mrf.mxu2 }
 0x3db   : > { %v2724_v30 = vpop.f32.mrf.mxu3  ;;  %v5679_v44 = vpack.c.bf16 %v4265_v2, %v4312_v46  ;;  %v4456_v60 = vadd.f32 %v4455_v63, %v4265_v2  ;;  %v4510_v8 = vmul.f32 %v4265_v2, %v4265_v2  ;;  %v2969_v47 = vpop.f32.mrf.mxu0  ;;  %v3231_v18 = vadd.f32 %v2840_v27, %v8382_v31  ;;  %v8391_v2 = vld [vmem:[#allocation108_spill] sm:$0xff] }
 0x3dc   : > { %v7961_v33 = vpop.f32.mrf.mxu1  ;;  %v7973_v35 = vadd.f32 %v2724_v30, %v2038_v48  ;;  %v2044_v30 = vadd.f32 %v8391_v2, %v8390_v56  ;;  %v8400_v56 = vld [vmem:[#allocation113_spill] sm:$0xff] }
 0x3dd   : > { %5735 = vst [vmem:[%s7365_s8 + $0x78] sm:$0xff] %v5679_v44   ;;  %v4557_v21 = vadd.f32 %v4556_v36, %v4510_v8  ;;  %v4025_v6 = vadd.f32 %v7919_v13, %v3231_v18  ;;  %v3235_v13 = vadd.f32 %v2969_v47, %v2031_v61  ;;  %v2037_v44 = vadd.f32 %v7774_v43, %v8392_v59  ;;  %v8393_v18 = vld [vmem:[#allocation118_spill] sm:$0xff] }
 0x3de   : > { %v3909_v28 = vrot.slane %v7973_v35, 7 }
 0x3df   : > { %v4266_v50 = vadd.f32 %v4228_v0, %v4025_v6  ;;  %v4145_v4 = vrot.slane %v3235_v13, 1 }
 0x3e1   : > { %v4314_v11 = vmul.f32 %v7383_v14, %v4266_v50 }
 0x3e2   : > { %v2843_v19 = vpop.f32.mrf.mxu2 }
 0x3e3   : > { %v2727_v37 = vpop.f32.mrf.mxu3  ;;  %v3234_v20 = vadd.f32 %v2843_v19, %v8389_v54  ;;  %v2971_v7 = vpop.f32.mrf.mxu0  ;;  %v4457_v22 = vadd.f32 %v4456_v60, %v4314_v11  ;;  %v4511_v25 = vmul.f32 %v4314_v11, %v4314_v11  ;;  %v8394_v19 = vld [vmem:[#allocation121_spill] sm:$0xff] }
 0x3e4   : > { %v3245_v39 = vadd.f32 %v2727_v37, %v2041_v42  ;;  %v1798_v46 = vpop.f32.mrf.mxu1  ;;  %v3238_v17 = vadd.f32 %v2971_v7, %v2034_v1  ;;  %v8395_v7 = vld [vmem:[#allocation8_spill] sm:$0xff] }
 0x3e5   : > { %v4026_v26 = vadd.f32 %v3988_v34, %v3234_v20  ;;  %v4558_v41 = vadd.f32 %v4557_v21, %v4511_v25  ;;  %v8396_v34 = vld [vmem:[#allocation111_spill] sm:$0xff] }
 0x3e6   : > { %v3910_v10 = vrot.slane %v3245_v39, 7  ;;  %v4146_v63 = vrot.slane %v3238_v17, 1  ;;  %v8397_v17 = vld [vmem:[#allocation110_spill] sm:$0xff] }
 0x3e8   : > { %v7982_v49 = vsel %vm3848_vm0, %v3909_v28, %v3910_v10  ;;  %v4147_v36 = vsel %vm4089_vm1, %v4145_v4, %v4146_v63 }
 0x3e9   : > { %v4267_v27 = vadd.f32 %v4147_v36, %v4026_v26  ;;  %v8398_v26 = vld [vmem:[#allocation11_spill] sm:$0xff] }
 0x3ea   : > { %v2845_v8 = vpop.f32.mrf.mxu2 }
 0x3eb   : > { %v2729_v60 = vpop.f32.mrf.mxu3  ;;  %v4315_v47 = vmul.f32 %v7350_v45, %v4267_v27  ;;  %v3237_v21 = vadd.f32 %v2845_v8, %v8393_v18  ;;  %v2974_v62 = vpop.f32.mrf.mxu0 }
 0x3ec   : > { %v3248_v31 = vadd.f32 %v2729_v60, %v2044_v30  ;;  %v1800_v6 = vpop.f32.mrf.mxu1  ;;  %v3241_v12 = vadd.f32 %v2974_v62, %v2037_v44 }
 0x3ed   : > { %v5684_v48 = vpack.c.bf16 %v4315_v47, %v4314_v11  ;;  %v4512_v0 = vmul.f32 %v4315_v47, %v4315_v47  ;;  %v4027_v61 = vadd.f32 %v7945_v16, %v3237_v21  ;;  %v4458_v5 = vadd.f32 %v4457_v22, %v4315_v47 }
 0x3ee   : > { %v3912_v32 = vrot.slane %v3248_v31, 7  ;;  %v4148_v50 = vrot.slane %v3241_v12, 1  ;;  %v2047_v22 = vadd.f32 %v8396_v34, %v8395_v7  ;;  %v8401_v31 = vld [vmem:[#allocation124_spill] sm:$0xff]  ;;  %v3989_v6 = vsel %vm3848_vm0, 0.0, %v3909_v28  ;;  %v8405_v28 = vld [vmem:[#allocation117_spill] sm:$0xff]  ;;  %v8409_v34 = vld [vmem:[#allocation127_spill] sm:$0xff] }
 0x3ef   : > { %5736 = vst [vmem:[%s7365_s8 + $0x80] sm:$0xff] %v5684_v48   ;;  %v4559_v58 = vadd.f32 %v4558_v41, %v4512_v0  ;;  %v8399_v41 = vld [vmem:[#allocation114_spill] sm:$0xff] }
 0x3f0   : > { %v7994_v43 = vsel %vm3848_vm0, %v3910_v10, %v3912_v32  ;;  %v4149_v42 = vsel %vm4089_vm1, %v4146_v63, %v4148_v50  ;;  %v4229_v46 = vsel %vm4089_vm1, %v4148_v50, 0.0  ;;  %v2040_v10 = vadd.f32 %v7796_v23, %v8397_v17  ;;  %v8402_v50 = vld [vmem:[#allocation26_spill] sm:$0xff] }
 0x3f1   : > { %v4268_v35 = vadd.f32 %v4149_v42, %v4027_v61  ;;  %v2050_v4 = vadd.f32 %v8399_v41, %v8398_v26 }
 0x3f2   : > { %v2848_v1 = vpop.f32.mrf.mxu2 }
 0x3f3   : > { %v2732_v3 = vpop.f32.mrf.mxu3  ;;  %v4459_v13 = vadd.f32 %v4458_v5, %v4268_v35  ;;  %v4513_v37 = vmul.f32 %v4268_v35, %v4268_v35  ;;  %v3240_v11 = vadd.f32 %v2848_v1, %v8394_v19  ;;  %v2976_v54 = vpop.f32.mrf.mxu0  ;;  %v8403_v5 = vld [vmem:[#allocation129_spill] sm:$0xff] }
 0x3f4   : > { %v1801_v39 = vpop.f32.mrf.mxu1  ;;  %v8006_v63 = vadd.f32 %v2732_v3, %v2047_v22  ;;  %v3244_v2 = vadd.f32 %v2976_v54, %v2040_v10 }
 0x3f5   : > { %v4560_v20 = vadd.f32 %v4559_v58, %v4513_v37  ;;  %v4028_v16 = vadd.f32 %v7958_v51, %v3240_v11  ;;  %v2043_v51 = vadd.f32 %v7817_v24, %v8400_v56  ;;  %v2065_v58 = vadd.f32 %v8403_v5, %v8402_v50  ;;  %v8407_v37 = vld [vmem:[#allocation132_spill] sm:$0xff] }
 0x3f6   : > { %v3914_v62 = vrot.slane %v8006_v63, 7  ;;  %v4150_v24 = vrot.slane %v3244_v2, 1  ;;  %v8408_v11 = vld [vmem:[#allocation116_spill] sm:$0xff] }
 0x3f7   : > { %v4269_v25 = vadd.f32 %v4229_v46, %v4028_v16  ;;  %v2046_v39 = vadd.f32 %v7830_v38, %v8408_v11  ;;  %v8416_v11 = vld [vmem:[#allocation20_spill] sm:$0xff] }
 0x3f9   : > { %v4317_v36 = vmul.f32 %v7383_v14, %v4269_v25 }
 0x3fa   : > { %v2850_v27 = vpop.f32.mrf.mxu2 }
 0x3fb   : > { %v2734_v30 = vpop.f32.mrf.mxu3  ;;  %v5689_v59 = vpack.c.bf16 %v4317_v36, %v4268_v35  ;;  %v4460_v44 = vadd.f32 %v4459_v13, %v4317_v36  ;;  %v4514_v60 = vmul.f32 %v4317_v36, %v4317_v36  ;;  %v2979_v47 = vpop.f32.mrf.mxu0  ;;  %v3243_v18 = vadd.f32 %v2850_v27, %v8401_v31  ;;  %v8404_v35 = vld [vmem:[#allocation14_spill] sm:$0xff]  ;;  %v8406_v13 = vld [vmem:[#allocation29_spill] sm:$0xff] }
 0x3fc   : > { %v3254_v8 = vadd.f32 %v2734_v30, %v2050_v4  ;;  %v3593_v23 = vpop.f32.mrf.mxu1  ;;  %v3247_v21 = vadd.f32 %v2979_v47, %v2043_v51  ;;  %v2053_v3 = vadd.f32 %v8405_v28, %v8404_v35  ;;  %v2068_v19 = vadd.f32 %v8407_v37, %v8406_v13  ;;  %v8410_v47 = vld [vmem:[#allocation32_spill] sm:$0xff] }
 0x3fd   : > { %5737 = vst [vmem:[%s7365_s8 + $0x88] sm:$0xff] %v5689_v59   ;;  %v4561_v12 = vadd.f32 %v4560_v20, %v4514_v60  ;;  %v4029_v0 = vadd.f32 %v3989_v6, %v3243_v18  ;;  %v8029_v54 = vadd.f32 %v3593_v23, %v2065_v58  ;;  %v8411_v23 = vld [vmem:[#allocation135_spill] sm:$0xff]  ;;  %v8414_v35 = vld [vmem:[#allocation120_spill] sm:$0xff] }
 0x3fe   : > { %v3915_v48 = vrot.slane %v3254_v8, 7  ;;  %v4151_v32 = vrot.slane %v3247_v21, 1  ;;  %v2071_v31 = vadd.f32 %v8411_v23, %v8410_v47 }
 0x3ff   : > { %v3924_v38 = vrot.slane %v8029_v54, 7 }
 0x400   : > { %v8018_v61 = vsel %vm3848_vm0, %v3914_v62, %v3915_v48  ;;  %v4152_v42 = vsel %vm4089_vm1, %v4150_v24, %v4151_v32 }
 0x401   : > { %v4270_v1 = vadd.f32 %v4152_v42, %v4029_v0  ;;  %v8413_v42 = vld [vmem:[#allocation17_spill] sm:$0xff] }
 0x402   : > { %v2853_v16 = vpop.f32.mrf.mxu2  ;;  %v2056_v28 = vadd.f32 %v8414_v35, %v8413_v42  ;;  %v8424_v42 = vld [vmem:[#allocation144_spill] sm:$0xff] }
 0x403   : > { %v2737_v20 = vpop.f32.mrf.mxu3  ;;  %v4318_v46 = vmul.f32 %v7350_v45, %v4270_v1  ;;  %v3246_v22 = vadd.f32 %v2853_v16, %v8409_v34  ;;  %v2981_v25 = vpop.f32.mrf.mxu0  ;;  %v8415_v1 = vld [vmem:[#allocation119_spill] sm:$0xff]  ;;  %v8418_v16 = vld [vmem:[#allocation122_spill] sm:$0xff] }
 0x404   : > { %v3257_v7 = vadd.f32 %v2737_v20, %v2053_v3  ;;  %v3595_v17 = vpop.f32.mrf.mxu1  ;;  %v3250_v10 = vadd.f32 %v2981_v25, %v2046_v39  ;;  %v2049_v13 = vadd.f32 %v7845_v40, %v8415_v1  ;;  %v8417_v39 = vld [vmem:[#allocation123_spill] sm:$0xff] }
 0x405   : > { %v3641_v26 = vadd.f32 %v3595_v17, %v2068_v19  ;;  %v4515_v41 = vmul.f32 %v4318_v46, %v4318_v46  ;;  %v4030_v36 = vadd.f32 %v7982_v49, %v3246_v22  ;;  %v4461_v56 = vadd.f32 %v4460_v44, %v4318_v46  ;;  %v8419_v17 = vld [vmem:[#allocation133_spill] sm:$0xff] }
 0x406   : > { %v3917_v4 = vrot.slane %v3257_v7, 7  ;;  %v4153_v51 = vrot.slane %v3250_v10, 1  ;;  %v2059_v54 = vadd.f32 %v8417_v39, %v8416_v11 }
 0x407   : > { %v3925_v2 = vrot.slane %v3641_v26, 7  ;;  %v4562_v30 = vadd.f32 %v4561_v12, %v4515_v41  ;;  %v8412_v12 = vld [vmem:[#allocation130_spill] sm:$0xff]  ;;  %v3990_v41 = vsel %vm3848_vm0, 0.0, %v3914_v62  ;;  %v8422_v62 = vld [vmem:[#allocation125_spill] sm:$0xff] }
 0x408   : > { %v8036_v27 = vsel %vm3848_vm0, %v3915_v48, %v3917_v4  ;;  %v4154_v59 = vsel %vm4089_vm1, %v4151_v32, %v4153_v51  ;;  %v4230_v3 = vsel %vm4089_vm1, %v4153_v51, 0.0 }
 0x409   : > { %v8040_v60 = vsel %vm3848_vm0, %v3924_v38, %v3925_v2  ;;  %v4271_v8 = vadd.f32 %v4154_v59, %v4030_v36 }
 0x40a   : > { %v2855_v44 = vpop.f32.mrf.mxu2 }
 0x40b   : > { %v2739_v49 = vpop.f32.mrf.mxu3  ;;  %v5694_v18 = vpack.c.bf16 %v4271_v8, %v4318_v46  ;;  %v4462_v21 = vadd.f32 %v4461_v56, %v4271_v8  ;;  %v4516_v6 = vmul.f32 %v4271_v8, %v4271_v8  ;;  %v2984_v24 = vpop.f32.mrf.mxu0  ;;  %v3249_v50 = vadd.f32 %v2855_v44, %v8412_v12  ;;  %v8423_v12 = vld [vmem:[#allocation136_spill] sm:$0xff] }
 0x40c   : > { %v3598_v0 = vpop.f32.mrf.mxu1  ;;  %v8057_v20 = vadd.f32 %v2739_v49, %v2056_v28  ;;  %v3253_v7 = vadd.f32 %v2984_v24, %v2049_v13  ;;  %v8421_v49 = vld [vmem:[#allocation126_spill] sm:$0xff] }
 0x40d   : > { %v3644_v48 = vadd.f32 %v3598_v0, %v2071_v31  ;;  %5738 = vst [vmem:[%s7365_s8 + $0x90] sm:$0xff] %v5694_v18   ;;  %v4563_v5 = vadd.f32 %v4562_v30, %v4516_v6  ;;  %v4031_v32 = vadd.f32 %v7994_v43, %v3249_v50  ;;  %v2052_v43 = vadd.f32 %v7869_v53, %v8418_v16  ;;  %v8420_v31 = vld [vmem:[#allocation23_spill] sm:$0xff] }
 0x40e   : > { %v3919_v51 = vrot.slane %v8057_v20, 7  ;;  %v4155_v59 = vrot.slane %v3253_v7, 1  ;;  %v2062_v63 = vadd.f32 %v8421_v49, %v8420_v31  ;;  %v2055_v18 = vadd.f32 %v7876_v15, %v8422_v62  ;;  %v8430_v49 = vld [vmem:[#allocation139_spill] sm:$0xff] }
 0x40f   : > { %v3927_v58 = vrot.slane %v3644_v48, 7  ;;  %v4272_v37 = vadd.f32 %v4230_v3, %v4031_v32  ;;  %v3992_v32 = vsel %vm3848_vm0, 0.0, %v3924_v38 }
 0x411   : > { %v8053_v19 = vsel %vm3848_vm0, %v3925_v2, %v3927_v58  ;;  %v4320_v46 = vmul.f32 %v7383_v14, %v4272_v37 }
 0x412   : > { %v2858_v22 = vpop.f32.mrf.mxu2 }
 0x413   : > { %v2742_v34 = vpop.f32.mrf.mxu3  ;;  %v3252_v40 = vadd.f32 %v2858_v22, %v8419_v17  ;;  %v2986_v10 = vpop.f32.mrf.mxu0  ;;  %v4463_v4 = vadd.f32 %v4462_v21, %v4320_v46  ;;  %v4517_v36 = vmul.f32 %v4320_v46, %v4320_v46 }
 0x414   : > { %v3263_v25 = vadd.f32 %v2742_v34, %v2059_v54  ;;  %v3600_v26 = vpop.f32.mrf.mxu1  ;;  %v3256_v56 = vadd.f32 %v2986_v10, %v2052_v43 }
 0x415   : > { %v4032_v2 = vadd.f32 %v3990_v41, %v3252_v40  ;;  %v4564_v30 = vadd.f32 %v4563_v5, %v4517_v36  ;;  %v8427_v36 = vld [vmem:[#allocation137_spill] sm:$0xff] }
 0x416   : > { %v3920_v53 = vrot.slane %v3263_v25, 7  ;;  %v4156_v8 = vrot.slane %v3256_v56, 1  ;;  %v2067_v56 = vadd.f32 %v7938_v55, %v8427_v36 }
 0x418   : > { %v8068_v47 = vsel %vm3848_vm0, %v3919_v51, %v3920_v53  ;;  %v4157_v23 = vsel %vm4089_vm1, %v4155_v59, %v4156_v8 }
 0x419   : > { %v4273_v44 = vadd.f32 %v4157_v23, %v4032_v2  ;;  %v8428_v2 = vld [vmem:[#allocation128_spill] sm:$0xff]  ;;  %v8429_v23 = vld [vmem:[#allocation131_spill] sm:$0xff] }
 0x41a   : > { %v2860_v6 = vpop.f32.mrf.mxu2  ;;  %v2061_v31 = vadd.f32 %v7914_v9, %v8429_v23 }
 0x41b   : > { %v2744_v21 = vpop.f32.mrf.mxu3  ;;  %v4321_v24 = vmul.f32 %v7350_v45, %v4273_v44  ;;  %v3255_v50 = vadd.f32 %v2860_v6, %v8423_v12  ;;  %v2989_v48 = vpop.f32.mrf.mxu0 }
 0x41c   : > { %v3266_v0 = vadd.f32 %v2744_v21, %v2062_v63  ;;  %v3611_v5 = vpop.f32.mrf.mxu1  ;;  %v3259_v58 = vadd.f32 %v2989_v48, %v2055_v18  ;;  %v8431_v21 = vld [vmem:[#allocation140_spill] sm:$0xff]  ;;  %v8432_v48 = vld [vmem:[#allocation146_spill] sm:$0xff] }
 0x41d   : > { %v3639_v35 = vadd.f32 %v3611_v5, %v8424_v42  ;;  %v5699_v28 = vpack.c.bf16 %v4321_v24, %v4320_v46  ;;  %v4518_v3 = vmul.f32 %v4321_v24, %v4321_v24  ;;  %v4033_v15 = vadd.f32 %v8018_v61, %v3255_v50  ;;  %v8425_v46 = vld [vmem:[#allocation138_spill] sm:$0xff]  ;;  %v8426_v61 = vld [vmem:[#allocation145_spill] sm:$0xff] }
 0x41e   : > { %v3922_v1 = vrot.slane %v3266_v0, 7  ;;  %v4158_v13 = vrot.slane %v3259_v58, 1  ;;  %v4464_v37 = vadd.f32 %v4463_v4, %v4321_v24  ;;  %v3991_v0 = vsel %vm3848_vm0, 0.0, %v3919_v51 }
 0x41f   : > { %v4038_v11 = vadd.f32 %v3992_v32, %v3639_v35  ;;  %5739 = vst [vmem:[%s7365_s8 + $0x98] sm:$0xff] %v5699_v28   ;;  %v4565_v39 = vadd.f32 %v4564_v30, %v4518_v3  ;;  %v2058_v30 = vadd.f32 %v7898_v29, %v8428_v2 }
 0x420   : > { %v8082_v54 = vsel %vm3848_vm0, %v3920_v53, %v3922_v1  ;;  %v4159_v20 = vsel %vm4089_vm1, %v4156_v8, %v4158_v13  ;;  %v4231_v41 = vsel %vm4089_vm1, %v4158_v13, 0.0 }
 0x421   : > { %v4274_v16 = vadd.f32 %v4159_v20, %v4033_v15  ;;  %v8433_v15 = vld [vmem:[#allocation141_spill] sm:$0xff] }
 0x422   : > { %v2863_v38 = vpop.f32.mrf.mxu2  ;;  %v2073_v51 = vadd.f32 %v7961_v33, %v8433_v15 }
 0x423   : > { %v3629_v43 = vpop.f32.mrf.mxu3  ;;  %v4465_v7 = vadd.f32 %v4464_v37, %v4274_v16  ;;  %v4519_v34 = vmul.f32 %v4274_v16, %v4274_v16  ;;  %v3258_v22 = vadd.f32 %v2863_v38, %v8425_v46  ;;  %v2991_v25 = vpop.f32.mrf.mxu0 }
 0x424   : > { %v3613_v17 = vpop.f32.mrf.mxu1  ;;  %v3640_v8 = vadd.f32 %v3629_v43, %v2067_v56  ;;  %v3262_v63 = vadd.f32 %v2991_v25, %v2058_v30 }
 0x425   : > { %v3642_v40 = vadd.f32 %v3613_v17, %v8426_v61  ;;  %v4566_v10 = vadd.f32 %v4565_v39, %v4519_v34  ;;  %v4034_v26 = vadd.f32 %v8036_v27, %v3258_v22  ;;  %v2070_v27 = vadd.f32 %v7954_v52, %v8430_v49  ;;  %v8434_v39 = vld [vmem:[#allocation134_spill] sm:$0xff] }
 0x426   : > { %v4165_v32 = vrot.slane %v3640_v8, 1  ;;  %v4160_v58 = vrot.slane %v3262_v63, 1  ;;  %v2064_v20 = vadd.f32 %v7923_v57, %v8434_v39 }
 0x427   : > { %v4039_v4 = vadd.f32 %v8040_v60, %v3642_v40  ;;  %v4275_v53 = vadd.f32 %v4231_v41, %v4034_v26 }
 0x429   : > { %v4323_v59 = vmul.f32 %v7383_v14, %v4275_v53 }
 0x42a   : > { %v2865_v44 = vpop.f32.mrf.mxu2 }
 0x42b   : > { %v3631_v60 = vpop.f32.mrf.mxu3  ;;  %v5704_v62 = vpack.c.bf16 %v4323_v59, %v4274_v16  ;;  %v4466_v18 = vadd.f32 %v4465_v7, %v4323_v59  ;;  %v4520_v55 = vmul.f32 %v4323_v59, %v4323_v59  ;;  %v3261_v6 = vadd.f32 %v2865_v44, %v8431_v21  ;;  %v2994_v24 = vpop.f32.mrf.mxu0  ;;  %v8435_v7 = vld [vmem:[#allocation142_spill] sm:$0xff] }
 0x42c   : > { %v3616_v29 = vpop.f32.mrf.mxu1  ;;  %v3643_v12 = vadd.f32 %v3631_v60, %v2070_v27  ;;  %v3265_v50 = vadd.f32 %v2994_v24, %v2061_v31  ;;  %v8436_v31 = vld [vmem:[#allocation143_spill] sm:$0xff] }
 0x42d   : > { %v3645_v5 = vadd.f32 %v3616_v29, %v8432_v48  ;;  %5740 = vst [vmem:[%s7365_s8 + $0xa0] sm:$0xff] %v5704_v62   ;;  %v4567_v9 = vadd.f32 %v4566_v10, %v4520_v55  ;;  %v4035_v52 = vadd.f32 %v3991_v0, %v3261_v6 }
 0x42e   : > { %v4166_v42 = vrot.slane %v3643_v12, 1  ;;  %v4161_v35 = vrot.slane %v3265_v50, 1 }
 0x42f   : > { %v4040_v28 = vadd.f32 %v8053_v19, %v3645_v5 }
 0x430   : > { %v4167_v3 = vsel %vm4089_vm1, %v4165_v32, %v4166_v42  ;;  %v4162_v1 = vsel %vm4089_vm1, %v4160_v58, %v4161_v35 }
 0x431   : > { %v4279_v13 = vadd.f32 %v4167_v3, %v4038_v11  ;;  %v4276_v37 = vadd.f32 %v4162_v1, %v4035_v52 }
 0x432   : > { %v2868_v16 = vpop.f32.mrf.mxu2 }
 0x433   : > { %v3634_v38 = vpop.f32.mrf.mxu3  ;;  %v4324_v43 = vmul.f32 %v7350_v45, %v4276_v37  ;;  %v3264_v34 = vadd.f32 %v2868_v16, %v8435_v7  ;;  %v2996_v19 = vpop.f32.mrf.mxu0  ;;  %v4327_v62 = vmul.f32 %v7350_v45, %v4279_v13 }
 0x434   : > { %v3646_v46 = vadd.f32 %v3634_v38, %v2073_v51  ;;  %v3618_v22 = vpop.f32.mrf.mxu1  ;;  %v3268_v25 = vadd.f32 %v2996_v19, %v2064_v20 }
 0x435   : > { %v4521_v17 = vmul.f32 %v4324_v43, %v4324_v43  ;;  %v4036_v61 = vadd.f32 %v8068_v47, %v3264_v34  ;;  %v4467_v11 = vadd.f32 %v4466_v18, %v4324_v43  ;;  %v4524_v24 = vmul.f32 %v4327_v62, %v4327_v62 }
 0x436   : > { %v4168_v40 = vrot.slane %v3646_v46, 1  ;;  %v4163_v33 = vrot.slane %v3268_v25, 1 }
 0x437   : > { %v4568_v26 = vadd.f32 %v4567_v9, %v4521_v17 }
 0x438   : > { %v4169_v10 = vsel %vm4089_vm1, %v4166_v42, %v4168_v40  ;;  %v4233_v57 = vsel %vm4089_vm1, %v4168_v40, 0.0  ;;  %v4164_v56 = vsel %vm4089_vm1, %v4161_v35, %v4163_v33 }
 0x439   : > { %v4280_v41 = vadd.f32 %v4169_v10, %v4039_v4  ;;  %v4281_v36 = vadd.f32 %v4233_v57, %v4040_v28  ;;  %v4277_v53 = vadd.f32 %v4164_v56, %v4036_v61  ;;  %v4232_v4 = vsel %vm4089_vm1, %v4163_v33, 0.0 }
 0x43a   : > { %v2870_v30 = vpop.f32.mrf.mxu2 }
 0x43b   : > { %v4329_v2 = vmul.f32 %v7383_v14, %v4281_v36  ;;  %v3636_v59 = vpop.f32.mrf.mxu3  ;;  %v5709_v47 = vpack.c.bf16 %v4277_v53, %v4324_v43  ;;  %v4468_v8 = vadd.f32 %v4467_v11, %v4277_v53  ;;  %v4522_v23 = vmul.f32 %v4277_v53, %v4277_v53 }
 0x43c   : > { %v3267_v49 = vadd.f32 %v2870_v30, %v8436_v31  ;;  %v4525_v12 = vmul.f32 %v4280_v41, %v4280_v41 }
 0x43d   : > { %v5719_v27 = vpack.c.bf16 %v4329_v2, %v4280_v41  ;;  %5741 = vst [vmem:[%s7365_s8 + $0xa8] sm:$0xff] %v5709_v47   ;;  %v4569_v63 = vadd.f32 %v4568_v26, %v4522_v23 }
 0x43e   : > { %v4037_v44 = vadd.f32 %v8082_v54, %v3267_v49  ;;  %v4526_v54 = vmul.f32 %v4329_v2, %v4329_v2 }
 0x43f   : > { %5743 = vst [vmem:[%s7365_s8 + $0xb8] sm:$0xff] %v5719_v27  }
 0x440   : > { %v4278_v60 = vadd.f32 %v4232_v4, %v4037_v44 }
 0x442   : > { %v4326_v18 = vmul.f32 %v7383_v14, %v4278_v60 }
 0x444   : > { %v5714_v55 = vpack.c.bf16 %v4327_v62, %v4326_v18  ;;  %v4469_v21 = vadd.f32 %v4468_v8, %v4326_v18  ;;  %v4523_v6 = vmul.f32 %v4326_v18, %v4326_v18 }
 0x446   : > { %5742 = vst [vmem:[%s7365_s8 + $0xb0] sm:$0xff] %v5714_v55   ;;  %v4470_v29 = vadd.f32 %v4469_v21, %v4327_v62  ;;  %v4570_v0 = vadd.f32 %v4569_v63, %v4523_v6  ;;  %s4770_s8 = sshll.u32 %s8442_s18, 1 }
 0x447   : > { %s355_s25 = scalar_lea.vmem %s8144_s5, %s4770_s8 }
 0x448   : > { %v4471_v50 = vadd.f32 %v4470_v29, %v4280_v41  ;;  %v4571_v48 = vadd.f32 %v4570_v0, %v4524_v24 }
 0x44a   : > { %v4472_v5 = vadd.f32 %v4471_v50, %v4329_v2  ;;  %v4572_v9 = vadd.f32 %v4571_v48, %v4525_v12 }
 0x44c   : > { %v4473_v32 = vrot.slane %v4472_v5, 4  ;;  %v4573_v52 = vadd.f32 %v4572_v9, %v4526_v54 }
 0x44e   : > { %v4474_v58 = vadd.f32 %v4473_v32, %v4472_v5  ;;  %v4574_v45 = vrot.slane %v4573_v52, 4 }
 0x450   : > { %v4475_v42 = vrot.slane %v4474_v58, 2  ;;  %v4575_v14 = vadd.f32 %v4574_v45, %v4573_v52 }
 0x452   : > { %v4476_v35 = vadd.f32 %v4475_v42, %v4474_v58  ;;  %v4576_v28 = vrot.slane %v4575_v14, 2 }
 0x454   : > { %v4477_v3 = vrot.slane %v4476_v35, 1  ;;  %v4577_v1 = vadd.f32 %v4576_v28, %v4575_v14 }
 0x456   : > { %v4578_v15 = vrot.slane %v4577_v1, 1  ;;  %v4478_v51 = vadd.f32 %v4477_v3, %v4476_v35 }
 0x458   : > { %v4579_v13 = vadd.f32 %v4578_v15, %v4577_v1 }
 0x45a   : > { %v4580_v37 = vsel %vm3848_vm0, %v4478_v51, %v4579_v13 }
 0x45b   : > { %4581 = vst [vmem:[%s355_s25] sm:$0x3] %v4580_v37 }
 0x45c PF: > { %s16_s20 = sadd.s32 1, %s5846_s20   ;;  %s8437_s18 = smov %s5842_s19 }
 0x45d   : > { %p13_p5 = scmp.ge.s32.totalorder %s16_s20, 4   ;;  %s8438_s19 = smov %s8440_s21 }
 0x45f   :  { %15 = sbr.rel (!%p13_p5) target bundleno = 2 (0x2), region = 88 }

// kernel: up_forward.4
= control target key start
LH: loop header
LB: loop body
LE: loop exit
PB: predicated region body
PF: predicated region fallthrough
CT: control target
= control target key end

     0   :  { %s6023_s24 = smov 0   ;;  %s6025_s25 = smov 0   ;;  %s8420_s0 = inlined_call_operand.vmem [shape: bf16[2,16,24,128], index: 0, kind: input, shape index: {}]   ;;  %s8421_s1 = inlined_call_operand.vmem [shape: bf16[2,1,24,128], index: 1, kind: input, shape index: {}, may-alias: {1,2}]   ;;  %s8422_s2 = inlined_call_operand.vmem [shape: bf16[2,1,24,128], index: 2, kind: input, shape index: {}, may-alias: {1,2}]   ;;  %s8423_s3 = inlined_call_operand.vmem [shape: bf16[3,128,384], index: 3, kind: input, shape index: {}]   ;;  %s8424_s4 = inlined_call_operand.vmem [shape: f32[1,128], index: 4, kind: input, shape index: {}]   ;;  %s8425_s5 = inlined_call_operand.vmem [shape: f32[1,128], index: 5, kind: input, shape index: {}]   ;;  %s8426_s6 = inlined_call_operand.vmem [shape: f32[2,16,24,128], index: 6, kind: output, shape index: {0}]   ;;  %s8427_s7 = inlined_call_operand.vmem [shape: f32[2,1,2,128], index: 7, kind: output, shape index: {1}]  }
   0x1   :  { %s6027_s26 = smov 0  }
   0x2 LB: > { %s30_s27 = sadd.s32 1, %s5976_s25  ;;  %p5067_p0 = scmp.ge.s32.totalorder %s5980_s26, 1  ;;  %s5980_s26 = sphi %s6027_s26, %s18_s26   ;;  %s5976_s25 = sphi %s6025_s25, %s8759_s25   ;;  %s5972_s24 = sphi %s6023_s24, %s8758_s24  }
   0x3   : > { %p32_p1 = scmp.ge.s32.totalorder %s30_s27, 2  ;;  %p296_p2 = scmp.lt.s32.totalorder %s5980_s26, 3 }
   0x5   : > { %s8761_s27 = smov (%p32_p1, %s30_s27), 0  ;;  %p297_p3 = pnand %p5067_p0, %p296_p2 }
   0x7   : > { %300 = sbr.rel (%p297_p3) target bundleno = 1115 (0x45b), region = 44 }
   0xc   : > { %v5193_v0 = vld [vmem:[%s8423_s3 + $0x168] sm:$0xf]  ;;  %v5685_v1 = vld [vmem:[%s8423_s3 + $0x170] sm:$0xf0]  ;;  %v5181_v2 = vld [vmem:[%s8423_s3 + $0x150] sm:$0xf]  ;;  %v410_v5 = vlaneseq }
   0xd   : > { %v5194_v3 = vor.u32 %v5685_v1, %v5193_v0  ;;  %v5682_v4 = vld [vmem:[%s8423_s3 + $0x158] sm:$0xf0]  ;;  %v5169_v7 = vld [vmem:[%s8423_s3 + $0x138] sm:$0xf]  ;;  %v5679_v8 = vld [vmem:[%s8423_s3 + $0x140] sm:$0xf0] }
   0xe   : > { %v5182_v6 = vor.u32 %v5682_v4, %v5181_v2  ;;  %v5157_v9 = vld [vmem:[%s8423_s3 + $0x120] sm:$0xf]  ;;  %v5676_v10 = vld [vmem:[%s8423_s3 + $0x128] sm:$0xf0]  ;;  %v5145_v11 = vld [vmem:[%s8423_s3 + $0x108] sm:$0xf]  ;;  %v5170_v18 = vor.u32 %v5679_v8, %v5169_v7 }
   0xf   : > { %1084 = vmatpush.bf16.msra.mxu0 %v5194_v3  ;;  %5902 = vmatpush.bf16.msra.mxu1 %v5194_v3  ;;  %v5673_v12 = vld [vmem:[%s8423_s3 + $0x110] sm:$0xf0]  ;;  %v5133_v13 = vld [vmem:[%s8423_s3 + $0xf0] sm:$0xf]  ;;  %v5670_v14 = vld [vmem:[%s8423_s3 + $0xf8] sm:$0xf0]  ;;  %v5158_v26 = vor.u32 %v5676_v10, %v5157_v9 }
  0x10   : > { %5903 = vmatpush.bf16.msra.mxu2 %v5194_v3  ;;  %5904 = vmatpush.bf16.msra.mxu3 %v5194_v3  ;;  %p364_p4 = scmp.lt.s32.totalorder %s5972_s24, 1  ;;  %v411_v15 = vshrl.u32 %v410_v5, 7  ;;  %v5121_v16 = vld [vmem:[%s8423_s3 + $0xd8] sm:$0xf]  ;;  %v5667_v17 = vld [vmem:[%s8423_s3 + $0xe0] sm:$0xf0]  ;;  %v5146_v27 = vor.u32 %v5673_v12, %v5145_v11  ;;  %v6116_v28 = vor.u32 %v5670_v14, %v5133_v13 }
  0x11   : > { %v5109_v19 = vld [vmem:[%s8423_s3 + $0xc0] sm:$0xf]  ;;  %v5664_v20 = vld [vmem:[%s8423_s3 + $0xc8] sm:$0xf0]  ;;  %v6098_v22 = vld [vmem:[%s8423_s3 + $0x170] sm:$0xf]  ;;  %v6133_v32 = vor.u32 %v5667_v17, %v5121_v16 }
  0x12   : > { %s8763_s24 = smov (!%p364_p4, %s5972_s24), 1  ;;  %v413_v21 = vadd.s32 16, %v411_v15  ;;  %vm414_vm0 = vcmp.ge.s32.totalorder %v411_v15, 1  ;;  %v6103_v23 = vld [vmem:[%s8423_s3 + $0x178] sm:$0xf0]  ;;  %v6135_v33 = vor.u32 %v5664_v20, %v5109_v19  ;;  %v5982_v34 = vmov 0.0  }
  0x13   : > { %1085 = vmatpush.bf16.msra.mxu0 %v5182_v6  ;;  %5905 = vmatpush.bf16.msra.mxu1 %v5182_v6  ;;  %s5926_s22 = smul.u32 192, %s8763_s24  ;;  %v6109_v24 = vld [vmem:[%s8423_s3 + $0xac] sm:$0xf]  ;;  %v6114_v25 = vld [vmem:[%s8423_s3 + $0xb4] sm:$0xf0]  ;;  %v6143_v35 = vsel %vm414_vm0, 1.0, %v5982_v34  ;;  %v5202_v36 = vor.u32 %v6103_v23, %v6098_v22 }
  0x14   : > { %5906 = vmatpush.bf16.msra.mxu2 %v5182_v6  ;;  %5907 = vmatpush.bf16.msra.mxu3 %v5182_v6  ;;  %vm419_vm1 = vcmp.le.s32.totalorder %v413_v21, 16  ;;  %v6121_v29 = vld [vmem:[%s8424_s4] ss:$0 sm:$0xff]  ;;  %v6126_v30 = vld [vmem:[%s8423_s3 + $0x158] sm:$0xf]  ;;  %v5294_v43 = vor.u32 %v6109_v24, %v6114_v25  ;;  %s5927_s13 = smul.u32 12, %s8763_s24 }
  0x15   : > { %v6131_v31 = vld [vmem:[%s8423_s3 + $0x160] sm:$0xf0]  ;;  %s6140_s16 = scalar_lea.vmem %s8420_s0, %s5926_s22  ;;  %v6150_v37 = vld [vmem:[%s8423_s3 + $0xa8] sm:$0xf]  ;;  %v6155_v38 = vld [vmem:[%s8423_s3 + $0xb0] sm:$0xf0] }
  0x16   : > { %v5784_v39 = vld [vmem:[%s6140_s16] sm:$0xff]   ;;  %v5887_v40 = vld [vmem:[%s6140_s16 + $0x48] sm:$0xff]   ;;  %v6160_v41 = vsel %vm419_vm1, 1.0, %v5982_v34  ;;  %v5892_v42 = vld [vmem:[%s6140_s16 + $0x70] sm:$0xff]   ;;  %v5190_v44 = vor.u32 %v6131_v31, %v6126_v30  ;;  %v5290_v45 = vor.u32 %v6155_v38, %v6150_v37  ;;  %s7289_s14 = scalar_lea.vmem %s8421_s1, %s5927_s13  ;;  %vm4198_vm2 = vcmask 1040384   ;;  %s5928_s21 = smul.u32 384, %s8763_s24 }
  0x17   : > { %1086 = vmatpush.bf16.msra.mxu0 %v5170_v18  ;;  %5908 = vmatpush.bf16.msra.mxu1 %v5170_v18  ;;  %v5785_v46 = vunpack.c.l.bf16 %v5784_v39  ;;  %v5786_v47 = vunpack.c.h.bf16 %v5784_v39  ;;  %v6172_v48 = vld [vmem:[%s8425_s5] ss:$0 sm:$0xff]  ;;  %v5821_v49 = vunpack.c.l.bf16 %v5887_v40  ;;  %v5822_v50 = vunpack.c.h.bf16 %v5887_v40  ;;  %v5897_v51 = vld [vmem:[%s6140_s16 + $0x98] sm:$0xff]   ;;  %v6176_v52 = vld [vmem:[%s6140_s16 + $0x8] sm:$0xff]   ;;  %s8026_s30 = scalar_lea.vmem %s8422_s2, %s5927_s13  ;;  %s5072_s13 = sshll.u32 %s8763_s24, 1 }
  0x18   : > { %5909 = vmatpush.bf16.msra.mxu2 %v5170_v18  ;;  %5910 = vmatpush.bf16.msra.mxu3 %v5170_v18  ;;  %v5841_v53 = vunpack.c.l.bf16 %v5892_v42  ;;  %v5842_v54 = vunpack.c.h.bf16 %v5892_v42  ;;  %v5861_v55 = vunpack.c.l.bf16 %v5897_v51  ;;  %v5862_v56 = vunpack.c.h.bf16 %v5897_v51  ;;  %v5684_v23 = vld [vmem:[%s8423_s3 + $0x16c] sm:$0xf]  ;;  %v5195_v24 = vld [vmem:[%s8423_s3 + $0x174] sm:$0xf0]  ;;  %v5681_v31 = vld [vmem:[%s8423_s3 + $0x154] sm:$0xf]  ;;  %s409_s15 = scalar_lea.vmem %s8427_s7, %s5072_s13 }
  0x19   : > { %v530_v57 = vmul.f32 %v6121_v29, %v5785_v46  ;;  %v531_v58 = vmul.f32 %v6121_v29, %v5786_v47  ;;  %v548_v59 = vmul.f32 %v6121_v29, %v5821_v49  ;;  %v5789_v60 = vunpack.c.l.bf16 %v6176_v52  ;;  %v5888_v47 = vld [vmem:[%s6140_s16 + $0x50] sm:$0xff]  }
  0x1a   : > { %v549_v61 = vmul.f32 %v6121_v29, %v5822_v50  ;;  %v558_v62 = vmul.f32 %v6121_v29, %v5841_v53  ;;  %v559_v63 = vmul.f32 %v6121_v29, %v5842_v54  ;;  %v5790_v0 = vunpack.c.h.bf16 %v6176_v52 }
  0x1b   : > { %1087 = vmatpush.bf16.msra.mxu0 %v5158_v26  ;;  %5911 = vmatpush.bf16.msra.mxu1 %v5158_v26  ;;  %v581_v1 = vadd.f32 %v6172_v48, %v530_v57  ;;  %v582_v2 = vadd.f32 %v6172_v48, %v531_v58  ;;  %v599_v3 = vadd.f32 %v6172_v48, %v548_v59  ;;  %vm4439_vm3 = vcmask 1046528  }
  0x1c   : > { %5912 = vmatpush.bf16.msra.mxu2 %v5158_v26  ;;  %5913 = vmatpush.bf16.msra.mxu3 %v5158_v26  ;;  %v568_v4 = vmul.f32 %v6121_v29, %v5861_v55  ;;  %v600_v5 = vadd.f32 %v6172_v48, %v549_v61  ;;  %v609_v6 = vadd.f32 %v6172_v48, %v558_v62  ;;  %v5825_v61 = vunpack.c.l.bf16 %v5888_v47  ;;  %v5893_v62 = vld [vmem:[%s6140_s16 + $0x78] sm:$0xff]  }
  0x1d   : > { %v610_v7 = vadd.f32 %v6172_v48, %v559_v63  ;;  %v569_v8 = vmul.f32 %v6121_v29, %v5862_v56  ;;  %v629_v9 = vmax.f32 %v581_v1, 0.0  ;;  %v630_v10 = vmax.f32 %v582_v2, 0.0 }
  0x1e   : > { %v647_v11 = vmax.f32 %v599_v3, 0.0  ;;  %v619_v12 = vadd.f32 %v6172_v48, %v568_v4  ;;  %v648_v13 = vmax.f32 %v600_v5, 0.0  ;;  %v657_v14 = vmax.f32 %v609_v6, 0.0  ;;  %v5898_v5 = vld [vmem:[%s6140_s16 + $0xa0] sm:$0xff]  }
  0x1f   : > { %1088 = vmatpush.bf16.msra.mxu0 %v5146_v27  ;;  %5914 = vmatpush.bf16.msra.mxu1 %v5146_v27  ;;  %v658_v15 = vmax.f32 %v610_v7, 0.0  ;;  %v620_v16 = vadd.f32 %v6172_v48, %v569_v8  ;;  %v677_v17 = vmul.f32 %v6143_v35, %v629_v9  ;;  %v726_v18 = vpack.c.bf16 %v630_v10, %v630_v10 }
  0x20   : > { %5915 = vmatpush.bf16.msra.mxu2 %v5146_v27  ;;  %5916 = vmatpush.bf16.msra.mxu3 %v5146_v27  ;;  %v695_v19 = vmul.f32 %v6143_v35, %v647_v11  ;;  %v667_v20 = vmax.f32 %v619_v12, 0.0  ;;  %v744_v21 = vpack.c.bf16 %v648_v13, %v648_v13  ;;  %v753_v34 = vpack.c.bf16 %v657_v14, %v657_v14 }
  0x21   : > { %v706_v26 = vmul.f32 %v6160_v41, %v658_v15  ;;  %v668_v39 = vmax.f32 %v620_v16, 0.0  ;;  %v725_v27 = vpack.c.bf16 %v677_v17, %v677_v17  ;;  %v861_v40 = vunpack.c.l.b16 %v726_v18  ;;  %v6232_v17 = vld [vmem:[%s6140_s16 + $0x10] sm:$0xff]  }
  0x22   : > { %v743_v42 = vpack.c.bf16 %v695_v19, %v695_v19  ;;  %v715_v46 = vmul.f32 %v6160_v41, %v667_v20  ;;  %v879_v49 = vunpack.c.l.b16 %v744_v21  ;;  %v888_v51 = vunpack.c.l.b16 %v753_v34 }
  0x23   : > { %1089 = vmatpush.bf16.msra.mxu0 %v6116_v28  ;;  %5917 = vmatpush.bf16.msra.mxu1 %v6116_v28  ;;  %v754_v50 = vpack.c.bf16 %v706_v26, %v706_v26  ;;  %v716_v52 = vmul.f32 %v6143_v35, %v668_v39  ;;  %v860_v53 = vunpack.c.l.b16 %v725_v27  ;;  %v532_v56 = vmul.f32 %v6121_v29, %v5789_v60 }
  0x24   : > { %5918 = vmatpush.bf16.msra.mxu2 %v6116_v28  ;;  %5919 = vmatpush.bf16.msra.mxu3 %v6116_v28  ;;  %v878_v54 = vunpack.c.l.b16 %v743_v42  ;;  %v763_v55 = vpack.c.bf16 %v715_v46, %v715_v46  ;;  %v533_v59 = vmul.f32 %v6121_v29, %v5790_v0  ;;  %v5826_v4 = vunpack.c.h.bf16 %v5888_v47  ;;  %v5177_v47 = vld [vmem:[%s8423_s3 + $0x140] sm:$0xf] }
  0x25   : > { %v889_v57 = vunpack.c.l.b16 %v754_v50  ;;  %v764_v58 = vpack.c.bf16 %v716_v52, %v716_v52  ;;  %v6211_v28 = vpack.c.b16 %v861_v40, %v860_v53  ;;  %v583_v2 = vadd.f32 %v6172_v48, %v532_v56 }
  0x26   : > { %v6213_v63 = vpack.c.b16 %v879_v49, %v878_v54  ;;  %v898_v1 = vunpack.c.l.b16 %v763_v55  ;;  %v584_v3 = vadd.f32 %v6172_v48, %v533_v59  ;;  %v550_v7 = vmul.f32 %v6121_v29, %v5825_v61  ;;  %v5680_v49 = vld [vmem:[%s8423_s3 + $0x148] sm:$0xf0]  ;;  %v5277_v54 = vld [vmem:[%s8423_s3 + $0x90] sm:$0xf]  ;;  %v5706_v55 = vld [vmem:[%s8423_s3 + $0x98] sm:$0xf0] }
  0x27   : > { %1090 = vmatpush.bf16.msra.mxu0 %v6133_v32  ;;  %5920 = vmatpush.bf16.msra.mxu1 %v6133_v32  ;;  %v6218_v60 = vpack.c.b16 %v889_v57, %v888_v51  ;;  %v899_v0 = vunpack.c.l.b16 %v764_v58  ;;  %v631_v6 = vmax.f32 %v583_v2, 0.0  ;;  %v5845_v8 = vunpack.c.l.bf16 %v5893_v62  ;;  %v5705_v57 = vld [vmem:[%s8423_s3 + $0x94] sm:$0xf]  ;;  %v5279_v58 = vld [vmem:[%s8423_s3 + $0x9c] sm:$0xf0] }
  0x28   : > { %5921 = vmatpush.bf16.msra.mxu2 %v6133_v32  ;;  %5922 = vmatpush.bf16.msra.mxu3 %v6133_v32  ;;  %v5846_v9 = vunpack.c.h.bf16 %v5893_v62  ;;  %v632_v11 = vmax.f32 %v584_v3, 0.0  ;;  %v551_v12 = vmul.f32 %v6121_v29, %v5826_v4  ;;  %v5865_v13 = vunpack.c.l.bf16 %v5898_v5  ;;  %v5165_v4 = vld [vmem:[%s8423_s3 + $0x128] sm:$0xf] }
  0x29   : > { %v6223_v10 = vpack.c.b16 %v899_v0, %v898_v1  ;;  %v679_v32 = vmul.f32 %v6160_v41, %v631_v6  ;;  %v601_v14 = vadd.f32 %v6172_v48, %v550_v7  ;;  %v560_v15 = vmul.f32 %v6121_v29, %v5845_v8 }
  0x2a   : > { %v5866_v16 = vunpack.c.h.bf16 %v5898_v5  ;;  %v680_v18 = vmul.f32 %v6143_v35, %v632_v11  ;;  %v602_v19 = vadd.f32 %v6172_v48, %v551_v12  ;;  %v561_v20 = vmul.f32 %v6121_v29, %v5846_v9  ;;  %v5677_v5 = vld [vmem:[%s8423_s3 + $0x130] sm:$0xf0]  ;;  %v5889_v11 = vld [vmem:[%s6140_s16 + $0x58] sm:$0xff]  }
  0x2b   : > { %8438 = vst [vmem:[#allocation3_spill] sm:$0xff] %v6223_v10  ;;  %1091 = vmatpush.bf16.msra.mxu0 %v6135_v33  ;;  %5923 = vmatpush.bf16.msra.mxu1 %v6135_v33  ;;  %v5793_v21 = vunpack.c.l.bf16 %v6232_v17  ;;  %v727_v26 = vpack.c.bf16 %v679_v32, %v679_v32  ;;  %v649_v34 = vmax.f32 %v601_v14, 0.0  ;;  %v570_v39 = vmul.f32 %v6121_v29, %v5865_v13 }
  0x2c   : > { %5924 = vmatpush.bf16.msra.mxu2 %v6135_v33  ;;  %5925 = vmatpush.bf16.msra.mxu3 %v6135_v33  ;;  %v611_v33 = vadd.f32 %v6172_v48, %v560_v15  ;;  %v728_v27 = vpack.c.bf16 %v680_v18, %v680_v18  ;;  %v650_v40 = vmax.f32 %v602_v19, 0.0  ;;  %v612_v42 = vadd.f32 %v6172_v48, %v561_v20  ;;  %v5894_v15 = vld [vmem:[%s6140_s16 + $0x80] sm:$0xff]  }
  0x2d   : > { %v571_v22 = vmul.f32 %v6121_v29, %v5866_v16  ;;  %v862_v25 = vunpack.c.l.b16 %v727_v26  ;;  %v621_v46 = vadd.f32 %v6172_v48, %v570_v39  ;;  %v5198_v56 = vor.u32 %v5684_v23, %v5195_v24  ;;  %v5899_v26 = vld [vmem:[%s6140_s16 + $0xa8] sm:$0xff]  }
  0x2e   : > { %1092 = vmatmul.bf16.vlgmr.msra.gmra.mxu0 %v6211_v28  ;;  %1137 = vmatmul.bf16.vlgmr.msra.gmra.mxu1 %v6213_v63  ;;  %v863_v50 = vunpack.c.l.b16 %v728_v27  ;;  %v698_v51 = vmul.f32 %v6143_v35, %v650_v40  ;;  %v660_v52 = vmax.f32 %v612_v42, 0.0  ;;  %v5178_v3 = vor.u32 %v5680_v49, %v5177_v47 }
  0x2f   : > { %1901 = vmatpush.bf16.msrb.mxu0 %v5294_v43  ;;  %1162 = vmatmul.bf16.vlgmr.msra.gmra.mxu2 %v6218_v60  ;;  %v659_v43 = vmax.f32 %v611_v33, 0.0  ;;  %v622_v53 = vadd.f32 %v6172_v48, %v571_v22  ;;  %v5278_v9 = vor.u32 %v5706_v55, %v5277_v54  ;;  %v5282_v32 = vor.u32 %v5705_v57, %v5279_v58 }
  0x30   : > { %1342 = vmatpush.bf16.msrb.mxu2 %v5202_v36  ;;  %1187 = vmatmul.bf16.vlgmr.msra.gmra.mxu3 %v6223_v10  ;;  %v697_v36 = vmul.f32 %v6160_v41, %v649_v34  ;;  %v6289_v59 = vpack.c.b16 %v863_v50, %v862_v25  ;;  %v746_v61 = vpack.c.bf16 %v698_v51, %v698_v51  ;;  %v5794_v20 = vunpack.c.h.bf16 %v6232_v17 }
  0x31   : > { %1775 = vmatpush.bf16.msrb.mxu3 %v5290_v45  ;;  %v707_v38 = vmul.f32 %v6143_v35, %v659_v43  ;;  %v669_v45 = vmax.f32 %v621_v46, 0.0  ;;  %v756_v62 = vpack.c.bf16 %v660_v52, %v660_v52  ;;  %v670_v30 = vmax.f32 %v622_v53, 0.0  ;;  %1213 = vmatpush.bf16.msrb.mxu1 %v5198_v56 }
  0x32   : > { %v745_v37 = vpack.c.bf16 %v697_v36, %v697_v36  ;;  %v881_v6 = vunpack.c.l.b16 %v746_v61  ;;  %v5166_v19 = vor.u32 %v5677_v5, %v5165_v4  ;;  %v534_v33 = vmul.f32 %v6121_v29, %v5793_v21  ;;  %v5678_v4 = vld [vmem:[%s8423_s3 + $0x13c] sm:$0xf]  ;;  %v5171_v5 = vld [vmem:[%s8423_s3 + $0x144] sm:$0xf0] }
  0x33   : > { %v755_v2 = vpack.c.bf16 %v707_v38, %v707_v38  ;;  %v765_v0 = vpack.c.bf16 %v669_v45, %v669_v45  ;;  %v891_v7 = vunpack.c.l.b16 %v756_v62  ;;  %v718_v8 = vmul.f32 %v6160_v41, %v670_v30  ;;  %1902 = vmatpush.bf16.msrb.mxu0 %v5282_v32 }
  0x34   : > { %1343 = vmatpush.bf16.msrb.mxu2 %v5190_v44  ;;  %v5183_v44 = vld [vmem:[%s8423_s3 + $0x15c] sm:$0xf0]  ;;  %v880_v1 = vunpack.c.l.b16 %v745_v37  ;;  %v5829_v39 = vunpack.c.l.bf16 %v5889_v11  ;;  %v5830_v27 = vunpack.c.h.bf16 %v5889_v11  ;;  %v535_v42 = vmul.f32 %v6121_v29, %v5794_v20  ;;  %v5153_v11 = vld [vmem:[%s8423_s3 + $0x110] sm:$0xf] }
  0x35   : > { %v890_v12 = vunpack.c.l.b16 %v755_v2  ;;  %v900_v13 = vunpack.c.l.b16 %v765_v0  ;;  %v5186_v14 = vor.u32 %v5681_v31, %v5183_v44  ;;  %v766_v18 = vpack.c.bf16 %v718_v8, %v718_v8  ;;  %1776 = vmatpush.bf16.msrb.mxu3 %v5278_v9  ;;  %v5265_v31 = vld [vmem:[%s8423_s3 + $0x78] sm:$0xf]  ;;  %v5703_v44 = vld [vmem:[%s8423_s3 + $0x80] sm:$0xf0] }
  0x36   : > { %v6306_v16 = vpack.c.b16 %v881_v6, %v880_v1  ;;  %v5849_v22 = vunpack.c.l.bf16 %v5894_v15  ;;  %v5850_v23 = vunpack.c.h.bf16 %v5894_v15  ;;  %v585_v24 = vadd.f32 %v6172_v48, %v534_v33 }
  0x37   : > { %v6310_v34 = vpack.c.b16 %v891_v7, %v890_v12  ;;  %1214 = vmatpush.bf16.msrb.mxu1 %v5186_v14  ;;  %v901_v40 = vunpack.c.l.b16 %v766_v18  ;;  %v552_v25 = vmul.f32 %v6121_v29, %v5829_v39  ;;  %v553_v36 = vmul.f32 %v6121_v29, %v5830_v27  ;;  %v5674_v12 = vld [vmem:[%s8423_s3 + $0x118] sm:$0xf0]  ;;  %v5267_v39 = vld [vmem:[%s8423_s3 + $0x84] sm:$0xf0]  ;;  %v5253_v27 = vld [vmem:[%s8423_s3 + $0x60] sm:$0xf] }
  0x38   : > { %1344 = vmatpush.bf16.msrb.mxu2 %v5178_v3  ;;  %v5869_v43 = vunpack.c.l.bf16 %v5899_v26  ;;  %v586_v17 = vadd.f32 %v6172_v48, %v535_v42  ;;  %v562_v21 = vmul.f32 %v6121_v29, %v5849_v22  ;;  %v563_v47 = vmul.f32 %v6121_v29, %v5850_v23  ;;  %v5702_v18 = vld [vmem:[%s8423_s3 + $0x7c] sm:$0xf] }
  0x39   : > { %v6319_v46 = vpack.c.b16 %v901_v40, %v900_v13  ;;  %v633_v49 = vmax.f32 %v585_v24, 0.0  ;;  %v603_v50 = vadd.f32 %v6172_v48, %v552_v25  ;;  %v604_v51 = vadd.f32 %v6172_v48, %v553_v36  ;;  %v5700_v40 = vld [vmem:[%s8423_s3 + $0x68] sm:$0xf0]  ;;  %v5881_v25 = vld [vmem:[%s6140_s16 + $0x18] sm:$0xff]  }
  0x3a   : > { %v5870_v52 = vunpack.c.h.bf16 %v5899_v26  ;;  %v634_v53 = vmax.f32 %v586_v17, 0.0  ;;  %v613_v54 = vadd.f32 %v6172_v48, %v562_v21  ;;  %v614_v55 = vadd.f32 %v6172_v48, %v563_v47  ;;  %v5890_v47 = vld [vmem:[%s6140_s16 + $0x60] sm:$0xff]  }
  0x3b   : > { %8439 = vst [vmem:[#allocation4_spill] sm:$0xff] %v6319_v46  ;;  %v572_v37 = vmul.f32 %v6121_v29, %v5869_v43  ;;  %v729_v38 = vpack.c.bf16 %v633_v49, %v633_v49  ;;  %v651_v45 = vmax.f32 %v603_v50, 0.0  ;;  %v652_v56 = vmax.f32 %v604_v51, 0.0  ;;  %v5895_v49 = vld [vmem:[%s6140_s16 + $0x88] sm:$0xff]  }
  0x3c   : > { %1345 = vmatpush.bf16.msrb.mxu2 %v5166_v19  ;;  %v573_v57 = vmul.f32 %v6121_v29, %v5870_v52  ;;  %v682_v58 = vmul.f32 %v6160_v41, %v634_v53  ;;  %v661_v61 = vmax.f32 %v613_v54, 0.0  ;;  %v662_v62 = vmax.f32 %v614_v55, 0.0  ;;  %v5900_v54 = vld [vmem:[%s6140_s16 + $0xb0] sm:$0xff]  }
  0x3d   : > { %v623_v30 = vadd.f32 %v6172_v48, %v572_v37  ;;  %v864_v1 = vunpack.c.l.b16 %v729_v38  ;;  %v700_v2 = vmul.f32 %v6160_v41, %v652_v56  ;;  %v747_v0 = vpack.c.bf16 %v651_v45, %v651_v45 }
  0x3e   : > { %1097 = vmatmul.bf16.gmra.mxu0 %v6289_v59  ;;  %1142 = vmatmul.bf16.gmra.mxu1 %v6306_v16  ;;  %v624_v3 = vadd.f32 %v6172_v48, %v573_v57  ;;  %v730_v6 = vpack.c.bf16 %v682_v58, %v682_v58  ;;  %v709_v7 = vmul.f32 %v6160_v41, %v661_v61  ;;  %v5797_v38 = vunpack.c.l.bf16 %v5881_v25 }
  0x3f   : > { %1167 = vmatmul.bf16.gmra.mxu2 %v6310_v34  ;;  %v710_v8 = vmul.f32 %v6143_v35, %v662_v62  ;;  %v671_v9 = vmax.f32 %v623_v30, 0.0  ;;  %v748_v13 = vpack.c.bf16 %v700_v2, %v700_v2  ;;  %v882_v32 = vunpack.c.l.b16 %v747_v0 }
  0x40   : > { %1192 = vmatmul.bf16.gmra.mxu3 %v6319_v46  ;;  %v672_v14 = vmax.f32 %v624_v3, 0.0  ;;  %v5266_v15 = vor.u32 %v5703_v44, %v5265_v31  ;;  %v865_v19 = vunpack.c.l.b16 %v730_v6  ;;  %v757_v20 = vpack.c.bf16 %v709_v7, %v709_v7 }
  0x41   : > { %v758_v26 = vpack.c.bf16 %v710_v8, %v710_v8  ;;  %v719_v33 = vmul.f32 %v6143_v35, %v671_v9  ;;  %v883_v42 = vunpack.c.l.b16 %v748_v13  ;;  %v5174_v23 = vor.u32 %v5678_v4, %v5171_v5 }
  0x42   : > { %v768_v22 = vpack.c.bf16 %v672_v14, %v672_v14  ;;  %1777 = vmatpush.bf16.msrb.mxu3 %v5266_v15  ;;  %v5154_v24 = vor.u32 %v5674_v12, %v5153_v11  ;;  %v6372_v36 = vpack.c.b16 %v865_v19, %v864_v1  ;;  %v892_v43 = vunpack.c.l.b16 %v757_v20 }
  0x43   : > { %v893_v17 = vunpack.c.l.b16 %v758_v26  ;;  %v767_v21 = vpack.c.bf16 %v719_v33, %v719_v33  ;;  %v6376_v50 = vpack.c.b16 %v883_v42, %v882_v32  ;;  %1215 = vmatpush.bf16.msrb.mxu1 %v5174_v23  ;;  %v5270_v52 = vor.u32 %v5702_v18, %v5267_v39  ;;  %v6399_v18 = vld [vmem:[%s6140_s16 + $0x20] sm:$0xff]  }
  0x44   : > { %v903_v51 = vunpack.c.l.b16 %v768_v22  ;;  %1346 = vmatpush.bf16.msrb.mxu2 %v5154_v24  ;;  %v5254_v53 = vor.u32 %v5700_v40, %v5253_v27  ;;  %v5798_v45 = vunpack.c.h.bf16 %v5881_v25  ;;  %v5833_v56 = vunpack.c.l.bf16 %v5890_v47  ;;  %v5675_v25 = vld [vmem:[%s8423_s3 + $0x124] sm:$0xf] }
  0x45   : > { %v6379_v55 = vpack.c.b16 %v893_v17, %v892_v43  ;;  %v902_v37 = vunpack.c.l.b16 %v767_v21  ;;  %1903 = vmatpush.bf16.msrb.mxu0 %v5270_v52  ;;  %v5834_v57 = vunpack.c.h.bf16 %v5890_v47  ;;  %v5853_v58 = vunpack.c.l.bf16 %v5895_v49  ;;  %v5159_v43 = vld [vmem:[%s8423_s3 + $0x12c] sm:$0xf0]  ;;  %v5141_v17 = vld [vmem:[%s8423_s3 + $0xf8] sm:$0xf] }
  0x46   : > { %1778 = vmatpush.bf16.msrb.mxu3 %v5254_v53  ;;  %v5854_v61 = vunpack.c.h.bf16 %v5895_v49  ;;  %v536_v30 = vmul.f32 %v6121_v29, %v5797_v38  ;;  %v537_v31 = vmul.f32 %v6121_v29, %v5798_v45  ;;  %v5873_v44 = vunpack.c.l.bf16 %v5900_v54  ;;  %v5671_v53 = vld [vmem:[%s8423_s3 + $0x100] sm:$0xf0] }
  0x47   : > { %v6381_v62 = vpack.c.b16 %v903_v51, %v902_v37  ;;  %v554_v1 = vmul.f32 %v6121_v29, %v5833_v56  ;;  %v555_v2 = vmul.f32 %v6121_v29, %v5834_v57  ;;  %v564_v0 = vmul.f32 %v6121_v29, %v5853_v58  ;;  %v5697_v57 = vld [vmem:[%s8423_s3 + $0x50] sm:$0xf0]  ;;  %v5699_v58 = vld [vmem:[%s8423_s3 + $0x64] sm:$0xf] }
  0x48   : > { %v565_v3 = vmul.f32 %v6121_v29, %v5854_v61  ;;  %v587_v4 = vadd.f32 %v6172_v48, %v536_v30  ;;  %v588_v5 = vadd.f32 %v6172_v48, %v537_v31  ;;  %v5874_v6 = vunpack.c.h.bf16 %v5900_v54  ;;  %v5241_v54 = vld [vmem:[%s8423_s3 + $0x48] sm:$0xf]  ;;  %v5255_v61 = vld [vmem:[%s8423_s3 + $0x6c] sm:$0xf0] }
  0x49   : > { %8440 = vst [vmem:[#allocation5_spill] sm:$0xff] %v6381_v62  ;;  %v574_v7 = vmul.f32 %v6121_v29, %v5873_v44  ;;  %v605_v8 = vadd.f32 %v6172_v48, %v554_v1  ;;  %v606_v9 = vadd.f32 %v6172_v48, %v555_v2  ;;  %v615_v11 = vadd.f32 %v6172_v48, %v564_v0  ;;  %v5672_v2 = vld [vmem:[%s8423_s3 + $0x10c] sm:$0xf]  ;;  %v5147_v0 = vld [vmem:[%s8423_s3 + $0x114] sm:$0xf0] }
  0x4a   : > { %v616_v12 = vadd.f32 %v6172_v48, %v565_v3  ;;  %v635_v13 = vmax.f32 %v587_v4, 0.0  ;;  %v636_v32 = vmax.f32 %v588_v5, 0.0  ;;  %v575_v14 = vmul.f32 %v6121_v29, %v5874_v6  ;;  %v5129_v3 = vld [vmem:[%s8423_s3 + $0xe0] sm:$0xf] }
  0x4b   : > { %v625_v15 = vadd.f32 %v6172_v48, %v574_v7  ;;  %v653_v19 = vmax.f32 %v605_v8, 0.0  ;;  %v654_v20 = vmax.f32 %v606_v9, 0.0  ;;  %v663_v26 = vmax.f32 %v615_v11, 0.0  ;;  %v5668_v8 = vld [vmem:[%s8423_s3 + $0xe8] sm:$0xf0] }
  0x4c   : > { %v664_v33 = vmax.f32 %v616_v12, 0.0  ;;  %v683_v39 = vmul.f32 %v6143_v35, %v635_v13  ;;  %v732_v27 = vpack.c.bf16 %v636_v32, %v636_v32  ;;  %v626_v40 = vadd.f32 %v6172_v48, %v575_v14  ;;  %v5229_v9 = vld [vmem:[%s8423_s3 + $0x30] sm:$0xf]  ;;  %v5694_v11 = vld [vmem:[%s8423_s3 + $0x38] sm:$0xf0] }
  0x4d   : > { %v673_v42 = vmax.f32 %v625_v15, 0.0  ;;  %v701_v22 = vmul.f32 %v6143_v35, %v653_v19  ;;  %v750_v23 = vpack.c.bf16 %v654_v20, %v654_v20  ;;  %v5801_v21 = vunpack.c.l.bf16 %v6399_v18  ;;  %v5891_v15 = vld [vmem:[%s6140_s16 + $0x68] sm:$0xff]   ;;  %v5896_v19 = vld [vmem:[%s6140_s16 + $0x90] sm:$0xff]  }
  0x4e   : > { %1102 = vmatmul.bf16.gmra.mxu0 %v6372_v36  ;;  %1147 = vmatmul.bf16.gmra.mxu1 %v6376_v50  ;;  %v712_v24 = vmul.f32 %v6160_v41, %v664_v33  ;;  %v731_v47 = vpack.c.bf16 %v683_v39, %v683_v39  ;;  %v867_v49 = vunpack.c.l.b16 %v732_v27  ;;  %v759_v51 = vpack.c.bf16 %v663_v26, %v663_v26 }
  0x4f   : > { %1172 = vmatmul.bf16.gmra.mxu2 %v6379_v55  ;;  %v674_v52 = vmax.f32 %v626_v40, 0.0  ;;  %v749_v37 = vpack.c.bf16 %v701_v22, %v701_v22  ;;  %v885_v38 = vunpack.c.l.b16 %v750_v23  ;;  %v721_v56 = vmul.f32 %v6160_v41, %v673_v42 }
  0x50   : > { %1197 = vmatmul.bf16.gmra.mxu3 %v6381_v62  ;;  %v760_v45 = vpack.c.bf16 %v712_v24, %v712_v24  ;;  %v866_v30 = vunpack.c.l.b16 %v731_v47  ;;  %v894_v31 = vunpack.c.l.b16 %v759_v51  ;;  %v5162_v1 = vor.u32 %v5675_v25, %v5159_v43 }
  0x51   : > { %v722_v44 = vmul.f32 %v6143_v35, %v674_v52  ;;  %v884_v4 = vunpack.c.l.b16 %v749_v37  ;;  %v769_v6 = vpack.c.bf16 %v721_v56, %v721_v56  ;;  %v5142_v7 = vor.u32 %v5671_v53, %v5141_v17  ;;  %v5901_v17 = vld [vmem:[%s6140_s16 + $0xb8] sm:$0xff]  }
  0x52   : > { %v895_v5 = vunpack.c.l.b16 %v760_v45  ;;  %v6454_v12 = vpack.c.b16 %v867_v49, %v866_v30  ;;  %1216 = vmatpush.bf16.msrb.mxu1 %v5162_v1  ;;  %v5242_v32 = vor.u32 %v5697_v57, %v5241_v54  ;;  %v5258_v14 = vor.u32 %v5699_v58, %v5255_v61 }
  0x53   : > { %v770_v13 = vpack.c.bf16 %v722_v44, %v722_v44  ;;  %v6458_v20 = vpack.c.b16 %v885_v38, %v884_v4  ;;  %v904_v33 = vunpack.c.l.b16 %v769_v6  ;;  %1347 = vmatpush.bf16.msrb.mxu2 %v5142_v7  ;;  %v5150_v39 = vor.u32 %v5672_v2, %v5147_v0 }
  0x54   : > { %v6460_v26 = vpack.c.b16 %v895_v5, %v894_v31  ;;  %1779 = vmatpush.bf16.msrb.mxu3 %v5242_v32  ;;  %1904 = vmatpush.bf16.msrb.mxu0 %v5258_v14  ;;  %v5130_v40 = vor.u32 %v5668_v8, %v5129_v3  ;;  %v5230_v42 = vor.u32 %v5694_v11, %v5229_v9  ;;  %v5802_v22 = vunpack.c.h.bf16 %v6399_v18  ;;  %v5669_v14 = vld [vmem:[%s8423_s3 + $0xf4] sm:$0xf] }
  0x55   : > { %v905_v27 = vunpack.c.l.b16 %v770_v13  ;;  %v538_v23 = vmul.f32 %v6121_v29, %v5801_v21  ;;  %v5837_v24 = vunpack.c.l.bf16 %v5891_v15  ;;  %v5838_v25 = vunpack.c.h.bf16 %v5891_v15 }
  0x56   : > { %v5857_v43 = vunpack.c.l.bf16 %v5896_v19  ;;  %1217 = vmatpush.bf16.msrb.mxu1 %v5150_v39  ;;  %v539_v49 = vmul.f32 %v6121_v29, %v5802_v22  ;;  %v5858_v51 = vunpack.c.h.bf16 %v5896_v19  ;;  %v5877_v52 = vunpack.c.l.bf16 %v5901_v17 }
  0x57   : > { %v6465_v47 = vpack.c.b16 %v905_v27, %v904_v33  ;;  %1348 = vmatpush.bf16.msrb.mxu2 %v5130_v40  ;;  %v589_v53 = vadd.f32 %v6172_v48, %v538_v23  ;;  %v556_v54 = vmul.f32 %v6121_v29, %v5837_v24  ;;  %v557_v18 = vmul.f32 %v6121_v29, %v5838_v25  ;;  %v5135_v27 = vld [vmem:[%s8423_s3 + $0xfc] sm:$0xf0]  ;;  %v5117_v40 = vld [vmem:[%s8423_s3 + $0xc8] sm:$0xf]  ;;  %v5665_v24 = vld [vmem:[%s8423_s3 + $0xd0] sm:$0xf0] }
  0x58   : > { %v566_v21 = vmul.f32 %v6121_v29, %v5857_v43  ;;  %1780 = vmatpush.bf16.msrb.mxu3 %v5230_v42  ;;  %v590_v37 = vadd.f32 %v6172_v48, %v539_v49  ;;  %v567_v38 = vmul.f32 %v6121_v29, %v5858_v51  ;;  %v5878_v45 = vunpack.c.h.bf16 %v5901_v17  ;;  %v5883_v42 = vld [vmem:[%s6140_s16 + $0x28] sm:$0xff]   ;;  %v5666_v25 = vld [vmem:[%s8423_s3 + $0xdc] sm:$0xf] }
  0x59   : > { %8441 = vst [vmem:[#allocation6_spill] sm:$0xff] %v6465_v47  ;;  %v576_v56 = vmul.f32 %v6121_v29, %v5877_v52  ;;  %v637_v57 = vmax.f32 %v589_v53, 0.0  ;;  %v607_v58 = vadd.f32 %v6172_v48, %v556_v54  ;;  %v608_v61 = vadd.f32 %v6172_v48, %v557_v18  ;;  %v5123_v43 = vld [vmem:[%s8423_s3 + $0xe4] sm:$0xf0]  ;;  %v5217_v52 = vld [vmem:[%s8423_s3 + $0x18] sm:$0xf] }
  0x5a   : > { %v617_v30 = vadd.f32 %v6172_v48, %v566_v21  ;;  %v638_v31 = vmax.f32 %v590_v37, 0.0  ;;  %v618_v44 = vadd.f32 %v6172_v48, %v567_v38  ;;  %v577_v1 = vmul.f32 %v6121_v29, %v5878_v45  ;;  %v5691_v53 = vld [vmem:[%s8423_s3 + $0x20] sm:$0xf0]  ;;  %v5205_v54 = vld [vmem:[%s8423_s3] sm:$0xf] }
  0x5b   : > { %v627_v2 = vadd.f32 %v6172_v48, %v576_v56  ;;  %v685_v0 = vmul.f32 %v6160_v41, %v637_v57  ;;  %v655_v3 = vmax.f32 %v607_v58, 0.0  ;;  %v656_v4 = vmax.f32 %v608_v61, 0.0  ;;  %v5688_v37 = vld [vmem:[%s8423_s3 + $0x8] sm:$0xf0]  ;;  %v5243_v45 = vld [vmem:[%s8423_s3 + $0x54] sm:$0xf0] }
  0x5c   : > { %v665_v5 = vmax.f32 %v617_v30, 0.0  ;;  %v686_v6 = vmul.f32 %v6143_v35, %v638_v31  ;;  %v666_v7 = vmax.f32 %v618_v44, 0.0  ;;  %v628_v8 = vadd.f32 %v6172_v48, %v577_v1  ;;  %v5696_v38 = vld [vmem:[%s8423_s3 + $0x4c] sm:$0xf]  ;;  %v5389_v31 = vld [vmem:[%s8423_s3 + $0xa8] sm:$0xf] }
  0x5d   : > { %v675_v9 = vmax.f32 %v627_v2, 0.0  ;;  %v733_v11 = vpack.c.bf16 %v685_v0, %v685_v0  ;;  %v703_v13 = vmul.f32 %v6160_v41, %v655_v3  ;;  %v704_v32 = vmul.f32 %v6143_v35, %v656_v4  ;;  %v5733_v44 = vld [vmem:[%s8423_s3 + $0xb0] sm:$0xf0]  ;;  %v5732_v1 = vld [vmem:[%s8423_s3 + $0xac] sm:$0xf] }
  0x5e   : > { %1107 = vmatmul.bf16.gmra.mxu0 %v6454_v12  ;;  %1152 = vmatmul.bf16.gmra.mxu1 %v6458_v20  ;;  %v734_v15 = vpack.c.bf16 %v686_v6, %v686_v6  ;;  %v713_v19 = vmul.f32 %v6143_v35, %v665_v5  ;;  %v762_v33 = vpack.c.bf16 %v666_v7, %v666_v7  ;;  %v676_v39 = vmax.f32 %v628_v8, 0.0  ;;  %v5391_v5 = vld [vmem:[%s8423_s3 + $0xb4] sm:$0xf0]  ;;  %v5693_v6 = vld [vmem:[%s8423_s3 + $0x34] sm:$0xf] }
  0x5f   : > { %1177 = vmatmul.bf16.gmra.mxu2 %v6460_v26  ;;  %v751_v22 = vpack.c.bf16 %v703_v13, %v703_v13  ;;  %v752_v23 = vpack.c.bf16 %v704_v32, %v704_v32  ;;  %v771_v51 = vpack.c.bf16 %v675_v9, %v675_v9  ;;  %v868_v18 = vunpack.c.l.b16 %v733_v11  ;;  %v5231_v7 = vld [vmem:[%s8423_s3 + $0x3c] sm:$0xf0]  ;;  %v5663_v13 = vld [vmem:[%s8423_s3 + $0xc4] sm:$0xf]  ;;  %v5111_v32 = vld [vmem:[%s8423_s3 + $0xcc] sm:$0xf0] }
  0x60   : > { %1202 = vmatmul.bf16.gmra.mxu3 %v6465_v47  ;;  %v761_v17 = vpack.c.bf16 %v713_v19, %v713_v19  ;;  %v724_v49 = vmul.f32 %v6160_v41, %v676_v39  ;;  %v5138_v21 = vor.u32 %v5669_v14, %v5135_v27  ;;  %v5805_v56 = vunpack.c.l.bf16 %v5883_v42 }
  0x61   : > { %v869_v57 = vunpack.c.l.b16 %v734_v15  ;;  %v897_v58 = vunpack.c.l.b16 %v762_v33  ;;  %v5118_v30 = vor.u32 %v5665_v24, %v5117_v40  ;;  %v886_v2 = vunpack.c.l.b16 %v751_v22 }
  0x62   : > { %v772_v61 = vpack.c.bf16 %v724_v49, %v724_v49  ;;  %v887_v0 = vunpack.c.l.b16 %v752_v23  ;;  %1218 = vmatpush.bf16.msrb.mxu1 %v5138_v21  ;;  %v5126_v3 = vor.u32 %v5666_v25, %v5123_v43  ;;  %v5218_v4 = vor.u32 %v5691_v53, %v5217_v52  ;;  %v5297_v21 = vld [vmem:[%s8423_s3 + $0xb0] sm:$0xf] }
  0x63   : > { %v896_v8 = vunpack.c.l.b16 %v761_v17  ;;  %v906_v9 = vunpack.c.l.b16 %v771_v51  ;;  %1349 = vmatpush.bf16.msrb.mxu2 %v5118_v30  ;;  %v5246_v14 = vor.u32 %v5696_v38, %v5243_v45  ;;  %v5206_v15 = vor.u32 %v5688_v37, %v5205_v54  ;;  %v5884_v51 = vld [vmem:[%s6140_s16 + $0x30] sm:$0xff]   ;;  %v5710_v37 = vld [vmem:[%s8423_s3 + $0xb8] sm:$0xf0] }
  0x64   : > { %v907_v11 = vunpack.c.l.b16 %v772_v61  ;;  %1781 = vmatpush.bf16.msrb.mxu3 %v5218_v4  ;;  %v5806_v19 = vunpack.c.h.bf16 %v5883_v42  ;;  %v540_v33 = vmul.f32 %v6121_v29, %v5805_v56  ;;  %v5390_v39 = vor.u32 %v5733_v44, %v5389_v31 }
  0x65   : > { %1905 = vmatpush.bf16.msrb.mxu0 %v5246_v14  ;;  %v5394_v27 = vor.u32 %v5732_v1, %v5391_v5  ;;  %v5234_v40 = vor.u32 %v5693_v6, %v5231_v7  ;;  %v5114_v22 = vor.u32 %v5663_v13, %v5111_v32  ;;  %v6555_v24 = vpack.c.b16 %v869_v57, %v868_v18  ;;  %v5956_v32 = vld [vmem:[%s8424_s4] ss:$0 sm:$0xff] }
  0x66   : > { %1219 = vmatpush.bf16.msrb.mxu1 %v5126_v3  ;;  %v541_v23 = vmul.f32 %v6121_v29, %v5806_v19  ;;  %v6557_v25 = vpack.c.b16 %v887_v0, %v886_v2  ;;  %v591_v43 = vadd.f32 %v6172_v48, %v540_v33  ;;  %v6560_v17 = vpack.c.b16 %v897_v58, %v896_v8  ;;  %v5885_v3 = vld [vmem:[%s6140_s16 + $0x38] sm:$0xff]   ;;  %v5219_v8 = vld [vmem:[%s8423_s3 + $0x24] sm:$0xf0] }
  0x67   : > { %2738 = vmatpush.bf16.msra.mxu2 %v5390_v39  ;;  %v6562_v42 = vpack.c.b16 %v907_v11, %v906_v9  ;;  %v5809_v54 = vunpack.c.l.bf16 %v5884_v51  ;;  %v5298_v38 = vor.u32 %v5710_v37, %v5297_v21  ;;  %v5810_v57 = vunpack.c.h.bf16 %v5884_v51 }
  0x68   : > { %1782 = vmatpush.bf16.msrb.mxu3 %v5206_v15  ;;  %v592_v49 = vadd.f32 %v6172_v48, %v541_v23  ;;  %v639_v53 = vmax.f32 %v591_v43, 0.0  ;;  %v5813_v6 = vunpack.c.l.bf16 %v5885_v3  ;;  %v5814_v7 = vunpack.c.h.bf16 %v5885_v3  ;;  %v5886_v43 = vld [vmem:[%s6140_s16 + $0x40] sm:$0xff]   ;;  %s7647_s16 = scalar_lea.vmem %s8426_s6, %s5928_s21 }
  0x69   : > { %8442 = vst [vmem:[#allocation7_spill] sm:$0xff] %v6562_v42  ;;  %1906 = vmatpush.bf16.msrb.mxu0 %v5234_v40  ;;  %v542_v58 = vmul.f32 %v6121_v29, %v5809_v54  ;;  %v543_v31 = vmul.f32 %v6121_v29, %v5810_v57  ;;  %v5690_v29 = vld [vmem:[%s8423_s3 + $0x1c] sm:$0xf]  ;;  %v5817_v37 = vunpack.c.l.bf16 %v5886_v43 }
  0x6a   : > { %1220 = vmatpush.bf16.msrb.mxu1 %v5114_v22  ;;  %v640_v52 = vmax.f32 %v592_v49, 0.0  ;;  %v735_v45 = vpack.c.bf16 %v639_v53, %v639_v53  ;;  %v5222_v9 = vor.u32 %v5690_v29, %v5219_v8  ;;  %v544_v14 = vmul.f32 %v5956_v32, %v5813_v6  ;;  %v5730_v53 = vld [vmem:[%s8423_s3 + $0x98] sm:$0xf0] }
  0x6b   : > { %v593_v44 = vadd.f32 %v6172_v48, %v542_v58  ;;  %v594_v2 = vadd.f32 %v6172_v48, %v543_v31  ;;  %v545_v15 = vmul.f32 %v5956_v32, %v5814_v7  ;;  %v5957_v31 = vld [vmem:[%s8425_s5] ss:$0 sm:$0xff] }
  0x6c   : > { %2756 = vmatpush.bf16.msra.mxu3 %v5394_v27  ;;  %v688_v18 = vmul.f32 %v6160_v41, %v640_v52  ;;  %v870_v61 = vunpack.c.l.b16 %v735_v45  ;;  %v595_v39 = vadd.f32 %v6172_v48, %v544_v14  ;;  %v5818_v52 = vunpack.c.h.bf16 %v5886_v43  ;;  %v5687_v45 = vld [vmem:[%s8423_s3 + $0x4] sm:$0xf]  ;;  %v5525_v14 = vld [vmem:[%s8423_s3 + $0x230] sm:$0xf] }
  0x6d   : > { %v641_v0 = vmax.f32 %v593_v44, 0.0  ;;  %v642_v4 = vmax.f32 %v594_v2, 0.0  ;;  %1907 = vmatpush.bf16.msrb.mxu0 %v5222_v9  ;;  %v596_v27 = vadd.f32 %v6172_v48, %v545_v15  ;;  %v5377_v48 = vld [vmem:[%s8423_s3 + $0x90] sm:$0xf]  ;;  %v5758_v15 = vld [vmem:[%s8423_s3 + $0x238] sm:$0xf0] }
  0x6e   : > { %1112 = vmatmul.bf16.gmra.mxu0 %v6555_v24  ;;  %1157 = vmatmul.bf16.gmra.mxu1 %v6557_v25  ;;  %v736_v56 = vpack.c.bf16 %v688_v18, %v688_v18  ;;  %v643_v22 = vmax.f32 %v595_v39, 0.0  ;;  %v5378_v54 = vor.u32 %v5730_v53, %v5377_v48 }
  0x6f   : > { %1182 = vmatmul.bf16.gmra.mxu2 %v6560_v17  ;;  %2027 = vmatpush.bf16.msra.mxu1 %v5298_v38  ;;  %v689_v5 = vmul.f32 %v6143_v35, %v641_v0  ;;  %v738_v13 = vpack.c.bf16 %v642_v4, %v642_v4  ;;  %v644_v23 = vmax.f32 %v596_v27, 0.0  ;;  %v547_v38 = vmul.f32 %v5956_v32, %v5818_v52  ;;  %v5729_v4 = vld [vmem:[%s8423_s3 + $0x94] sm:$0xf] }
  0x70   : > { %1207 = vmatmul.bf16.gmra.mxu3 %v6562_v42  ;;  %v871_v30 = vunpack.c.l.b16 %v736_v56  ;;  %v691_v49 = vmul.f32 %v6160_v41, %v643_v22  ;;  %2739 = vmatpush.bf16.msra.mxu2 %v5378_v54  ;;  %v5207_v56 = vld [vmem:[%s8423_s3 + $0xc] sm:$0xf0] }
  0x71   : > { %v737_v11 = vpack.c.bf16 %v689_v5, %v689_v5  ;;  %v873_v33 = vunpack.c.l.b16 %v738_v13  ;;  %v692_v51 = vmul.f32 %v6143_v35, %v644_v23  ;;  %v5210_v57 = vor.u32 %v5687_v45, %v5207_v56  ;;  %v5379_v5 = vld [vmem:[%s8423_s3 + $0x9c] sm:$0xf0]  ;;  %v5707_v13 = vld [vmem:[%s8423_s3 + $0xa0] sm:$0xf0] }
  0x72   : > { %v6580_v1 = vpack.c.b16 %v871_v30, %v870_v61  ;;  %v739_v18 = vpack.c.bf16 %v691_v49, %v691_v49  ;;  %v546_v30 = vmul.f32 %v5956_v32, %v5817_v37  ;;  %v598_v44 = vadd.f32 %v5957_v31, %v547_v38  ;;  %v5727_v37 = vld [vmem:[%s8423_s3 + $0x80] sm:$0xf0] }
  0x73   : > { %v872_v19 = vunpack.c.l.b16 %v737_v11  ;;  %v740_v21 = vpack.c.bf16 %v692_v51, %v692_v51  ;;  %1908 = vmatpush.bf16.msrb.mxu0 %v5210_v57  ;;  %v5382_v6 = vor.u32 %v5729_v4, %v5379_v5  ;;  %v5285_v11 = vld [vmem:[%s8423_s3 + $0x98] sm:$0xf] }
  0x74   : > { %v874_v58 = vunpack.c.l.b16 %v739_v18  ;;  %v597_v0 = vadd.f32 %v5957_v31, %v546_v30  ;;  %v646_v3 = vmax.f32 %v598_v44, 0.0  ;;  %v5286_v32 = vor.u32 %v5707_v13, %v5285_v11  ;;  %v5513_v13 = vld [vmem:[%s8423_s3 + $0x218] sm:$0xf] }
  0x75   : > { %v6600_v40 = vpack.c.b16 %v873_v33, %v872_v19  ;;  %v875_v61 = vunpack.c.l.b16 %v740_v21  ;;  %2757 = vmatpush.bf16.msra.mxu3 %v5382_v6  ;;  %v5526_v19 = vor.u32 %v5758_v15, %v5525_v14  ;;  %v5365_v21 = vld [vmem:[%s8423_s3 + $0x78] sm:$0xf] }
  0x76   : > { %v645_v7 = vmax.f32 %v597_v0, 0.0  ;;  %v694_v29 = vmul.f32 %v6160_v41, %v646_v3  ;;  %2028 = vmatpush.bf16.msra.mxu1 %v5286_v32  ;;  %v5366_v38 = vor.u32 %v5727_v37, %v5365_v21  ;;  %v5726_v0 = vld [vmem:[%s8423_s3 + $0x7c] sm:$0xf]  ;;  %v5367_v3 = vld [vmem:[%s8423_s3 + $0x84] sm:$0xf0] }
  0x77   : > { %v6624_v2 = vpack.c.b16 %v875_v61, %v874_v58  ;;  %3223 = vmatpush.bf16.msra.mxu0 %v5526_v19  ;;  %v5370_v4 = vor.u32 %v5726_v0, %v5367_v3  ;;  %v5755_v32 = vld [vmem:[%s8423_s3 + $0x220] sm:$0xf0] }
  0x78   : > { %v741_v8 = vpack.c.bf16 %v645_v7, %v645_v7  ;;  %v742_v9 = vpack.c.bf16 %v694_v29, %v694_v29  ;;  %2740 = vmatpush.bf16.msra.mxu2 %v5366_v38  ;;  %v5273_v7 = vld [vmem:[%s8423_s3 + $0x80] sm:$0xf]  ;;  %v5704_v29 = vld [vmem:[%s8423_s3 + $0x88] sm:$0xf0]  ;;  %v5514_v14 = vor.u32 %v5755_v32, %v5513_v13 }
  0x79   : > { %2758 = vmatpush.bf16.msra.mxu3 %v5370_v4  ;;  %v5274_v11 = vor.u32 %v5704_v29, %v5273_v7  ;;  %v5724_v13 = vld [vmem:[%s8423_s3 + $0x68] sm:$0xf0] }
  0x7a   : > { %v876_v33 = vunpack.c.l.b16 %v741_v8  ;;  %v877_v39 = vunpack.c.l.b16 %v742_v9 }
  0x7b   : > { %2029 = vmatpush.bf16.msra.mxu1 %v5274_v11  ;;  %3224 = vmatpush.bf16.msra.mxu0 %v5514_v14  ;;  %v5353_v11 = vld [vmem:[%s8423_s3 + $0x60] sm:$0xf] }
  0x7c   : > { %v6649_v27 = vpack.c.b16 %v877_v39, %v876_v33  ;;  %v5354_v32 = vor.u32 %v5724_v13, %v5353_v11  ;;  %v5723_v11 = vld [vmem:[%s8423_s3 + $0x64] sm:$0xf]  ;;  %v5355_v13 = vld [vmem:[%s8423_s3 + $0x6c] sm:$0xf0] }
  0x7e   : > { %1117 = vmatmul.bf16.gmra.mxu0 %v6580_v1  ;;  %1221 = vmatmul.bf16.vlgmr.msrb.gmra.mxu1 %v6211_v28 }
  0x7f   : > { %1350 = vmatmul.bf16.vlgmr.msrb.gmra.mxu2 %v6211_v28 }
  0x80   : > { %1783 = vmatmul.bf16.vlgmr.msrb.gmra.mxu3 %v6211_v28  ;;  %2741 = vmatpush.bf16.msra.mxu2 %v5354_v32  ;;  %v5358_v32 = vor.u32 %v5723_v11, %v5355_v13  ;;  %v5261_v11 = vld [vmem:[%s8423_s3 + $0x68] sm:$0xf]  ;;  %v5701_v13 = vld [vmem:[%s8423_s3 + $0x70] sm:$0xf0] }
  0x82   : > { %2759 = vmatpush.bf16.msra.mxu3 %v5358_v32  ;;  %v5501_v32 = vld [vmem:[%s8423_s3 + $0x200] sm:$0xf] }
  0x8e   : > { %1122 = vmatmul.bf16.gmra.mxu0 %v6600_v40  ;;  %1226 = vmatmul.bf16.gmra.mxu1 %v6289_v59 }
  0x8f   : > { %1355 = vmatmul.bf16.gmra.mxu2 %v6289_v59 }
  0x90   : > { %1788 = vmatmul.bf16.gmra.mxu3 %v6289_v59 }
  0x9e   : > { %1127 = vmatmul.bf16.gmra.mxu0 %v6624_v2  ;;  %1231 = vmatmul.bf16.gmra.mxu1 %v6372_v36 }
  0x9f   : > { %1360 = vmatmul.bf16.gmra.mxu2 %v6372_v36 }
  0xa0   : > { %1793 = vmatmul.bf16.gmra.mxu3 %v6372_v36 }
  0xab   : > { %v6651_v22 = vpop.f32.mrf.mxu0  ;;  %v6653_v23 = vpop.f32.mrf.mxu1 }
  0xac   : > { %8443 = vst [vmem:[#allocation8_spill] sm:$0xff] %v6653_v23 }
  0xae   : > { %1132 = vmatmul.bf16.gmra.mxu0 %v6649_v27  ;;  %1236 = vmatmul.bf16.gmra.mxu1 %v6454_v12 }
  0xaf   : > { %1365 = vmatmul.bf16.gmra.mxu2 %v6454_v12 }
  0xb0   : > { %1798 = vmatmul.bf16.gmra.mxu3 %v6454_v12 }
  0xb2   : > { %v6659_v43 = vpop.f32.mrf.mxu2 }
  0xb3   : > { %8444 = vst [vmem:[#allocation9_spill] sm:$0xff] %v6659_v43  ;;  %v6661_v49 = vpop.f32.mrf.mxu3  ;;  %v6663_v51 = vpop.f32.mrf.mxu0 }
  0xb4   : > { %8445 = vst [vmem:[#allocation10_spill] sm:$0xff] %v6661_v49  ;;  %v6665_v52 = vpop.f32.mrf.mxu1 }
  0xb5   : > { %8446 = vst [vmem:[#allocation11_spill] sm:$0xff] %v6665_v52 }
  0xba   : > { %v6667_v48 = vpop.f32.mrf.mxu2 }
  0xbb   : > { %8447 = vst [vmem:[#allocation12_spill] sm:$0xff] %v6667_v48  ;;  %v6669_v53 = vpop.f32.mrf.mxu3  ;;  %v6671_v54 = vpop.f32.mrf.mxu0 }
  0xbc   : > { %8448 = vst [vmem:[#allocation13_spill] sm:$0xff] %v6669_v53  ;;  %v6673_v18 = vpop.f32.mrf.mxu1 }
  0xbd   : > { %8449 = vst [vmem:[#allocation14_spill] sm:$0xff] %v6673_v18 }
  0xbe   : > { %1241 = vmatmul.bf16.gmra.mxu1 %v6555_v24  ;;  %1909 = vmatmul.bf16.vlgmr.msrb.gmra.mxu0 %v6211_v28 }
  0xbf   : > { %1370 = vmatmul.bf16.gmra.mxu2 %v6555_v24 }
  0xc0   : > { %1803 = vmatmul.bf16.gmra.mxu3 %v6555_v24 }
  0xc2   : > { %v6685_v45 = vpop.f32.mrf.mxu2 }
  0xc3   : > { %8450 = vst [vmem:[#allocation15_spill] sm:$0xff] %v6685_v45  ;;  %v6687_v56 = vpop.f32.mrf.mxu3  ;;  %v6689_v57 = vpop.f32.mrf.mxu0 }
  0xc4   : > { %8451 = vst [vmem:[#allocation16_spill] sm:$0xff] %v6687_v56  ;;  %v6691_v58 = vpop.f32.mrf.mxu1 }
  0xc5   : > { %8452 = vst [vmem:[#allocation17_spill] sm:$0xff] %v6691_v58 }
  0xca   : > { %v6693_v61 = vpop.f32.mrf.mxu2 }
  0xcb   : > { %8453 = vst [vmem:[#allocation18_spill] sm:$0xff] %v6693_v61  ;;  %v6695_v30 = vpop.f32.mrf.mxu3  ;;  %v6697_v31 = vpop.f32.mrf.mxu0 }
  0xcc   : > { %8454 = vst [vmem:[#allocation19_spill] sm:$0xff] %v6695_v30  ;;  %v6699_v44 = vpop.f32.mrf.mxu1 }
  0xcd   : > { %8455 = vst [vmem:[#allocation20_spill] sm:$0xff] %v6699_v44 }
  0xce   : > { %1246 = vmatmul.bf16.gmra.mxu1 %v6580_v1  ;;  %1914 = vmatmul.bf16.gmra.mxu0 %v6289_v59 }
  0xcf   : > { %1375 = vmatmul.bf16.gmra.mxu2 %v6580_v1 }
  0xd0   : > { %1808 = vmatmul.bf16.gmra.mxu3 %v6580_v1 }
  0xd2   : > { %v6711_v5 = vpop.f32.mrf.mxu2 }
  0xd3   : > { %8456 = vst [vmem:[#allocation21_spill] sm:$0xff] %v6711_v5  ;;  %v6713_v6 = vpop.f32.mrf.mxu3  ;;  %v6721_v8 = vpop.f32.mrf.mxu0 }
  0xd4   : > { %8457 = vst [vmem:[#allocation22_spill] sm:$0xff] %v6713_v6  ;;  %v6723_v9 = vpop.f32.mrf.mxu1 }
  0xd5   : > { %8458 = vst [vmem:[#allocation23_spill] sm:$0xff] %v6723_v9 }
  0xda   : > { %v6731_v15 = vpop.f32.mrf.mxu2 }
  0xdb   : > { %8459 = vst [vmem:[#allocation24_spill] sm:$0xff] %v6731_v15  ;;  %v6733_v19 = vpop.f32.mrf.mxu3  ;;  %v6735_v33 = vpop.f32.mrf.mxu0 }
  0xdc   : > { %8460 = vst [vmem:[#allocation25_spill] sm:$0xff] %v6733_v19  ;;  %v6737_v39 = vpop.f32.mrf.mxu1 }
  0xdd   : > { %8461 = vst [vmem:[#allocation26_spill] sm:$0xff] %v6737_v39 }
  0xde   : > { %1251 = vmatmul.bf16.gmra.mxu1 %v6600_v40  ;;  %1919 = vmatmul.bf16.gmra.mxu0 %v6372_v36 }
  0xdf   : > { %1380 = vmatmul.bf16.gmra.mxu2 %v6600_v40 }
  0xe0   : > { %1813 = vmatmul.bf16.gmra.mxu3 %v6600_v40 }
  0xe2   : > { %v6743_v21 = vpop.f32.mrf.mxu2 }
  0xe3   : > { %8462 = vst [vmem:[#allocation27_spill] sm:$0xff] %v6743_v21  ;;  %v6745_v37 = vpop.f32.mrf.mxu3  ;;  %v6747_v38 = vpop.f32.mrf.mxu0 }
  0xe4   : > { %8463 = vst [vmem:[#allocation28_spill] sm:$0xff] %v6745_v37  ;;  %v6749_v0 = vpop.f32.mrf.mxu1 }
  0xe5   : > { %8464 = vst [vmem:[#allocation29_spill] sm:$0xff] %v6749_v0 }
  0xea   : > { %v6751_v3 = vpop.f32.mrf.mxu2 }
  0xeb   : > { %8465 = vst [vmem:[#allocation30_spill] sm:$0xff] %v6751_v3  ;;  %v6753_v4 = vpop.f32.mrf.mxu3  ;;  %v6755_v7 = vpop.f32.mrf.mxu0  ;;  %v5262_v3 = vor.u32 %v5701_v13, %v5261_v11 }
  0xec   : > { %8466 = vst [vmem:[#allocation31_spill] sm:$0xff] %v6753_v4  ;;  %v6757_v29 = vpop.f32.mrf.mxu1 }
  0xed   : > { %8467 = vst [vmem:[#allocation32_spill] sm:$0xff] %v6757_v29  ;;  %2030 = vmatpush.bf16.msra.mxu1 %v5262_v3 }
  0xee   : > { %1256 = vmatmul.bf16.gmra.mxu1 %v6624_v2  ;;  %1924 = vmatmul.bf16.gmra.mxu0 %v6454_v12 }
  0xef   : > { %1385 = vmatmul.bf16.gmra.mxu2 %v6624_v2 }
  0xf0   : > { %1818 = vmatmul.bf16.gmra.mxu3 %v6624_v2 }
  0xf2   : > { %v6769_v14 = vpop.f32.mrf.mxu2 }
  0xf3   : > { %8468 = vst [vmem:[#allocation33_spill] sm:$0xff] %v6769_v14  ;;  %v6771_v37 = vpop.f32.mrf.mxu3  ;;  %v6773_v19 = vpop.f32.mrf.mxu0 }
  0xf4   : > { %8469 = vst [vmem:[#allocation34_spill] sm:$0xff] %v6771_v37  ;;  %v6775_v6 = vpop.f32.mrf.mxu1 }
  0xf5   : > { %8470 = vst [vmem:[#allocation35_spill] sm:$0xff] %v6775_v6 }
  0xfa   : > { %v6777_v30 = vpop.f32.mrf.mxu2 }
  0xfb   : > { %8471 = vst [vmem:[#allocation36_spill] sm:$0xff] %v6777_v30  ;;  %v6779_v4 = vpop.f32.mrf.mxu3  ;;  %v6781_v56 = vpop.f32.mrf.mxu0 }
  0xfc   : > { %8472 = vst [vmem:[#allocation37_spill] sm:$0xff] %v6779_v4  ;;  %v6783_v53 = vpop.f32.mrf.mxu1 }
  0xfe   : > { %1261 = vmatmul.bf16.gmra.mxu1 %v6649_v27  ;;  %1929 = vmatmul.bf16.gmra.mxu0 %v6555_v24 }
  0xff   : > { %1390 = vmatmul.bf16.gmra.mxu2 %v6649_v27 }
 0x100   : > { %1823 = vmatmul.bf16.gmra.mxu3 %v6649_v27 }
 0x102   : > { %v6795_v4 = vpop.f32.mrf.mxu2 }
 0x103   : > { %v1784_v37 = vpop.f32.mrf.mxu3  ;;  %v6800_v30 = vpop.f32.mrf.mxu0 }
 0x104   : > { %v6798_v49 = vadd.f32 %v1784_v37, %v6689_v57  ;;  %v6802_v14 = vpop.f32.mrf.mxu1  ;;  %v5752_v57 = vld [vmem:[%s8423_s3 + $0x208] sm:$0xf0] }
 0x105   : > { %v5502_v37 = vor.u32 %v5752_v57, %v5501_v32 }
 0x107   : > { %3225 = vmatpush.bf16.msra.mxu0 %v5502_v37 }
 0x10a   : > { %v6816_v21 = vpop.f32.mrf.mxu2 }
 0x10b   : > { %v1786_v15 = vpop.f32.mrf.mxu3  ;;  %v6821_v61 = vpop.f32.mrf.mxu0 }
 0x10c   : > { %v6819_v5 = vadd.f32 %v1786_v15, %v6697_v31  ;;  %v6823_v45 = vpop.f32.mrf.mxu1 }
 0x10e   : > { %1266 = vmatmul.bf16.gmra.mxu1 %v6213_v63  ;;  %1934 = vmatmul.bf16.gmra.mxu0 %v6580_v1 }
 0x10f   : > { %1395 = vmatmul.bf16.gmra.mxu2 %v6213_v63 }
 0x110   : > { %1828 = vmatmul.bf16.gmra.mxu3 %v6213_v63 }
 0x112   : > { %v6829_v3 = vpop.f32.mrf.mxu2 }
 0x113   : > { %v1789_v11 = vpop.f32.mrf.mxu3  ;;  %v6834_v31 = vpop.f32.mrf.mxu0 }
 0x114   : > { %v6832_v13 = vadd.f32 %v1789_v11, %v6721_v8  ;;  %v1229_v15 = vpop.f32.mrf.mxu1  ;;  %v5341_v8 = vld [vmem:[%s8423_s3 + $0x48] sm:$0xf] }
 0x11a   : > { %v6836_v32 = vpop.f32.mrf.mxu2 }
 0x11b   : > { %v1791_v57 = vpop.f32.mrf.mxu3  ;;  %v6841_v48 = vpop.f32.mrf.mxu0 }
 0x11c   : > { %v6839_v37 = vadd.f32 %v1791_v57, %v6735_v33  ;;  %v1232_v43 = vpop.f32.mrf.mxu1  ;;  %v5721_v33 = vld [vmem:[%s8423_s3 + $0x50] sm:$0xf0] }
 0x11d   : > { %v5342_v11 = vor.u32 %v5721_v33, %v5341_v8  ;;  %v5720_v8 = vld [vmem:[%s8423_s3 + $0x4c] sm:$0xf] }
 0x11e   : > { %1271 = vmatmul.bf16.gmra.mxu1 %v6306_v16  ;;  %1939 = vmatmul.bf16.gmra.mxu0 %v6600_v40 }
 0x11f   : > { %1400 = vmatmul.bf16.gmra.mxu2 %v6306_v16 }
 0x120   : > { %1833 = vmatmul.bf16.gmra.mxu3 %v6306_v16  ;;  %2742 = vmatpush.bf16.msra.mxu2 %v5342_v11 }
 0x122   : > { %v6853_v57 = vpop.f32.mrf.mxu2 }
 0x123   : > { %8473 = vst [vmem:[#allocation38_spill] sm:$0xff] %v6853_v57  ;;  %v1794_v6 = vpop.f32.mrf.mxu3  ;;  %v6858_v0 = vpop.f32.mrf.mxu0 }
 0x124   : > { %v6856_v29 = vadd.f32 %v1794_v6, %v6747_v38  ;;  %v1234_v39 = vpop.f32.mrf.mxu1  ;;  %v5343_v6 = vld [vmem:[%s8423_s3 + $0x54] sm:$0xf0] }
 0x125   : > { %v5346_v38 = vor.u32 %v5720_v8, %v5343_v6  ;;  %v5249_v8 = vld [vmem:[%s8423_s3 + $0x50] sm:$0xf]  ;;  %v5698_v6 = vld [vmem:[%s8423_s3 + $0x58] sm:$0xf0] }
 0x126   : > { %8474 = vst [vmem:[#allocation39_spill] sm:$0xff] %v6856_v29 }
 0x127   : > { %2760 = vmatpush.bf16.msra.mxu3 %v5346_v38  ;;  %v5489_v38 = vld [vmem:[%s8423_s3 + $0x1e8] sm:$0xf] }
 0x12a   : > { %v6860_v9 = vpop.f32.mrf.mxu2 }
 0x12b   : > { %8475 = vst [vmem:[#allocation40_spill] sm:$0xff] %v6860_v9  ;;  %v1796_v44 = vpop.f32.mrf.mxu3  ;;  %v6865_v18 = vpop.f32.mrf.mxu0 }
 0x12c   : > { %v6863_v58 = vadd.f32 %v1796_v44, %v6755_v7  ;;  %v1237_v52 = vpop.f32.mrf.mxu1 }
 0x12e   : > { %8476 = vst [vmem:[#allocation41_spill] sm:$0xff] %v6863_v58  ;;  %1276 = vmatmul.bf16.gmra.mxu1 %v6376_v50  ;;  %1944 = vmatmul.bf16.gmra.mxu0 %v6624_v2  ;;  %v5250_v58 = vor.u32 %v5698_v6, %v5249_v8 }
 0x12f   : > { %1405 = vmatmul.bf16.gmra.mxu2 %v6376_v50 }
 0x130   : > { %1838 = vmatmul.bf16.gmra.mxu3 %v6376_v50  ;;  %2031 = vmatpush.bf16.msra.mxu1 %v5250_v58 }
 0x132   : > { %v6877_v44 = vpop.f32.mrf.mxu2 }
 0x133   : > { %8477 = vst [vmem:[#allocation42_spill] sm:$0xff] %v6877_v44  ;;  %v1799_v7 = vpop.f32.mrf.mxu3  ;;  %v6882_v11 = vpop.f32.mrf.mxu0 }
 0x134   : > { %v6880_v33 = vadd.f32 %v1799_v7, %v6773_v19  ;;  %v1239_v23 = vpop.f32.mrf.mxu1  ;;  %v5749_v19 = vld [vmem:[%s8423_s3 + $0x1f0] sm:$0xf0] }
 0x135   : > { %v5490_v7 = vor.u32 %v5749_v19, %v5489_v38 }
 0x136   : > { %8478 = vst [vmem:[#allocation43_spill] sm:$0xff] %v6880_v33 }
 0x137   : > { %3226 = vmatpush.bf16.msra.mxu0 %v5490_v7 }
 0x13a   : > { %v6896_v33 = vpop.f32.mrf.mxu2 }
 0x13b   : > { %8479 = vst [vmem:[#allocation44_spill] sm:$0xff] %v6896_v33  ;;  %v1801_v44 = vpop.f32.mrf.mxu3  ;;  %v1910_v57 = vpop.f32.mrf.mxu0 }
 0x13c   : > { %v6899_v9 = vadd.f32 %v1801_v44, %v6781_v56  ;;  %v1242_v29 = vpop.f32.mrf.mxu1  ;;  %v6901_v8 = vadd.f32 %v1910_v57, %v1229_v15 }
 0x13e   : > { %8480 = vst [vmem:[#allocation45_spill] sm:$0xff] %v6899_v9  ;;  %1281 = vmatmul.bf16.gmra.mxu1 %v6458_v20  ;;  %1949 = vmatmul.bf16.gmra.mxu0 %v6649_v27 }
 0x13f   : > { %8481 = vst [vmem:[#allocation46_spill] sm:$0xff] %v6901_v8  ;;  %1410 = vmatmul.bf16.gmra.mxu2 %v6458_v20 }
 0x140   : > { %1843 = vmatmul.bf16.gmra.mxu3 %v6458_v20 }
 0x142   : > { %v6907_v58 = vpop.f32.mrf.mxu2 }
 0x143   : > { %8482 = vst [vmem:[#allocation47_spill] sm:$0xff] %v6907_v58  ;;  %v1804_v6 = vpop.f32.mrf.mxu3  ;;  %v1912_v44 = vpop.f32.mrf.mxu0 }
 0x144   : > { %v6910_v38 = vadd.f32 %v1804_v6, %v6800_v30  ;;  %v1244_v56 = vpop.f32.mrf.mxu1  ;;  %v6912_v19 = vadd.f32 %v1912_v44, %v1232_v43  ;;  %v5329_v43 = vld [vmem:[%s8423_s3 + $0x30] sm:$0xf] }
 0x146   : > { %8483 = vst [vmem:[#allocation48_spill] sm:$0xff] %v6910_v38 }
 0x147   : > { %8484 = vst [vmem:[#allocation49_spill] sm:$0xff] %v6912_v19 }
 0x14a   : > { %v6914_v15 = vpop.f32.mrf.mxu2 }
 0x14b   : > { %8485 = vst [vmem:[#allocation50_spill] sm:$0xff] %v6914_v15  ;;  %v1806_v57 = vpop.f32.mrf.mxu3  ;;  %v1915_v33 = vpop.f32.mrf.mxu0 }
 0x14c   : > { %v6917_v7 = vadd.f32 %v1806_v57, %v6821_v61  ;;  %v1247_v9 = vpop.f32.mrf.mxu1  ;;  %v6919_v8 = vadd.f32 %v1915_v33, %v1234_v39  ;;  %v5718_v61 = vld [vmem:[%s8423_s3 + $0x38] sm:$0xf0] }
 0x14d   : > { %v5330_v30 = vor.u32 %v5718_v61, %v5329_v43  ;;  %v5717_v61 = vld [vmem:[%s8423_s3 + $0x34] sm:$0xf] }
 0x14e   : > { %8486 = vst [vmem:[#allocation51_spill] sm:$0xff] %v6917_v7  ;;  %1286 = vmatmul.bf16.gmra.mxu1 %v6557_v25  ;;  %1954 = vmatmul.bf16.gmra.mxu0 %v6213_v63 }
 0x14f   : > { %8487 = vst [vmem:[#allocation52_spill] sm:$0xff] %v6919_v8  ;;  %1415 = vmatmul.bf16.gmra.mxu2 %v6557_v25 }
 0x150   : > { %1848 = vmatmul.bf16.gmra.mxu3 %v6557_v25  ;;  %2743 = vmatpush.bf16.msra.mxu2 %v5330_v30 }
 0x152   : > { %v6931_v6 = vpop.f32.mrf.mxu2 }
 0x153   : > { %v1809_v39 = vpop.f32.mrf.mxu3  ;;  %v1917_v57 = vpop.f32.mrf.mxu0 }
 0x154   : > { %v6934_v33 = vadd.f32 %v1809_v39, %v6834_v31  ;;  %v1249_v44 = vpop.f32.mrf.mxu1  ;;  %v6936_v7 = vadd.f32 %v1917_v57, %v1237_v52  ;;  %v5331_v31 = vld [vmem:[%s8423_s3 + $0x3c] sm:$0xf0]  ;;  %v5237_v39 = vld [vmem:[%s8423_s3 + $0x38] sm:$0xf]  ;;  %v5695_v57 = vld [vmem:[%s8423_s3 + $0x40] sm:$0xf0] }
 0x155   : > { %v5334_v52 = vor.u32 %v5717_v61, %v5331_v31  ;;  %v5238_v31 = vor.u32 %v5695_v57, %v5237_v39 }
 0x157   : > { %2761 = vmatpush.bf16.msra.mxu3 %v5334_v52  ;;  %v5477_v52 = vld [vmem:[%s8423_s3 + $0x1d0] sm:$0xf]  ;;  %2032 = vmatpush.bf16.msra.mxu1 %v5238_v31 }
 0x15a   : > { %v6938_v15 = vpop.f32.mrf.mxu2 }
 0x15b   : > { %8488 = vst [vmem:[#allocation53_spill] sm:$0xff] %v6938_v15  ;;  %v1811_v38 = vpop.f32.mrf.mxu3  ;;  %v1920_v19 = vpop.f32.mrf.mxu0 }
 0x15c   : > { %v6941_v58 = vadd.f32 %v1811_v38, %v6841_v48  ;;  %v1252_v8 = vpop.f32.mrf.mxu1  ;;  %v6943_v43 = vadd.f32 %v1920_v19, %v1239_v23 }
 0x15e   : > { %8489 = vst [vmem:[#allocation54_spill] sm:$0xff] %v6941_v58  ;;  %1291 = vmatmul.bf16.gmra.mxu1 %v6218_v60  ;;  %1959 = vmatmul.bf16.gmra.mxu0 %v6306_v16 }
 0x15f   : > { %1420 = vmatmul.bf16.gmra.mxu2 %v6218_v60 }
 0x160   : > { %1853 = vmatmul.bf16.gmra.mxu3 %v6218_v60 }
 0x162   : > { %v6955_v23 = vpop.f32.mrf.mxu2 }
 0x163   : > { %8490 = vst [vmem:[#allocation55_spill] sm:$0xff] %v6955_v23  ;;  %v1814_v48 = vpop.f32.mrf.mxu3  ;;  %v1922_v30 = vpop.f32.mrf.mxu0 }
 0x164   : > { %v6958_v38 = vadd.f32 %v1814_v48, %v6858_v0  ;;  %v1254_v19 = vpop.f32.mrf.mxu1  ;;  %v6966_v61 = vadd.f32 %v1922_v30, %v1242_v29  ;;  %v5746_v0 = vld [vmem:[%s8423_s3 + $0x1d8] sm:$0xf0] }
 0x165   : > { %v5478_v48 = vor.u32 %v5746_v0, %v5477_v52 }
 0x166   : > { %8491 = vst [vmem:[#allocation56_spill] sm:$0xff] %v6958_v38 }
 0x167   : > { %3227 = vmatpush.bf16.msra.mxu0 %v5478_v48 }
 0x16a   : > { %v6974_v38 = vpop.f32.mrf.mxu2 }
 0x16b   : > { %8492 = vst [vmem:[#allocation57_spill] sm:$0xff] %v6974_v38  ;;  %v1816_v23 = vpop.f32.mrf.mxu3  ;;  %v1925_v30 = vpop.f32.mrf.mxu0 }
 0x16c   : > { %v6977_v58 = vadd.f32 %v1816_v23, %v6865_v18  ;;  %v1257_v29 = vpop.f32.mrf.mxu1  ;;  %v6979_v39 = vadd.f32 %v1925_v30, %v1244_v56 }
 0x16e   : > { %8493 = vst [vmem:[#allocation58_spill] sm:$0xff] %v6977_v58  ;;  %1296 = vmatmul.bf16.gmra.mxu1 %v6310_v34  ;;  %1964 = vmatmul.bf16.gmra.mxu0 %v6376_v50 }
 0x16f   : > { %1425 = vmatmul.bf16.gmra.mxu2 %v6310_v34 }
 0x170   : > { %1858 = vmatmul.bf16.gmra.mxu3 %v6310_v34 }
 0x172   : > { %v6985_v57 = vpop.f32.mrf.mxu2 }
 0x173   : > { %8494 = vst [vmem:[#allocation59_spill] sm:$0xff] %v6985_v57  ;;  %v1819_v31 = vpop.f32.mrf.mxu3  ;;  %v1927_v23 = vpop.f32.mrf.mxu0 }
 0x174   : > { %v6988_v52 = vadd.f32 %v1819_v31, %v6882_v11  ;;  %v1259_v18 = vpop.f32.mrf.mxu1  ;;  %v6990_v0 = vadd.f32 %v1927_v23, %v1247_v9  ;;  %v5317_v9 = vld [vmem:[%s8423_s3 + $0x18] sm:$0xf]  ;;  %v5715_v11 = vld [vmem:[%s8423_s3 + $0x20] sm:$0xf0] }
 0x175   : > { %v5318_v31 = vor.u32 %v5715_v11, %v5317_v9  ;;  %v5714_v9 = vld [vmem:[%s8423_s3 + $0x1c] sm:$0xf]  ;;  %v5319_v11 = vld [vmem:[%s8423_s3 + $0x24] sm:$0xf0] }
 0x176   : > { %8495 = vst [vmem:[#allocation60_spill] sm:$0xff] %v6988_v52 }
 0x177   : > { %8496 = vst [vmem:[#allocation61_spill] sm:$0xff] %v6990_v0  ;;  %2744 = vmatpush.bf16.msra.mxu2 %v5318_v31  ;;  %v5322_v31 = vor.u32 %v5714_v9, %v5319_v11  ;;  %v5692_v9 = vld [vmem:[%s8423_s3 + $0x28] sm:$0xf0] }
 0x179   : > { %2762 = vmatpush.bf16.msra.mxu3 %v5322_v31  ;;  %v5465_v31 = vld [vmem:[%s8423_s3 + $0x1b8] sm:$0xf] }
 0x17a   : > { %v6992_v56 = vpop.f32.mrf.mxu2 }
 0x17b   : > { %8497 = vst [vmem:[#allocation62_spill] sm:$0xff] %v6992_v56  ;;  %v6994_v48 = vpop.f32.mrf.mxu3  ;;  %v1930_v58 = vpop.f32.mrf.mxu0 }
 0x17c   : > { %8498 = vst [vmem:[#allocation63_spill] sm:$0xff] %v6994_v48  ;;  %v1262_v30 = vpop.f32.mrf.mxu1  ;;  %v6996_v38 = vadd.f32 %v1930_v58, %v1249_v44 }
 0x17e   : > { %8499 = vst [vmem:[#allocation64_spill] sm:$0xff] %v6996_v38  ;;  %1301 = vmatmul.bf16.gmra.mxu1 %v6379_v55  ;;  %1969 = vmatmul.bf16.gmra.mxu0 %v6458_v20 }
 0x17f   : > { %1430 = vmatmul.bf16.gmra.mxu2 %v6379_v55 }
 0x180   : > { %1863 = vmatmul.bf16.gmra.mxu3 %v6379_v55 }
 0x182   : > { %v7008_v23 = vpop.f32.mrf.mxu2 }
 0x183   : > { %8500 = vst [vmem:[#allocation65_spill] sm:$0xff] %v7008_v23  ;;  %v7010_v58 = vpop.f32.mrf.mxu3  ;;  %v1932_v56 = vpop.f32.mrf.mxu0 }
 0x184   : > { %8501 = vst [vmem:[#allocation66_spill] sm:$0xff] %v7010_v58  ;;  %v1264_v44 = vpop.f32.mrf.mxu1  ;;  %v7012_v48 = vadd.f32 %v1932_v56, %v1252_v8 }
 0x186   : > { %8502 = vst [vmem:[#allocation67_spill] sm:$0xff] %v7012_v48 }
 0x18a   : > { %v7014_v52 = vpop.f32.mrf.mxu2 }
 0x18b   : > { %8503 = vst [vmem:[#allocation68_spill] sm:$0xff] %v7014_v52  ;;  %v7016_v57 = vpop.f32.mrf.mxu3  ;;  %v1935_v0 = vpop.f32.mrf.mxu0  ;;  %v5225_v52 = vld [vmem:[%s8423_s3 + $0x20] sm:$0xf] }
 0x18c   : > { %8504 = vst [vmem:[#allocation69_spill] sm:$0xff] %v7016_v57  ;;  %v1267_v38 = vpop.f32.mrf.mxu1  ;;  %v7018_v15 = vadd.f32 %v1935_v0, %v1254_v19  ;;  %v5226_v57 = vor.u32 %v5692_v9, %v5225_v52 }
 0x18e   : > { %8505 = vst [vmem:[#allocation70_spill] sm:$0xff] %v7018_v15  ;;  %1306 = vmatmul.bf16.gmra.mxu1 %v6460_v26  ;;  %1974 = vmatmul.bf16.gmra.mxu0 %v6557_v25 }
 0x18f   : > { %1435 = vmatmul.bf16.gmra.mxu2 %v6460_v26  ;;  %2033 = vmatpush.bf16.msra.mxu1 %v5226_v57 }
 0x190   : > { %1868 = vmatmul.bf16.gmra.mxu3 %v6460_v26 }
 0x192   : > { %v7030_v8 = vpop.f32.mrf.mxu2 }
 0x193   : > { %8506 = vst [vmem:[#allocation71_spill] sm:$0xff] %v7030_v8  ;;  %v7032_v19 = vpop.f32.mrf.mxu3  ;;  %v1937_v56 = vpop.f32.mrf.mxu0  ;;  %v5743_v8 = vld [vmem:[%s8423_s3 + $0x1c0] sm:$0xf0] }
 0x194   : > { %8507 = vst [vmem:[#allocation72_spill] sm:$0xff] %v7032_v19  ;;  %v1269_v0 = vpop.f32.mrf.mxu1  ;;  %v7040_v11 = vadd.f32 %v1937_v56, %v1257_v29  ;;  %v5466_v19 = vor.u32 %v5743_v8, %v5465_v31 }
 0x196   : > { %8508 = vst [vmem:[#allocation73_spill] sm:$0xff] %v7040_v11  ;;  %3228 = vmatpush.bf16.msra.mxu0 %v5466_v19 }
 0x19a   : > { %v7048_v23 = vpop.f32.mrf.mxu2 }
 0x19b   : > { %8509 = vst [vmem:[#allocation74_spill] sm:$0xff] %v7048_v23  ;;  %v7050_v58 = vpop.f32.mrf.mxu3  ;;  %v1940_v48 = vpop.f32.mrf.mxu0 }
 0x19c   : > { %8510 = vst [vmem:[#allocation75_spill] sm:$0xff] %v7050_v58  ;;  %v1272_v15 = vpop.f32.mrf.mxu1  ;;  %v7052_v29 = vadd.f32 %v1940_v48, %v1259_v18 }
 0x19e   : > { %8511 = vst [vmem:[#allocation76_spill] sm:$0xff] %v7052_v29  ;;  %1311 = vmatmul.bf16.gmra.mxu1 %v6560_v17  ;;  %1979 = vmatmul.bf16.gmra.mxu0 %v6218_v60 }
 0x19f   : > { %1440 = vmatmul.bf16.gmra.mxu2 %v6560_v17 }
 0x1a0   : > { %1873 = vmatmul.bf16.gmra.mxu3 %v6560_v17 }
 0x1a2   : > { %v7058_v52 = vpop.f32.mrf.mxu2 }
 0x1a3   : > { %8512 = vst [vmem:[#allocation77_spill] sm:$0xff] %v7058_v52  ;;  %v7060_v57 = vpop.f32.mrf.mxu3  ;;  %v1942_v19 = vpop.f32.mrf.mxu0 }
 0x1a4   : > { %8513 = vst [vmem:[#allocation78_spill] sm:$0xff] %v7060_v57  ;;  %v1274_v8 = vpop.f32.mrf.mxu1  ;;  %v7062_v56 = vadd.f32 %v1942_v19, %v1262_v30  ;;  %v5305_v30 = vld [vmem:[%s8423_s3] sm:$0xf]  ;;  %v5712_v19 = vld [vmem:[%s8423_s3 + $0x8] sm:$0xf0] }
 0x1a6   : > { %8514 = vst [vmem:[#allocation79_spill] sm:$0xff] %v7062_v56 }
 0x1aa   : > { %v7064_v9 = vpop.f32.mrf.mxu2 }
 0x1ab   : > { %8515 = vst [vmem:[#allocation80_spill] sm:$0xff] %v7064_v9  ;;  %v7066_v18 = vpop.f32.mrf.mxu3  ;;  %v1945_v31 = vpop.f32.mrf.mxu0  ;;  %v5306_v9 = vor.u32 %v5712_v19, %v5305_v30  ;;  %v5711_v30 = vld [vmem:[%s8423_s3 + $0x4] sm:$0xf] }
 0x1ac   : > { %8516 = vst [vmem:[#allocation81_spill] sm:$0xff] %v7066_v18  ;;  %v1277_v48 = vpop.f32.mrf.mxu1  ;;  %v7068_v23 = vadd.f32 %v1945_v31, %v1264_v44 }
 0x1ad   : > { %2745 = vmatpush.bf16.msra.mxu2 %v5306_v9  ;;  %v5307_v9 = vld [vmem:[%s8423_s3 + $0xc] sm:$0xf0] }
 0x1ae   : > { %8517 = vst [vmem:[#allocation82_spill] sm:$0xff] %v7068_v23  ;;  %1316 = vmatmul.bf16.gmra.mxu1 %v6223_v10  ;;  %1984 = vmatmul.bf16.gmra.mxu0 %v6310_v34  ;;  %v5310_v19 = vor.u32 %v5711_v30, %v5307_v9  ;;  %v5213_v30 = vld [vmem:[%s8423_s3 + $0x8] sm:$0xf]  ;;  %v5689_v9 = vld [vmem:[%s8423_s3 + $0x10] sm:$0xf0] }
 0x1af   : > { %1445 = vmatmul.bf16.gmra.mxu2 %v6223_v10 }
 0x1b0   : > { %1878 = vmatmul.bf16.gmra.mxu3 %v6223_v10 }
 0x1b1   : > { %2763 = vmatpush.bf16.msra.mxu3 %v5310_v19  ;;  %v5453_v19 = vld [vmem:[%s8423_s3 + $0x1a0] sm:$0xf] }
 0x1b2   : > { %v7080_v18 = vpop.f32.mrf.mxu2 }
 0x1b3   : > { %8518 = vst [vmem:[#allocation83_spill] sm:$0xff] %v7080_v18  ;;  %v7082_v44 = vpop.f32.mrf.mxu3  ;;  %v1947_v52 = vpop.f32.mrf.mxu0 }
 0x1b4   : > { %8519 = vst [vmem:[#allocation84_spill] sm:$0xff] %v7082_v44  ;;  %v1279_v31 = vpop.f32.mrf.mxu1  ;;  %v7084_v57 = vadd.f32 %v1947_v52, %v1267_v38 }
 0x1b6   : > { %8520 = vst [vmem:[#allocation85_spill] sm:$0xff] %v7084_v57  ;;  %v5325_v57 = vld [vmem:[%s8423_s3 + $0x20] sm:$0xf] }
 0x1ba   : > { %v7086_v58 = vpop.f32.mrf.mxu2 }
 0x1bb   : > { %8521 = vst [vmem:[#allocation86_spill] sm:$0xff] %v7086_v58  ;;  %v7088_v23 = vpop.f32.mrf.mxu3  ;;  %v1950_v29 = vpop.f32.mrf.mxu0 }
 0x1bc   : > { %8522 = vst [vmem:[#allocation87_spill] sm:$0xff] %v7088_v23  ;;  %v7090_v56 = vpop.f32.mrf.mxu1  ;;  %v7092_v11 = vadd.f32 %v1950_v29, %v1269_v0  ;;  %v5214_v23 = vor.u32 %v5689_v9, %v5213_v30 }
 0x1be   : > { %8523 = vst [vmem:[#allocation88_spill] sm:$0xff] %v7092_v11  ;;  %1321 = vmatmul.bf16.gmra.mxu1 %v6319_v46  ;;  %1989 = vmatmul.bf16.gmra.mxu0 %v6379_v55 }
 0x1bf   : > { %1450 = vmatmul.bf16.gmra.mxu2 %v6319_v46  ;;  %2034 = vmatpush.bf16.msra.mxu1 %v5214_v23 }
 0x1c0   : > { %1883 = vmatmul.bf16.gmra.mxu3 %v6319_v46 }
 0x1c2   : > { %v7104_v38 = vpop.f32.mrf.mxu2 }
 0x1c3   : > { %8524 = vst [vmem:[#allocation89_spill] sm:$0xff] %v7104_v38  ;;  %v7106_v0 = vpop.f32.mrf.mxu3  ;;  %v1952_v52 = vpop.f32.mrf.mxu0  ;;  %v5740_v38 = vld [vmem:[%s8423_s3 + $0x1a8] sm:$0xf0] }
 0x1c4   : > { %8525 = vst [vmem:[#allocation90_spill] sm:$0xff] %v7106_v0  ;;  %v7108_v29 = vpop.f32.mrf.mxu1  ;;  %v7116_v58 = vadd.f32 %v1952_v52, %v1272_v15  ;;  %v5454_v0 = vor.u32 %v5740_v38, %v5453_v19 }
 0x1c6   : > { %8526 = vst [vmem:[#allocation91_spill] sm:$0xff] %v7116_v58  ;;  %3229 = vmatpush.bf16.msra.mxu0 %v5454_v0  ;;  %v5373_v58 = vld [vmem:[%s8423_s3 + $0x80] sm:$0xf] }
 0x1ca   : > { %v7124_v18 = vpop.f32.mrf.mxu2 }
 0x1cb   : > { %8527 = vst [vmem:[#allocation92_spill] sm:$0xff] %v7124_v18  ;;  %v7126_v44 = vpop.f32.mrf.mxu3  ;;  %v1955_v15 = vpop.f32.mrf.mxu0 }
 0x1cc   : > { %8528 = vst [vmem:[#allocation93_spill] sm:$0xff] %v7126_v44  ;;  %v7128_v11 = vpop.f32.mrf.mxu1  ;;  %v7130_v52 = vadd.f32 %v1955_v15, %v1274_v8 }
 0x1ce   : > { %8529 = vst [vmem:[#allocation94_spill] sm:$0xff] %v7130_v52  ;;  %1326 = vmatmul.bf16.gmra.mxu1 %v6381_v62  ;;  %1994 = vmatmul.bf16.gmra.mxu0 %v6460_v26 }
 0x1cf   : > { %1455 = vmatmul.bf16.gmra.mxu2 %v6381_v62 }
 0x1d0   : > { %1888 = vmatmul.bf16.gmra.mxu3 %v6381_v62 }
 0x1d2   : > { %v7136_v38 = vpop.f32.mrf.mxu2 }
 0x1d3   : > { %8530 = vst [vmem:[#allocation95_spill] sm:$0xff] %v7136_v38  ;;  %v7138_v23 = vpop.f32.mrf.mxu3  ;;  %v1957_v30 = vpop.f32.mrf.mxu0  ;;  %v5397_v38 = vld [vmem:[%s8423_s3 + $0xb0] sm:$0xf] }
 0x1d4   : > { %8531 = vst [vmem:[#allocation96_spill] sm:$0xff] %v7138_v23  ;;  %v7140_v0 = vpop.f32.mrf.mxu1  ;;  %v7142_v9 = vadd.f32 %v1957_v30, %v1277_v48  ;;  %v5734_v23 = vld [vmem:[%s8423_s3 + $0xb8] sm:$0xf0]  ;;  %v5517_v30 = vld [vmem:[%s8423_s3 + $0x228] sm:$0xf] }
 0x1d5   : > { %v5398_v48 = vor.u32 %v5734_v23, %v5397_v38  ;;  %v5731_v38 = vld [vmem:[%s8423_s3 + $0xa0] sm:$0xf0]  ;;  %v5505_v23 = vld [vmem:[%s8423_s3 + $0x210] sm:$0xf] }
 0x1d6   : > { %8532 = vst [vmem:[#allocation97_spill] sm:$0xff] %v7142_v9 }
 0x1d7   : > { %2774 = vmatpush.bf16.msrb.mxu2 %v5398_v48  ;;  %v5754_v48 = vld [vmem:[%s8423_s3 + $0x218] sm:$0xf0] }
 0x1da   : > { %v7144_v19 = vpop.f32.mrf.mxu2 }
 0x1db   : > { %8533 = vst [vmem:[#allocation98_spill] sm:$0xff] %v7144_v19  ;;  %v7146_v8 = vpop.f32.mrf.mxu3  ;;  %v1960_v18 = vpop.f32.mrf.mxu0  ;;  %v5385_v19 = vld [vmem:[%s8423_s3 + $0x98] sm:$0xf] }
 0x1dc   : > { %8534 = vst [vmem:[#allocation99_spill] sm:$0xff] %v7146_v8  ;;  %v7148_v15 = vpop.f32.mrf.mxu1  ;;  %v7150_v44 = vadd.f32 %v1960_v18, %v1279_v31  ;;  %v5757_v18 = vld [vmem:[%s8423_s3 + $0x230] sm:$0xf0]  ;;  %v5386_v9 = vor.u32 %v5731_v38, %v5385_v19  ;;  %v5728_v19 = vld [vmem:[%s8423_s3 + $0x88] sm:$0xf0] }
 0x1dd   : > { %v5518_v31 = vor.u32 %v5757_v18, %v5517_v30  ;;  %v5493_v38 = vld [vmem:[%s8423_s3 + $0x1f8] sm:$0xf] }
 0x1de   : > { %8535 = vst [vmem:[#allocation100_spill] sm:$0xff] %v7150_v44  ;;  %1331 = vmatmul.bf16.gmra.mxu1 %v6465_v47  ;;  %1999 = vmatmul.bf16.gmra.mxu0 %v6560_v17 }
 0x1df   : > { %1460 = vmatmul.bf16.gmra.mxu2 %v6465_v47  ;;  %2971 = vmatpush.bf16.msrb.mxu3 %v5518_v31  ;;  %v5506_v31 = vor.u32 %v5754_v48, %v5505_v23  ;;  %v5725_v48 = vld [vmem:[%s8423_s3 + $0x70] sm:$0xf0] }
 0x1e0   : > { %1893 = vmatmul.bf16.gmra.mxu3 %v6465_v47  ;;  %2775 = vmatpush.bf16.msrb.mxu2 %v5386_v9  ;;  %v5361_v9 = vld [vmem:[%s8423_s3 + $0x68] sm:$0xf] }
 0x1e2   : > { %v7177_v8 = vpop.f32.mrf.mxu2 }
 0x1e3   : > { %8536 = vst [vmem:[#allocation101_spill] sm:$0xff] %v7177_v8  ;;  %v7179_v44 = vpop.f32.mrf.mxu3  ;;  %v1962_v18 = vpop.f32.mrf.mxu0  ;;  %2972 = vmatpush.bf16.msrb.mxu3 %v5506_v31  ;;  %v5374_v8 = vor.u32 %v5728_v19, %v5373_v58  ;;  %v5362_v19 = vor.u32 %v5725_v48, %v5361_v9  ;;  %v5722_v9 = vld [vmem:[%s8423_s3 + $0x58] sm:$0xf0]  ;;  %v5469_v48 = vld [vmem:[%s8423_s3 + $0x1c8] sm:$0xf] }
 0x1e4   : > { %8537 = vst [vmem:[#allocation102_spill] sm:$0xff] %v7179_v44  ;;  %v7184_v30 = vpop.f32.mrf.mxu1  ;;  %v7187_v52 = vadd.f32 %v1962_v18, %v7090_v56  ;;  %v5751_v56 = vld [vmem:[%s8423_s3 + $0x200] sm:$0xf0]  ;;  %v5481_v18 = vld [vmem:[%s8423_s3 + $0x1e0] sm:$0xf] }
 0x1e5   : > { %v5494_v23 = vor.u32 %v5751_v56, %v5493_v38  ;;  %2776 = vmatpush.bf16.msrb.mxu2 %v5374_v8  ;;  %v5748_v8 = vld [vmem:[%s8423_s3 + $0x1e8] sm:$0xf0] }
 0x1e6   : > { %8538 = vst [vmem:[#allocation103_spill] sm:$0xff] %v7187_v52  ;;  %v5737_v52 = vld [vmem:[%s8423_s3 + $0x190] sm:$0xf0] }
 0x1e7   : > { %2973 = vmatpush.bf16.msrb.mxu3 %v5494_v23  ;;  %v5482_v23 = vor.u32 %v5748_v8, %v5481_v18  ;;  %v5745_v18 = vld [vmem:[%s8423_s3 + $0x1d0] sm:$0xf0]  ;;  %v5337_v8 = vld [vmem:[%s8423_s3 + $0x38] sm:$0xf] }
 0x1e9   : > { %2777 = vmatpush.bf16.msrb.mxu2 %v5362_v19  ;;  %v5470_v19 = vor.u32 %v5745_v18, %v5469_v48  ;;  %v5742_v48 = vld [vmem:[%s8423_s3 + $0x1b8] sm:$0xf0] }
 0x1ea   : > { %v7210_v58 = vpop.f32.mrf.mxu2 }
 0x1eb   : > { %8539 = vst [vmem:[#allocation104_spill] sm:$0xff] %v7210_v58  ;;  %v7212_v31 = vpop.f32.mrf.mxu3  ;;  %v1965_v56 = vpop.f32.mrf.mxu0  ;;  %2974 = vmatpush.bf16.msrb.mxu3 %v5482_v23  ;;  %v5349_v58 = vld [vmem:[%s8423_s3 + $0x50] sm:$0xf] }
 0x1ec   : > { %8540 = vst [vmem:[#allocation105_spill] sm:$0xff] %v7212_v31  ;;  %v7217_v38 = vpop.f32.mrf.mxu1  ;;  %v7220_v44 = vadd.f32 %v1965_v56, %v7108_v29  ;;  %v5350_v29 = vor.u32 %v5722_v9, %v5349_v58  ;;  %v5719_v58 = vld [vmem:[%s8423_s3 + $0x40] sm:$0xf0]  ;;  %v5457_v56 = vld [vmem:[%s8423_s3 + $0x1b0] sm:$0xf] }
 0x1ed   : > { %v5338_v31 = vor.u32 %v5719_v58, %v5337_v8 }
 0x1ee   : > { %8541 = vst [vmem:[#allocation106_spill] sm:$0xff] %v7220_v44  ;;  %1336 = vmatmul.bf16.gmra.mxu1 %v6562_v42  ;;  %2004 = vmatmul.bf16.gmra.mxu0 %v6223_v10  ;;  %v5781_v44 = vld [vmem:[%s8423_s3 + $0x230] sm:$0xf0] }
 0x1ef   : > { %1465 = vmatmul.bf16.gmra.mxu2 %v6562_v42  ;;  %2975 = vmatpush.bf16.msrb.mxu3 %v5470_v19  ;;  %v5649_v19 = vld [vmem:[%s8423_s3 + $0x228] sm:$0xf] }
 0x1f0   : > { %1897 = vmatmul.bf16.gmra.mxu3 %v6562_v42  ;;  %2778 = vmatpush.bf16.msrb.mxu2 %v5350_v29  ;;  %v5650_v58 = vor.u32 %v5781_v44, %v5649_v19  ;;  %v5445_v44 = vld [vmem:[%s8423_s3 + $0x198] sm:$0xf] }
 0x1f2   : > { %v7247_v23 = vpop.f32.mrf.mxu2  ;;  %3934 = vmatpush.bf16.msrb.mxu1 %v5650_v58 }
 0x1f3   : > { %8542 = vst [vmem:[#allocation107_spill] sm:$0xff] %v7247_v23  ;;  %v7249_v9 = vpop.f32.mrf.mxu3  ;;  %v1967_v18 = vpop.f32.mrf.mxu0  ;;  %v5458_v23 = vor.u32 %v5742_v48, %v5457_v56 }
 0x1f4   : > { %8543 = vst [vmem:[#allocation108_spill] sm:$0xff] %v7249_v9  ;;  %v7254_v29 = vpop.f32.mrf.mxu1  ;;  %v7264_v8 = vadd.f32 %v1967_v18, %v7128_v11  ;;  %2779 = vmatpush.bf16.msrb.mxu2 %v5338_v31  ;;  %v5441_v9 = vld [vmem:[%s8423_s3 + $0x188] sm:$0xf]  ;;  %v5716_v11 = vld [vmem:[%s8423_s3 + $0x28] sm:$0xf0] }
 0x1f5   : > { %2976 = vmatpush.bf16.msrb.mxu3 %v5458_v23  ;;  %v5442_v56 = vor.u32 %v5737_v52, %v5441_v9  ;;  %v5739_v31 = vld [vmem:[%s8423_s3 + $0x1a0] sm:$0xf0]  ;;  %v5326_v48 = vor.u32 %v5716_v11, %v5325_v57  ;;  %v5313_v52 = vld [vmem:[%s8423_s3 + $0x8] sm:$0xf]  ;;  %v5713_v23 = vld [vmem:[%s8423_s3 + $0x10] sm:$0xf0] }
 0x1f6   : > { %8544 = vst [vmem:[#allocation109_spill] sm:$0xff] %v7264_v8  ;;  %v5446_v18 = vor.u32 %v5739_v31, %v5445_v44  ;;  %v5433_v57 = vld [vmem:[%s8423_s3 + $0x180] sm:$0xf]  ;;  %v5314_v58 = vor.u32 %v5713_v23, %v5313_v52  ;;  %v5519_v52 = vld [vmem:[%s8423_s3 + $0x234] sm:$0xf0] }
 0x1f7   : > { %3230 = vmatpush.bf16.msra.mxu0 %v5442_v56  ;;  %v5736_v56 = vld [vmem:[%s8423_s3 + $0x188] sm:$0xf0]  ;;  %v7310_v31 = vld [vmem:[%s7289_s14] sm:$0xff] }
 0x1f8   : > { %2780 = vmatpush.bf16.msrb.mxu2 %v5326_v48  ;;  %v5434_v48 = vor.u32 %v5736_v56, %v5433_v57  ;;  %v5507_v57 = vld [vmem:[%s8423_s3 + $0x21c] sm:$0xf0] }
 0x1f9   : > { %2977 = vmatpush.bf16.msrb.mxu3 %v5446_v18 }
 0x1fa   : > { %v7300_v9 = vpop.f32.mrf.mxu2 }
 0x1fb   : > { %8545 = vst [vmem:[#allocation110_spill] sm:$0xff] %v7300_v9  ;;  %v7302_v19 = vpop.f32.mrf.mxu3  ;;  %v1970_v44 = vpop.f32.mrf.mxu0  ;;  %v5756_v9 = vld [vmem:[%s8423_s3 + $0x22c] sm:$0xf] }
 0x1fc   : > { %8546 = vst [vmem:[#allocation111_spill] sm:$0xff] %v7302_v19  ;;  %v7307_v11 = vpop.f32.mrf.mxu1  ;;  %v7313_v18 = vadd.f32 %v1970_v44, %v7140_v0  ;;  %2781 = vmatpush.bf16.msrb.mxu2 %v5314_v58  ;;  %v5522_v23 = vor.u32 %v5756_v9, %v5519_v52  ;;  %v5753_v0 = vld [vmem:[%s8423_s3 + $0x214] sm:$0xf]  ;;  %v5750_v19 = vld [vmem:[%s8423_s3 + $0x1fc] sm:$0xf] }
 0x1fd   : > { %2978 = vmatpush.bf16.msrb.mxu3 %v5434_v48  ;;  %v5510_v44 = vor.u32 %v5753_v0, %v5507_v57  ;;  %v5747_v0 = vld [vmem:[%s8423_s3 + $0x1e4] sm:$0xf] }
 0x1fe   : > { %8547 = vst [vmem:[#allocation112_spill] sm:$0xff] %v7313_v18  ;;  %2009 = vmatmul.bf16.gmra.mxu0 %v6319_v46  ;;  %2035 = vmatmul.bf16.vlgmr.msra.gmra.mxu1 %v6211_v28  ;;  %v5495_v18 = vld [vmem:[%s8423_s3 + $0x204] sm:$0xf0] }
 0x1ff   : > { %2746 = vmatmul.bf16.vlgmr.msra.gmra.mxu2 %v7310_v31 }
 0x200   : > { %2764 = vmatmul.bf16.vlgmr.msra.gmra.mxu3 %v7310_v31  ;;  %3097 = vmatpush.bf16.msra.mxu2 %v5522_v23  ;;  %v775_v23 = vld [vmem:[%s7289_s14 + $0x8] sm:$0xf] }
 0x201   : > { %v2605_v8 = vunpack.c.l.b16 %v775_v23 }
 0x202   : > { %v7331_v58 = vpop.f32.mrf.mxu2 }
 0x203   : > { %8548 = vst [vmem:[#allocation113_spill] sm:$0xff] %v7331_v58  ;;  %v7333_v56 = vpop.f32.mrf.mxu3  ;;  %v1972_v9 = vpop.f32.mrf.mxu0  ;;  %v5498_v58 = vor.u32 %v5750_v19, %v5495_v18  ;;  %v2607_v46 = vpack.c.b16 %v2605_v8, %v2605_v8  ;;  %v5657_v18 = vld [vmem:[%s8423_s3 + $0x230] sm:$0xf]  ;;  %v5471_v8 = vld [vmem:[%s8423_s3 + $0x1d4] sm:$0xf0] }
 0x204   : > { %8549 = vst [vmem:[#allocation114_spill] sm:$0xff] %v7333_v56  ;;  %v7335_v48 = vpop.f32.mrf.mxu1  ;;  %v7338_v52 = vadd.f32 %v1972_v9, %v7148_v15  ;;  %3098 = vmatpush.bf16.msra.mxu2 %v5510_v44  ;;  %v5483_v15 = vld [vmem:[%s8423_s3 + $0x1ec] sm:$0xf0] }
 0x205   : > { %v5486_v9 = vor.u32 %v5747_v0, %v5483_v15  ;;  %v5744_v0 = vld [vmem:[%s8423_s3 + $0x1cc] sm:$0xf]  ;;  %v5459_v15 = vld [vmem:[%s8423_s3 + $0x1bc] sm:$0xf0] }
 0x206   : > { %8550 = vst [vmem:[#allocation115_spill] sm:$0xff] %v7338_v52 }
 0x208   : > { %3099 = vmatpush.bf16.msra.mxu2 %v5498_v58  ;;  %v5782_v58 = vld [vmem:[%s8423_s3 + $0x238] sm:$0xf0] }
 0x209   : > { %v5658_v23 = vor.u32 %v5782_v58, %v5657_v18 }
 0x20a   : > { %v7353_v57 = vpop.f32.mrf.mxu2 }
 0x20b   : > { %8551 = vst [vmem:[#allocation116_spill] sm:$0xff] %v7353_v57  ;;  %v7355_v44 = vpop.f32.mrf.mxu3  ;;  %v1975_v52 = vpop.f32.mrf.mxu0  ;;  %3970 = vmatpush.bf16.msra.mxu3 %v5658_v23  ;;  %v5738_v23 = vld [vmem:[%s8423_s3 + $0x19c] sm:$0xf] }
 0x20c   : > { %8552 = vst [vmem:[#allocation117_spill] sm:$0xff] %v7355_v44  ;;  %v7357_v56 = vpop.f32.mrf.mxu1  ;;  %v7360_v19 = vadd.f32 %v1975_v52, %v7184_v30  ;;  %3100 = vmatpush.bf16.msra.mxu2 %v5486_v9  ;;  %v5474_v30 = vor.u32 %v5744_v0, %v5471_v8  ;;  %v5741_v52 = vld [vmem:[%s8423_s3 + $0x1b4] sm:$0xf]  ;;  %v5447_v8 = vld [vmem:[%s8423_s3 + $0x1a4] sm:$0xf0] }
 0x20d   : > { %v5462_v58 = vor.u32 %v5741_v52, %v5459_v15  ;;  %v5735_v52 = vld [vmem:[%s8423_s3 + $0x184] sm:$0xf] }
 0x20e   : > { %8553 = vst [vmem:[#allocation118_spill] sm:$0xff] %v7360_v19  ;;  %2014 = vmatmul.bf16.gmra.mxu0 %v6381_v62  ;;  %2040 = vmatmul.bf16.gmra.mxu1 %v6289_v59 }
 0x20f   : > { %2751 = vmatmul.bf16.gmra.mxu2 %v2607_v46 }
 0x210   : > { %2769 = vmatmul.bf16.gmra.mxu3 %v2607_v46  ;;  %3101 = vmatpush.bf16.msra.mxu2 %v5474_v30  ;;  %v5450_v30 = vor.u32 %v5738_v23, %v5447_v8 }
 0x212   : > { %v7382_v9 = vpop.f32.mrf.mxu2 }
 0x213   : > { %8554 = vst [vmem:[#allocation119_spill] sm:$0xff] %v7382_v9  ;;  %v7384_v18 = vpop.f32.mrf.mxu3  ;;  %v1977_v44 = vpop.f32.mrf.mxu0 }
 0x214   : > { %8555 = vst [vmem:[#allocation120_spill] sm:$0xff] %v7384_v18  ;;  %v1309_v57 = vpop.f32.mrf.mxu1  ;;  %v7387_v0 = vadd.f32 %v1977_v44, %v7217_v38  ;;  %3102 = vmatpush.bf16.msra.mxu2 %v5462_v58  ;;  %v5435_v38 = vld [vmem:[%s8423_s3 + $0x18c] sm:$0xf0] }
 0x215   : > { %v5438_v58 = vor.u32 %v5735_v52, %v5435_v38 }
 0x216   : > { %8556 = vst [vmem:[#allocation121_spill] sm:$0xff] %v7387_v0 }
 0x218   : > { %3103 = vmatpush.bf16.msra.mxu2 %v5450_v30 }
 0x21a   : > { %v7401_v44 = vpop.f32.mrf.mxu2 }
 0x21b   : > { %8557 = vst [vmem:[#allocation122_spill] sm:$0xff] %v7401_v44  ;;  %v7403_v15 = vpop.f32.mrf.mxu3  ;;  %v1980_v18 = vpop.f32.mrf.mxu0 }
 0x21c   : > { %8558 = vst [vmem:[#allocation123_spill] sm:$0xff] %v7403_v15  ;;  %v1312_v9 = vpop.f32.mrf.mxu1  ;;  %v7406_v0 = vadd.f32 %v1980_v18, %v7254_v29  ;;  %3104 = vmatpush.bf16.msra.mxu2 %v5438_v58  ;;  %v5637_v29 = vld [vmem:[%s8423_s3 + $0x210] sm:$0xf]  ;;  %v5778_v18 = vld [vmem:[%s8423_s3 + $0x218] sm:$0xf0] }
 0x21e   : > { %8559 = vst [vmem:[#allocation124_spill] sm:$0xff] %v7406_v0  ;;  %2019 = vmatmul.bf16.gmra.mxu0 %v6465_v47  ;;  %2045 = vmatmul.bf16.gmra.mxu1 %v6372_v36 }
 0x21f   : > { %2782 = vmatmul.bf16.vlgmr.msrb.gmra.mxu2 %v7310_v31  ;;  %v5638_v31 = vor.u32 %v5778_v18, %v5637_v29 }
 0x220   : > { %2979 = vmatmul.bf16.vlgmr.msrb.gmra.mxu3 %v6211_v28 }
 0x221   : > { %3935 = vmatpush.bf16.msrb.mxu1 %v5638_v31 }
 0x222   : > { %v7412_v23 = vpop.f32.mrf.mxu2 }
 0x223   : > { %8560 = vst [vmem:[#allocation125_spill] sm:$0xff] %v7412_v23  ;;  %v7414_v8 = vpop.f32.mrf.mxu3  ;;  %v1982_v52 = vpop.f32.mrf.mxu0 }
 0x224   : > { %8561 = vst [vmem:[#allocation126_spill] sm:$0xff] %v7414_v8  ;;  %v1314_v30 = vpop.f32.mrf.mxu1  ;;  %v7423_v38 = vadd.f32 %v1982_v52, %v7307_v11 }
 0x226   : > { %8562 = vst [vmem:[#allocation127_spill] sm:$0xff] %v7423_v38 }
 0x22a   : > { %v7425_v58 = vpop.f32.mrf.mxu2 }
 0x22b   : > { %8563 = vst [vmem:[#allocation128_spill] sm:$0xff] %v7425_v58  ;;  %v7427_v23 = vpop.f32.mrf.mxu3  ;;  %v1985_v44 = vpop.f32.mrf.mxu0 }
 0x22c   : > { %8564 = vst [vmem:[#allocation129_spill] sm:$0xff] %v7427_v23  ;;  %v1317_v8 = vpop.f32.mrf.mxu1  ;;  %v7430_v15 = vadd.f32 %v1985_v44, %v7335_v48 }
 0x22e   : > { %8565 = vst [vmem:[#allocation130_spill] sm:$0xff] %v7430_v15  ;;  %2023 = vmatmul.bf16.gmra.mxu0 %v6562_v42  ;;  %2050 = vmatmul.bf16.gmra.mxu1 %v6454_v12 }
 0x22f   : > { %2787 = vmatmul.bf16.gmra.mxu2 %v2607_v46  ;;  %v5645_v46 = vld [vmem:[%s8423_s3 + $0x218] sm:$0xf] }
 0x230   : > { %2982 = vmatmul.bf16.gmra.mxu3 %v6289_v59 }
 0x232   : > { %v7435_v11 = vpop.f32.mrf.mxu2 }
 0x233   : > { %8566 = vst [vmem:[#allocation131_spill] sm:$0xff] %v7435_v11  ;;  %v7437_v52 = vpop.f32.mrf.mxu3  ;;  %v1987_v18 = vpop.f32.mrf.mxu0  ;;  %v5779_v11 = vld [vmem:[%s8423_s3 + $0x220] sm:$0xf0] }
 0x234   : > { %8567 = vst [vmem:[#allocation132_spill] sm:$0xff] %v7437_v52  ;;  %v1319_v29 = vpop.f32.mrf.mxu1  ;;  %v7440_v31 = vadd.f32 %v1987_v18, %v7357_v56  ;;  %v5646_v52 = vor.u32 %v5779_v11, %v5645_v46 }
 0x236   : > { %8568 = vst [vmem:[#allocation133_spill] sm:$0xff] %v7440_v31  ;;  %3971 = vmatpush.bf16.msra.mxu3 %v5646_v52  ;;  %v5625_v52 = vld [vmem:[%s8423_s3 + $0x1f8] sm:$0xf] }
 0x23a   : > { %v7442_v58 = vpop.f32.mrf.mxu2 }
 0x23b   : > { %8569 = vst [vmem:[#allocation134_spill] sm:$0xff] %v7442_v58  ;;  %v7444_v48 = vpop.f32.mrf.mxu3  ;;  %v1990_v23 = vpop.f32.mrf.mxu0 }
 0x23c   : > { %8570 = vst [vmem:[#allocation135_spill] sm:$0xff] %v7444_v48  ;;  %v1322_v44 = vpop.f32.mrf.mxu1  ;;  %v7446_v15 = vadd.f32 %v1990_v23, %v1309_v57 }
 0x23e   : > { %8571 = vst [vmem:[#allocation136_spill] sm:$0xff] %v7446_v15  ;;  %2055 = vmatmul.bf16.gmra.mxu1 %v6555_v24  ;;  %3231 = vmatmul.bf16.vlgmr.msra.gmra.mxu0 %v6211_v28 }
 0x23f   : > { %3105 = vmatmul.bf16.vlgmr.msra.gmra.mxu2 %v6211_v28 }
 0x240   : > { %2986 = vmatmul.bf16.gmra.mxu3 %v6372_v36 }
 0x242   : > { %v7458_v56 = vpop.f32.mrf.mxu2 }
 0x243   : > { %8572 = vst [vmem:[#allocation137_spill] sm:$0xff] %v7458_v56  ;;  %v7460_v57 = vpop.f32.mrf.mxu3  ;;  %v1992_v18 = vpop.f32.mrf.mxu0 }
 0x244   : > { %8573 = vst [vmem:[#allocation138_spill] sm:$0xff] %v7460_v57  ;;  %v1324_v23 = vpop.f32.mrf.mxu1  ;;  %v7462_v58 = vadd.f32 %v1992_v18, %v1312_v9 }
 0x246   : > { %8574 = vst [vmem:[#allocation139_spill] sm:$0xff] %v7462_v58 }
 0x24a   : > { %v7464_v48 = vpop.f32.mrf.mxu2 }
 0x24b   : > { %8575 = vst [vmem:[#allocation140_spill] sm:$0xff] %v7464_v48  ;;  %v7466_v11 = vpop.f32.mrf.mxu3  ;;  %v1995_v15 = vpop.f32.mrf.mxu0 }
 0x24c   : > { %8576 = vst [vmem:[#allocation141_spill] sm:$0xff] %v7466_v11  ;;  %v1327_v46 = vpop.f32.mrf.mxu1  ;;  %v7468_v31 = vadd.f32 %v1995_v15, %v1314_v30  ;;  %v5775_v15 = vld [vmem:[%s8423_s3 + $0x200] sm:$0xf0] }
 0x24d   : > { %v5626_v48 = vor.u32 %v5775_v15, %v5625_v52 }
 0x24e   : > { %8577 = vst [vmem:[#allocation142_spill] sm:$0xff] %v7468_v31  ;;  %2060 = vmatmul.bf16.gmra.mxu1 %v6580_v1  ;;  %3234 = vmatmul.bf16.gmra.mxu0 %v6289_v59 }
 0x24f   : > { %3108 = vmatmul.bf16.gmra.mxu2 %v6289_v59  ;;  %3936 = vmatpush.bf16.msrb.mxu1 %v5626_v48 }
 0x250   : > { %2991 = vmatmul.bf16.gmra.mxu3 %v6454_v12 }
 0x252   : > { %v7474_v28 = vpop.f32.mrf.mxu2 }
 0x253   : > { %8578 = vst [vmem:[#allocation143_spill] sm:$0xff] %v7474_v28  ;;  %v7476_v9 = vpop.f32.mrf.mxu3  ;;  %v1997_v18 = vpop.f32.mrf.mxu0 }
 0x254   : > { %8579 = vst [vmem:[#allocation144_spill] sm:$0xff] %v7476_v9  ;;  %v1329_v30 = vpop.f32.mrf.mxu1  ;;  %v7484_v11 = vadd.f32 %v1997_v18, %v1317_v8 }
 0x256   : > { %8580 = vst [vmem:[#allocation145_spill] sm:$0xff] %v7484_v11 }
 0x25a   : > { %v7486_v56 = vpop.f32.mrf.mxu2 }
 0x25b   : > { %8581 = vst [vmem:[#allocation146_spill] sm:$0xff] %v7486_v56  ;;  %v7488_v59 = vpop.f32.mrf.mxu3  ;;  %v2000_v57 = vpop.f32.mrf.mxu0 }
 0x25c   : > { %8582 = vst [vmem:[#allocation147_spill] sm:$0xff] %v7488_v59  ;;  %v1332_v28 = vpop.f32.mrf.mxu1  ;;  %v7490_v31 = vadd.f32 %v2000_v57, %v1319_v29  ;;  %v5633_v59 = vld [vmem:[%s8423_s3 + $0x200] sm:$0xf] }
 0x25e   : > { %8583 = vst [vmem:[#allocation148_spill] sm:$0xff] %v7490_v31  ;;  %2065 = vmatmul.bf16.gmra.mxu1 %v6600_v40  ;;  %3238 = vmatmul.bf16.gmra.mxu0 %v6372_v36 }
 0x25f   : > { %3112 = vmatmul.bf16.gmra.mxu2 %v6372_v36  ;;  %v5776_v36 = vld [vmem:[%s8423_s3 + $0x208] sm:$0xf0] }
 0x260   : > { %2996 = vmatmul.bf16.gmra.mxu3 %v6555_v24 }
 0x262   : > { %v7496_v52 = vpop.f32.mrf.mxu2 }
 0x263   : > { %8584 = vst [vmem:[#allocation149_spill] sm:$0xff] %v7496_v52  ;;  %v7498_v8 = vpop.f32.mrf.mxu3  ;;  %v2002_v15 = vpop.f32.mrf.mxu0  ;;  %v5634_v52 = vor.u32 %v5776_v36, %v5633_v59 }
 0x264   : > { %8585 = vst [vmem:[#allocation150_spill] sm:$0xff] %v7498_v8  ;;  %v1334_v48 = vpop.f32.mrf.mxu1  ;;  %v7500_v18 = vadd.f32 %v2002_v15, %v1322_v44 }
 0x265   : > { %3972 = vmatpush.bf16.msra.mxu3 %v5634_v52 }
 0x266   : > { %8586 = vst [vmem:[#allocation151_spill] sm:$0xff] %v7500_v18 }
 0x26a   : > { %v7502_v56 = vpop.f32.mrf.mxu2 }
 0x26b   : > { %8587 = vst [vmem:[#allocation152_spill] sm:$0xff] %v7502_v56  ;;  %v1896_v29 = vpop.f32.mrf.mxu3  ;;  %v2005_v31 = vpop.f32.mrf.mxu0 }
 0x26c   : > { %v1337_v57 = vpop.f32.mrf.mxu1  ;;  %v7504_v11 = vadd.f32 %v2005_v31, %v1324_v23 }
 0x26e   : > { %8588 = vst [vmem:[#allocation153_spill] sm:$0xff] %v7504_v11  ;;  %2070 = vmatmul.bf16.gmra.mxu1 %v6624_v2  ;;  %3243 = vmatmul.bf16.gmra.mxu0 %v6454_v12 }
 0x26f   : > { %3117 = vmatmul.bf16.gmra.mxu2 %v6454_v12 }
 0x270   : > { %3001 = vmatmul.bf16.gmra.mxu3 %v6580_v1 }
 0x272   : > { %v7516_v31 = vpop.f32.mrf.mxu2 }
 0x273   : > { %8589 = vst [vmem:[#allocation154_spill] sm:$0xff] %v7516_v31  ;;  %v1898_v44 = vpop.f32.mrf.mxu3  ;;  %v2007_v15 = vpop.f32.mrf.mxu0 }
 0x274   : > { %v1339_v23 = vpop.f32.mrf.mxu1  ;;  %v7518_v29 = vadd.f32 %v2007_v15, %v1327_v46 }
 0x276   : > { %8590 = vst [vmem:[#allocation155_spill] sm:$0xff] %v7518_v29 }
 0x27a   : > { %v7520_v56 = vpop.f32.mrf.mxu2 }
 0x27b   : > { %8591 = vst [vmem:[#allocation156_spill] sm:$0xff] %v7520_v56  ;;  %v1899_v11 = vpop.f32.mrf.mxu3  ;;  %v2010_v59 = vpop.f32.mrf.mxu0 }
 0x27c   : > { %v7522_v36 = vpop.f32.mrf.mxu1  ;;  %v7524_v18 = vadd.f32 %v2010_v59, %v1329_v30  ;;  %v5613_v11 = vld [vmem:[%s8423_s3 + $0x1e0] sm:$0xf]  ;;  %v5772_v30 = vld [vmem:[%s8423_s3 + $0x1e8] sm:$0xf0] }
 0x27d   : > { %v5614_v59 = vor.u32 %v5772_v30, %v5613_v11 }
 0x27e   : > { %8592 = vst [vmem:[#allocation157_spill] sm:$0xff] %v7524_v18  ;;  %2075 = vmatmul.bf16.gmra.mxu1 %v6649_v27  ;;  %3248 = vmatmul.bf16.gmra.mxu0 %v6555_v24 }
 0x27f   : > { %3122 = vmatmul.bf16.gmra.mxu2 %v6555_v24  ;;  %3937 = vmatpush.bf16.msrb.mxu1 %v5614_v59 }
 0x280   : > { %3006 = vmatmul.bf16.gmra.mxu3 %v6600_v40 }
 0x282   : > { %v2747_v12 = vpop.f32.mrf.mxu2 }
 0x283   : > { %v7530_v52 = vpop.f32.mrf.mxu3  ;;  %v2012_v46 = vpop.f32.mrf.mxu0 }
 0x284   : > { %v7532_v44 = vpop.f32.mrf.mxu1  ;;  %v7540_v15 = vadd.f32 %v2012_v46, %v1332_v28 }
 0x286   : > { %8593 = vst [vmem:[#allocation158_spill] sm:$0xff] %v7540_v15 }
 0x28a   : > { %v2749_v18 = vpop.f32.mrf.mxu2 }
 0x28b   : > { %v7542_v24 = vpop.f32.mrf.mxu3  ;;  %v2015_v56 = vpop.f32.mrf.mxu0 }
 0x28c   : > { %v7544_v29 = vpop.f32.mrf.mxu1  ;;  %v7546_v31 = vadd.f32 %v2015_v56, %v1334_v48 }
 0x28e   : > { %8594 = vst [vmem:[#allocation159_spill] sm:$0xff] %v7546_v31  ;;  %2080 = vmatmul.bf16.gmra.mxu1 %v6213_v63  ;;  %3253 = vmatmul.bf16.gmra.mxu0 %v6580_v1 }
 0x28f   : > { %3127 = vmatmul.bf16.gmra.mxu2 %v6580_v1  ;;  %v5621_v1 = vld [vmem:[%s8423_s3 + $0x1e8] sm:$0xf] }
 0x290   : > { %3011 = vmatmul.bf16.gmra.mxu3 %v6624_v2 }
 0x292   : > { %v2752_v28 = vpop.f32.mrf.mxu2 }
 0x293   : > { %v7552_v46 = vpop.f32.mrf.mxu3  ;;  %v2017_v11 = vpop.f32.mrf.mxu0 }
 0x294   : > { %v7554_v30 = vpop.f32.mrf.mxu1  ;;  %v7556_v59 = vadd.f32 %v2017_v11, %v1337_v57 }
 0x296   : > { %8595 = vst [vmem:[#allocation160_spill] sm:$0xff] %v7556_v59 }
 0x29a   : > { %v2754_v15 = vpop.f32.mrf.mxu2 }
 0x29b   : > { %v2772_v8 = vpop.f32.mrf.mxu3  ;;  %v2020_v56 = vpop.f32.mrf.mxu0 }
 0x29c   : > { %v7558_v48 = vpop.f32.mrf.mxu1  ;;  %v7560_v31 = vadd.f32 %v2020_v56, %v1339_v23  ;;  %v5773_v8 = vld [vmem:[%s8423_s3 + $0x1f0] sm:$0xf0] }
 0x29d   : > { %v5622_v57 = vor.u32 %v5773_v8, %v5621_v1 }
 0x29e   : > { %8596 = vst [vmem:[#allocation161_spill] sm:$0xff] %v7560_v31  ;;  %2085 = vmatmul.bf16.gmra.mxu1 %v6306_v16  ;;  %3258 = vmatmul.bf16.gmra.mxu0 %v6600_v40 }
 0x29f   : > { %3132 = vmatmul.bf16.gmra.mxu2 %v6600_v40  ;;  %3973 = vmatpush.bf16.msra.mxu3 %v5622_v57 }
 0x2a0   : > { %3016 = vmatmul.bf16.gmra.mxu3 %v6649_v27 }
 0x2a2   : > { %v2783_v15 = vpop.f32.mrf.mxu2 }
 0x2a3   : > { %v2980_v23 = vpop.f32.mrf.mxu3  ;;  %v2022_v11 = vpop.f32.mrf.mxu0 }
 0x2a4   : > { %v7572_v56 = vpop.f32.mrf.mxu1 }
 0x2aa   : > { %v2785_v31 = vpop.f32.mrf.mxu2 }
 0x2ab   : > { %v2981_v59 = vpop.f32.mrf.mxu3  ;;  %v2024_v9 = vpop.f32.mrf.mxu0 }
 0x2ac   : > { %v7574_v58 = vpop.f32.mrf.mxu1  ;;  %v5601_v9 = vld [vmem:[%s8423_s3 + $0x1c8] sm:$0xf]  ;;  %v5769_v59 = vld [vmem:[%s8423_s3 + $0x1d0] sm:$0xf0] }
 0x2ad   : > { %v5602_v23 = vor.u32 %v5769_v59, %v5601_v9 }
 0x2ae   : > { %2090 = vmatmul.bf16.gmra.mxu1 %v6376_v50  ;;  %3263 = vmatmul.bf16.gmra.mxu0 %v6624_v2 }
 0x2af   : > { %3137 = vmatmul.bf16.gmra.mxu2 %v6624_v2  ;;  %3938 = vmatpush.bf16.msrb.mxu1 %v5602_v23 }
 0x2b0   : > { %3021 = vmatmul.bf16.gmra.mxu3 %v6213_v63 }
 0x2b2   : > { %v7580_v40 = vpop.f32.mrf.mxu2 }
 0x2b3   : > { %v2983_v1 = vpop.f32.mrf.mxu3  ;;  %v2025_v8 = vpop.f32.mrf.mxu0 }
 0x2b4   : > { %v7582_v57 = vpop.f32.mrf.mxu1  ;;  %v2792_v1 = vadd.f32 %v2747_v12, %v6651_v22  ;;  %v2795_v8 = vadd.f32 %v2749_v18, %v6663_v51  ;;  %v2798_v22 = vadd.f32 %v2752_v28, %v6671_v54  ;;  %v5770_v28 = vld [vmem:[%s8423_s3 + $0x1d8] sm:$0xf0] }
 0x2ba   : > { %v2790_v11 = vpop.f32.mrf.mxu2 }
 0x2bb   : > { %v2984_v38 = vpop.f32.mrf.mxu3  ;;  %v3232_v2 = vpop.f32.mrf.mxu0 }
 0x2bc   : > { %v7590_v0 = vpop.f32.mrf.mxu1  ;;  %v3484_v19 = vadd.f32 %v2984_v38, %v2792_v1 }
 0x2bd   : > { %8597 = vst [vmem:[#allocation162_spill] sm:$0xff] %v7590_v0 }
 0x2be   : > { %2095 = vmatmul.bf16.gmra.mxu1 %v6458_v20  ;;  %3268 = vmatmul.bf16.gmra.mxu0 %v6649_v27  ;;  %v4199_v2 = vrot.slane %v3484_v19, 7 }
 0x2bf   : > { %3142 = vmatmul.bf16.gmra.mxu2 %v6649_v27 }
 0x2c0   : > { %3026 = vmatmul.bf16.gmra.mxu3 %v6306_v16 }
 0x2c2   : > { %v3106_v59 = vpop.f32.mrf.mxu2 }
 0x2c3   : > { %v2987_v9 = vpop.f32.mrf.mxu3  ;;  %v3233_v42 = vpop.f32.mrf.mxu0 }
 0x2c4   : > { %v3487_v11 = vadd.f32 %v2987_v9, %v2795_v8  ;;  %v7598_v23 = vpop.f32.mrf.mxu1  ;;  %v2794_v8 = vadd.f32 %v2783_v15, %v6795_v4  ;;  %v2797_v9 = vadd.f32 %v2785_v31, %v6816_v21  ;;  %v4327_v4 = vsel %vm4198_vm2, 0.0, %v4199_v2 }
 0x2c6   : > { %v4200_v47 = vrot.slane %v3487_v11, 7 }
 0x2c8   : > { %v4201_v62 = vsel %vm4198_vm2, %v4199_v2, %v4200_v47  ;;  %v2796_v2 = vadd.f32 %v7542_v24, %v6802_v14 }
 0x2ca   : > { %v3107_v10 = vpop.f32.mrf.mxu2 }
 0x2cb   : > { %v2989_v12 = vpop.f32.mrf.mxu3  ;;  %v3235_v51 = vpop.f32.mrf.mxu0 }
 0x2cc   : > { %v3490_v0 = vadd.f32 %v2989_v12, %v2798_v22  ;;  %v7602_v27 = vpop.f32.mrf.mxu1 }
 0x2ce   : > { %v4202_v38 = vrot.slane %v3490_v0, 7  ;;  %2100 = vmatmul.bf16.gmra.mxu1 %v6557_v25  ;;  %3273 = vmatmul.bf16.gmra.mxu0 %v6213_v63  ;;  %v5609_v0 = vld [vmem:[%s8423_s3 + $0x1d0] sm:$0xf] }
 0x2cf   : > { %3147 = vmatmul.bf16.gmra.mxu2 %v6213_v63  ;;  %v5610_v1 = vor.u32 %v5770_v28, %v5609_v0  ;;  %v2793_v63 = vadd.f32 %v7530_v52, %v6783_v53 }
 0x2d0   : > { %3031 = vmatmul.bf16.gmra.mxu3 %v6376_v50  ;;  %v7609_v42 = vsel %vm4198_vm2, %v4200_v47, %v4202_v38 }
 0x2d1   : > { %3974 = vmatpush.bf16.msra.mxu3 %v5610_v1 }
 0x2d2   : > { %v3109_v54 = vpop.f32.mrf.mxu2 }
 0x2d3   : > { %v2992_v19 = vpop.f32.mrf.mxu3  ;;  %v3236_v10 = vpop.f32.mrf.mxu0 }
 0x2d4   : > { %v7611_v18 = vpop.f32.mrf.mxu1  ;;  %v7623_v47 = vadd.f32 %v2992_v19, %v6798_v49  ;;  %v3486_v59 = vadd.f32 %v3236_v10, %v2794_v8 }
 0x2d6   : > { %v4204_v53 = vrot.slane %v7623_v47, 7  ;;  %v4440_v49 = vrot.slane %v3486_v59, 1 }
 0x2da   : > { %v3110_v22 = vpop.f32.mrf.mxu2 }
 0x2db   : > { %v2994_v11 = vpop.f32.mrf.mxu3  ;;  %v3485_v51 = vadd.f32 %v3110_v22, %v2793_v63  ;;  %v3239_v54 = vpop.f32.mrf.mxu0 }
 0x2dc   : > { %v3496_v12 = vadd.f32 %v2994_v11, %v6819_v5  ;;  %v7627_v38 = vpop.f32.mrf.mxu1  ;;  %v3489_v15 = vadd.f32 %v3239_v54, %v2797_v9 }
 0x2dd   : > { %v4343_v0 = vadd.f32 %v4327_v4, %v3485_v51 }
 0x2de   : > { %v4205_v52 = vrot.slane %v3496_v12, 7  ;;  %v4441_v21 = vrot.slane %v3489_v15, 1  ;;  %2105 = vmatmul.bf16.gmra.mxu1 %v6218_v60  ;;  %3278 = vmatmul.bf16.gmra.mxu0 %v6306_v16 }
 0x2df   : > { %3152 = vmatmul.bf16.gmra.mxu2 %v6306_v16  ;;  %v2800_v16 = vadd.f32 %v7580_v40, %v6829_v3  ;;  %v2799_v40 = vadd.f32 %v7552_v46, %v6823_v45  ;;  %v5766_v45 = vld [vmem:[%s8423_s3 + $0x1b8] sm:$0xf0] }
 0x2e0   : > { %3036 = vmatmul.bf16.gmra.mxu3 %v6458_v20  ;;  %v7639_v5 = vsel %vm4198_vm2, %v4204_v53, %v4205_v52  ;;  %v4442_v31 = vsel %vm4439_vm3, %v4440_v49, %v4441_v21 }
 0x2e1   : > { %v4584_v19 = vadd.f32 %v4442_v31, %v4343_v0 }
 0x2e2   : > { %v3113_v28 = vpop.f32.mrf.mxu2 }
 0x2e3   : > { %v2997_v10 = vpop.f32.mrf.mxu3  ;;  %v4632_v1 = vmul.f32 %v6143_v35, %v4584_v19  ;;  %v3488_v63 = vadd.f32 %v3113_v28, %v2796_v2  ;;  %v3241_v14 = vpop.f32.mrf.mxu0 }
 0x2e4   : > { %v3499_v8 = vadd.f32 %v2997_v10, %v6832_v13  ;;  %v7653_v9 = vpop.f32.mrf.mxu1  ;;  %v3492_v24 = vadd.f32 %v3241_v14, %v2800_v16 }
 0x2e5   : > { %4680 = vst [vmem:[%s7647_s16] sm:$0xff] %v4632_v1  ;;  %v4344_v11 = vadd.f32 %v4201_v62, %v3488_v63  ;;  %v4781_v4 = vmul.f32 %v4632_v1, %v4632_v1 }
 0x2e6   : > { %v4207_v59 = vrot.slane %v3499_v8, 7  ;;  %v4443_v22 = vrot.slane %v3492_v24, 1 }
 0x2e8   : > { %v7657_v12 = vsel %vm4198_vm2, %v4205_v52, %v4207_v59  ;;  %v4444_v3 = vsel %vm4439_vm3, %v4441_v21, %v4443_v22  ;;  %v5589_v21 = vld [vmem:[%s8423_s3 + $0x1b0] sm:$0xf]  ;;  %v4568_v46 = vsel %vm4439_vm3, %v4443_v22, 0.0  ;;  %v8599_v22 = vld [vmem:[#allocation39_spill] sm:$0xff] }
 0x2e9   : > { %v4585_v51 = vadd.f32 %v4444_v3, %v4344_v11  ;;  %v5590_v19 = vor.u32 %v5766_v45, %v5589_v21  ;;  %v8600_v3 = vld [vmem:[#allocation46_spill] sm:$0xff]  ;;  %v8601_v21 = vld [vmem:[#allocation40_spill] sm:$0xff] }
 0x2ea   : > { %v3115_v54 = vpop.f32.mrf.mxu2  ;;  %v2297_v47 = vadd.f32 %v7544_v29, %v8601_v21 }
 0x2eb   : > { %v2999_v13 = vpop.f32.mrf.mxu3  ;;  %4681 = vst [vmem:[%s7647_s16 + $0x8] sm:$0xff] %v4585_v51  ;;  %v4728_v15 = vadd.f32 %v4632_v1, %v4585_v51  ;;  %v4782_v0 = vmul.f32 %v4585_v51, %v4585_v51  ;;  %v3491_v49 = vadd.f32 %v3115_v54, %v2799_v40  ;;  %v3244_v62 = vpop.f32.mrf.mxu0  ;;  %3939 = vmatpush.bf16.msrb.mxu1 %v5590_v19  ;;  %v8598_v1 = vld [vmem:[#allocation38_spill] sm:$0xff]  ;;  %v8602_v19 = vld [vmem:[#allocation41_spill] sm:$0xff] }
 0x2ec   : > { %v7663_v31 = vpop.f32.mrf.mxu1  ;;  %v7680_v10 = vadd.f32 %v2999_v13, %v6839_v37  ;;  %v2294_v8 = vadd.f32 %v7532_v44, %v8598_v1  ;;  %v4328_v37 = vsel %vm4198_vm2, 0.0, %v4204_v53 }
 0x2ed   : > { %v4829_v2 = vadd.f32 %v4782_v0, %v4781_v4  ;;  %v4345_v52 = vadd.f32 %v7609_v42, %v3491_v49  ;;  %v2291_v42 = vadd.f32 %v7522_v36, %v6836_v32 }
 0x2ee   : > { %2110 = vmatmul.bf16.gmra.mxu1 %v6310_v34  ;;  %3283 = vmatmul.bf16.gmra.mxu0 %v6376_v50  ;;  %v4209_v44 = vrot.slane %v7680_v10, 7 }
 0x2ef   : > { %v4586_v16 = vadd.f32 %v4568_v46, %v4345_v52  ;;  %3157 = vmatmul.bf16.gmra.mxu2 %v6376_v50  ;;  %v3495_v63 = vadd.f32 %v3244_v62, %v2291_v42 }
 0x2f0   : > { %3041 = vmatmul.bf16.gmra.mxu3 %v6557_v25 }
 0x2f1   : > { %v4634_v28 = vmul.f32 %v6160_v41, %v4586_v16  ;;  %v8603_v16 = vld [vmem:[#allocation49_spill] sm:$0xff] }
 0x2f2   : > { %v3118_v24 = vpop.f32.mrf.mxu2 }
 0x2f3   : > { %v3002_v14 = vpop.f32.mrf.mxu3  ;;  %4682 = vst [vmem:[%s7647_s16 + $0x10] sm:$0xff] %v4634_v28  ;;  %v4729_v59 = vadd.f32 %v4728_v15, %v4634_v28  ;;  %v4783_v11 = vmul.f32 %v4634_v28, %v4634_v28  ;;  %v3494_v40 = vadd.f32 %v3118_v24, %v8600_v3  ;;  %v3246_v36 = vpop.f32.mrf.mxu0  ;;  %v4445_v15 = vrot.slane %v3495_v63, 1 }
 0x2f4   : > { %v3505_v50 = vadd.f32 %v3002_v14, %v8599_v22  ;;  %v7688_v32 = vpop.f32.mrf.mxu1  ;;  %v3498_v51 = vadd.f32 %v3246_v36, %v2294_v8 }
 0x2f5   : > { %v4830_v13 = vadd.f32 %v4829_v2, %v4783_v11  ;;  %v4346_v4 = vadd.f32 %v4328_v37, %v3494_v40  ;;  %v8604_v37 = vld [vmem:[#allocation52_spill] sm:$0xff] }
 0x2f6   : > { %v4210_v54 = vrot.slane %v3505_v50, 7  ;;  %v4446_v0 = vrot.slane %v3498_v51, 1 }
 0x2f8   : > { %v7695_v49 = vsel %vm4198_vm2, %v4209_v44, %v4210_v54  ;;  %v4447_v62 = vsel %vm4439_vm3, %v4445_v15, %v4446_v0 }
 0x2f9   : > { %v4587_v52 = vadd.f32 %v4447_v62, %v4346_v4 }
 0x2fa   : > { %v3120_v53 = vpop.f32.mrf.mxu2 }
 0x2fb   : > { %v3004_v45 = vpop.f32.mrf.mxu3  ;;  %v4635_v46 = vmul.f32 %v6143_v35, %v4587_v52  ;;  %v3497_v42 = vadd.f32 %v3120_v53, %v8603_v16  ;;  %v3249_v28 = vpop.f32.mrf.mxu0  ;;  %v8606_v53 = vld [vmem:[#allocation43_spill] sm:$0xff] }
 0x2fc   : > { %v3508_v2 = vadd.f32 %v3004_v45, %v8602_v19  ;;  %v7703_v10 = vpop.f32.mrf.mxu1  ;;  %v3501_v1 = vadd.f32 %v3249_v28, %v2297_v47  ;;  %v8605_v47 = vld [vmem:[#allocation42_spill] sm:$0xff]  ;;  %v8607_v19 = vld [vmem:[#allocation44_spill] sm:$0xff] }
 0x2fd   : > { %4683 = vst [vmem:[%s7647_s16 + $0x18] sm:$0xff] %v4635_v46  ;;  %v4784_v8 = vmul.f32 %v4635_v46, %v4635_v46  ;;  %v4347_v14 = vadd.f32 %v7639_v5, %v3497_v42  ;;  %v4730_v24 = vadd.f32 %v4729_v59, %v4635_v46  ;;  %v2300_v45 = vadd.f32 %v7554_v30, %v8605_v47 }
 0x2fe   : > { %v4212_v63 = vrot.slane %v3508_v2, 7  ;;  %v4448_v29 = vrot.slane %v3501_v1, 1  ;;  %2115 = vmatmul.bf16.gmra.mxu1 %v6379_v55  ;;  %3288 = vmatmul.bf16.gmra.mxu0 %v6458_v20  ;;  %v2303_v2 = vadd.f32 %v7558_v48, %v8607_v19 }
 0x2ff   : > { %v4831_v11 = vadd.f32 %v4830_v13, %v4784_v8  ;;  %3162 = vmatmul.bf16.gmra.mxu2 %v6458_v20 }
 0x300   : > { %3046 = vmatmul.bf16.gmra.mxu3 %v6218_v60  ;;  %v7712_v22 = vsel %vm4198_vm2, %v4210_v54, %v4212_v63  ;;  %v4449_v50 = vsel %vm4439_vm3, %v4446_v0, %v4448_v29  ;;  %v5597_v54 = vld [vmem:[%s8423_s3 + $0x1b8] sm:$0xf]  ;;  %v5767_v0 = vld [vmem:[%s8423_s3 + $0x1c0] sm:$0xf0]  ;;  %v4569_v62 = vsel %vm4439_vm3, %v4448_v29, 0.0  ;;  %v8608_v63 = vld [vmem:[#allocation45_spill] sm:$0xff] }
 0x301   : > { %v4588_v3 = vadd.f32 %v4449_v50, %v4347_v14  ;;  %v5598_v52 = vor.u32 %v5767_v0, %v5597_v54  ;;  %v8610_v0 = vld [vmem:[#allocation48_spill] sm:$0xff] }
 0x302   : > { %v3123_v36 = vpop.f32.mrf.mxu2 }
 0x303   : > { %v3007_v40 = vpop.f32.mrf.mxu3  ;;  %4684 = vst [vmem:[%s7647_s16 + $0x20] sm:$0xff] %v4588_v3  ;;  %v4731_v5 = vadd.f32 %v4730_v24, %v4588_v3  ;;  %v4785_v59 = vmul.f32 %v4588_v3, %v4588_v3  ;;  %v3500_v51 = vadd.f32 %v3123_v36, %v8604_v37  ;;  %v3251_v13 = vpop.f32.mrf.mxu0  ;;  %3975 = vmatpush.bf16.msra.mxu3 %v5598_v52 }
 0x304   : > { %v7717_v4 = vpop.f32.mrf.mxu1  ;;  %v7730_v46 = vadd.f32 %v3007_v40, %v8606_v53  ;;  %v3504_v16 = vadd.f32 %v3251_v13, %v2300_v45 }
 0x305   : > { %v4832_v15 = vadd.f32 %v4831_v11, %v4785_v59  ;;  %v4348_v20 = vadd.f32 %v7657_v12, %v3500_v51  ;;  %v4329_v11 = vsel %vm4198_vm2, 0.0, %v4209_v44  ;;  %v8609_v51 = vld [vmem:[#allocation47_spill] sm:$0xff] }
 0x306   : > { %v4214_v3 = vrot.slane %v7730_v46, 7  ;;  %v4450_v59 = vrot.slane %v3504_v16, 1  ;;  %v2306_v13 = vadd.f32 %v7572_v56, %v8609_v51  ;;  %v2312_v51 = vadd.f32 %v7582_v57, %v6931_v6 }
 0x307   : > { %v4589_v21 = vadd.f32 %v4569_v62, %v4348_v20 }
 0x309   : > { %v4637_v12 = vmul.f32 %v6160_v41, %v4589_v21 }
 0x30a   : > { %v3125_v28 = vpop.f32.mrf.mxu2 }
 0x30b   : > { %v3009_v42 = vpop.f32.mrf.mxu3  ;;  %4685 = vst [vmem:[%s7647_s16 + $0x28] sm:$0xff] %v4637_v12  ;;  %v4732_v1 = vadd.f32 %v4731_v5, %v4637_v12  ;;  %v4786_v8 = vmul.f32 %v4637_v12, %v4637_v12  ;;  %v3503_v24 = vadd.f32 %v3125_v28, %v6936_v7  ;;  %v3254_v29 = vpop.f32.mrf.mxu0 }
 0x30c   : > { %v3514_v14 = vadd.f32 %v3009_v42, %v8608_v63  ;;  %v7738_v30 = vpop.f32.mrf.mxu1  ;;  %v3507_v50 = vadd.f32 %v3254_v29, %v2303_v2 }
 0x30d   : > { %v4833_v40 = vadd.f32 %v4832_v15, %v4786_v8  ;;  %v4349_v36 = vadd.f32 %v4329_v11, %v3503_v24 }
 0x30e   : > { %v4215_v48 = vrot.slane %v3514_v14, 7  ;;  %v4451_v37 = vrot.slane %v3507_v50, 1  ;;  %2120 = vmatmul.bf16.gmra.mxu1 %v6460_v26  ;;  %3293 = vmatmul.bf16.gmra.mxu0 %v6557_v25  ;;  %v5577_v50 = vld [vmem:[%s8423_s3 + $0x198] sm:$0xf] }
 0x30f   : > { %3167 = vmatmul.bf16.gmra.mxu2 %v6557_v25 }
 0x310   : > { %3051 = vmatmul.bf16.gmra.mxu3 %v6310_v34  ;;  %v7749_v7 = vsel %vm4198_vm2, %v4214_v3, %v4215_v48  ;;  %v4452_v44 = vsel %vm4439_vm3, %v4450_v59, %v4451_v37 }
 0x311   : > { %v4590_v5 = vadd.f32 %v4452_v44, %v4349_v36 }
 0x312   : > { %v3128_v20 = vpop.f32.mrf.mxu2 }
 0x313   : > { %v3012_v15 = vpop.f32.mrf.mxu3  ;;  %v4638_v54 = vmul.f32 %v6143_v35, %v4590_v5  ;;  %v3506_v52 = vadd.f32 %v3128_v20, %v6943_v43  ;;  %v3256_v21 = vpop.f32.mrf.mxu0 }
 0x314   : > { %v3517_v62 = vadd.f32 %v3012_v15, %v8610_v0  ;;  %v7757_v25 = vpop.f32.mrf.mxu1  ;;  %v3510_v47 = vadd.f32 %v3256_v21, %v2306_v13  ;;  %v4330_v21 = vsel %vm4198_vm2, 0.0, %v4214_v3 }
 0x315   : > { %4686 = vst [vmem:[%s7647_s16 + $0x30] sm:$0xff] %v4638_v54  ;;  %v4733_v45 = vadd.f32 %v4732_v1, %v4638_v54  ;;  %v4787_v53 = vmul.f32 %v4638_v54, %v4638_v54  ;;  %v4350_v19 = vadd.f32 %v7695_v49, %v3506_v52 }
 0x316   : > { %v4217_v12 = vrot.slane %v3517_v62, 7  ;;  %v4453_v56 = vrot.slane %v3510_v47, 1 }
 0x317   : > { %v4834_v2 = vadd.f32 %v4833_v40, %v4787_v53  ;;  %v5763_v40 = vld [vmem:[%s8423_s3 + $0x1a0] sm:$0xf0] }
 0x318   : > { %v7762_v16 = vsel %vm4198_vm2, %v4215_v48, %v4217_v12  ;;  %v4454_v42 = vsel %vm4439_vm3, %v4451_v37, %v4453_v56  ;;  %v4570_v48 = vsel %vm4439_vm3, %v4453_v56, 0.0  ;;  %v8612_v37 = vld [vmem:[#allocation51_spill] sm:$0xff] }
 0x319   : > { %v4591_v28 = vadd.f32 %v4454_v42, %v4350_v19  ;;  %v8614_v42 = vld [vmem:[#allocation162_spill] sm:$0xff] }
 0x31a   : > { %v3130_v8 = vpop.f32.mrf.mxu2 }
 0x31b   : > { %v3014_v43 = vpop.f32.mrf.mxu3  ;;  %4687 = vst [vmem:[%s7647_s16 + $0x38] sm:$0xff] %v4591_v28  ;;  %v4734_v63 = vadd.f32 %v4733_v45, %v4591_v28  ;;  %v4788_v14 = vmul.f32 %v4591_v28, %v4591_v28  ;;  %v3509_v24 = vadd.f32 %v3130_v8, %v6966_v61  ;;  %v3259_v29 = vpop.f32.mrf.mxu0  ;;  %v5578_v61 = vor.u32 %v5763_v40, %v5577_v50  ;;  %v8615_v8 = vld [vmem:[#allocation54_spill] sm:$0xff] }
 0x31c   : > { %v7767_v1 = vpop.f32.mrf.mxu1  ;;  %v7784_v44 = vadd.f32 %v3014_v43, %v8612_v37 }
 0x31d   : > { %v4835_v11 = vadd.f32 %v4834_v2, %v4788_v14  ;;  %v4351_v49 = vadd.f32 %v7712_v22, %v3509_v24  ;;  %v8611_v22 = vld [vmem:[#allocation50_spill] sm:$0xff]  ;;  %3940 = vmatpush.bf16.msrb.mxu1 %v5578_v61  ;;  %v8613_v2 = vld [vmem:[#allocation53_spill] sm:$0xff] }
 0x31e   : > { %2125 = vmatmul.bf16.gmra.mxu1 %v6560_v17  ;;  %3298 = vmatmul.bf16.gmra.mxu0 %v6218_v60  ;;  %v2309_v59 = vadd.f32 %v7574_v58, %v8611_v22  ;;  %v4219_v6 = vrot.slane %v7784_v44, 7  ;;  %v2315_v46 = vadd.f32 %v8614_v42, %v8613_v2  ;;  %v8616_v14 = vld [vmem:[#allocation61_spill] sm:$0xff]  ;;  %v8617_v22 = vld [vmem:[#allocation3_spill] sm:$0xff] }
 0x31f   : > { %v4592_v36 = vadd.f32 %v4570_v48, %v4351_v49  ;;  %3172 = vmatmul.bf16.gmra.mxu2 %v6218_v60 }
 0x320   : > { %3056 = vmatmul.bf16.gmra.mxu3 %v6379_v55  ;;  %v3513_v13 = vadd.f32 %v3259_v29, %v2309_v59 }
 0x321   : > { %v4640_v5 = vmul.f32 %v6160_v41, %v4592_v36 }
 0x322   : > { %v3133_v20 = vpop.f32.mrf.mxu2  ;;  %v4455_v12 = vrot.slane %v3513_v13, 1 }
 0x323   : > { %v3017_v15 = vpop.f32.mrf.mxu3  ;;  %4688 = vst [vmem:[%s7647_s16 + $0x40] sm:$0xff] %v4640_v5  ;;  %v4735_v54 = vadd.f32 %v4734_v63, %v4640_v5  ;;  %v4789_v0 = vmul.f32 %v4640_v5, %v4640_v5  ;;  %v3512_v62 = vadd.f32 %v3133_v20, %v6979_v39  ;;  %v3261_v52 = vpop.f32.mrf.mxu0  ;;  %v8618_v20 = vld [vmem:[#allocation64_spill] sm:$0xff] }
 0x324   : > { %v3523_v60 = vadd.f32 %v3017_v15, %v6934_v33  ;;  %v7792_v58 = vpop.f32.mrf.mxu1  ;;  %v3516_v47 = vadd.f32 %v3261_v52, %v2312_v51  ;;  %v5585_v52 = vld [vmem:[%s8423_s3 + $0x1a0] sm:$0xf] }
 0x325   : > { %v4836_v57 = vadd.f32 %v4835_v11, %v4789_v0  ;;  %v4352_v53 = vadd.f32 %v4330_v21, %v3512_v62  ;;  %v5764_v21 = vld [vmem:[%s8423_s3 + $0x1a8] sm:$0xf0] }
 0x326   : > { %v4220_v45 = vrot.slane %v3523_v60, 7  ;;  %v4456_v19 = vrot.slane %v3516_v47, 1 }
 0x328   : > { %v7799_v33 = vsel %vm4198_vm2, %v4219_v6, %v4220_v45  ;;  %v4457_v39 = vsel %vm4439_vm3, %v4455_v12, %v4456_v19 }
 0x329   : > { %v4593_v56 = vadd.f32 %v4457_v39, %v4352_v53  ;;  %v8619_v53 = vld [vmem:[#allocation55_spill] sm:$0xff] }
 0x32a   : > { %v3135_v3 = vpop.f32.mrf.mxu2  ;;  %v2318_v12 = vadd.f32 %v7598_v23, %v8619_v53 }
 0x32b   : > { %v3019_v28 = vpop.f32.mrf.mxu3  ;;  %v4641_v43 = vmul.f32 %v6143_v35, %v4593_v56  ;;  %v3515_v24 = vadd.f32 %v3135_v3, %v8616_v14  ;;  %v3264_v11 = vpop.f32.mrf.mxu0  ;;  %v8621_v56 = vld [vmem:[#allocation57_spill] sm:$0xff]  ;;  %v8623_v14 = vld [vmem:[#allocation67_spill] sm:$0xff] }
 0x32c   : > { %v3526_v63 = vadd.f32 %v3019_v28, %v8615_v8  ;;  %v7807_v29 = vpop.f32.mrf.mxu1  ;;  %v3519_v49 = vadd.f32 %v3264_v11, %v2315_v46  ;;  %v2321_v2 = vadd.f32 %v7602_v27, %v8621_v56  ;;  %v8622_v8 = vld [vmem:[#allocation58_spill] sm:$0xff] }
 0x32d   : > { %4689 = vst [vmem:[%s7647_s16 + $0x48] sm:$0xff] %v4641_v43  ;;  %v4790_v50 = vmul.f32 %v4641_v43, %v4641_v43  ;;  %v4353_v48 = vadd.f32 %v7749_v7, %v3515_v24  ;;  %v4736_v61 = vadd.f32 %v4735_v54, %v4641_v43 }
 0x32e   : > { %v4222_v40 = vrot.slane %v3526_v63, 7  ;;  %v4458_v36 = vrot.slane %v3519_v49, 1  ;;  %2130 = vmatmul.bf16.gmra.mxu1 %v8617_v22  ;;  %3303 = vmatmul.bf16.gmra.mxu0 %v6310_v34  ;;  %v4331_v49 = vsel %vm4198_vm2, 0.0, %v4219_v6 }
 0x32f   : > { %v4837_v59 = vadd.f32 %v4836_v57, %v4790_v50  ;;  %3177 = vmatmul.bf16.gmra.mxu2 %v6310_v34  ;;  %v5586_v57 = vor.u32 %v5764_v21, %v5585_v52 }
 0x330   : > { %3061 = vmatmul.bf16.gmra.mxu3 %v6460_v26  ;;  %v7816_v37 = vsel %vm4198_vm2, %v4220_v45, %v4222_v40  ;;  %v4459_v44 = vsel %vm4439_vm3, %v4456_v19, %v4458_v36  ;;  %v4571_v47 = vsel %vm4439_vm3, %v4458_v36, 0.0  ;;  %v8620_v19 = vld [vmem:[#allocation56_spill] sm:$0xff] }
 0x331   : > { %v4594_v5 = vadd.f32 %v4459_v44, %v4353_v48  ;;  %3976 = vmatpush.bf16.msra.mxu3 %v5586_v57  ;;  %v8624_v44 = vld [vmem:[#allocation4_spill] sm:$0xff] }
 0x332   : > { %v3138_v13 = vpop.f32.mrf.mxu2 }
 0x333   : > { %v3022_v51 = vpop.f32.mrf.mxu3  ;;  %4690 = vst [vmem:[%s7647_s16 + $0x50] sm:$0xff] %v4594_v5  ;;  %v4737_v7 = vadd.f32 %v4736_v61, %v4594_v5  ;;  %v4791_v15 = vmul.f32 %v4594_v5, %v4594_v5  ;;  %v3518_v54 = vadd.f32 %v3138_v13, %v8618_v20  ;;  %v3266_v60 = vpop.f32.mrf.mxu0  ;;  %v8625_v13 = vld [vmem:[#allocation59_spill] sm:$0xff] }
 0x334   : > { %v7821_v0 = vpop.f32.mrf.mxu1  ;;  %v7834_v39 = vadd.f32 %v3022_v51, %v8620_v19  ;;  %v3522_v42 = vadd.f32 %v3266_v60, %v2318_v12  ;;  %v8626_v60 = vld [vmem:[#allocation60_spill] sm:$0xff] }
 0x335   : > { %v4838_v62 = vadd.f32 %v4837_v59, %v4791_v15  ;;  %v4354_v34 = vadd.f32 %v7762_v16, %v3518_v54 }
 0x336   : > { %v4224_v40 = vrot.slane %v7834_v39, 7  ;;  %v4460_v36 = vrot.slane %v3522_v42, 1  ;;  %v8638_v39 = vld [vmem:[#allocation69_spill] sm:$0xff] }
 0x337   : > { %v4595_v45 = vadd.f32 %v4571_v47, %v4354_v34  ;;  %v8627_v34 = vld [vmem:[#allocation70_spill] sm:$0xff] }
 0x339   : > { %v4643_v16 = vmul.f32 %v6160_v41, %v4595_v45 }
 0x33a   : > { %v3140_v28 = vpop.f32.mrf.mxu2 }
 0x33b   : > { %v3024_v46 = vpop.f32.mrf.mxu3  ;;  %4691 = vst [vmem:[%s7647_s16 + $0x58] sm:$0xff] %v4643_v16  ;;  %v4738_v3 = vadd.f32 %v4737_v7, %v4643_v16  ;;  %v4792_v43 = vmul.f32 %v4643_v16, %v4643_v16  ;;  %v3521_v24 = vadd.f32 %v3140_v28, %v8623_v14  ;;  %v3269_v11 = vpop.f32.mrf.mxu0  ;;  %v2324_v7 = vadd.f32 %v7611_v18, %v8625_v13  ;;  %v8633_v13 = vld [vmem:[#allocation11_spill] sm:$0xff] }
 0x33c   : > { %v3532_v63 = vadd.f32 %v3024_v46, %v8622_v8  ;;  %v7842_v23 = vpop.f32.mrf.mxu1  ;;  %v3525_v50 = vadd.f32 %v3269_v11, %v2321_v2  ;;  %v8628_v8 = vld [vmem:[#allocation73_spill] sm:$0xff]  ;;  %v5565_v11 = vld [vmem:[%s8423_s3 + $0x180] sm:$0xf] }
 0x33d   : > { %v4839_v48 = vadd.f32 %v4838_v62, %v4792_v43  ;;  %v4355_v61 = vadd.f32 %v4331_v49, %v3521_v24  ;;  %v5760_v49 = vld [vmem:[%s8423_s3 + $0x188] sm:$0xf0] }
 0x33e   : > { %v4225_v27 = vrot.slane %v3532_v63, 7  ;;  %v4461_v59 = vrot.slane %v3525_v50, 1  ;;  %2135 = vmatmul.bf16.gmra.mxu1 %v8624_v44  ;;  %3308 = vmatmul.bf16.gmra.mxu0 %v6379_v55 }
 0x33f   : > { %3182 = vmatmul.bf16.gmra.mxu2 %v6379_v55 }
 0x340   : > { %3066 = vmatmul.bf16.gmra.mxu3 %v6560_v17  ;;  %v7853_v6 = vsel %vm4198_vm2, %v4224_v40, %v4225_v27  ;;  %v4462_v5 = vsel %vm4439_vm3, %v4460_v36, %v4461_v59  ;;  %v8631_v36 = vld [vmem:[#allocation63_spill] sm:$0xff] }
 0x341   : > { %v4596_v51 = vadd.f32 %v4462_v5, %v4355_v61  ;;  %v8630_v61 = vld [vmem:[#allocation8_spill] sm:$0xff]  ;;  %v8632_v5 = vld [vmem:[#allocation62_spill] sm:$0xff] }
 0x342   : > { %v3143_v20 = vpop.f32.mrf.mxu2 }
 0x343   : > { %v3027_v15 = vpop.f32.mrf.mxu3  ;;  %v4644_v54 = vmul.f32 %v6143_v35, %v4596_v51  ;;  %v3524_v52 = vadd.f32 %v3143_v20, %v8627_v34  ;;  %v3271_v21 = vpop.f32.mrf.mxu0  ;;  %v2327_v51 = vadd.f32 %v7627_v38, %v8632_v5 }
 0x344   : > { %v3535_v62 = vadd.f32 %v3027_v15, %v8626_v60  ;;  %v7861_v55 = vpop.f32.mrf.mxu1  ;;  %v3528_v47 = vadd.f32 %v3271_v21, %v2324_v7  ;;  %v8634_v7 = vld [vmem:[#allocation66_spill] sm:$0xff]  ;;  %v8635_v60 = vld [vmem:[#allocation65_spill] sm:$0xff] }
 0x345   : > { %4692 = vst [vmem:[%s7647_s16 + $0x60] sm:$0xff] %v4644_v54  ;;  %v4739_v57 = vadd.f32 %v4738_v3, %v4644_v54  ;;  %v4793_v45 = vmul.f32 %v4644_v54, %v4644_v54  ;;  %v4356_v12 = vadd.f32 %v7799_v33, %v3524_v52  ;;  %v2337_v15 = vadd.f32 %v8634_v7, %v8633_v13 }
 0x346   : > { %v4227_v53 = vrot.slane %v3535_v62, 7  ;;  %v4463_v18 = vrot.slane %v3528_v47, 1  ;;  %v2330_v62 = vadd.f32 %v7653_v9, %v8635_v60  ;;  %v8641_v60 = vld [vmem:[#allocation6_spill] sm:$0xff] }
 0x347   : > { %v4840_v19 = vadd.f32 %v4839_v48, %v4793_v45  ;;  %v8629_v48 = vld [vmem:[#allocation5_spill] sm:$0xff]  ;;  %v8636_v45 = vld [vmem:[#allocation76_spill] sm:$0xff] }
 0x348   : > { %v7866_v16 = vsel %vm4198_vm2, %v4225_v27, %v4227_v53  ;;  %v4464_v56 = vsel %vm4439_vm3, %v4461_v59, %v4463_v18  ;;  %v4572_v50 = vsel %vm4439_vm3, %v4463_v18, 0.0  ;;  %v5566_v27 = vor.u32 %v5760_v49, %v5565_v11 }
 0x349   : > { %v4597_v2 = vadd.f32 %v4464_v56, %v4356_v12  ;;  %v2334_v59 = vadd.f32 %v8631_v36, %v8630_v61  ;;  %v4332_v18 = vsel %vm4198_vm2, 0.0, %v4224_v40  ;;  %v8640_v61 = vld [vmem:[#allocation79_spill] sm:$0xff] }
 0x34a   : > { %v3145_v46 = vpop.f32.mrf.mxu2  ;;  %3941 = vmatpush.bf16.msrb.mxu1 %v5566_v27 }
 0x34b   : > { %v3029_v42 = vpop.f32.mrf.mxu3  ;;  %4693 = vst [vmem:[%s7647_s16 + $0x68] sm:$0xff] %v4597_v2  ;;  %v4740_v28 = vadd.f32 %v4739_v57, %v4597_v2  ;;  %v4794_v43 = vmul.f32 %v4597_v2, %v4597_v2  ;;  %v3527_v63 = vadd.f32 %v3145_v46, %v8628_v8  ;;  %v3274_v14 = vpop.f32.mrf.mxu0 }
 0x34c   : > { %v7871_v3 = vpop.f32.mrf.mxu1  ;;  %v7891_v20 = vadd.f32 %v3029_v42, %v2334_v59  ;;  %v3531_v34 = vadd.f32 %v3274_v14, %v2327_v51 }
 0x34d   : > { %v4841_v24 = vadd.f32 %v4840_v19, %v4794_v43  ;;  %v4357_v33 = vadd.f32 %v7816_v37, %v3527_v63  ;;  %v8637_v63 = vld [vmem:[#allocation14_spill] sm:$0xff] }
 0x34e   : > { %2140 = vmatmul.bf16.gmra.mxu1 %v8629_v48  ;;  %3313 = vmatmul.bf16.gmra.mxu0 %v6460_v26  ;;  %v4229_v56 = vrot.slane %v7891_v20, 7  ;;  %v4465_v46 = vrot.slane %v3531_v34, 1  ;;  %v2340_v14 = vadd.f32 %v8638_v39, %v8637_v63  ;;  %v5761_v63 = vld [vmem:[%s8423_s3 + $0x190] sm:$0xf0]  ;;  %v8650_v20 = vld [vmem:[#allocation7_spill] sm:$0xff] }
 0x34f   : > { %v4598_v37 = vadd.f32 %v4572_v50, %v4357_v33  ;;  %3187 = vmatmul.bf16.gmra.mxu2 %v6460_v26  ;;  %v8639_v33 = vld [vmem:[#allocation68_spill] sm:$0xff] }
 0x350   : > { %3071 = vmatmul.bf16.gmra.mxu3 %v8617_v22  ;;  %v2333_v11 = vadd.f32 %v7663_v31, %v8639_v33  ;;  %v5780_v31 = vld [vmem:[%s8423_s3 + $0x22c] sm:$0xf]  ;;  %v8643_v33 = vld [vmem:[#allocation17_spill] sm:$0xff] }
 0x351   : > { %v4646_v54 = vmul.f32 %v6160_v41, %v4598_v37 }
 0x352   : > { %v3148_v21 = vpop.f32.mrf.mxu2 }
 0x353   : > { %v3032_v52 = vpop.f32.mrf.mxu3  ;;  %4694 = vst [vmem:[%s7647_s16 + $0x70] sm:$0xff] %v4646_v54  ;;  %v4741_v47 = vadd.f32 %v4740_v28, %v4646_v54  ;;  %v4795_v26 = vmul.f32 %v4646_v54, %v4646_v54  ;;  %v3530_v38 = vadd.f32 %v3148_v21, %v8636_v45  ;;  %v3276_v12 = vpop.f32.mrf.mxu0 }
 0x354   : > { %v3541_v57 = vadd.f32 %v3032_v52, %v2337_v15  ;;  %v7898_v53 = vpop.f32.mrf.mxu1  ;;  %v3534_v19 = vadd.f32 %v3276_v12, %v2330_v62  ;;  %v5651_v62 = vld [vmem:[%s8423_s3 + $0x234] sm:$0xf0] }
 0x355   : > { %v4842_v9 = vadd.f32 %v4841_v24, %v4795_v26  ;;  %v4358_v42 = vadd.f32 %v4332_v18, %v3530_v38  ;;  %v5654_v52 = vor.u32 %v5780_v31, %v5651_v62  ;;  %v5777_v26 = vld [vmem:[%s8423_s3 + $0x214] sm:$0xf]  ;;  %v8648_v31 = vld [vmem:[#allocation74_spill] sm:$0xff] }
 0x356   : > { %v4230_v2 = vrot.slane %v3541_v57, 7  ;;  %v4466_v28 = vrot.slane %v3534_v19, 1  ;;  %v5639_v57 = vld [vmem:[%s8423_s3 + $0x21c] sm:$0xf0]  ;;  %v8642_v19 = vld [vmem:[#allocation82_spill] sm:$0xff] }
 0x357   : > { %3952 = vmatpush.bf16.msra.mxu1 %v5654_v52  ;;  %v5642_v12 = vor.u32 %v5777_v26, %v5639_v57  ;;  %v8649_v57 = vld [vmem:[#allocation85_spill] sm:$0xff] }
 0x358   : > { %v7907_v43 = vsel %vm4198_vm2, %v4229_v56, %v4230_v2  ;;  %v4467_v8 = vsel %vm4439_vm3, %v4465_v46, %v4466_v28 }
 0x359   : > { %v4599_v40 = vadd.f32 %v4467_v8, %v4358_v42  ;;  %v5573_v8 = vld [vmem:[%s8423_s3 + $0x188] sm:$0xf] }
 0x35a   : > { %v3150_v49 = vpop.f32.mrf.mxu2 }
 0x35b   : > { %v3034_v24 = vpop.f32.mrf.mxu3  ;;  %v4647_v50 = vmul.f32 %v6143_v35, %v4599_v40  ;;  %v3533_v36 = vadd.f32 %v3150_v49, %v8640_v61  ;;  %v3279_v37 = vpop.f32.mrf.mxu0  ;;  %3953 = vmatpush.bf16.msra.mxu1 %v5642_v12  ;;  %v5774_v40 = vld [vmem:[%s8423_s3 + $0x1fc] sm:$0xf] }
 0x35c   : > { %v3544_v27 = vadd.f32 %v3034_v24, %v2340_v14  ;;  %v7916_v59 = vpop.f32.mrf.mxu1  ;;  %v3537_v5 = vadd.f32 %v3279_v37, %v2333_v11  ;;  %v5574_v14 = vor.u32 %v5761_v63, %v5573_v8  ;;  %v8644_v11 = vld [vmem:[#allocation72_spill] sm:$0xff]  ;;  %v8647_v37 = vld [vmem:[#allocation75_spill] sm:$0xff]  ;;  %v5603_v8 = vld [vmem:[%s8423_s3 + $0x1d4] sm:$0xf0] }
 0x35d   : > { %4695 = vst [vmem:[%s7647_s16 + $0x78] sm:$0xff] %v4647_v50  ;;  %v4796_v51 = vmul.f32 %v4647_v50, %v4647_v50  ;;  %v4359_v7 = vadd.f32 %v7853_v6, %v3533_v36  ;;  %v4742_v15 = vadd.f32 %v4741_v47, %v4647_v50  ;;  %v2343_v24 = vadd.f32 %v8644_v11, %v8643_v33  ;;  %v8646_v36 = vld [vmem:[#allocation20_spill] sm:$0xff] }
 0x35e   : > { %v4232_v13 = vrot.slane %v3544_v27, 7  ;;  %v4468_v54 = vrot.slane %v3537_v5, 1  ;;  %2145 = vmatmul.bf16.gmra.mxu1 %v8641_v60  ;;  %3318 = vmatmul.bf16.gmra.mxu0 %v6560_v17  ;;  %v8645_v27 = vld [vmem:[#allocation71_spill] sm:$0xff]  ;;  %v2346_v5 = vadd.f32 %v8647_v37, %v8646_v36 }
 0x35f   : > { %v4843_v34 = vadd.f32 %v4842_v9, %v4796_v51  ;;  %3192 = vmatmul.bf16.gmra.mxu2 %v6560_v17  ;;  %v2336_v61 = vadd.f32 %v7688_v32, %v8645_v27  ;;  %3977 = vmatpush.bf16.msra.mxu3 %v5574_v14  ;;  %v2339_v32 = vadd.f32 %v7703_v10, %v8648_v31 }
 0x360   : > { %3076 = vmatmul.bf16.gmra.mxu3 %v8624_v44  ;;  %v7931_v6 = vsel %vm4198_vm2, %v4230_v2, %v4232_v13  ;;  %v4469_v21 = vsel %vm4439_vm3, %v4466_v28, %v4468_v54  ;;  %v4573_v39 = vsel %vm4439_vm3, %v4468_v54, 0.0 }
 0x361   : > { %v4600_v47 = vadd.f32 %v4469_v21, %v4359_v7  ;;  %v5771_v7 = vld [vmem:[%s8423_s3 + $0x1e4] sm:$0xf] }
 0x362   : > { %v3153_v38 = vpop.f32.mrf.mxu2 }
 0x363   : > { %v3037_v45 = vpop.f32.mrf.mxu3  ;;  %4696 = vst [vmem:[%s7647_s16 + $0x80] sm:$0xff] %v4600_v47  ;;  %v4743_v17 = vadd.f32 %v4742_v15, %v4600_v47  ;;  %v4797_v18 = vmul.f32 %v4600_v47, %v4600_v47  ;;  %v3536_v9 = vadd.f32 %v3153_v38, %v8642_v19  ;;  %v3281_v42 = vpop.f32.mrf.mxu0  ;;  %v5615_v15 = vld [vmem:[%s8423_s3 + $0x1ec] sm:$0xf0] }
 0x364   : > { %v7942_v2 = vpop.f32.mrf.mxu1  ;;  %v7964_v51 = vadd.f32 %v3037_v45, %v2343_v24  ;;  %v3540_v54 = vadd.f32 %v3281_v42, %v2336_v61  ;;  %v5618_v52 = vor.u32 %v5771_v7, %v5615_v15  ;;  %v5765_v24 = vld [vmem:[%s8423_s3 + $0x1b4] sm:$0xf] }
 0x365   : > { %v4844_v46 = vadd.f32 %v4843_v34, %v4797_v18  ;;  %v4360_v28 = vadd.f32 %v7866_v16, %v3536_v9  ;;  %v5627_v16 = vld [vmem:[%s8423_s3 + $0x204] sm:$0xf0]  ;;  %v4333_v18 = vsel %vm4198_vm2, 0.0, %v4229_v56 }
 0x366   : > { %v5630_v50 = vor.u32 %v5774_v40, %v5627_v16  ;;  %v4234_v10 = vrot.slane %v7964_v51, 7  ;;  %v4470_v63 = vrot.slane %v3540_v54, 1  ;;  %v8651_v40 = vld [vmem:[#allocation23_spill] sm:$0xff]  ;;  %v8652_v16 = vld [vmem:[#allocation78_spill] sm:$0xff]  ;;  %v8663_v51 = vld [vmem:[#allocation32_spill] sm:$0xff] }
 0x367   : > { %v4601_v49 = vadd.f32 %v4573_v39, %v4360_v28  ;;  %v2349_v33 = vadd.f32 %v8652_v16, %v8651_v40 }
 0x368   : > { %3954 = vmatpush.bf16.msra.mxu1 %v5630_v50 }
 0x369   : > { %v4649_v13 = vmul.f32 %v6160_v41, %v4601_v49  ;;  %v8653_v49 = vld [vmem:[#allocation77_spill] sm:$0xff] }
 0x36a   : > { %v3155_v34 = vpop.f32.mrf.mxu2  ;;  %v2342_v50 = vadd.f32 %v7717_v4, %v8653_v49  ;;  %v5762_v4 = vld [vmem:[%s8423_s3 + $0x19c] sm:$0xf] }
 0x36b   : > { %v3039_v62 = vpop.f32.mrf.mxu3  ;;  %4697 = vst [vmem:[%s7647_s16 + $0x88] sm:$0xff] %v4649_v13  ;;  %v4744_v21 = vadd.f32 %v4743_v17, %v4649_v13  ;;  %v4798_v47 = vmul.f32 %v4649_v13, %v4649_v13  ;;  %v3539_v45 = vadd.f32 %v3155_v34, %v8649_v57  ;;  %v3284_v12 = vpop.f32.mrf.mxu0  ;;  %v5768_v17 = vld [vmem:[%s8423_s3 + $0x1cc] sm:$0xf] }
 0x36c   : > { %v3550_v26 = vadd.f32 %v3039_v62, %v2346_v5  ;;  %v7977_v38 = vpop.f32.mrf.mxu1  ;;  %v3543_v19 = vadd.f32 %v3284_v12, %v2339_v32  ;;  %3955 = vmatpush.bf16.msra.mxu1 %v5618_v52  ;;  %v5606_v56 = vor.u32 %v5768_v17, %v5603_v8  ;;  %v8654_v13 = vld [vmem:[#allocation88_spill] sm:$0xff]  ;;  %v8039_v17 = vld [vmem:[%s8026_s30] sm:$0xff] }
 0x36d   : > { %v4845_v9 = vadd.f32 %v4844_v46, %v4798_v47  ;;  %v4361_v28 = vadd.f32 %v4333_v18, %v3539_v45  ;;  %v5579_v47 = vld [vmem:[%s8423_s3 + $0x1a4] sm:$0xf0]  ;;  %v5759_v18 = vld [vmem:[%s8423_s3 + $0x184] sm:$0xf] }
 0x36e   : > { %v4235_v42 = vrot.slane %v3550_v26, 7  ;;  %v4471_v39 = vrot.slane %v3543_v19, 1  ;;  %2149 = vmatmul.bf16.gmra.mxu1 %v8650_v20  ;;  %3323 = vmatmul.bf16.gmra.mxu0 %v8617_v22  ;;  %v5582_v57 = vor.u32 %v5762_v4, %v5579_v47  ;;  %v5567_v19 = vld [vmem:[%s8423_s3 + $0x18c] sm:$0xf0]  ;;  %v8662_v4 = vld [vmem:[#allocation94_spill] sm:$0xff] }
 0x36f   : > { %3197 = vmatmul.bf16.gmra.mxu2 %v8617_v22  ;;  %v5591_v22 = vld [vmem:[%s8423_s3 + $0x1bc] sm:$0xf0]  ;;  %v5570_v8 = vor.u32 %v5759_v18, %v5567_v19 }
 0x370   : > { %3081 = vmatmul.bf16.gmra.mxu3 %v8629_v48  ;;  %v7996_v46 = vsel %vm4198_vm2, %v4234_v10, %v4235_v42  ;;  %v4472_v14 = vsel %vm4439_vm3, %v4470_v63, %v4471_v39  ;;  %3956 = vmatpush.bf16.msra.mxu1 %v5606_v56  ;;  %v5594_v36 = vor.u32 %v5765_v24, %v5591_v22  ;;  %v8655_v56 = vld [vmem:[#allocation91_spill] sm:$0xff]  ;;  %v8656_v24 = vld [vmem:[#allocation26_spill] sm:$0xff]  ;;  %v8657_v22 = vld [vmem:[#allocation81_spill] sm:$0xff] }
 0x371   : > { %v4602_v11 = vadd.f32 %v4472_v14, %v4361_v28  ;;  %v2352_v49 = vadd.f32 %v8657_v22, %v8656_v24 }
 0x372   : > { %v3158_v61 = vpop.f32.mrf.mxu2 }
 0x373   : > { %v3042_v27 = vpop.f32.mrf.mxu3  ;;  %v4650_v37 = vmul.f32 %v6143_v35, %v4602_v11  ;;  %v3542_v7 = vadd.f32 %v3158_v61, %v8654_v13  ;;  %v3286_v31 = vpop.f32.mrf.mxu0  ;;  %v8659_v61 = vld [vmem:[#allocation29_spill] sm:$0xff] }
 0x374   : > { %v3553_v5 = vadd.f32 %v3042_v27, %v2349_v33  ;;  %v8011_v15 = vpop.f32.mrf.mxu1  ;;  %v3546_v32 = vadd.f32 %v3286_v31, %v2342_v50  ;;  %3957 = vmatpush.bf16.msra.mxu1 %v5594_v36  ;;  %v8658_v27 = vld [vmem:[#allocation80_spill] sm:$0xff] }
 0x375   : > { %4698 = vst [vmem:[%s7647_s16 + $0x90] sm:$0xff] %v4650_v37  ;;  %v4745_v54 = vadd.f32 %v4744_v21, %v4650_v37  ;;  %v4799_v62 = vmul.f32 %v4650_v37, %v4650_v37  ;;  %v4362_v52 = vadd.f32 %v7907_v43, %v3542_v7  ;;  %v8660_v36 = vld [vmem:[#allocation84_spill] sm:$0xff]  ;;  %v8661_v7 = vld [vmem:[#allocation83_spill] sm:$0xff] }
 0x376   : > { %v4237_v34 = vrot.slane %v3553_v5, 7  ;;  %v4473_v26 = vrot.slane %v3546_v32, 1  ;;  %v2355_v37 = vadd.f32 %v8660_v36, %v8659_v61  ;;  %v2348_v31 = vadd.f32 %v7757_v25, %v8661_v7 }
 0x377   : > { %v4846_v45 = vadd.f32 %v4845_v9, %v4799_v62 }
 0x378   : > { %v8029_v43 = vsel %vm4198_vm2, %v4235_v42, %v4237_v34  ;;  %v4474_v21 = vsel %vm4439_vm3, %v4471_v39, %v4473_v26  ;;  %3958 = vmatpush.bf16.msra.mxu1 %v5582_v57  ;;  %v4574_v11 = vsel %vm4439_vm3, %v4473_v26, 0.0  ;;  %v778_v57 = vld [vmem:[%s8026_s30 + $0x8] sm:$0xf] }
 0x379   : > { %v4603_v12 = vadd.f32 %v4474_v21, %v4362_v52 }
 0x37a   : > { %v3160_v28 = vpop.f32.mrf.mxu2 }
 0x37b   : > { %v3044_v9 = vpop.f32.mrf.mxu3  ;;  %4699 = vst [vmem:[%s7647_s16 + $0x98] sm:$0xff] %v4603_v12  ;;  %v4746_v42 = vadd.f32 %v4745_v54, %v4603_v12  ;;  %v4800_v63 = vmul.f32 %v4603_v12, %v4603_v12  ;;  %v3545_v39 = vadd.f32 %v3160_v28, %v8655_v56  ;;  %v3289_v40 = vpop.f32.mrf.mxu0  ;;  %v8664_v56 = vld [vmem:[#allocation87_spill] sm:$0xff] }
 0x37c   : > { %v8043_v14 = vpop.f32.mrf.mxu1  ;;  %3959 = vmatpush.bf16.msra.mxu1 %v5570_v8  ;;  %v8057_v5 = vadd.f32 %v3044_v9, %v2352_v49  ;;  %v3801_v8 = vunpack.c.l.b16 %v778_v57 }
 0x37d   : > { %v4847_v16 = vadd.f32 %v4846_v45, %v4800_v63  ;;  %v4363_v33 = vadd.f32 %v7931_v6, %v3545_v39  ;;  %v2345_v6 = vadd.f32 %v7738_v30, %v8658_v27  ;;  %v4334_v45 = vsel %vm4198_vm2, 0.0, %v4234_v10 }
 0x37e   : > { %3328 = vmatmul.bf16.gmra.mxu0 %v8624_v44  ;;  %3942 = vmatmul.bf16.vlgmr.msrb.gmra.mxu1 %v8039_v17  ;;  %v4239_v25 = vrot.slane %v8057_v5, 7  ;;  %v2358_v10 = vadd.f32 %v8664_v56, %v8663_v51  ;;  %v8081_v24 = vpack.c.b16 %v3801_v8, %v3801_v8  ;;  %v8670_v8 = vld [vmem:[#allocation89_spill] sm:$0xff] }
 0x37f   : > { %v4604_v50 = vadd.f32 %v4574_v11, %v4363_v33  ;;  %3202 = vmatmul.bf16.gmra.mxu2 %v8624_v44  ;;  %v3549_v32 = vadd.f32 %v3289_v40, %v2345_v6  ;;  %v8665_v40 = vld [vmem:[#allocation86_spill] sm:$0xff]  ;;  %v8671_v51 = vld [vmem:[#allocation9_spill] sm:$0xff] }
 0x380   : > { %3086 = vmatmul.bf16.gmra.mxu3 %v8641_v60  ;;  %v8672_v56 = vld [vmem:[#allocation93_spill] sm:$0xff] }
 0x381   : > { %v4652_v13 = vmul.f32 %v6160_v41, %v4604_v50  ;;  %v4475_v9 = vrot.slane %v3549_v32, 1  ;;  %v8666_v50 = vld [vmem:[#allocation97_spill] sm:$0xff] }
 0x382   : > { %v3163_v62 = vpop.f32.mrf.mxu2 }
 0x383   : > { %v3047_v54 = vpop.f32.mrf.mxu3  ;;  %4700 = vst [vmem:[%s7647_s16 + $0xa0] sm:$0xff] %v4652_v13  ;;  %v4747_v34 = vadd.f32 %v4746_v42, %v4652_v13  ;;  %v4801_v44 = vmul.f32 %v4652_v13, %v4652_v13  ;;  %v3548_v47 = vadd.f32 %v3163_v62, %v8662_v4  ;;  %v3291_v26 = vpop.f32.mrf.mxu0 }
 0x384   : > { %v3559_v52 = vadd.f32 %v3047_v54, %v2355_v37  ;;  %v8064_v30 = vpop.f32.mrf.mxu1  ;;  %v3552_v21 = vadd.f32 %v3291_v26, %v2348_v31 }
 0x385   : > { %v4848_v12 = vadd.f32 %v4847_v16, %v4801_v44  ;;  %v4364_v19 = vadd.f32 %v4334_v45, %v3548_v47  ;;  %v2351_v16 = vadd.f32 %v7767_v1, %v8665_v40  ;;  %v8667_v47 = vld [vmem:[#allocation100_spill] sm:$0xff] }
 0x386   : > { %v4240_v18 = vrot.slane %v3559_v52, 7  ;;  %v4476_v28 = vrot.slane %v3552_v21, 1 }
 0x388   : > { %v8074_v42 = vsel %vm4198_vm2, %v4239_v25, %v4240_v18  ;;  %v4477_v63 = vsel %vm4439_vm3, %v4475_v9, %v4476_v28 }
 0x389   : > { %v4605_v39 = vadd.f32 %v4477_v63, %v4364_v19  ;;  %v8669_v19 = vld [vmem:[#allocation90_spill] sm:$0xff]  ;;  %v2354_v63 = vadd.f32 %v7792_v58, %v8670_v8 }
 0x38a   : > { %v3165_v11 = vpop.f32.mrf.mxu2 }
 0x38b   : > { %v3049_v33 = vpop.f32.mrf.mxu3  ;;  %v4653_v22 = vmul.f32 %v6143_v35, %v4605_v39  ;;  %v3551_v27 = vadd.f32 %v3165_v11, %v8666_v50  ;;  %v3294_v61 = vpop.f32.mrf.mxu0 }
 0x38c   : > { %v3562_v49 = vadd.f32 %v3049_v33, %v2358_v10  ;;  %v8085_v6 = vpop.f32.mrf.mxu1  ;;  %v3555_v36 = vadd.f32 %v3294_v61, %v2351_v16  ;;  %v2364_v10 = vadd.f32 %v8672_v56, %v8671_v51  ;;  %v8673_v16 = vld [vmem:[#allocation92_spill] sm:$0xff]  ;;  %v8674_v61 = vld [vmem:[#allocation103_spill] sm:$0xff] }
 0x38d   : > { %4701 = vst [vmem:[%s7647_s16 + $0xa8] sm:$0xff] %v4653_v22  ;;  %v4802_v37 = vmul.f32 %v4653_v22, %v4653_v22  ;;  %v4365_v7 = vadd.f32 %v7996_v46, %v3551_v27  ;;  %v4748_v1 = vadd.f32 %v4747_v34, %v4653_v22  ;;  %v2357_v33 = vadd.f32 %v7807_v29, %v8673_v16 }
 0x38e   : > { %v4242_v13 = vrot.slane %v3562_v49, 7  ;;  %v4478_v31 = vrot.slane %v3555_v36, 1  ;;  %3333 = vmatmul.bf16.gmra.mxu0 %v8629_v48  ;;  %3947 = vmatmul.bf16.gmra.mxu1 %v8081_v24 }
 0x38f   : > { %v4849_v32 = vadd.f32 %v4848_v12, %v4802_v37  ;;  %3207 = vmatmul.bf16.gmra.mxu2 %v8629_v48 }
 0x390   : > { %3091 = vmatmul.bf16.gmra.mxu3 %v8650_v20  ;;  %v8094_v54 = vsel %vm4198_vm2, %v4240_v18, %v4242_v13  ;;  %v4479_v62 = vsel %vm4439_vm3, %v4476_v28, %v4478_v31  ;;  %v4575_v12 = vsel %vm4439_vm3, %v4478_v31, 0.0  ;;  %v8668_v18 = vld [vmem:[#allocation35_spill] sm:$0xff]  ;;  %v4335_v13 = vsel %vm4198_vm2, 0.0, %v4239_v25 }
 0x391   : > { %v4606_v44 = vadd.f32 %v4479_v62, %v4365_v7  ;;  %v2361_v9 = vadd.f32 %v8669_v19, %v8668_v18 }
 0x392   : > { %v3168_v4 = vpop.f32.mrf.mxu2 }
 0x393   : > { %v3052_v52 = vpop.f32.mrf.mxu3  ;;  %4702 = vst [vmem:[%s7647_s16 + $0xb0] sm:$0xff] %v4606_v44  ;;  %v4749_v46 = vadd.f32 %v4748_v1, %v4606_v44  ;;  %v4803_v34 = vmul.f32 %v4606_v44, %v4606_v44  ;;  %v3554_v26 = vadd.f32 %v3168_v4, %v8667_v47  ;;  %v3296_v45 = vpop.f32.mrf.mxu0  ;;  %v8676_v4 = vld [vmem:[#allocation96_spill] sm:$0xff]  ;;  %v8677_v47 = vld [vmem:[#allocation95_spill] sm:$0xff] }
 0x394   : > { %v8099_v57 = vpop.f32.mrf.mxu1  ;;  %v8109_v39 = vadd.f32 %v3052_v52, %v2361_v9  ;;  %v8675_v52 = vld [vmem:[#allocation12_spill] sm:$0xff] }
 0x395   : > { %v4850_v21 = vadd.f32 %v4849_v32, %v4803_v34  ;;  %v4366_v48 = vadd.f32 %v8029_v43, %v3554_v26  ;;  %v3558_v43 = vadd.f32 %v3296_v45, %v2354_v63  ;;  %v2360_v26 = vadd.f32 %v7821_v0, %v8677_v47 }
 0x396   : > { %v4244_v1 = vrot.slane %v8109_v39, 7 }
 0x397   : > { %v4607_v28 = vadd.f32 %v4575_v12, %v4366_v48  ;;  %v4480_v62 = vrot.slane %v3558_v43, 1 }
 0x399   : > { %v4655_v40 = vmul.f32 %v6160_v41, %v4607_v28 }
 0x39a   : > { %v3170_v22 = vpop.f32.mrf.mxu2 }
 0x39b   : > { %v3054_v11 = vpop.f32.mrf.mxu3  ;;  %4703 = vst [vmem:[%s7647_s16 + $0xb8] sm:$0xff] %v4655_v40  ;;  %v4750_v49 = vadd.f32 %v4749_v46, %v4655_v40  ;;  %v4804_v50 = vmul.f32 %v4655_v40, %v4655_v40  ;;  %v3557_v36 = vadd.f32 %v3170_v22, %v8674_v61  ;;  %v3299_v37 = vpop.f32.mrf.mxu0  ;;  %v2367_v46 = vadd.f32 %v8676_v4, %v8675_v52 }
 0x39c   : > { %v3568_v27 = vadd.f32 %v3054_v11, %v2364_v10  ;;  %v8116_v58 = vpop.f32.mrf.mxu1  ;;  %v3561_v7 = vadd.f32 %v3299_v37, %v2357_v33 }
 0x39d   : > { %v4851_v29 = vadd.f32 %v4850_v21, %v4804_v50  ;;  %v4367_v32 = vadd.f32 %v4335_v13, %v3557_v36  ;;  %v8679_v50 = vld [vmem:[#allocation109_spill] sm:$0xff]  ;;  %v8680_v13 = vld [vmem:[#allocation15_spill] sm:$0xff] }
 0x39e   : > { %v4245_v31 = vrot.slane %v3568_v27, 7  ;;  %v4481_v44 = vrot.slane %v3561_v7, 1  ;;  %3338 = vmatmul.bf16.gmra.mxu0 %v8641_v60  ;;  %3960 = vmatmul.bf16.vlgmr.msra.gmra.mxu1 %v8039_v17  ;;  %v8681_v7 = vld [vmem:[#allocation99_spill] sm:$0xff] }
 0x39f   : > { %3212 = vmatmul.bf16.gmra.mxu2 %v8641_v60 }
 0x3a0   : > { %3978 = vmatmul.bf16.vlgmr.msra.gmra.mxu3 %v8039_v17  ;;  %v8129_v5 = vsel %vm4198_vm2, %v4244_v1, %v4245_v31  ;;  %v4482_v25 = vsel %vm4439_vm3, %v4480_v62, %v4481_v44  ;;  %v8678_v17 = vld [vmem:[#allocation106_spill] sm:$0xff] }
 0x3a1   : > { %v4608_v34 = vadd.f32 %v4482_v25, %v4367_v32  ;;  %v8682_v32 = vld [vmem:[#allocation98_spill] sm:$0xff] }
 0x3a2   : > { %v3173_v21 = vpop.f32.mrf.mxu2  ;;  %v2363_v62 = vadd.f32 %v7842_v23, %v8682_v32 }
 0x3a3   : > { %v3057_v45 = vpop.f32.mrf.mxu3  ;;  %v4656_v60 = vmul.f32 %v6143_v35, %v4608_v34  ;;  %v3560_v12 = vadd.f32 %v3173_v21, %v8678_v17  ;;  %v3301_v19 = vpop.f32.mrf.mxu0 }
 0x3a4   : > { %v3571_v48 = vadd.f32 %v3057_v45, %v2367_v46  ;;  %v8138_v18 = vpop.f32.mrf.mxu1  ;;  %v3564_v9 = vadd.f32 %v3301_v19, %v2360_v26  ;;  %v8685_v46 = vld [vmem:[#allocation101_spill] sm:$0xff] }
 0x3a5   : > { %4704 = vst [vmem:[%s7647_s16 + $0xc0] sm:$0xff] %v4656_v60  ;;  %v4805_v28 = vmul.f32 %v4656_v60, %v4656_v60  ;;  %v4368_v63 = vadd.f32 %v8074_v42, %v3560_v12  ;;  %v4751_v51 = vadd.f32 %v4750_v49, %v4656_v60  ;;  %v2366_v34 = vadd.f32 %v7861_v55, %v8685_v46  ;;  %v8686_v60 = vld [vmem:[#allocation112_spill] sm:$0xff] }
 0x3a6   : > { %v4247_v8 = vrot.slane %v3571_v48, 7  ;;  %v4483_v56 = vrot.slane %v3564_v9, 1  ;;  %v4336_v12 = vsel %vm4198_vm2, 0.0, %v4244_v1 }
 0x3a7   : > { %v4852_v0 = vadd.f32 %v4851_v29, %v4805_v28  ;;  %v2370_v29 = vadd.f32 %v8681_v7, %v8680_v13 }
 0x3a8   : > { %v8143_v10 = vsel %vm4198_vm2, %v4245_v31, %v4247_v8  ;;  %v4484_v40 = vsel %vm4439_vm3, %v4481_v44, %v4483_v56  ;;  %v4576_v37 = vsel %vm4439_vm3, %v4483_v56, 0.0  ;;  %v8683_v44 = vld [vmem:[#allocation18_spill] sm:$0xff] }
 0x3a9   : > { %v4609_v16 = vadd.f32 %v4484_v40, %v4368_v63  ;;  %v8687_v40 = vld [vmem:[#allocation21_spill] sm:$0xff] }
 0x3aa   : > { %v3175_v43 = vpop.f32.mrf.mxu2 }
 0x3ab   : > { %v3059_v33 = vpop.f32.mrf.mxu3  ;;  %4705 = vst [vmem:[%s7647_s16 + $0xc8] sm:$0xff] %v4609_v16  ;;  %v4752_v11 = vadd.f32 %v4751_v51, %v4609_v16  ;;  %v4806_v22 = vmul.f32 %v4609_v16, %v4609_v16  ;;  %v3563_v27 = vadd.f32 %v3175_v43, %v8679_v50  ;;  %v3304_v36 = vpop.f32.mrf.mxu0  ;;  %v8688_v16 = vld [vmem:[#allocation105_spill] sm:$0xff]  ;;  %v8689_v43 = vld [vmem:[#allocation104_spill] sm:$0xff] }
 0x3ac   : > { %v8148_v61 = vpop.f32.mrf.mxu1  ;;  %v8162_v52 = vadd.f32 %v3059_v33, %v2370_v29  ;;  %v3567_v47 = vadd.f32 %v3304_v36, %v2363_v62  ;;  %v2376_v33 = vadd.f32 %v8688_v16, %v8687_v40  ;;  %v2369_v1 = vadd.f32 %v7871_v3, %v8689_v43  ;;  %v8690_v36 = vld [vmem:[#allocation115_spill] sm:$0xff]  ;;  %v8697_v40 = vld [vmem:[#allocation110_spill] sm:$0xff] }
 0x3ad   : > { %v4853_v42 = vadd.f32 %v4852_v0, %v4806_v22  ;;  %v4369_v49 = vadd.f32 %v8094_v54, %v3563_v27  ;;  %v8684_v54 = vld [vmem:[#allocation102_spill] sm:$0xff]  ;;  %v2375_v16 = vadd.f32 %v7916_v59, %v8697_v40 }
 0x3ae   : > { %3343 = vmatmul.bf16.gmra.mxu0 %v8650_v20  ;;  %3965 = vmatmul.bf16.gmra.mxu1 %v8081_v24  ;;  %v2373_v25 = vadd.f32 %v8684_v54, %v8683_v44  ;;  %v4249_v9 = vrot.slane %v8162_v52, 7  ;;  %v4485_v63 = vrot.slane %v3567_v47, 1  ;;  %v8691_v47 = vld [vmem:[#allocation118_spill] sm:$0xff] }
 0x3af   : > { %v4610_v31 = vadd.f32 %v4576_v37, %v4369_v49  ;;  %3217 = vmatmul.bf16.gmra.mxu2 %v8650_v20 }
 0x3b0   : > { %3983 = vmatmul.bf16.gmra.mxu3 %v8081_v24 }
 0x3b1   : > { %v4658_v4 = vmul.f32 %v6160_v41, %v4610_v31 }
 0x3b2   : > { %v3178_v45 = vpop.f32.mrf.mxu2 }
 0x3b3   : > { %v3062_v26 = vpop.f32.mrf.mxu3  ;;  %4706 = vst [vmem:[%s7647_s16 + $0xd0] sm:$0xff] %v4658_v4  ;;  %v4753_v20 = vadd.f32 %v4752_v11, %v4658_v4  ;;  %v4807_v21 = vmul.f32 %v4658_v4, %v4658_v4  ;;  %v3566_v48 = vadd.f32 %v3178_v45, %v8686_v60  ;;  %v3306_v17 = vpop.f32.mrf.mxu0  ;;  %v8692_v60 = vld [vmem:[#allocation24_spill] sm:$0xff] }
 0x3b4   : > { %v3577_v24 = vadd.f32 %v3062_v26, %v2373_v25  ;;  %v8169_v23 = vpop.f32.mrf.mxu1  ;;  %v3570_v19 = vadd.f32 %v3306_v17, %v2366_v34 }
 0x3b5   : > { %v4854_v55 = vadd.f32 %v4853_v42, %v4807_v21  ;;  %v4370_v8 = vadd.f32 %v4336_v12, %v3566_v48  ;;  %v8693_v48 = vld [vmem:[#allocation108_spill] sm:$0xff] }
 0x3b6   : > { %v4250_v28 = vrot.slane %v3577_v24, 7  ;;  %v4486_v51 = vrot.slane %v3570_v19, 1  ;;  %v2379_v17 = vadd.f32 %v8693_v48, %v8692_v60  ;;  %v8694_v19 = vld [vmem:[#allocation107_spill] sm:$0xff] }
 0x3b8   : > { %v8176_v56 = vsel %vm4198_vm2, %v4249_v9, %v4250_v28  ;;  %v4487_v0 = vsel %vm4439_vm3, %v4485_v63, %v4486_v51 }
 0x3b9   : > { %v4611_v39 = vadd.f32 %v4487_v0, %v4370_v8  ;;  %v8696_v8 = vld [vmem:[#allocation111_spill] sm:$0xff] }
 0x3ba   : > { %v3180_v22 = vpop.f32.mrf.mxu2 }
 0x3bb   : > { %v3064_v11 = vpop.f32.mrf.mxu3  ;;  %v4659_v50 = vmul.f32 %v6143_v35, %v4611_v39  ;;  %v3569_v42 = vadd.f32 %v3180_v22, %v8690_v36  ;;  %v3309_v37 = vpop.f32.mrf.mxu0  ;;  %v8698_v22 = vld [vmem:[#allocation121_spill] sm:$0xff]  ;;  %v4337_v36 = vsel %vm4198_vm2, 0.0, %v4249_v9 }
 0x3bc   : > { %v3580_v27 = vadd.f32 %v3064_v11, %v2376_v33  ;;  %v8185_v49 = vpop.f32.mrf.mxu1  ;;  %v3573_v13 = vadd.f32 %v3309_v37, %v2369_v1 }
 0x3bd   : > { %4707 = vst [vmem:[%s7647_s16 + $0xd8] sm:$0xff] %v4659_v50  ;;  %v4808_v7 = vmul.f32 %v4659_v50, %v4659_v50  ;;  %v4371_v31 = vadd.f32 %v8129_v5, %v3569_v42  ;;  %v4754_v32 = vadd.f32 %v4753_v20, %v4659_v50 }
 0x3be   : > { %v4252_v29 = vrot.slane %v3580_v27, 7  ;;  %v4488_v62 = vrot.slane %v3573_v13, 1 }
 0x3bf   : > { %v4855_v3 = vadd.f32 %v4854_v55, %v4808_v7  ;;  %v2372_v55 = vadd.f32 %v7898_v53, %v8694_v19 }
 0x3c0   : > { %v8190_v44 = vsel %vm4198_vm2, %v4250_v28, %v4252_v29  ;;  %v4489_v54 = vsel %vm4439_vm3, %v4486_v51, %v4488_v62  ;;  %v4577_v24 = vsel %vm4439_vm3, %v4488_v62, 0.0  ;;  %v8695_v28 = vld [vmem:[#allocation27_spill] sm:$0xff] }
 0x3c1   : > { %v4612_v25 = vadd.f32 %v4489_v54, %v4371_v31  ;;  %v2382_v63 = vadd.f32 %v8696_v8, %v8695_v28  ;;  %v8700_v54 = vld [vmem:[#allocation114_spill] sm:$0xff] }
 0x3c2   : > { %v3183_v4 = vpop.f32.mrf.mxu2 }
 0x3c3   : > { %v3067_v52 = vpop.f32.mrf.mxu3  ;;  %4708 = vst [vmem:[%s7647_s16 + $0xe0] sm:$0xff] %v4612_v25  ;;  %v4755_v46 = vadd.f32 %v4754_v32, %v4612_v25  ;;  %v4809_v34 = vmul.f32 %v4612_v25, %v4612_v25  ;;  %v3572_v26 = vadd.f32 %v3183_v4, %v8691_v47  ;;  %v3311_v5 = vpop.f32.mrf.mxu0  ;;  %v8701_v4 = vld [vmem:[#allocation113_spill] sm:$0xff] }
 0x3c4   : > { %v8195_v45 = vpop.f32.mrf.mxu1  ;;  %v8205_v51 = vadd.f32 %v3067_v52, %v2379_v17  ;;  %v2378_v9 = vadd.f32 %v7942_v2, %v8701_v4 }
 0x3c5   : > { %v4856_v20 = vadd.f32 %v4855_v3, %v4809_v34  ;;  %v4372_v21 = vadd.f32 %v8143_v10, %v3572_v26  ;;  %v3576_v10 = vadd.f32 %v3311_v5, %v2372_v55  ;;  %v8699_v3 = vld [vmem:[#allocation30_spill] sm:$0xff]  ;;  %v8702_v5 = vld [vmem:[#allocation124_spill] sm:$0xff] }
 0x3c6   : > { %v4254_v37 = vrot.slane %v8205_v51, 7  ;;  %v2385_v25 = vadd.f32 %v8700_v54, %v8699_v3  ;;  %v8709_v3 = vld [vmem:[#allocation119_spill] sm:$0xff] }
 0x3c7   : > { %v4613_v12 = vadd.f32 %v4577_v24, %v4372_v21  ;;  %v4490_v29 = vrot.slane %v3576_v10, 1  ;;  %v8703_v10 = vld [vmem:[#allocation127_spill] sm:$0xff]  ;;  %v2384_v54 = vadd.f32 %v8011_v15, %v8709_v3 }
 0x3c9   : > { %v4661_v0 = vmul.f32 %v6160_v41, %v4613_v12 }
 0x3ca   : > { %v3185_v39 = vpop.f32.mrf.mxu2 }
 0x3cb   : > { %v3069_v33 = vpop.f32.mrf.mxu3  ;;  %4709 = vst [vmem:[%s7647_s16 + $0xe8] sm:$0xff] %v4661_v0  ;;  %v4756_v43 = vadd.f32 %v4755_v46, %v4661_v0  ;;  %v4810_v1 = vmul.f32 %v4661_v0, %v4661_v0  ;;  %v3575_v50 = vadd.f32 %v3185_v39, %v8698_v22  ;;  %v3314_v27 = vpop.f32.mrf.mxu0  ;;  %v8704_v22 = vld [vmem:[#allocation33_spill] sm:$0xff] }
 0x3cc   : > { %v3586_v11 = vadd.f32 %v3069_v33, %v2382_v63  ;;  %v8212_v53 = vpop.f32.mrf.mxu1  ;;  %v3579_v42 = vadd.f32 %v3314_v27, %v2375_v16 }
 0x3cd   : > { %v4857_v13 = vadd.f32 %v4856_v20, %v4810_v1  ;;  %v4373_v59 = vadd.f32 %v4337_v36, %v3575_v50  ;;  %v8705_v50 = vld [vmem:[#allocation117_spill] sm:$0xff] }
 0x3ce   : > { %v4255_v7 = vrot.slane %v3586_v11, 7  ;;  %v4491_v31 = vrot.slane %v3579_v42, 1  ;;  %v2388_v27 = vadd.f32 %v8705_v50, %v8704_v22  ;;  %v8706_v42 = vld [vmem:[#allocation116_spill] sm:$0xff] }
 0x3d0   : > { %v8217_v32 = vsel %vm4198_vm2, %v4254_v37, %v4255_v7  ;;  %v4492_v62 = vsel %vm4439_vm3, %v4490_v29, %v4491_v31 }
 0x3d1   : > { %v4614_v52 = vadd.f32 %v4492_v62, %v4373_v59  ;;  %v8708_v59 = vld [vmem:[#allocation120_spill] sm:$0xff] }
 0x3d2   : > { %v3188_v34 = vpop.f32.mrf.mxu2 }
 0x3d3   : > { %v3072_v46 = vpop.f32.mrf.mxu3  ;;  %v4662_v47 = vmul.f32 %v6143_v35, %v4614_v52  ;;  %v3578_v20 = vadd.f32 %v3188_v34, %v8702_v5  ;;  %v3316_v24 = vpop.f32.mrf.mxu0  ;;  %v8710_v34 = vld [vmem:[#allocation130_spill] sm:$0xff]  ;;  %v4338_v5 = vsel %vm4198_vm2, 0.0, %v4254_v37 }
 0x3d4   : > { %v3589_v26 = vadd.f32 %v3072_v46, %v2385_v25  ;;  %v8226_v21 = vpop.f32.mrf.mxu1  ;;  %v3582_v60 = vadd.f32 %v3316_v24, %v2378_v9 }
 0x3d5   : > { %4710 = vst [vmem:[%s7647_s16 + $0xf0] sm:$0xff] %v4662_v47  ;;  %v4811_v48 = vmul.f32 %v4662_v47, %v4662_v47  ;;  %v4374_v12 = vadd.f32 %v8176_v56, %v3578_v20  ;;  %v4757_v19 = vadd.f32 %v4756_v43, %v4662_v47 }
 0x3d6   : > { %v4257_v17 = vrot.slane %v3589_v26, 7  ;;  %v4493_v55 = vrot.slane %v3582_v60, 1 }
 0x3d7   : > { %v4858_v2 = vadd.f32 %v4857_v13, %v4811_v48  ;;  %v2381_v13 = vadd.f32 %v7977_v38, %v8706_v42 }
 0x3d8   : > { %v8231_v28 = vsel %vm4198_vm2, %v4255_v7, %v4257_v17  ;;  %v4494_v8 = vsel %vm4439_vm3, %v4491_v31, %v4493_v55  ;;  %v4578_v11 = vsel %vm4439_vm3, %v4493_v55, 0.0  ;;  %v8707_v7 = vld [vmem:[#allocation36_spill] sm:$0xff] }
 0x3d9   : > { %v4615_v63 = vadd.f32 %v4494_v8, %v4374_v12  ;;  %v2391_v29 = vadd.f32 %v8708_v59, %v8707_v7  ;;  %v8712_v8 = vld [vmem:[#allocation123_spill] sm:$0xff] }
 0x3da   : > { %v3190_v0 = vpop.f32.mrf.mxu2 }
 0x3db   : > { %v3074_v51 = vpop.f32.mrf.mxu3  ;;  %4711 = vst [vmem:[%s7647_s16 + $0xf8] sm:$0xff] %v4615_v63  ;;  %v4758_v40 = vadd.f32 %v4757_v19, %v4615_v63  ;;  %v4812_v16 = vmul.f32 %v4615_v63, %v4615_v63  ;;  %v3581_v33 = vadd.f32 %v3190_v0, %v8703_v10  ;;  %v3319_v56 = vpop.f32.mrf.mxu0  ;;  %v8713_v0 = vld [vmem:[#allocation122_spill] sm:$0xff] }
 0x3dc   : > { %v8236_v39 = vpop.f32.mrf.mxu1  ;;  %v8246_v31 = vadd.f32 %v3074_v51, %v2388_v27  ;;  %v2387_v37 = vadd.f32 %v8043_v14, %v8713_v0 }
 0x3dd   : > { %v4859_v43 = vadd.f32 %v4858_v2, %v4812_v16  ;;  %v4375_v1 = vadd.f32 %v8190_v44, %v3581_v33  ;;  %v3585_v44 = vadd.f32 %v3319_v56, %v2381_v13  ;;  %v8711_v2 = vld [vmem:[#allocation10_spill] sm:$0xff]  ;;  %v8714_v56 = vld [vmem:[#allocation133_spill] sm:$0xff] }
 0x3de   : > { %v4259_v24 = vrot.slane %v8246_v31, 7  ;;  %v2394_v63 = vadd.f32 %v8712_v8, %v8711_v2 }
 0x3df   : > { %v4616_v36 = vadd.f32 %v4578_v11, %v4375_v1  ;;  %v4495_v15 = vrot.slane %v3585_v44, 1  ;;  %v8715_v44 = vld [vmem:[#allocation136_spill] sm:$0xff] }
 0x3e1   : > { %v4664_v62 = vmul.f32 %v6160_v41, %v4616_v36 }
 0x3e2   : > { %v3193_v52 = vpop.f32.mrf.mxu2 }
 0x3e3   : > { %v3077_v25 = vpop.f32.mrf.mxu3  ;;  %4712 = vst [vmem:[%s7647_s16 + $0x100] sm:$0xff] %v4664_v62  ;;  %v4759_v4 = vadd.f32 %v4758_v40, %v4664_v62  ;;  %v4813_v9 = vmul.f32 %v4664_v62, %v4664_v62  ;;  %v3584_v47 = vadd.f32 %v3193_v52, %v8710_v34  ;;  %v3321_v26 = vpop.f32.mrf.mxu0  ;;  %v8716_v34 = vld [vmem:[#allocation13_spill] sm:$0xff] }
 0x3e4   : > { %v3595_v46 = vadd.f32 %v3077_v25, %v2391_v29  ;;  %v2148_v38 = vpop.f32.mrf.mxu1  ;;  %v3588_v20 = vadd.f32 %v3321_v26, %v2384_v54 }
 0x3e5   : > { %v4860_v60 = vadd.f32 %v4859_v43, %v4813_v9  ;;  %v4376_v17 = vadd.f32 %v4338_v5, %v3584_v47  ;;  %v8717_v47 = vld [vmem:[#allocation126_spill] sm:$0xff]  ;;  %v8718_v5 = vld [vmem:[#allocation125_spill] sm:$0xff] }
 0x3e6   : > { %v4260_v48 = vrot.slane %v3595_v46, 7  ;;  %v4496_v12 = vrot.slane %v3588_v20, 1  ;;  %v2397_v38 = vadd.f32 %v8717_v47, %v8716_v34  ;;  %v2390_v20 = vadd.f32 %v8064_v30, %v8718_v5  ;;  %v8730_v34 = vld [vmem:[#allocation142_spill] sm:$0xff] }
 0x3e8   : > { %v8256_v19 = vsel %vm4198_vm2, %v4259_v24, %v4260_v48  ;;  %v4497_v55 = vsel %vm4439_vm3, %v4495_v15, %v4496_v12 }
 0x3e9   : > { %v4617_v51 = vadd.f32 %v4497_v55, %v4376_v17  ;;  %v8721_v55 = vld [vmem:[#allocation128_spill] sm:$0xff] }
 0x3ea   : > { %v3195_v16 = vpop.f32.mrf.mxu2  ;;  %v2393_v2 = vadd.f32 %v8085_v6, %v8721_v55 }
 0x3eb   : > { %v3079_v40 = vpop.f32.mrf.mxu3  ;;  %v4665_v10 = vmul.f32 %v6143_v35, %v4617_v51  ;;  %v3587_v43 = vadd.f32 %v3195_v16, %v8714_v56  ;;  %v3324_v11 = vpop.f32.mrf.mxu0 }
 0x3ec   : > { %v3598_v33 = vadd.f32 %v3079_v40, %v2394_v63  ;;  %v2150_v1 = vpop.f32.mrf.mxu1  ;;  %v3591_v22 = vadd.f32 %v3324_v11, %v2387_v37  ;;  %v8722_v40 = vld [vmem:[#allocation139_spill] sm:$0xff] }
 0x3ed   : > { %4713 = vst [vmem:[%s7647_s16 + $0x108] sm:$0xff] %v4665_v10  ;;  %v4814_v50 = vmul.f32 %v4665_v10, %v4665_v10  ;;  %v4377_v36 = vadd.f32 %v8217_v32, %v3587_v43  ;;  %v4760_v42 = vadd.f32 %v4759_v4, %v4665_v10 }
 0x3ee   : > { %v4262_v27 = vrot.slane %v3598_v33, 7  ;;  %v4498_v13 = vrot.slane %v3591_v22, 1  ;;  %v4339_v33 = vsel %vm4198_vm2, 0.0, %v4259_v24  ;;  %v8725_v24 = vld [vmem:[#allocation19_spill] sm:$0xff] }
 0x3ef   : > { %v4861_v7 = vadd.f32 %v4860_v60, %v4814_v50  ;;  %v8719_v60 = vld [vmem:[#allocation16_spill] sm:$0xff] }
 0x3f0   : > { %v8268_v14 = vsel %vm4198_vm2, %v4260_v48, %v4262_v27  ;;  %v4499_v59 = vsel %vm4439_vm3, %v4496_v12, %v4498_v13  ;;  %v4579_v46 = vsel %vm4439_vm3, %v4498_v13, 0.0  ;;  %v8720_v48 = vld [vmem:[#allocation129_spill] sm:$0xff] }
 0x3f1   : > { %v4618_v29 = vadd.f32 %v4499_v59, %v4377_v36  ;;  %v2400_v17 = vadd.f32 %v8720_v48, %v8719_v60  ;;  %v8723_v36 = vld [vmem:[#allocation31_spill] sm:$0xff]  ;;  %v8726_v59 = vld [vmem:[#allocation132_spill] sm:$0xff] }
 0x3f2   : > { %v3198_v62 = vpop.f32.mrf.mxu2 }
 0x3f3   : > { %v3082_v31 = vpop.f32.mrf.mxu3  ;;  %4714 = vst [vmem:[%s7647_s16 + $0x110] sm:$0xff] %v4618_v29  ;;  %v4761_v3 = vadd.f32 %v4760_v42, %v4618_v29  ;;  %v4815_v54 = vmul.f32 %v4618_v29, %v4618_v29  ;;  %v3590_v25 = vadd.f32 %v3198_v62, %v8715_v44  ;;  %v3326_v9 = vpop.f32.mrf.mxu0  ;;  %v8724_v42 = vld [vmem:[#allocation144_spill] sm:$0xff]  ;;  %v2403_v29 = vadd.f32 %v8726_v59, %v8725_v24  ;;  %v8727_v62 = vld [vmem:[#allocation34_spill] sm:$0xff]  ;;  %v8729_v44 = vld [vmem:[#allocation131_spill] sm:$0xff] }
 0x3f4   : > { %v2151_v52 = vpop.f32.mrf.mxu1  ;;  %v8281_v15 = vadd.f32 %v3082_v31, %v2397_v38  ;;  %v2415_v13 = vadd.f32 %v8724_v42, %v8723_v36  ;;  %v8735_v24 = vld [vmem:[#allocation135_spill] sm:$0xff] }
 0x3f5   : > { %v4862_v32 = vadd.f32 %v4861_v7, %v4815_v54  ;;  %v4378_v4 = vadd.f32 %v8231_v28, %v3590_v25  ;;  %v3594_v28 = vadd.f32 %v3326_v9, %v2390_v20  ;;  %v2396_v25 = vadd.f32 %v8099_v57, %v8729_v44  ;;  %v8738_v44 = vld [vmem:[#allocation138_spill] sm:$0xff] }
 0x3f6   : > { %v4264_v43 = vrot.slane %v8281_v15, 7 }
 0x3f7   : > { %v4619_v26 = vadd.f32 %v4579_v46, %v4378_v4  ;;  %v4500_v6 = vrot.slane %v3594_v28, 1 }
 0x3f9   : > { %v4667_v12 = vmul.f32 %v6160_v41, %v4619_v26 }
 0x3fa   : > { %v3200_v63 = vpop.f32.mrf.mxu2 }
 0x3fb   : > { %v3084_v8 = vpop.f32.mrf.mxu3  ;;  %4715 = vst [vmem:[%s7647_s16 + $0x118] sm:$0xff] %v4667_v12  ;;  %v4762_v51 = vadd.f32 %v4761_v3, %v4667_v12  ;;  %v4816_v0 = vmul.f32 %v4667_v12, %v4667_v12  ;;  %v3593_v16 = vadd.f32 %v3200_v63, %v8722_v40  ;;  %v3329_v30 = vpop.f32.mrf.mxu0  ;;  %v8728_v3 = vld [vmem:[#allocation147_spill] sm:$0xff]  ;;  %v8731_v40 = vld [vmem:[#allocation37_spill] sm:$0xff] }
 0x3fc   : > { %v3604_v37 = vadd.f32 %v3084_v8, %v2400_v17  ;;  %v3943_v10 = vpop.f32.mrf.mxu1  ;;  %v3597_v56 = vadd.f32 %v3329_v30, %v2393_v2  ;;  %v2418_v54 = vadd.f32 %v8728_v3, %v8727_v62 }
 0x3fd   : > { %v4863_v1 = vadd.f32 %v4862_v32, %v4816_v0  ;;  %v4379_v22 = vadd.f32 %v4339_v33, %v3593_v16  ;;  %v8304_v52 = vadd.f32 %v3943_v10, %v2415_v13  ;;  %v8732_v16 = vld [vmem:[#allocation150_spill] sm:$0xff] }
 0x3fe   : > { %v4265_v11 = vrot.slane %v3604_v37, 7  ;;  %v4501_v50 = vrot.slane %v3597_v56, 1  ;;  %v2421_v30 = vadd.f32 %v8732_v16, %v8731_v40  ;;  %v8733_v56 = vld [vmem:[#allocation145_spill] sm:$0xff]  ;;  %v8741_v16 = vld [vmem:[#allocation28_spill] sm:$0xff] }
 0x3ff   : > { %v4274_v12 = vrot.slane %v8304_v52, 7 }
 0x400   : > { %v8293_v27 = vsel %vm4198_vm2, %v4264_v43, %v4265_v11  ;;  %v4502_v7 = vsel %vm4439_vm3, %v4500_v6, %v4501_v50 }
 0x401   : > { %v4620_v31 = vadd.f32 %v4502_v7, %v4379_v22  ;;  %v8734_v7 = vld [vmem:[#allocation22_spill] sm:$0xff] }
 0x402   : > { %v3203_v32 = vpop.f32.mrf.mxu2  ;;  %v2406_v59 = vadd.f32 %v8735_v24, %v8734_v7 }
 0x403   : > { %v3087_v9 = vpop.f32.mrf.mxu3  ;;  %v4668_v4 = vmul.f32 %v6143_v35, %v4620_v31  ;;  %v3596_v47 = vadd.f32 %v3203_v32, %v8730_v34  ;;  %v3331_v38 = vpop.f32.mrf.mxu0  ;;  %v8736_v31 = vld [vmem:[#allocation134_spill] sm:$0xff] }
 0x404   : > { %v3607_v46 = vadd.f32 %v3087_v9, %v2403_v29  ;;  %v3945_v26 = vpop.f32.mrf.mxu1  ;;  %v3600_v5 = vadd.f32 %v3331_v38, %v2396_v25  ;;  %v2399_v62 = vadd.f32 %v8116_v58, %v8736_v31  ;;  %v8739_v9 = vld [vmem:[#allocation137_spill] sm:$0xff] }
 0x405   : > { %v3991_v20 = vadd.f32 %v3945_v26, %v2418_v54  ;;  %4716 = vst [vmem:[%s7647_s16 + $0x120] sm:$0xff] %v4668_v4  ;;  %v4817_v60 = vmul.f32 %v4668_v4, %v4668_v4  ;;  %v4380_v17 = vadd.f32 %v8256_v19, %v3596_v47  ;;  %v4763_v57 = vadd.f32 %v4762_v51, %v4668_v4  ;;  %v8737_v54 = vld [vmem:[#allocation25_spill] sm:$0xff]  ;;  %v8740_v26 = vld [vmem:[#allocation148_spill] sm:$0xff] }
 0x406   : > { %v4267_v48 = vrot.slane %v3607_v46, 7  ;;  %v4503_v55 = vrot.slane %v3600_v5, 1  ;;  %v2409_v25 = vadd.f32 %v8738_v44, %v8737_v54  ;;  %v2402_v32 = vadd.f32 %v8138_v18, %v8739_v9 }
 0x407   : > { %v4275_v2 = vrot.slane %v3991_v20, 7  ;;  %v4864_v28 = vadd.f32 %v4863_v1, %v4817_v60 }
 0x408   : > { %v8312_v8 = vsel %vm4198_vm2, %v4265_v11, %v4267_v48  ;;  %v4504_v63 = vsel %vm4439_vm3, %v4501_v50, %v4503_v55  ;;  %v4580_v42 = vsel %vm4439_vm3, %v4503_v55, 0.0  ;;  %v4340_v48 = vsel %vm4198_vm2, 0.0, %v4264_v43 }
 0x409   : > { %v8316_v0 = vsel %vm4198_vm2, %v4274_v12, %v4275_v2  ;;  %v4621_v37 = vadd.f32 %v4504_v63, %v4380_v17 }
 0x40a   : > { %v3205_v19 = vpop.f32.mrf.mxu2 }
 0x40b   : > { %v3089_v10 = vpop.f32.mrf.mxu3  ;;  %4717 = vst [vmem:[%s7647_s16 + $0x128] sm:$0xff] %v4621_v37  ;;  %v4764_v51 = vadd.f32 %v4763_v57, %v4621_v37  ;;  %v4818_v33 = vmul.f32 %v4621_v37, %v4621_v37  ;;  %v3599_v22 = vadd.f32 %v3205_v19, %v8733_v56  ;;  %v3334_v1 = vpop.f32.mrf.mxu0  ;;  %v8743_v19 = vld [vmem:[#allocation140_spill] sm:$0xff] }
 0x40c   : > { %v3948_v6 = vpop.f32.mrf.mxu1  ;;  %v8333_v52 = vadd.f32 %v3089_v10, %v2406_v59  ;;  %v3603_v4 = vadd.f32 %v3334_v1, %v2399_v62  ;;  %v2405_v43 = vadd.f32 %v8148_v61, %v8743_v19  ;;  %v8744_v1 = vld [vmem:[#allocation151_spill] sm:$0xff] }
 0x40d   : > { %v3994_v11 = vadd.f32 %v3948_v6, %v2421_v30  ;;  %v4865_v36 = vadd.f32 %v4864_v28, %v4818_v33  ;;  %v4381_v50 = vadd.f32 %v8268_v14, %v3599_v22  ;;  %v8742_v30 = vld [vmem:[#allocation141_spill] sm:$0xff] }
 0x40e   : > { %v4269_v57 = vrot.slane %v8333_v52, 7  ;;  %v4505_v28 = vrot.slane %v3603_v4, 1  ;;  %v2412_v10 = vadd.f32 %v8742_v30, %v8741_v16  ;;  %v8746_v4 = vld [vmem:[#allocation153_spill] sm:$0xff]  ;;  %v8751_v16 = vld [vmem:[#allocation146_spill] sm:$0xff] }
 0x40f   : > { %v4277_v13 = vrot.slane %v3994_v11, 7  ;;  %v4622_v29 = vadd.f32 %v4580_v42, %v4381_v50  ;;  %v4342_v50 = vsel %vm4198_vm2, 0.0, %v4274_v12 }
 0x411   : > { %v8329_v3 = vsel %vm4198_vm2, %v4275_v2, %v4277_v13  ;;  %v4670_v14 = vmul.f32 %v6160_v41, %v4622_v29  ;;  %v8745_v13 = vld [vmem:[#allocation159_spill] sm:$0xff] }
 0x412   : > { %v3208_v34 = vpop.f32.mrf.mxu2 }
 0x413   : > { %v3092_v46 = vpop.f32.mrf.mxu3  ;;  %4718 = vst [vmem:[%s7647_s16 + $0x130] sm:$0xff] %v4670_v14  ;;  %v4765_v47 = vadd.f32 %v4764_v51, %v4670_v14  ;;  %v4819_v38 = vmul.f32 %v4670_v14, %v4670_v14  ;;  %v3602_v5 = vadd.f32 %v3208_v34, %v8740_v26  ;;  %v3336_v20 = vpop.f32.mrf.mxu0 }
 0x414   : > { %v3613_v58 = vadd.f32 %v3092_v46, %v2409_v25  ;;  %v3950_v60 = vpop.f32.mrf.mxu1  ;;  %v3606_v17 = vadd.f32 %v3336_v20, %v2402_v32 }
 0x415   : > { %v4866_v55 = vadd.f32 %v4865_v36, %v4819_v38  ;;  %v4382_v2 = vadd.f32 %v4340_v48, %v3602_v5  ;;  %v8748_v60 = vld [vmem:[#allocation152_spill] sm:$0xff] }
 0x416   : > { %v4270_v18 = vrot.slane %v3613_v58, 7  ;;  %v4506_v63 = vrot.slane %v3606_v17, 1  ;;  %v2417_v48 = vadd.f32 %v8212_v53, %v8748_v60  ;;  %v8752_v53 = vld [vmem:[#allocation155_spill] sm:$0xff] }
 0x418   : > { %v8345_v37 = vsel %vm4198_vm2, %v4269_v57, %v4270_v18  ;;  %v4507_v40 = vsel %vm4439_vm3, %v4505_v28, %v4506_v63 }
 0x419   : > { %v4623_v15 = vadd.f32 %v4507_v40, %v4382_v2  ;;  %v8750_v2 = vld [vmem:[#allocation154_spill] sm:$0xff] }
 0x41a   : > { %v3210_v33 = vpop.f32.mrf.mxu2  ;;  %v2420_v28 = vadd.f32 %v8226_v21, %v8750_v2 }
 0x41b   : > { %v3094_v51 = vpop.f32.mrf.mxu3  ;;  %v4671_v56 = vmul.f32 %v6143_v35, %v4623_v15  ;;  %v3605_v6 = vadd.f32 %v3210_v33, %v8744_v1  ;;  %v3339_v11 = vpop.f32.mrf.mxu0 }
 0x41c   : > { %v3616_v22 = vadd.f32 %v3094_v51, %v2412_v10  ;;  %v3961_v36 = vpop.f32.mrf.mxu1  ;;  %v3609_v42 = vadd.f32 %v3339_v11, %v2405_v43 }
 0x41d   : > { %v3989_v7 = vadd.f32 %v3961_v36, %v8745_v13  ;;  %4719 = vst [vmem:[%s7647_s16 + $0x138] sm:$0xff] %v4671_v56  ;;  %v4820_v24 = vmul.f32 %v4671_v56, %v4671_v56  ;;  %v4383_v61 = vadd.f32 %v8293_v27, %v3605_v6  ;;  %v4766_v29 = vadd.f32 %v4765_v47, %v4671_v56  ;;  %v8747_v27 = vld [vmem:[#allocation160_spill] sm:$0xff] }
 0x41e   : > { %v4272_v59 = vrot.slane %v3616_v22, 7  ;;  %v4508_v31 = vrot.slane %v3609_v42, 1  ;;  %v4341_v56 = vsel %vm4198_vm2, 0.0, %v4269_v57  ;;  %v8753_v22 = vld [vmem:[#allocation161_spill] sm:$0xff] }
 0x41f   : > { %v4388_v62 = vadd.f32 %v4342_v50, %v3989_v7  ;;  %v4867_v54 = vadd.f32 %v4866_v55, %v4820_v24  ;;  %v8749_v55 = vld [vmem:[#allocation143_spill] sm:$0xff] }
 0x420   : > { %v8359_v44 = vsel %vm4198_vm2, %v4270_v18, %v4272_v59  ;;  %v4509_v25 = vsel %vm4439_vm3, %v4506_v63, %v4508_v31  ;;  %v4581_v5 = vsel %vm4439_vm3, %v4508_v31, 0.0  ;;  %v2408_v18 = vadd.f32 %v8169_v23, %v8749_v55  ;;  %v8755_v31 = vld [vmem:[#allocation149_spill] sm:$0xff] }
 0x421   : > { %v4624_v52 = vadd.f32 %v4509_v25, %v4383_v61  ;;  %v8754_v61 = vld [vmem:[#allocation156_spill] sm:$0xff] }
 0x422   : > { %v3213_v12 = vpop.f32.mrf.mxu2  ;;  %v2423_v57 = vadd.f32 %v8236_v39, %v8754_v61 }
 0x423   : > { %v3979_v14 = vpop.f32.mrf.mxu3  ;;  %4720 = vst [vmem:[%s7647_s16 + $0x140] sm:$0xff] %v4624_v52  ;;  %v4767_v9 = vadd.f32 %v4766_v29, %v4624_v52  ;;  %v4821_v32 = vmul.f32 %v4624_v52, %v4624_v52  ;;  %v3608_v46 = vadd.f32 %v3213_v12, %v8746_v4  ;;  %v3341_v34 = vpop.f32.mrf.mxu0 }
 0x424   : > { %v3963_v38 = vpop.f32.mrf.mxu1  ;;  %v3990_v40 = vadd.f32 %v3979_v14, %v2417_v48  ;;  %v3612_v30 = vadd.f32 %v3341_v34, %v2408_v18 }
 0x425   : > { %v3992_v47 = vadd.f32 %v3963_v38, %v8747_v27  ;;  %v4868_v58 = vadd.f32 %v4867_v54, %v4821_v32  ;;  %v4384_v26 = vadd.f32 %v8312_v8, %v3608_v46  ;;  %v2411_v8 = vadd.f32 %v8185_v49, %v8751_v16 }
 0x426   : > { %v4515_v11 = vrot.slane %v3990_v40, 1  ;;  %v4510_v50 = vrot.slane %v3612_v30, 1  ;;  %v2414_v54 = vadd.f32 %v8195_v45, %v8755_v31 }
 0x427   : > { %v4389_v20 = vadd.f32 %v8316_v0, %v3992_v47  ;;  %v4625_v17 = vadd.f32 %v4581_v5, %v4384_v26 }
 0x429   : > { %v4673_v63 = vmul.f32 %v6160_v41, %v4625_v17 }
 0x42a   : > { %v3215_v10 = vpop.f32.mrf.mxu2 }
 0x42b   : > { %v3981_v15 = vpop.f32.mrf.mxu3  ;;  %4721 = vst [vmem:[%s7647_s16 + $0x148] sm:$0xff] %v4673_v63  ;;  %v4768_v0 = vadd.f32 %v4767_v9, %v4673_v63  ;;  %v4822_v19 = vmul.f32 %v4673_v63, %v4673_v63  ;;  %v3611_v43 = vadd.f32 %v3215_v10, %v8752_v53  ;;  %v3344_v33 = vpop.f32.mrf.mxu0 }
 0x42c   : > { %v3993_v51 = vadd.f32 %v3981_v15, %v2420_v28  ;;  %v3966_v23 = vpop.f32.mrf.mxu1  ;;  %v3615_v21 = vadd.f32 %v3344_v33, %v2411_v8  ;;  %v8757_v28 = vld [vmem:[#allocation158_spill] sm:$0xff] }
 0x42d   : > { %v3995_v1 = vadd.f32 %v3966_v23, %v8753_v22  ;;  %v4869_v6 = vadd.f32 %v4868_v58, %v4822_v19  ;;  %v4385_v36 = vadd.f32 %v4341_v56, %v3611_v43 }
 0x42e   : > { %v4516_v49 = vrot.slane %v3993_v51, 1  ;;  %v4511_v42 = vrot.slane %v3615_v21, 1 }
 0x42f   : > { %v4390_v13 = vadd.f32 %v8329_v3, %v3995_v1  ;;  %v8756_v3 = vld [vmem:[#allocation157_spill] sm:$0xff] }
 0x430   : > { %v4517_v7 = vsel %vm4439_vm3, %v4515_v11, %v4516_v49  ;;  %v4512_v59 = vsel %vm4439_vm3, %v4510_v50, %v4511_v42 }
 0x431   : > { %v4629_v24 = vadd.f32 %v4517_v7, %v4388_v62  ;;  %v4626_v29 = vadd.f32 %v4512_v59, %v4385_v36 }
 0x432   : > { %v3218_v52 = vpop.f32.mrf.mxu2 }
 0x433   : > { %v4677_v25 = vmul.f32 %v6143_v35, %v4629_v24  ;;  %v3984_v12 = vpop.f32.mrf.mxu3  ;;  %v4674_v14 = vmul.f32 %v6143_v35, %v4626_v29  ;;  %v3614_v9 = vadd.f32 %v3218_v52, %v8756_v3  ;;  %v3346_v4 = vpop.f32.mrf.mxu0 }
 0x434   : > { %v3996_v32 = vadd.f32 %v3984_v12, %v2423_v57  ;;  %v3968_v62 = vpop.f32.mrf.mxu1  ;;  %v3618_v46 = vadd.f32 %v3346_v4, %v2414_v54 }
 0x435   : > { %4725 = vst [vmem:[%s7647_s16 + $0x168] sm:$0xff] %v4677_v25  ;;  %v4823_v39 = vmul.f32 %v4674_v14, %v4674_v14  ;;  %v4386_v34 = vadd.f32 %v8345_v37, %v3614_v9  ;;  %v4769_v38 = vadd.f32 %v4768_v0, %v4674_v14  ;;  %v4826_v0 = vmul.f32 %v4677_v25, %v4677_v25 }
 0x436   : > { %4722 = vst [vmem:[%s7647_s16 + $0x150] sm:$0xff] %v4674_v14  ;;  %v4518_v45 = vrot.slane %v3996_v32, 1  ;;  %v4513_v27 = vrot.slane %v3618_v46, 1 }
 0x437   : > { %v4870_v58 = vadd.f32 %v4869_v6, %v4823_v39 }
 0x438   : > { %v4519_v47 = vsel %vm4439_vm3, %v4516_v49, %v4518_v45  ;;  %v4583_v35 = vsel %vm4439_vm3, %v4518_v45, 0.0  ;;  %v4514_v60 = vsel %vm4439_vm3, %v4511_v42, %v4513_v27 }
 0x439   : > { %v4630_v26 = vadd.f32 %v4519_v47, %v4389_v20  ;;  %v4631_v5 = vadd.f32 %v4583_v35, %v4390_v13  ;;  %v4627_v48 = vadd.f32 %v4514_v60, %v4386_v34  ;;  %v4582_v20 = vsel %vm4439_vm3, %v4513_v27, 0.0 }
 0x43a   : > { %v3220_v55 = vpop.f32.mrf.mxu2 }
 0x43b   : > { %v4679_v17 = vmul.f32 %v6160_v41, %v4631_v5  ;;  %4726 = vst [vmem:[%s7647_s16 + $0x170] sm:$0xff] %v4630_v26  ;;  %v3986_v37 = vpop.f32.mrf.mxu3  ;;  %v4770_v18 = vadd.f32 %v4769_v38, %v4627_v48  ;;  %v4824_v2 = vmul.f32 %v4627_v48, %v4627_v48  ;;  %v3617_v63 = vadd.f32 %v3220_v55, %v8757_v28 }
 0x43c   : > { %4723 = vst [vmem:[%s7647_s16 + $0x158] sm:$0xff] %v4627_v48  ;;  %v4827_v43 = vmul.f32 %v4630_v26, %v4630_v26 }
 0x43d   : > { %4727 = vst [vmem:[%s7647_s16 + $0x178] sm:$0xff] %v4679_v17  ;;  %v4871_v40 = vadd.f32 %v4870_v58, %v4824_v2  ;;  %v4387_v16 = vadd.f32 %v8359_v44, %v3617_v63  ;;  %v4828_v23 = vmul.f32 %v4679_v17, %v4679_v17 }
 0x43f   : > { %v4628_v8 = vadd.f32 %v4582_v20, %v4387_v16 }
 0x441   : > { %v4676_v30 = vmul.f32 %v6160_v41, %v4628_v8 }
 0x443   : > { %4724 = vst [vmem:[%s7647_s16 + $0x160] sm:$0xff] %v4676_v30  ;;  %v4771_v10 = vadd.f32 %v4770_v18, %v4676_v30  ;;  %v4825_v15 = vmul.f32 %v4676_v30, %v4676_v30 }
 0x445   : > { %v4772_v19 = vadd.f32 %v4771_v10, %v4677_v25  ;;  %v4872_v53 = vadd.f32 %v4871_v40, %v4825_v15 }
 0x447   : > { %v4773_v51 = vadd.f32 %v4772_v19, %v4630_v26  ;;  %v4873_v33 = vadd.f32 %v4872_v53, %v4826_v0 }
 0x449   : > { %v4774_v56 = vadd.f32 %v4773_v51, %v4679_v17  ;;  %v4874_v21 = vadd.f32 %v4873_v33, %v4827_v43 }
 0x44b   : > { %v4775_v22 = vrot.slane %v4774_v56, 4  ;;  %v4875_v44 = vadd.f32 %v4874_v21, %v4828_v23 }
 0x44d   : > { %v4776_v1 = vadd.f32 %v4775_v22, %v4774_v56  ;;  %v4876_v6 = vrot.slane %v4875_v44, 4 }
 0x44f   : > { %v4777_v11 = vrot.slane %v4776_v1, 2  ;;  %v4877_v36 = vadd.f32 %v4876_v6, %v4875_v44 }
 0x451   : > { %v4778_v41 = vadd.f32 %v4777_v11, %v4776_v1  ;;  %v4878_v49 = vrot.slane %v4877_v36, 2 }
 0x453   : > { %v4779_v50 = vrot.slane %v4778_v41, 1  ;;  %v4879_v42 = vadd.f32 %v4878_v49, %v4877_v36 }
 0x455   : > { %v4880_v13 = vrot.slane %v4879_v42, 1  ;;  %v4780_v7 = vadd.f32 %v4779_v50, %v4778_v41 }
 0x457   : > { %v4881_v24 = vadd.f32 %v4880_v13, %v4879_v42 }
 0x459   : > { %v4882_v59 = vsel %vm4198_vm2, %v4780_v7, %v4881_v24 }
 0x45a   : > { %4883 = vst [vmem:[%s409_s15] sm:$0x3] %v4882_v59 }
 0x45b PF: > { %s18_s26 = sadd.s32 1, %s5980_s26   ;;  %s8758_s24 = smov %s5976_s25 }
 0x45c   : > { %p15_p5 = scmp.ge.s32.totalorder %s18_s26, 4   ;;  %s8759_s25 = smov %s8761_s27 }
 0x45e   :  { %17 = sbr.rel (!%p15_p5) target bundleno = 2 (0x2), region = 96 }

</bundles_post_ra>
